<compile_context>
chip_gen: v7x
topology: tpu7x:2x2x1
jax: 0.10.0
libtpu: 0.0.40
codegen_flags: <defaults>
</compile_context>

<pallas_src>
import math
import jax
import jax.numpy as jnp
from jax.experimental import pallas as pl
from jax.experimental.pallas import tpu as pltpu

# ----------------------------------------------------------------------------
# Architecture (deterministic "ValueChoice" picks)
# ----------------------------------------------------------------------------
INPUT_DIM = 784
OUTPUT_DIM = 10
HIDDEN_DIMS = [512, 256, 384, 128, 256, 512, 128, 384, 256, 128]  # all k*128
N_LAYERS = len(HIDDEN_DIMS) + 1  # 10 hidden Linear layers + final Linear

LANE = 128
SUBLANE = 8


def _round_up(x, m):
    return (x + m - 1) // m * m


OUT_PAD = _round_up(OUTPUT_DIM, LANE)    # 128 (lane-dense output tile)
LAYER_OUT_PAD = HIDDEN_DIMS + [OUT_PAD]  # per-layer padded out widths
TOTAL_BIAS = sum(LAYER_OUT_PAD)          # 3072 (lane-aligned)

_BIAS_OFFSETS = []
_off = 0
for _w in LAYER_OUT_PAD:
    _BIAS_OFFSETS.append(_off)
    _off += _w


def _layer_dims():
    dims = [INPUT_DIM] + HIDDEN_DIMS + [OUTPUT_DIM]
    return list(zip(dims[:-1], dims[1:]))  # (in_features, out_features)


# ----------------------------------------------------------------------------
# Pallas kernel: whole MLP fused; weights resident in VMEM across batch tiles
# ----------------------------------------------------------------------------
def nasnet_kernel(x_ref, b_ref, *refs):
    # refs = (w_0 .. w_10, out_ref)
    w_refs = refs[:N_LAYERS]
    out_ref = refs[N_LAYERS]

    # Input arrives f32 / unpadded (bt, 784); cast once to bf16 for the MXU.
    h = x_ref[...].astype(jnp.bfloat16)

    # Hidden layers: Linear -> ReLU -> Dropout(eval == identity)
    for i in range(N_LAYERS - 1):
        width = LAYER_OUT_PAD[i]
        off = _BIAS_OFFSETS[i]
        acc = jnp.dot(h, w_refs[i][...], preferred_element_type=jnp.float32)
        acc = acc + b_ref[:, off:off + width]   # (1, W) f32 bias, broadcasts
        acc = jnp.maximum(acc, 0.0)             # ReLU in f32 (v5e-safe VPU path)
        h = acc.astype(jnp.bfloat16)            # bf16 for next MXU matmul

    # Final layer: Linear only (no ReLU / dropout), lane-padded to 128 cols.
    off = _BIAS_OFFSETS[-1]
    y = jnp.dot(h, w_refs[-1][...], preferred_element_type=jnp.float32)
    out_ref[...] = (y + b_ref[:, off:off + OUT_PAD]).astype(jnp.bfloat16)


# ----------------------------------------------------------------------------
# Wrapper
# ----------------------------------------------------------------------------
def _pick_bt(B):
    """Batch tile: >=32 rows (bf16 layout-native, decent MXU M fill); for
    larger B pick the biggest tile in {512,...,32} that still yields >=2 grid
    steps (keeps both v7x TensorCores busy via the parallel axis)."""
    if B <= 48:
        return _round_up(max(B, 16), 32)
    for cand in (512, 256, 128, 64, 32):
        if _round_up(B, cand) >= 2 * cand:
            return cand
    return 32


def _build_call(bt, n_tiles, b_pad, weight_shapes, single_buffer_resident):
    resident_kw = (
        dict(pipeline_mode=pl.Buffered(1)) if single_buffer_resident else {}
    )
    x_spec = pl.BlockSpec((bt, INPUT_DIM), lambda i: (i, 0))
    bias_spec = pl.BlockSpec((1, TOTAL_BIAS), lambda i: (0, 0), **resident_kw)
    w_specs = [pl.BlockSpec(s, lambda i: (0, 0), **resident_kw)
               for s in weight_shapes]
    out_spec = pl.BlockSpec((bt, OUT_PAD), lambda i: (i, 0))

    return pl.pallas_call(
        nasnet_kernel,
        out_shape=jax.ShapeDtypeStruct((b_pad, OUT_PAD), jnp.bfloat16),
        grid_spec=pltpu.PrefetchScalarGridSpec(
            num_scalar_prefetch=0,
            grid=(n_tiles,),
            in_specs=[x_spec, bias_spec] + w_specs,
            out_specs=out_spec,
        ),
        compiler_params=pltpu.CompilerParams(
            dimension_semantics=("parallel",),
            vmem_limit_bytes=32 << 20,
        ),
    )


def nasnet_forward(x, packed_weights, bias_concat):
    """x: (B, INPUT_DIM) f32.

    packed_weights[i]: bf16, (in_i, out_pad_i); bias_concat: (1, TOTAL_BIAS) f32.
    Returns (B, OUTPUT_DIM) f32.
    """
    B = x.shape[0]
    bt = _pick_bt(B)
    b_pad = _round_up(B, bt)
    n_tiles = b_pad // bt

    # Only a batch-dim pad (no feature pad / dtype cast pre-pass); no-op when
    # B is already a multiple of the tile.
    if b_pad != B:
        x = jnp.pad(x, ((0, b_pad - B), (0, 0)))

    weight_shapes = [w.shape for w in packed_weights]
    try:
        call = _build_call(bt, n_tiles, b_pad, weight_shapes, True)
        out_full = call(x, bias_concat, *packed_weights)
    except Exception:
        # Fallback: if Buffered(1) resident specs are rejected by this JAX
        # version, rebuild with default (double-buffered) specs.
        call = _build_call(bt, n_tiles, b_pad, weight_shapes, False)
        out_full = call(x, bias_concat, *packed_weights)

    return out_full[:B, :OUTPUT_DIM].astype(jnp.float32)


# ----------------------------------------------------------------------------
# Parameter init (PyTorch nn.Linear default: U(-1/sqrt(in), +1/sqrt(in)))
# and packing into the kernel layout (bf16 lane-padded weights + fused f32 bias).
# ----------------------------------------------------------------------------
def init_params(key):
    weights, biases = [], []
    for (fan_in, fan_out) in _layer_dims():
        key, kw, kb = jax.random.split(key, 3)
        bound = 1.0 / math.sqrt(fan_in)
        w = jax.random.uniform(kw, (fan_in, fan_out), jnp.float32, -bound, bound)
        b = jax.random.uniform(kb, (1, fan_out), jnp.float32, -bound, bound)
        weights.append(w)
        biases.append(b)
    return weights, biases


def pack_params(weights, biases):
    packed_w = []
    for i, w in enumerate(weights):
        fan_in, fan_out = w.shape
        out_pad = LAYER_OUT_PAD[i]            # only the final layer pads 10->128
        wp = jnp.pad(w, ((0, 0), (0, out_pad - fan_out)))
        packed_w.append(wp.astype(jnp.bfloat16))
    packed_b = [jnp.pad(b, ((0, 0), (0, LAYER_OUT_PAD[i] - b.shape[1])))
                for i, b in enumerate(biases)]
    bias_concat = jnp.concatenate(packed_b, axis=1).astype(jnp.float32)
    return packed_w, bias_concat


# Pure-JAX reference mirroring the kernel numerics (bf16 operands, f32 acc).
def nasnet_ref(x, weights, biases):
    h = x.astype(jnp.bfloat16)
    for i in range(N_LAYERS - 1):
        acc = jnp.dot(h, weights[i].astype(jnp.bfloat16),
                      preferred_element_type=jnp.float32)
        h = jnp.maximum(acc + biases[i], 0.0).astype(jnp.bfloat16)
    return jnp.dot(h, weights[-1].astype(jnp.bfloat16),
                   preferred_element_type=jnp.float32) + biases[-1]


if __name__ == "__main__":
    key = jax.random.PRNGKey(0)
    key, kx = jax.random.split(key)

    batch = 8
    x = jax.random.normal(kx, (batch, INPUT_DIM), jnp.float32)
    weights, biases = init_params(key)
    packed_w, bias_concat = pack_params(weights, biases)

    out = nasnet_forward(x, packed_w, bias_concat)
    out = jax.block_until_ready(out)

    ref = nasnet_ref(x, weights, biases)
    assert out.shape == (batch, OUTPUT_DIM), out.shape
    assert jnp.allclose(out, ref, atol=2e-2, rtol=2e-2), "mismatch vs reference"

    print("KERNEL_OK")
</pallas_src>

<mosaic_0001>
module attributes {stable_mosaic.version = 11 : i64} {
  func.func @nasnet_kernel(%arg0: i32, %arg1: memref<32x784xf32, #tpu.memory_space<vmem>>, %arg2: memref<1x3072xf32, #tpu.memory_space<vmem>>, %arg3: memref<784x512xbf16, #tpu.memory_space<vmem>>, %arg4: memref<512x256xbf16, #tpu.memory_space<vmem>>, %arg5: memref<256x384xbf16, #tpu.memory_space<vmem>>, %arg6: memref<384x128xbf16, #tpu.memory_space<vmem>>, %arg7: memref<128x256xbf16, #tpu.memory_space<vmem>>, %arg8: memref<256x512xbf16, #tpu.memory_space<vmem>>, %arg9: memref<512x128xbf16, #tpu.memory_space<vmem>>, %arg10: memref<128x384xbf16, #tpu.memory_space<vmem>>, %arg11: memref<384x256xbf16, #tpu.memory_space<vmem>>, %arg12: memref<256x128xbf16, #tpu.memory_space<vmem>>, %arg13: memref<128x128xbf16, #tpu.memory_space<vmem>>, %arg14: memref<32x128xbf16, #tpu.memory_space<vmem>>) attributes {dimension_semantics = [#tpu.dimension_semantics<parallel>], iteration_bounds = array<i64: 1>, scalar_prefetch = 0 : i64, scratch_operands = 0 : i64, tpu.core_type = #tpu.core_type<tc>, window_params = [{transform_indices = @transform_0, window_bounds = array<i64: 32, 784>}, {pipeline_mode = #tpu.pipeline_mode<synchronous>, transform_indices = @transform_1, window_bounds = array<i64: 1, 3072>}, {pipeline_mode = #tpu.pipeline_mode<synchronous>, transform_indices = @transform_2, window_bounds = array<i64: 784, 512>}, {pipeline_mode = #tpu.pipeline_mode<synchronous>, transform_indices = @transform_3, window_bounds = array<i64: 512, 256>}, {pipeline_mode = #tpu.pipeline_mode<synchronous>, transform_indices = @transform_4, window_bounds = array<i64: 256, 384>}, {pipeline_mode = #tpu.pipeline_mode<synchronous>, transform_indices = @transform_5, window_bounds = array<i64: 384, 128>}, {pipeline_mode = #tpu.pipeline_mode<synchronous>, transform_indices = @transform_6, window_bounds = array<i64: 128, 256>}, {pipeline_mode = #tpu.pipeline_mode<synchronous>, transform_indices = @transform_7, window_bounds = array<i64: 256, 512>}, {pipeline_mode = #tpu.pipeline_mode<synchronous>, transform_indices = @transform_8, window_bounds = array<i64: 512, 128>}, {pipeline_mode = #tpu.pipeline_mode<synchronous>, transform_indices = @transform_9, window_bounds = array<i64: 128, 384>}, {pipeline_mode = #tpu.pipeline_mode<synchronous>, transform_indices = @transform_10, window_bounds = array<i64: 384, 256>}, {pipeline_mode = #tpu.pipeline_mode<synchronous>, transform_indices = @transform_11, window_bounds = array<i64: 256, 128>}, {pipeline_mode = #tpu.pipeline_mode<synchronous>, transform_indices = @transform_12, window_bounds = array<i64: 128, 128>}, {transform_indices = @transform_13, window_bounds = array<i64: 32, 128>}]} {
    %c0 = arith.constant 0 : index
    %c0_0 = arith.constant 0 : index
    %0 = vector.load %arg1[%c0, %c0_0] : memref<32x784xf32, #tpu.memory_space<vmem>>, vector<32x784xf32>
    %1 = arith.truncf %0 : vector<32x784xf32> to vector<32x784xbf16>
    %c0_1 = arith.constant 0 : index
    %c0_2 = arith.constant 0 : index
    %2 = vector.load %arg3[%c0_1, %c0_2] : memref<784x512xbf16, #tpu.memory_space<vmem>>, vector<784x512xbf16>
    %cst = arith.constant dense<0.000000e+00> : vector<32x512xf32>
    %3 = tpu.matmul %1, %2, %cst {dimension_numbers = #tpu.dot_dimension_numbers<[1], [0], [0], [1], [0, 0, 1, 1], [], []>} : vector<32x784xbf16>, vector<784x512xbf16>, vector<32x512xf32> -> vector<32x512xf32>
    %c0_3 = arith.constant 0 : index
    %c0_4 = arith.constant 0 : index
    %4 = vector.load %arg2[%c0_3, %c0_4] : memref<1x3072xf32, #tpu.memory_space<vmem>>, vector<1x512xf32>
    %5 = vector.broadcast %4 : vector<1x512xf32> to vector<32x512xf32>
    %6 = arith.addf %3, %5 : vector<32x512xf32>
    %cst_5 = arith.constant 0.000000e+00 : f32
    %7 = vector.broadcast %cst_5 : f32 to vector<32x512xf32>
    %8 = arith.maximumf %6, %7 : vector<32x512xf32>
    %9 = arith.truncf %8 : vector<32x512xf32> to vector<32x512xbf16>
    %c0_6 = arith.constant 0 : index
    %c0_7 = arith.constant 0 : index
    %10 = vector.load %arg4[%c0_6, %c0_7] : memref<512x256xbf16, #tpu.memory_space<vmem>>, vector<512x256xbf16>
    %cst_8 = arith.constant dense<0.000000e+00> : vector<32x256xf32>
    %11 = tpu.matmul %9, %10, %cst_8 {dimension_numbers = #tpu.dot_dimension_numbers<[1], [0], [0], [1], [0, 0, 1, 1], [], []>} : vector<32x512xbf16>, vector<512x256xbf16>, vector<32x256xf32> -> vector<32x256xf32>
    %c0_9 = arith.constant 0 : index
    %c512 = arith.constant 512 : index
    %12 = vector.load %arg2[%c0_9, %c512] : memref<1x3072xf32, #tpu.memory_space<vmem>>, vector<1x256xf32>
    %13 = vector.broadcast %12 : vector<1x256xf32> to vector<32x256xf32>
    %14 = arith.addf %11, %13 : vector<32x256xf32>
    %cst_10 = arith.constant 0.000000e+00 : f32
    %15 = vector.broadcast %cst_10 : f32 to vector<32x256xf32>
    %16 = arith.maximumf %14, %15 : vector<32x256xf32>
    %17 = arith.truncf %16 : vector<32x256xf32> to vector<32x256xbf16>
    %c0_11 = arith.constant 0 : index
    %c0_12 = arith.constant 0 : index
    %18 = vector.load %arg5[%c0_11, %c0_12] : memref<256x384xbf16, #tpu.memory_space<vmem>>, vector<256x384xbf16>
    %cst_13 = arith.constant dense<0.000000e+00> : vector<32x384xf32>
    %19 = tpu.matmul %17, %18, %cst_13 {dimension_numbers = #tpu.dot_dimension_numbers<[1], [0], [0], [1], [0, 0, 1, 1], [], []>} : vector<32x256xbf16>, vector<256x384xbf16>, vector<32x384xf32> -> vector<32x384xf32>
    %c0_14 = arith.constant 0 : index
    %c768 = arith.constant 768 : index
    %20 = vector.load %arg2[%c0_14, %c768] : memref<1x3072xf32, #tpu.memory_space<vmem>>, vector<1x384xf32>
    %21 = vector.broadcast %20 : vector<1x384xf32> to vector<32x384xf32>
    %22 = arith.addf %19, %21 : vector<32x384xf32>
    %cst_15 = arith.constant 0.000000e+00 : f32
    %23 = vector.broadcast %cst_15 : f32 to vector<32x384xf32>
    %24 = arith.maximumf %22, %23 : vector<32x384xf32>
    %25 = arith.truncf %24 : vector<32x384xf32> to vector<32x384xbf16>
    %c0_16 = arith.constant 0 : index
    %c0_17 = arith.constant 0 : index
    %26 = vector.load %arg6[%c0_16, %c0_17] : memref<384x128xbf16, #tpu.memory_space<vmem>>, vector<384x128xbf16>
    %cst_18 = arith.constant dense<0.000000e+00> : vector<32x128xf32>
    %27 = tpu.matmul %25, %26, %cst_18 {dimension_numbers = #tpu.dot_dimension_numbers<[1], [0], [0], [1], [0, 0, 1, 1], [], []>} : vector<32x384xbf16>, vector<384x128xbf16>, vector<32x128xf32> -> vector<32x128xf32>
    %c0_19 = arith.constant 0 : index
    %c1152 = arith.constant 1152 : index
    %28 = vector.load %arg2[%c0_19, %c1152] : memref<1x3072xf32, #tpu.memory_space<vmem>>, vector<1x128xf32>
    %29 = vector.broadcast %28 : vector<1x128xf32> to vector<32x128xf32>
    %30 = arith.addf %27, %29 : vector<32x128xf32>
    %cst_20 = arith.constant 0.000000e+00 : f32
    %31 = vector.broadcast %cst_20 : f32 to vector<32x128xf32>
    %32 = arith.maximumf %30, %31 : vector<32x128xf32>
    %33 = arith.truncf %32 : vector<32x128xf32> to vector<32x128xbf16>
    %c0_21 = arith.constant 0 : index
    %c0_22 = arith.constant 0 : index
    %34 = vector.load %arg7[%c0_21, %c0_22] : memref<128x256xbf16, #tpu.memory_space<vmem>>, vector<128x256xbf16>
    %cst_23 = arith.constant dense<0.000000e+00> : vector<32x256xf32>
    %35 = tpu.matmul %33, %34, %cst_23 {dimension_numbers = #tpu.dot_dimension_numbers<[1], [0], [0], [1], [0, 0, 1, 1], [], []>} : vector<32x128xbf16>, vector<128x256xbf16>, vector<32x256xf32> -> vector<32x256xf32>
    %c0_24 = arith.constant 0 : index
    %c1280 = arith.constant 1280 : index
    %36 = vector.load %arg2[%c0_24, %c1280] : memref<1x3072xf32, #tpu.memory_space<vmem>>, vector<1x256xf32>
    %37 = vector.broadcast %36 : vector<1x256xf32> to vector<32x256xf32>
    %38 = arith.addf %35, %37 : vector<32x256xf32>
    %cst_25 = arith.constant 0.000000e+00 : f32
    %39 = vector.broadcast %cst_25 : f32 to vector<32x256xf32>
    %40 = arith.maximumf %38, %39 : vector<32x256xf32>
    %41 = arith.truncf %40 : vector<32x256xf32> to vector<32x256xbf16>
    %c0_26 = arith.constant 0 : index
    %c0_27 = arith.constant 0 : index
    %42 = vector.load %arg8[%c0_26, %c0_27] : memref<256x512xbf16, #tpu.memory_space<vmem>>, vector<256x512xbf16>
    %cst_28 = arith.constant dense<0.000000e+00> : vector<32x512xf32>
    %43 = tpu.matmul %41, %42, %cst_28 {dimension_numbers = #tpu.dot_dimension_numbers<[1], [0], [0], [1], [0, 0, 1, 1], [], []>} : vector<32x256xbf16>, vector<256x512xbf16>, vector<32x512xf32> -> vector<32x512xf32>
    %c0_29 = arith.constant 0 : index
    %c1536 = arith.constant 1536 : index
    %44 = vector.load %arg2[%c0_29, %c1536] : memref<1x3072xf32, #tpu.memory_space<vmem>>, vector<1x512xf32>
    %45 = vector.broadcast %44 : vector<1x512xf32> to vector<32x512xf32>
    %46 = arith.addf %43, %45 : vector<32x512xf32>
    %cst_30 = arith.constant 0.000000e+00 : f32
    %47 = vector.broadcast %cst_30 : f32 to vector<32x512xf32>
    %48 = arith.maximumf %46, %47 : vector<32x512xf32>
    %49 = arith.truncf %48 : vector<32x512xf32> to vector<32x512xbf16>
    %c0_31 = arith.constant 0 : index
    %c0_32 = arith.constant 0 : index
    %50 = vector.load %arg9[%c0_31, %c0_32] : memref<512x128xbf16, #tpu.memory_space<vmem>>, vector<512x128xbf16>
    %cst_33 = arith.constant dense<0.000000e+00> : vector<32x128xf32>
    %51 = tpu.matmul %49, %50, %cst_33 {dimension_numbers = #tpu.dot_dimension_numbers<[1], [0], [0], [1], [0, 0, 1, 1], [], []>} : vector<32x512xbf16>, vector<512x128xbf16>, vector<32x128xf32> -> vector<32x128xf32>
    %c0_34 = arith.constant 0 : index
    %c2048 = arith.constant 2048 : index
    %52 = vector.load %arg2[%c0_34, %c2048] : memref<1x3072xf32, #tpu.memory_space<vmem>>, vector<1x128xf32>
    %53 = vector.broadcast %52 : vector<1x128xf32> to vector<32x128xf32>
    %54 = arith.addf %51, %53 : vector<32x128xf32>
    %cst_35 = arith.constant 0.000000e+00 : f32
    %55 = vector.broadcast %cst_35 : f32 to vector<32x128xf32>
    %56 = arith.maximumf %54, %55 : vector<32x128xf32>
    %57 = arith.truncf %56 : vector<32x128xf32> to vector<32x128xbf16>
    %c0_36 = arith.constant 0 : index
    %c0_37 = arith.constant 0 : index
    %58 = vector.load %arg10[%c0_36, %c0_37] : memref<128x384xbf16, #tpu.memory_space<vmem>>, vector<128x384xbf16>
    %cst_38 = arith.constant dense<0.000000e+00> : vector<32x384xf32>
    %59 = tpu.matmul %57, %58, %cst_38 {dimension_numbers = #tpu.dot_dimension_numbers<[1], [0], [0], [1], [0, 0, 1, 1], [], []>} : vector<32x128xbf16>, vector<128x384xbf16>, vector<32x384xf32> -> vector<32x384xf32>
    %c0_39 = arith.constant 0 : index
    %c2176 = arith.constant 2176 : index
    %60 = vector.load %arg2[%c0_39, %c2176] : memref<1x3072xf32, #tpu.memory_space<vmem>>, vector<1x384xf32>
    %61 = vector.broadcast %60 : vector<1x384xf32> to vector<32x384xf32>
    %62 = arith.addf %59, %61 : vector<32x384xf32>
    %cst_40 = arith.constant 0.000000e+00 : f32
    %63 = vector.broadcast %cst_40 : f32 to vector<32x384xf32>
    %64 = arith.maximumf %62, %63 : vector<32x384xf32>
    %65 = arith.truncf %64 : vector<32x384xf32> to vector<32x384xbf16>
    %c0_41 = arith.constant 0 : index
    %c0_42 = arith.constant 0 : index
    %66 = vector.load %arg11[%c0_41, %c0_42] : memref<384x256xbf16, #tpu.memory_space<vmem>>, vector<384x256xbf16>
    %cst_43 = arith.constant dense<0.000000e+00> : vector<32x256xf32>
    %67 = tpu.matmul %65, %66, %cst_43 {dimension_numbers = #tpu.dot_dimension_numbers<[1], [0], [0], [1], [0, 0, 1, 1], [], []>} : vector<32x384xbf16>, vector<384x256xbf16>, vector<32x256xf32> -> vector<32x256xf32>
    %c0_44 = arith.constant 0 : index
    %c2560 = arith.constant 2560 : index
    %68 = vector.load %arg2[%c0_44, %c2560] : memref<1x3072xf32, #tpu.memory_space<vmem>>, vector<1x256xf32>
    %69 = vector.broadcast %68 : vector<1x256xf32> to vector<32x256xf32>
    %70 = arith.addf %67, %69 : vector<32x256xf32>
    %cst_45 = arith.constant 0.000000e+00 : f32
    %71 = vector.broadcast %cst_45 : f32 to vector<32x256xf32>
    %72 = arith.maximumf %70, %71 : vector<32x256xf32>
    %73 = arith.truncf %72 : vector<32x256xf32> to vector<32x256xbf16>
    %c0_46 = arith.constant 0 : index
    %c0_47 = arith.constant 0 : index
    %74 = vector.load %arg12[%c0_46, %c0_47] : memref<256x128xbf16, #tpu.memory_space<vmem>>, vector<256x128xbf16>
    %cst_48 = arith.constant dense<0.000000e+00> : vector<32x128xf32>
    %75 = tpu.matmul %73, %74, %cst_48 {dimension_numbers = #tpu.dot_dimension_numbers<[1], [0], [0], [1], [0, 0, 1, 1], [], []>} : vector<32x256xbf16>, vector<256x128xbf16>, vector<32x128xf32> -> vector<32x128xf32>
    %c0_49 = arith.constant 0 : index
    %c2816 = arith.constant 2816 : index
    %76 = vector.load %arg2[%c0_49, %c2816] : memref<1x3072xf32, #tpu.memory_space<vmem>>, vector<1x128xf32>
    %77 = vector.broadcast %76 : vector<1x128xf32> to vector<32x128xf32>
    %78 = arith.addf %75, %77 : vector<32x128xf32>
    %cst_50 = arith.constant 0.000000e+00 : f32
    %79 = vector.broadcast %cst_50 : f32 to vector<32x128xf32>
    %80 = arith.maximumf %78, %79 : vector<32x128xf32>
    %81 = arith.truncf %80 : vector<32x128xf32> to vector<32x128xbf16>
    %c0_51 = arith.constant 0 : index
    %c0_52 = arith.constant 0 : index
    %82 = vector.load %arg13[%c0_51, %c0_52] : memref<128x128xbf16, #tpu.memory_space<vmem>>, vector<128x128xbf16>
    %cst_53 = arith.constant dense<0.000000e+00> : vector<32x128xf32>
    %83 = tpu.matmul %81, %82, %cst_53 {dimension_numbers = #tpu.dot_dimension_numbers<[1], [0], [0], [1], [0, 0, 1, 1], [], []>} : vector<32x128xbf16>, vector<128x128xbf16>, vector<32x128xf32> -> vector<32x128xf32>
    %c0_54 = arith.constant 0 : index
    %c2944 = arith.constant 2944 : index
    %84 = vector.load %arg2[%c0_54, %c2944] : memref<1x3072xf32, #tpu.memory_space<vmem>>, vector<1x128xf32>
    %85 = vector.broadcast %84 : vector<1x128xf32> to vector<32x128xf32>
    %86 = arith.addf %83, %85 : vector<32x128xf32>
    %87 = arith.truncf %86 : vector<32x128xf32> to vector<32x128xbf16>
    %c0_55 = arith.constant 0 : index
    %c0_56 = arith.constant 0 : index
    %88 = vector.load %arg14[%c0_55, %c0_56] : memref<32x128xbf16, #tpu.memory_space<vmem>>, vector<32x128xbf16>
    tpu.vector_store %arg14[%c0_55, %c0_56], %87 {strides = array<i32>} : memref<32x128xbf16, #tpu.memory_space<vmem>>, vector<32x128xbf16>,
    return
  }
  func.func @transform_0(%arg0: i32) -> (i32, i32) {
    %c0_i32 = arith.constant 0 : i32
    %c0_i32_0 = arith.constant 0 : i32
    return %arg0, %c0_i32 : i32, i32
  }
  func.func @transform_1(%arg0: i32) -> (i32, i32) {
    %c0_i32 = arith.constant 0 : i32
    %c0_i32_0 = arith.constant 0 : i32
    %c0_i32_1 = arith.constant 0 : i32
    return %c0_i32, %c0_i32_0 : i32, i32
  }
  func.func @transform_2(%arg0: i32) -> (i32, i32) {
    %c0_i32 = arith.constant 0 : i32
    %c0_i32_0 = arith.constant 0 : i32
    %c0_i32_1 = arith.constant 0 : i32
    return %c0_i32, %c0_i32_0 : i32, i32
  }
  func.func @transform_3(%arg0: i32) -> (i32, i32) {
    %c0_i32 = arith.constant 0 : i32
    %c0_i32_0 = arith.constant 0 : i32
    %c0_i32_1 = arith.constant 0 : i32
    return %c0_i32, %c0_i32_0 : i32, i32
  }
  func.func @transform_4(%arg0: i32) -> (i32, i32) {
    %c0_i32 = arith.constant 0 : i32
    %c0_i32_0 = arith.constant 0 : i32
    %c0_i32_1 = arith.constant 0 : i32
    return %c0_i32, %c0_i32_0 : i32, i32
  }
  func.func @transform_5(%arg0: i32) -> (i32, i32) {
    %c0_i32 = arith.constant 0 : i32
    %c0_i32_0 = arith.constant 0 : i32
    %c0_i32_1 = arith.constant 0 : i32
    return %c0_i32, %c0_i32_0 : i32, i32
  }
  func.func @transform_6(%arg0: i32) -> (i32, i32) {
    %c0_i32 = arith.constant 0 : i32
    %c0_i32_0 = arith.constant 0 : i32
    %c0_i32_1 = arith.constant 0 : i32
    return %c0_i32, %c0_i32_0 : i32, i32
  }
  func.func @transform_7(%arg0: i32) -> (i32, i32) {
    %c0_i32 = arith.constant 0 : i32
    %c0_i32_0 = arith.constant 0 : i32
    %c0_i32_1 = arith.constant 0 : i32
    return %c0_i32, %c0_i32_0 : i32, i32
  }
  func.func @transform_8(%arg0: i32) -> (i32, i32) {
    %c0_i32 = arith.constant 0 : i32
    %c0_i32_0 = arith.constant 0 : i32
    %c0_i32_1 = arith.constant 0 : i32
    return %c0_i32, %c0_i32_0 : i32, i32
  }
  func.func @transform_9(%arg0: i32) -> (i32, i32) {
    %c0_i32 = arith.constant 0 : i32
    %c0_i32_0 = arith.constant 0 : i32
    %c0_i32_1 = arith.constant 0 : i32
    return %c0_i32, %c0_i32_0 : i32, i32
  }
  func.func @transform_10(%arg0: i32) -> (i32, i32) {
    %c0_i32 = arith.constant 0 : i32
    %c0_i32_0 = arith.constant 0 : i32
    %c0_i32_1 = arith.constant 0 : i32
    return %c0_i32, %c0_i32_0 : i32, i32
  }
  func.func @transform_11(%arg0: i32) -> (i32, i32) {
    %c0_i32 = arith.constant 0 : i32
    %c0_i32_0 = arith.constant 0 : i32
    %c0_i32_1 = arith.constant 0 : i32
    return %c0_i32, %c0_i32_0 : i32, i32
  }
  func.func @transform_12(%arg0: i32) -> (i32, i32) {
    %c0_i32 = arith.constant 0 : i32
    %c0_i32_0 = arith.constant 0 : i32
    %c0_i32_1 = arith.constant 0 : i32
    return %c0_i32, %c0_i32_0 : i32, i32
  }
  func.func @transform_13(%arg0: i32) -> (i32, i32) {
    %c0_i32 = arith.constant 0 : i32
    %c0_i32_0 = arith.constant 0 : i32
    return %arg0, %c0_i32 : i32, i32
  }
}

module attributes {stable_mosaic.version = 11 : i64} {
  func.func @nasnet_kernel(%arg0: i32, %arg1: memref<32x784xf32, #tpu.memory_space<vmem>>, %arg2: memref<1x3072xf32, #tpu.memory_space<vmem>>, %arg3: memref<784x512xbf16, #tpu.memory_space<vmem>>, %arg4: memref<512x256xbf16, #tpu.memory_space<vmem>>, %arg5: memref<256x384xbf16, #tpu.memory_space<vmem>>, %arg6: memref<384x128xbf16, #tpu.memory_space<vmem>>, %arg7: memref<128x256xbf16, #tpu.memory_space<vmem>>, %arg8: memref<256x512xbf16, #tpu.memory_space<vmem>>, %arg9: memref<512x128xbf16, #tpu.memory_space<vmem>>, %arg10: memref<128x384xbf16, #tpu.memory_space<vmem>>, %arg11: memref<384x256xbf16, #tpu.memory_space<vmem>>, %arg12: memref<256x128xbf16, #tpu.memory_space<vmem>>, %arg13: memref<128x128xbf16, #tpu.memory_space<vmem>>, %arg14: memref<32x128xbf16, #tpu.memory_space<vmem>>) attributes {dimension_semantics = [#tpu.dimension_semantics<parallel>], iteration_bounds = array<i64: 1>, scalar_prefetch = 0 : i64, scratch_operands = 0 : i64, tpu.core_type = #tpu.core_type<tc>, window_params = [{transform_indices = @transform_0, window_bounds = array<i64: 32, 784>}, {pipeline_mode = #tpu.pipeline_mode<synchronous>, transform_indices = @transform_1, window_bounds = array<i64: 1, 3072>}, {pipeline_mode = #tpu.pipeline_mode<synchronous>, transform_indices = @transform_2, window_bounds = array<i64: 784, 512>}, {pipeline_mode = #tpu.pipeline_mode<synchronous>, transform_indices = @transform_3, window_bounds = array<i64: 512, 256>}, {pipeline_mode = #tpu.pipeline_mode<synchronous>, transform_indices = @transform_4, window_bounds = array<i64: 256, 384>}, {pipeline_mode = #tpu.pipeline_mode<synchronous>, transform_indices = @transform_5, window_bounds = array<i64: 384, 128>}, {pipeline_mode = #tpu.pipeline_mode<synchronous>, transform_indices = @transform_6, window_bounds = array<i64: 128, 256>}, {pipeline_mode = #tpu.pipeline_mode<synchronous>, transform_indices = @transform_7, window_bounds = array<i64: 256, 512>}, {pipeline_mode = #tpu.pipeline_mode<synchronous>, transform_indices = @transform_8, window_bounds = array<i64: 512, 128>}, {pipeline_mode = #tpu.pipeline_mode<synchronous>, transform_indices = @transform_9, window_bounds = array<i64: 128, 384>}, {pipeline_mode = #tpu.pipeline_mode<synchronous>, transform_indices = @transform_10, window_bounds = array<i64: 384, 256>}, {pipeline_mode = #tpu.pipeline_mode<synchronous>, transform_indices = @transform_11, window_bounds = array<i64: 256, 128>}, {pipeline_mode = #tpu.pipeline_mode<synchronous>, transform_indices = @transform_12, window_bounds = array<i64: 128, 128>}, {transform_indices = @transform_13, window_bounds = array<i64: 32, 128>}]} {
    %c0 = arith.constant 0 : index
    %c0_0 = arith.constant 0 : index
    %0 = vector.load %arg1[%c0, %c0_0] : memref<32x784xf32, #tpu.memory_space<vmem>>, vector<32x784xf32>
    %1 = arith.truncf %0 : vector<32x784xf32> to vector<32x784xbf16>
    %c0_1 = arith.constant 0 : index
    %c0_2 = arith.constant 0 : index
    %2 = vector.load %arg3[%c0_1, %c0_2] : memref<784x512xbf16, #tpu.memory_space<vmem>>, vector<784x512xbf16>
    %cst = arith.constant dense<0.000000e+00> : vector<32x512xf32>
    %3 = tpu.matmul %1, %2, %cst {dimension_numbers = #tpu.dot_dimension_numbers<[1], [0], [0], [1], [0, 0, 1, 1], [], []>} : vector<32x784xbf16>, vector<784x512xbf16>, vector<32x512xf32> -> vector<32x512xf32>
    %c0_3 = arith.constant 0 : index
    %c0_4 = arith.constant 0 : index
    %4 = vector.load %arg2[%c0_3, %c0_4] : memref<1x3072xf32, #tpu.memory_space<vmem>>, vector<1x512xf32>
    %5 = vector.broadcast %4 : vector<1x512xf32> to vector<32x512xf32>
    %6 = arith.addf %3, %5 : vector<32x512xf32>
    %cst_5 = arith.constant 0.000000e+00 : f32
    %7 = vector.broadcast %cst_5 : f32 to vector<32x512xf32>
    %8 = arith.maximumf %6, %7 : vector<32x512xf32>
    %9 = arith.truncf %8 : vector<32x512xf32> to vector<32x512xbf16>
    %c0_6 = arith.constant 0 : index
    %c0_7 = arith.constant 0 : index
    %10 = vector.load %arg4[%c0_6, %c0_7] : memref<512x256xbf16, #tpu.memory_space<vmem>>, vector<512x256xbf16>
    %cst_8 = arith.constant dense<0.000000e+00> : vector<32x256xf32>
    %11 = tpu.matmul %9, %10, %cst_8 {dimension_numbers = #tpu.dot_dimension_numbers<[1], [0], [0], [1], [0, 0, 1, 1], [], []>} : vector<32x512xbf16>, vector<512x256xbf16>, vector<32x256xf32> -> vector<32x256xf32>
    %c0_9 = arith.constant 0 : index
    %c512 = arith.constant 512 : index
    %12 = vector.load %arg2[%c0_9, %c512] : memref<1x3072xf32, #tpu.memory_space<vmem>>, vector<1x256xf32>
    %13 = vector.broadcast %12 : vector<1x256xf32> to vector<32x256xf32>
    %14 = arith.addf %11, %13 : vector<32x256xf32>
    %cst_10 = arith.constant 0.000000e+00 : f32
    %15 = vector.broadcast %cst_10 : f32 to vector<32x256xf32>
    %16 = arith.maximumf %14, %15 : vector<32x256xf32>
    %17 = arith.truncf %16 : vector<32x256xf32> to vector<32x256xbf16>
    %c0_11 = arith.constant 0 : index
    %c0_12 = arith.constant 0 : index
    %18 = vector.load %arg5[%c0_11, %c0_12] : memref<256x384xbf16, #tpu.memory_space<vmem>>, vector<256x384xbf16>
    %cst_13 = arith.constant dense<0.000000e+00> : vector<32x384xf32>
    %19 = tpu.matmul %17, %18, %cst_13 {dimension_numbers = #tpu.dot_dimension_numbers<[1], [0], [0], [1], [0, 0, 1, 1], [], []>} : vector<32x256xbf16>, vector<256x384xbf16>, vector<32x384xf32> -> vector<32x384xf32>
    %c0_14 = arith.constant 0 : index
    %c768 = arith.constant 768 : index
    %20 = vector.load %arg2[%c0_14, %c768] : memref<1x3072xf32, #tpu.memory_space<vmem>>, vector<1x384xf32>
    %21 = vector.broadcast %20 : vector<1x384xf32> to vector<32x384xf32>
    %22 = arith.addf %19, %21 : vector<32x384xf32>
    %cst_15 = arith.constant 0.000000e+00 : f32
    %23 = vector.broadcast %cst_15 : f32 to vector<32x384xf32>
    %24 = arith.maximumf %22, %23 : vector<32x384xf32>
    %25 = arith.truncf %24 : vector<32x384xf32> to vector<32x384xbf16>
    %c0_16 = arith.constant 0 : index
    %c0_17 = arith.constant 0 : index
    %26 = vector.load %arg6[%c0_16, %c0_17] : memref<384x128xbf16, #tpu.memory_space<vmem>>, vector<384x128xbf16>
    %cst_18 = arith.constant dense<0.000000e+00> : vector<32x128xf32>
    %27 = tpu.matmul %25, %26, %cst_18 {dimension_numbers = #tpu.dot_dimension_numbers<[1], [0], [0], [1], [0, 0, 1, 1], [], []>} : vector<32x384xbf16>, vector<384x128xbf16>, vector<32x128xf32> -> vector<32x128xf32>
    %c0_19 = arith.constant 0 : index
    %c1152 = arith.constant 1152 : index
    %28 = vector.load %arg2[%c0_19, %c1152] : memref<1x3072xf32, #tpu.memory_space<vmem>>, vector<1x128xf32>
    %29 = vector.broadcast %28 : vector<1x128xf32> to vector<32x128xf32>
    %30 = arith.addf %27, %29 : vector<32x128xf32>
    %cst_20 = arith.constant 0.000000e+00 : f32
    %31 = vector.broadcast %cst_20 : f32 to vector<32x128xf32>
    %32 = arith.maximumf %30, %31 : vector<32x128xf32>
    %33 = arith.truncf %32 : vector<32x128xf32> to vector<32x128xbf16>
    %c0_21 = arith.constant 0 : index
    %c0_22 = arith.constant 0 : index
    %34 = vector.load %arg7[%c0_21, %c0_22] : memref<128x256xbf16, #tpu.memory_space<vmem>>, vector<128x256xbf16>
    %cst_23 = arith.constant dense<0.000000e+00> : vector<32x256xf32>
    %35 = tpu.matmul %33, %34, %cst_23 {dimension_numbers = #tpu.dot_dimension_numbers<[1], [0], [0], [1], [0, 0, 1, 1], [], []>} : vector<32x128xbf16>, vector<128x256xbf16>, vector<32x256xf32> -> vector<32x256xf32>
    %c0_24 = arith.constant 0 : index
    %c1280 = arith.constant 1280 : index
    %36 = vector.load %arg2[%c0_24, %c1280] : memref<1x3072xf32, #tpu.memory_space<vmem>>, vector<1x256xf32>
    %37 = vector.broadcast %36 : vector<1x256xf32> to vector<32x256xf32>
    %38 = arith.addf %35, %37 : vector<32x256xf32>
    %cst_25 = arith.constant 0.000000e+00 : f32
    %39 = vector.broadcast %cst_25 : f32 to vector<32x256xf32>
    %40 = arith.maximumf %38, %39 : vector<32x256xf32>
    %41 = arith.truncf %40 : vector<32x256xf32> to vector<32x256xbf16>
    %c0_26 = arith.constant 0 : index
    %c0_27 = arith.constant 0 : index
    %42 = vector.load %arg8[%c0_26, %c0_27] : memref<256x512xbf16, #tpu.memory_space<vmem>>, vector<256x512xbf16>
    %cst_28 = arith.constant dense<0.000000e+00> : vector<32x512xf32>
    %43 = tpu.matmul %41, %42, %cst_28 {dimension_numbers = #tpu.dot_dimension_numbers<[1], [0], [0], [1], [0, 0, 1, 1], [], []>} : vector<32x256xbf16>, vector<256x512xbf16>, vector<32x512xf32> -> vector<32x512xf32>
    %c0_29 = arith.constant 0 : index
    %c1536 = arith.constant 1536 : index
    %44 = vector.load %arg2[%c0_29, %c1536] : memref<1x3072xf32, #tpu.memory_space<vmem>>, vector<1x512xf32>
    %45 = vector.broadcast %44 : vector<1x512xf32> to vector<32x512xf32>
    %46 = arith.addf %43, %45 : vector<32x512xf32>
    %cst_30 = arith.constant 0.000000e+00 : f32
    %47 = vector.broadcast %cst_30 : f32 to vector<32x512xf32>
    %48 = arith.maximumf %46, %47 : vector<32x512xf32>
    %49 = arith.truncf %48 : vector<32x512xf32> to vector<32x512xbf16>
    %c0_31 = arith.constant 0 : index
    %c0_32 = arith.constant 0 : index
    %50 = vector.load %arg9[%c0_31, %c0_32] : memref<512x128xbf16, #tpu.memory_space<vmem>>, vector<512x128xbf16>
    %cst_33 = arith.constant dense<0.000000e+00> : vector<32x128xf32>
    %51 = tpu.matmul %49, %50, %cst_33 {dimension_numbers = #tpu.dot_dimension_numbers<[1], [0], [0], [1], [0, 0, 1, 1], [], []>} : vector<32x512xbf16>, vector<512x128xbf16>, vector<32x128xf32> -> vector<32x128xf32>
    %c0_34 = arith.constant 0 : index
    %c2048 = arith.constant 2048 : index
    %52 = vector.load %arg2[%c0_34, %c2048] : memref<1x3072xf32, #tpu.memory_space<vmem>>, vector<1x128xf32>
    %53 = vector.broadcast %52 : vector<1x128xf32> to vector<32x128xf32>
    %54 = arith.addf %51, %53 : vector<32x128xf32>
    %cst_35 = arith.constant 0.000000e+00 : f32
    %55 = vector.broadcast %cst_35 : f32 to vector<32x128xf32>
    %56 = arith.maximumf %54, %55 : vector<32x128xf32>
    %57 = arith.truncf %56 : vector<32x128xf32> to vector<32x128xbf16>
    %c0_36 = arith.constant 0 : index
    %c0_37 = arith.constant 0 : index
    %58 = vector.load %arg10[%c0_36, %c0_37] : memref<128x384xbf16, #tpu.memory_space<vmem>>, vector<128x384xbf16>
    %cst_38 = arith.constant dense<0.000000e+00> : vector<32x384xf32>
    %59 = tpu.matmul %57, %58, %cst_38 {dimension_numbers = #tpu.dot_dimension_numbers<[1], [0], [0], [1], [0, 0, 1, 1], [], []>} : vector<32x128xbf16>, vector<128x384xbf16>, vector<32x384xf32> -> vector<32x384xf32>
    %c0_39 = arith.constant 0 : index
    %c2176 = arith.constant 2176 : index
    %60 = vector.load %arg2[%c0_39, %c2176] : memref<1x3072xf32, #tpu.memory_space<vmem>>, vector<1x384xf32>
    %61 = vector.broadcast %60 : vector<1x384xf32> to vector<32x384xf32>
    %62 = arith.addf %59, %61 : vector<32x384xf32>
    %cst_40 = arith.constant 0.000000e+00 : f32
    %63 = vector.broadcast %cst_40 : f32 to vector<32x384xf32>
    %64 = arith.maximumf %62, %63 : vector<32x384xf32>
    %65 = arith.truncf %64 : vector<32x384xf32> to vector<32x384xbf16>
    %c0_41 = arith.constant 0 : index
    %c0_42 = arith.constant 0 : index
    %66 = vector.load %arg11[%c0_41, %c0_42] : memref<384x256xbf16, #tpu.memory_space<vmem>>, vector<384x256xbf16>
    %cst_43 = arith.constant dense<0.000000e+00> : vector<32x256xf32>
    %67 = tpu.matmul %65, %66, %cst_43 {dimension_numbers = #tpu.dot_dimension_numbers<[1], [0], [0], [1], [0, 0, 1, 1], [], []>} : vector<32x384xbf16>, vector<384x256xbf16>, vector<32x256xf32> -> vector<32x256xf32>
    %c0_44 = arith.constant 0 : index
    %c2560 = arith.constant 2560 : index
    %68 = vector.load %arg2[%c0_44, %c2560] : memref<1x3072xf32, #tpu.memory_space<vmem>>, vector<1x256xf32>
    %69 = vector.broadcast %68 : vector<1x256xf32> to vector<32x256xf32>
    %70 = arith.addf %67, %69 : vector<32x256xf32>
    %cst_45 = arith.constant 0.000000e+00 : f32
    %71 = vector.broadcast %cst_45 : f32 to vector<32x256xf32>
    %72 = arith.maximumf %70, %71 : vector<32x256xf32>
    %73 = arith.truncf %72 : vector<32x256xf32> to vector<32x256xbf16>
    %c0_46 = arith.constant 0 : index
    %c0_47 = arith.constant 0 : index
    %74 = vector.load %arg12[%c0_46, %c0_47] : memref<256x128xbf16, #tpu.memory_space<vmem>>, vector<256x128xbf16>
    %cst_48 = arith.constant dense<0.000000e+00> : vector<32x128xf32>
    %75 = tpu.matmul %73, %74, %cst_48 {dimension_numbers = #tpu.dot_dimension_numbers<[1], [0], [0], [1], [0, 0, 1, 1], [], []>} : vector<32x256xbf16>, vector<256x128xbf16>, vector<32x128xf32> -> vector<32x128xf32>
    %c0_49 = arith.constant 0 : index
    %c2816 = arith.constant 2816 : index
    %76 = vector.load %arg2[%c0_49, %c2816] : memref<1x3072xf32, #tpu.memory_space<vmem>>, vector<1x128xf32>
    %77 = vector.broadcast %76 : vector<1x128xf32> to vector<32x128xf32>
    %78 = arith.addf %75, %77 : vector<32x128xf32>
    %cst_50 = arith.constant 0.000000e+00 : f32
    %79 = vector.broadcast %cst_50 : f32 to vector<32x128xf32>
    %80 = arith.maximumf %78, %79 : vector<32x128xf32>
    %81 = arith.truncf %80 : vector<32x128xf32> to vector<32x128xbf16>
    %c0_51 = arith.constant 0 : index
    %c0_52 = arith.constant 0 : index
    %82 = vector.load %arg13[%c0_51, %c0_52] : memref<128x128xbf16, #tpu.memory_space<vmem>>, vector<128x128xbf16>
    %cst_53 = arith.constant dense<0.000000e+00> : vector<32x128xf32>
    %83 = tpu.matmul %81, %82, %cst_53 {dimension_numbers = #tpu.dot_dimension_numbers<[1], [0], [0], [1], [0, 0, 1, 1], [], []>} : vector<32x128xbf16>, vector<128x128xbf16>, vector<32x128xf32> -> vector<32x128xf32>
    %c0_54 = arith.constant 0 : index
    %c2944 = arith.constant 2944 : index
    %84 = vector.load %arg2[%c0_54, %c2944] : memref<1x3072xf32, #tpu.memory_space<vmem>>, vector<1x128xf32>
    %85 = vector.broadcast %84 : vector<1x128xf32> to vector<32x128xf32>
    %86 = arith.addf %83, %85 : vector<32x128xf32>
    %87 = arith.truncf %86 : vector<32x128xf32> to vector<32x128xbf16>
    %c0_55 = arith.constant 0 : index
    %c0_56 = arith.constant 0 : index
    %88 = vector.load %arg14[%c0_55, %c0_56] : memref<32x128xbf16, #tpu.memory_space<vmem>>, vector<32x128xbf16>
    tpu.vector_store %arg14[%c0_55, %c0_56], %87 {strides = array<i32>} : memref<32x128xbf16, #tpu.memory_space<vmem>>, vector<32x128xbf16>,
    return
  }
  func.func @transform_0(%arg0: i32) -> (i32, i32) {
    %c0_i32 = arith.constant 0 : i32
    %c0_i32_0 = arith.constant 0 : i32
    return %arg0, %c0_i32 : i32, i32
  }
  func.func @transform_1(%arg0: i32) -> (i32, i32) {
    %c0_i32 = arith.constant 0 : i32
    %c0_i32_0 = arith.constant 0 : i32
    %c0_i32_1 = arith.constant 0 : i32
    return %c0_i32, %c0_i32_0 : i32, i32
  }
  func.func @transform_2(%arg0: i32) -> (i32, i32) {
    %c0_i32 = arith.constant 0 : i32
    %c0_i32_0 = arith.constant 0 : i32
    %c0_i32_1 = arith.constant 0 : i32
    return %c0_i32, %c0_i32_0 : i32, i32
  }
  func.func @transform_3(%arg0: i32) -> (i32, i32) {
    %c0_i32 = arith.constant 0 : i32
    %c0_i32_0 = arith.constant 0 : i32
    %c0_i32_1 = arith.constant 0 : i32
    return %c0_i32, %c0_i32_0 : i32, i32
  }
  func.func @transform_4(%arg0: i32) -> (i32, i32) {
    %c0_i32 = arith.constant 0 : i32
    %c0_i32_0 = arith.constant 0 : i32
    %c0_i32_1 = arith.constant 0 : i32
    return %c0_i32, %c0_i32_0 : i32, i32
  }
  func.func @transform_5(%arg0: i32) -> (i32, i32) {
    %c0_i32 = arith.constant 0 : i32
    %c0_i32_0 = arith.constant 0 : i32
    %c0_i32_1 = arith.constant 0 : i32
    return %c0_i32, %c0_i32_0 : i32, i32
  }
  func.func @transform_6(%arg0: i32) -> (i32, i32) {
    %c0_i32 = arith.constant 0 : i32
    %c0_i32_0 = arith.constant 0 : i32
    %c0_i32_1 = arith.constant 0 : i32
    return %c0_i32, %c0_i32_0 : i32, i32
  }
  func.func @transform_7(%arg0: i32) -> (i32, i32) {
    %c0_i32 = arith.constant 0 : i32
    %c0_i32_0 = arith.constant 0 : i32
    %c0_i32_1 = arith.constant 0 : i32
    return %c0_i32, %c0_i32_0 : i32, i32
  }
  func.func @transform_8(%arg0: i32) -> (i32, i32) {
    %c0_i32 = arith.constant 0 : i32
    %c0_i32_0 = arith.constant 0 : i32
    %c0_i32_1 = arith.constant 0 : i32
    return %c0_i32, %c0_i32_0 : i32, i32
  }
  func.func @transform_9(%arg0: i32) -> (i32, i32) {
    %c0_i32 = arith.constant 0 : i32
    %c0_i32_0 = arith.constant 0 : i32
    %c0_i32_1 = arith.constant 0 : i32
    return %c0_i32, %c0_i32_0 : i32, i32
  }
  func.func @transform_10(%arg0: i32) -> (i32, i32) {
    %c0_i32 = arith.constant 0 : i32
    %c0_i32_0 = arith.constant 0 : i32
    %c0_i32_1 = arith.constant 0 : i32
    return %c0_i32, %c0_i32_0 : i32, i32
  }
  func.func @transform_11(%arg0: i32) -> (i32, i32) {
    %c0_i32 = arith.constant 0 : i32
    %c0_i32_0 = arith.constant 0 : i32
    %c0_i32_1 = arith.constant 0 : i32
    return %c0_i32, %c0_i32_0 : i32, i32
  }
  func.func @transform_12(%arg0: i32) -> (i32, i32) {
    %c0_i32 = arith.constant 0 : i32
    %c0_i32_0 = arith.constant 0 : i32
    %c0_i32_1 = arith.constant 0 : i32
    return %c0_i32, %c0_i32_0 : i32, i32
  }
  func.func @transform_13(%arg0: i32) -> (i32, i32) {
    %c0_i32 = arith.constant 0 : i32
    %c0_i32_0 = arith.constant 0 : i32
    return %arg0, %c0_i32 : i32, i32
  }
}

</mosaic_0001>

<bundles_post_ra>
// kernel: tpu_custom_call.1
= control target key start
LH: loop header
LB: loop body
LE: loop exit
PB: predicated region body
PF: predicated region fallthrough
CT: control target
= control target key end

     0   :  { %18 = vsyncpa [#allocation3], 0  ;;  %s7732_s0 = inlined_call_operand.hbm [shape: f32[32,784], index: 0, kind: input, shape index: {}]   ;;  %s7733_s1 = inlined_call_operand.hbm [shape: f32[1,3072], index: 1, kind: input, shape index: {}]   ;;  %s7734_s2 = inlined_call_operand.hbm [shape: bf16[784,512], index: 2, kind: input, shape index: {}]   ;;  %s7735_s3 = inlined_call_operand.hbm [shape: bf16[512,256], index: 3, kind: input, shape index: {}]   ;;  %s7736_s4 = inlined_call_operand.hbm [shape: bf16[256,384], index: 4, kind: input, shape index: {}]   ;;  %s7737_s5 = inlined_call_operand.hbm [shape: bf16[384,128], index: 5, kind: input, shape index: {}]   ;;  %s7738_s6 = inlined_call_operand.hbm [shape: bf16[128,256], index: 6, kind: input, shape index: {}]   ;;  %s7739_s7 = inlined_call_operand.hbm [shape: bf16[256,512], index: 7, kind: input, shape index: {}]   ;;  %s7740_s8 = inlined_call_operand.hbm [shape: bf16[512,128], index: 8, kind: input, shape index: {}]   ;;  %s7741_s9 = inlined_call_operand.hbm [shape: bf16[128,384], index: 9, kind: input, shape index: {}]   ;;  %s7742_s10 = inlined_call_operand.hbm [shape: bf16[384,256], index: 10, kind: input, shape index: {}]   ;;  %s7743_s11 = inlined_call_operand.hbm [shape: bf16[256,128], index: 11, kind: input, shape index: {}]   ;;  %s7744_s12 = inlined_call_operand.hbm [shape: bf16[128,128], index: 12, kind: input, shape index: {}]   ;;  %s7745_s13 = inlined_call_operand.hbm [shape: bf16[32,128], index: 13, kind: output, shape index: {}]  }
   0x1   :  { %19 = vsyncpa [#allocation6], 0 }
   0x2   :  { %20 = vsyncpa [#allocation9], 0 }
   0x3   :  { %21 = vsyncpa [#allocation12], 0 }
   0x4   :  { %22 = vsyncpa [#allocation15], 0 }
   0x5   :  { %23 = vsyncpa [#allocation18], 0 }
   0x6   :  { %24 = vsyncpa [#allocation21], 0 }
   0x7   :  { %25 = vsyncpa [#allocation4], 0  ;;  %s7333_s25 = smov [#allocation5]   ;;  %s7334_s27 = smov [#allocation8]  }
   0x8   :  { %s44_s26 = sshll.u32 %s7333_s25, 4  ;;  %s65_s28 = sshll.u32 %s7334_s27, 4  ;;  %s45_s26 = int_to_ptr.vmem [resolvable:$true] %s44_s26  ;;  %s7428_s28 = int_to_ptr.vmem [resolvable:$true] %s65_s28 }
   0x9   :  { %s7009_s14 = scalar_lea.hbm %s7733_s1, 384 }
   0xa   :  { %p7010_p0 = scmp.ne.s32.totalorder %s7733_s1, %s7009_s14  ;;  %p7013_p1 = scmp.lt.u32.totalorder %s7009_s14, %s7733_s1 }
   0xc   :  { %p7015_p2 = pnand %p7013_p1, %p7010_p0 }
   0xe   :  { %7018 = shalt.err (!%p7015_p2)
}
   0xf   :  { %s7019_s19 = scalar_lea.vmem %s45_s26, 384  ;;  %p7024_p4 = scmp.lt.s32.totalorder %s45_s26, %s45_s26 }
  0x10   :  { %p7020_p3 = scmp.ne.s32.totalorder %s45_s26, %s7019_s19  ;;  %p7025_p5 = scmp.lt.s32.totalorder %s7019_s19, %s7019_s19 }
  0x12   :  { %p7026_p6 = por %p7025_p5, %p7024_p4 }
  0x14   :  { %p7027_p7 = pnand %p7026_p6, %p7020_p3 }
  0x16   :  { %7030 = shalt.err (!%p7027_p7)
}
  0x17   :  { %47 = dma.hbm_to_vmem [thread:$0]  %s7733_s1, 384, %s45_s26, [#allocation6]  }
  0x18   :  { %s7031_s24 = scalar_lea.hbm %s7735_s3, 8192 }
  0x19   :  { %p7032_p8 = scmp.ne.s32.totalorder %s7735_s3, %s7031_s24  ;;  %p7035_p9 = scmp.lt.u32.totalorder %s7031_s24, %s7735_s3 }
  0x1b   :  { %p7037_p10 = pnand %p7035_p9, %p7032_p8 }
  0x1d   :  { %7040 = shalt.err (!%p7037_p10)
}
  0x1e   :  { %s7041_s14 = scalar_lea.vmem %s7428_s28, 8192  ;;  %p7046_p12 = scmp.lt.s32.totalorder %s7428_s28, %s7428_s28 }
  0x1f   :  { %p7042_p11 = scmp.ne.s32.totalorder %s7428_s28, %s7041_s14  ;;  %p7047_p13 = scmp.lt.s32.totalorder %s7041_s14, %s7041_s14 }
  0x21   :  { %p7048_p0 = por %p7047_p13, %p7046_p12 }
  0x23   :  { %p7049_p1 = pnand %p7048_p0, %p7042_p11 }
  0x25   :  { %7052 = shalt.err (!%p7049_p1)
}
  0x26   :  { %s7335_s1 = smov 128   ;;  %s7336_s26 = smov 8  }
  0x27   :  { %71 = dma.hbm_to_vmem [thread:$0]  %s7735_s3, 8192, %s7428_s28, [#allocation9], %s7335_s1, %s7335_s1, %s7336_s26  }
  0x28   :  { %s7337_s17 = smov [#allocation11]   ;;  %s7053_s21 = scalar_lea.hbm %s7737_s5, 3072 }
  0x29   :  { %s89_s18 = sshll.u32 %s7337_s17, 4  ;;  %p7054_p2 = scmp.ne.s32.totalorder %s7737_s5, %s7053_s21  ;;  %s90_s18 = int_to_ptr.vmem [resolvable:$true] %s89_s18 }
  0x2a   :  { %p7057_p3 = scmp.lt.u32.totalorder %s7053_s21, %s7737_s5 }
  0x2c   :  { %p7059_p4 = pnand %p7057_p3, %p7054_p2 }
  0x2e   :  { %7062 = shalt.err (!%p7059_p4)
}
  0x2f   :  { %s7063_s27 = scalar_lea.vmem %s90_s18, 3072  ;;  %p7068_p6 = scmp.lt.s32.totalorder %s90_s18, %s90_s18 }
  0x30   :  { %p7064_p5 = scmp.ne.s32.totalorder %s90_s18, %s7063_s27  ;;  %p7069_p7 = scmp.lt.s32.totalorder %s7063_s27, %s7063_s27 }
  0x32   :  { %p7070_p8 = por %p7069_p7, %p7068_p6 }
  0x34   :  { %p7071_p9 = pnand %p7070_p8, %p7064_p5 }
  0x36   :  { %7074 = shalt.err (!%p7071_p9)
}
  0x37   :  { %s7746_s3 = smov 64   ;;  %s7339_s28 = smov 4  }
  0x38   :  { %95 = dma.hbm_to_vmem [thread:$0]  %s7737_s5, 3072, %s90_s18, [#allocation12], %s7746_s3, %s7746_s3, %s7339_s28  }
  0x39   :  { %s7340_s14 = smov [#allocation14]   ;;  %s7075_s19 = scalar_lea.hbm %s7739_s7, 8192 }
  0x3a   :  { %s113_s15 = sshll.u32 %s7340_s14, 4  ;;  %p7076_p10 = scmp.ne.s32.totalorder %s7739_s7, %s7075_s19  ;;  %s114_s15 = int_to_ptr.vmem [resolvable:$true] %s113_s15 }
  0x3b   :  { %p7079_p11 = scmp.lt.u32.totalorder %s7075_s19, %s7739_s7 }
  0x3d   :  { %p7081_p12 = pnand %p7079_p11, %p7076_p10 }
  0x3f   :  { %7084 = shalt.err (!%p7081_p12)
}
  0x40   :  { %s7085_s24 = scalar_lea.vmem %s114_s15, 8192  ;;  %p7090_p0 = scmp.lt.s32.totalorder %s114_s15, %s114_s15 }
  0x41   :  { %p7086_p13 = scmp.ne.s32.totalorder %s114_s15, %s7085_s24  ;;  %p7091_p1 = scmp.lt.s32.totalorder %s7085_s24, %s7085_s24 }
  0x43   :  { %p7092_p2 = por %p7091_p1, %p7090_p0 }
  0x45   :  { %p7093_p3 = pnand %p7092_p2, %p7086_p13 }
  0x47   :  { %7096 = shalt.err (!%p7093_p3)
}
  0x48   :  { %s7341_s5 = smov 256   ;;  %s7342_s18 = smov 16  }
  0x49   :  { %119 = dma.hbm_to_vmem [thread:$0]  %s7739_s7, 8192, %s114_s15, [#allocation15], %s7341_s5, %s7341_s5, %s7342_s18  }
  0x4a   :  { %s7343_s29 = smov [#allocation17]   ;;  %s7344_s14 = smov [#allocation20]  }
  0x4b   :  { %s137_s30 = sshll.u32 %s7343_s29, 4  ;;  %s161_s16 = sshll.u32 %s7344_s14, 4  ;;  %s138_s30 = int_to_ptr.vmem [resolvable:$true] %s137_s30  ;;  %s7492_s16 = int_to_ptr.vmem [resolvable:$true] %s161_s16 }
  0x4c   :  { %s7097_s20 = scalar_lea.hbm %s7741_s9, 3072 }
  0x4d   :  { %p7098_p4 = scmp.ne.s32.totalorder %s7741_s9, %s7097_s20  ;;  %p7101_p5 = scmp.lt.u32.totalorder %s7097_s20, %s7741_s9 }
  0x4f   :  { %p7103_p6 = pnand %p7101_p5, %p7098_p4 }
  0x51   :  { %7106 = shalt.err (!%p7103_p6)
}
  0x52   :  { %s7107_s7 = scalar_lea.vmem %s138_s30, 3072  ;;  %p7112_p8 = scmp.lt.s32.totalorder %s138_s30, %s138_s30 }
  0x53   :  { %p7108_p7 = scmp.ne.s32.totalorder %s138_s30, %s7107_s7  ;;  %p7113_p9 = scmp.lt.s32.totalorder %s7107_s7, %s7107_s7 }
  0x55   :  { %p7114_p10 = por %p7113_p9, %p7112_p8 }
  0x57   :  { %p7115_p11 = pnand %p7114_p10, %p7108_p7 }
  0x59   :  { %7118 = shalt.err (!%p7115_p11)
}
  0x5a   :  { %s7345_s15 = smov 192   ;;  %s7346_s25 = smov 12  }
  0x5b   :  { %143 = dma.hbm_to_vmem [thread:$0]  %s7741_s9, 3072, %s138_s30, [#allocation18], %s7345_s15, %s7345_s15, %s7346_s25  }
  0x5c   :  { %s7119_s19 = scalar_lea.hbm %s7743_s11, 2048 }
  0x5d   :  { %p7120_p12 = scmp.ne.s32.totalorder %s7743_s11, %s7119_s19  ;;  %p7123_p13 = scmp.lt.u32.totalorder %s7119_s19, %s7743_s11 }
  0x5f   :  { %p7125_p0 = pnand %p7123_p13, %p7120_p12 }
  0x61   :  { %7128 = shalt.err (!%p7125_p0)
}
  0x62   :  { %s7129_s24 = scalar_lea.vmem %s7492_s16, 2048  ;;  %p7134_p2 = scmp.lt.s32.totalorder %s7492_s16, %s7492_s16 }
  0x63   :  { %p7130_p1 = scmp.ne.s32.totalorder %s7492_s16, %s7129_s24  ;;  %p7135_p3 = scmp.lt.s32.totalorder %s7129_s24, %s7129_s24 }
  0x65   :  { %p7136_p4 = por %p7135_p3, %p7134_p2 }
  0x67   :  { %p7137_p5 = pnand %p7136_p4, %p7130_p1 }
  0x69   :  { %7140 = shalt.err (!%p7137_p5)
}
  0x6a   :  { %167 = dma.hbm_to_vmem [thread:$0]  %s7743_s11, 2048, %s7492_s16, [#allocation21], %s7746_s3, %s7746_s3, %s7339_s28  }
  0x6b   :  { %s7347_s7 = smov [#allocation2]   ;;  %s7141_s17 = scalar_lea.hbm %s7732_s0, 3584 }
  0x6c   :  { %s31_s27 = sshll.u32 %s7347_s7, 4  ;;  %p7142_p6 = scmp.ne.s32.totalorder %s7732_s0, %s7141_s17  ;;  %s32_s27 = int_to_ptr.vmem [resolvable:$true] %s31_s27 }
  0x6d   :  { %p7145_p7 = scmp.lt.u32.totalorder %s7141_s17, %s7732_s0 }
  0x6f   :  { %p7147_p8 = pnand %p7145_p7, %p7142_p6 }
  0x71   :  { %7150 = shalt.err (!%p7147_p8)
}
  0x72   :  { %s7151_s23 = scalar_lea.vmem %s32_s27, 3584  ;;  %p7156_p10 = scmp.lt.s32.totalorder %s32_s27, %s32_s27 }
  0x73   :  { %p7152_p9 = scmp.ne.s32.totalorder %s32_s27, %s7151_s23  ;;  %p7157_p11 = scmp.lt.s32.totalorder %s7151_s23, %s7151_s23 }
  0x75   :  { %p7158_p12 = por %p7157_p11, %p7156_p10 }
  0x77   :  { %p7159_p13 = pnand %p7158_p12, %p7152_p9 }
  0x79   :  { %7162 = shalt.err (!%p7159_p13)
}
  0x7a   :  { %s7348_s11 = smov 896   ;;  %s7349_s16 = smov 56  }
  0x7b   :  { %37 = dma.hbm_to_vmem [thread:$0]  %s7732_s0, 3584, %s32_s27, [#allocation3], %s7348_s11, %s7348_s11, %s7349_s16  }
  0x7c   :  { %s7350_s30 = smov [#allocation7]   ;;  %s7351_s29 = smov [#allocation10]  }
  0x7d   :  { %s53_s7 = sshll.u32 %s7350_s30, 4  ;;  %s77_s14 = sshll.u32 %s7351_s29, 4  ;;  %s54_s7 = int_to_ptr.vmem [resolvable:$true] %s53_s7  ;;  %s78_s14 = int_to_ptr.vmem [resolvable:$true] %s77_s14 }
  0x7e   :  { %s7163_s20 = scalar_lea.hbm %s7734_s2, 25088 }
  0x7f   :  { %p7164_p0 = scmp.ne.s32.totalorder %s7734_s2, %s7163_s20  ;;  %p7167_p1 = scmp.lt.u32.totalorder %s7163_s20, %s7734_s2 }
  0x81   :  { %p7169_p2 = pnand %p7167_p1, %p7164_p0 }
  0x83   :  { %7172 = shalt.err (!%p7169_p2)
}
  0x84   :  { %s7173_s0 = scalar_lea.vmem %s54_s7, 25088  ;;  %p7178_p4 = scmp.lt.s32.totalorder %s54_s7, %s54_s7 }
  0x85   :  { %p7174_p3 = scmp.ne.s32.totalorder %s54_s7, %s7173_s0  ;;  %p7179_p5 = scmp.lt.s32.totalorder %s7173_s0, %s7173_s0 }
  0x87   :  { %p7180_p6 = por %p7179_p5, %p7178_p4 }
  0x89   :  { %p7181_p7 = pnand %p7180_p6, %p7174_p3 }
  0x8b   :  { %7184 = shalt.err (!%p7181_p7)
}
  0x8c   :  { %59 = dma.hbm_to_vmem [thread:$0]  %s7734_s2, 25088, %s54_s7, [#allocation6], %s7341_s5, %s7341_s5, %s7342_s18  }
  0x8d   :  { %s7185_s24 = scalar_lea.hbm %s7736_s4, 6144 }
  0x8e   :  { %p7186_p8 = scmp.ne.s32.totalorder %s7736_s4, %s7185_s24  ;;  %p7189_p9 = scmp.lt.u32.totalorder %s7185_s24, %s7736_s4 }
  0x90   :  { %p7191_p10 = pnand %p7189_p9, %p7186_p8 }
  0x92   :  { %7194 = shalt.err (!%p7191_p10)
}
  0x93   :  { %s7195_s19 = scalar_lea.vmem %s78_s14, 6144  ;;  %p7200_p12 = scmp.lt.s32.totalorder %s78_s14, %s78_s14 }
  0x94   :  { %p7196_p11 = scmp.ne.s32.totalorder %s78_s14, %s7195_s19  ;;  %p7201_p13 = scmp.lt.s32.totalorder %s7195_s19, %s7195_s19 }
  0x96   :  { %p7202_p0 = por %p7201_p13, %p7200_p12 }
  0x98   :  { %p7203_p1 = pnand %p7202_p0, %p7196_p11 }
  0x9a   :  { %7206 = shalt.err (!%p7203_p1)
}
  0x9b   :  { %83 = dma.hbm_to_vmem [thread:$0]  %s7736_s4, 6144, %s78_s14, [#allocation9], %s7345_s15, %s7345_s15, %s7346_s25  }
  0x9c   :  { %s7352_s18 = smov [#allocation13]   ;;  %s7353_s20 = smov [#allocation16]  }
  0x9d   :  { %s101_s7 = sshll.u32 %s7352_s18, 4  ;;  %s125_s21 = sshll.u32 %s7353_s20, 4  ;;  %s102_s7 = int_to_ptr.vmem [resolvable:$true] %s101_s7  ;;  %s126_s21 = int_to_ptr.vmem [resolvable:$true] %s125_s21 }
  0x9e   :  { %s7207_s0 = scalar_lea.hbm %s7738_s6, 2048 }
  0x9f   :  { %p7208_p2 = scmp.ne.s32.totalorder %s7738_s6, %s7207_s0  ;;  %p7211_p3 = scmp.lt.u32.totalorder %s7207_s0, %s7738_s6 }
  0xa1   :  { %p7213_p4 = pnand %p7211_p3, %p7208_p2 }
  0xa3   :  { %7216 = shalt.err (!%p7213_p4)
}
  0xa4   :  { %s7217_s4 = scalar_lea.vmem %s102_s7, 2048  ;;  %p7222_p6 = scmp.lt.s32.totalorder %s102_s7, %s102_s7 }
  0xa5   :  { %p7218_p5 = scmp.ne.s32.totalorder %s102_s7, %s7217_s4  ;;  %p7223_p7 = scmp.lt.s32.totalorder %s7217_s4, %s7217_s4 }
  0xa7   :  { %p7224_p8 = por %p7223_p7, %p7222_p6 }
  0xa9   :  { %p7225_p9 = pnand %p7224_p8, %p7218_p5 }
  0xab   :  { %7228 = shalt.err (!%p7225_p9)
}
  0xac   :  { %107 = dma.hbm_to_vmem [thread:$0]  %s7738_s6, 2048, %s102_s7, [#allocation12], %s7335_s1, %s7335_s1, %s7336_s26  }
  0xad   :  { %s7229_s9 = scalar_lea.hbm %s7740_s8, 4096 }
  0xae   :  { %p7230_p10 = scmp.ne.s32.totalorder %s7740_s8, %s7229_s9  ;;  %p7233_p11 = scmp.lt.u32.totalorder %s7229_s9, %s7740_s8 }
  0xb0   :  { %p7235_p12 = pnand %p7233_p11, %p7230_p10 }
  0xb2   :  { %7238 = shalt.err (!%p7235_p12)
}
  0xb3   :  { %s7239_s2 = scalar_lea.vmem %s126_s21, 4096  ;;  %p7244_p0 = scmp.lt.s32.totalorder %s126_s21, %s126_s21 }
  0xb4   :  { %p7240_p13 = scmp.ne.s32.totalorder %s126_s21, %s7239_s2  ;;  %p7245_p1 = scmp.lt.s32.totalorder %s7239_s2, %s7239_s2 }
  0xb6   :  { %p7246_p2 = por %p7245_p1, %p7244_p0 }
  0xb8   :  { %p7247_p3 = pnand %p7246_p2, %p7240_p13 }
  0xba   :  { %7250 = shalt.err (!%p7247_p3)
}
  0xbb   :  { %s7748_s6 = smov 64   ;;  %s7354_s7 = smov [#allocation19]  }
  0xbc   :  { %131 = dma.hbm_to_vmem [thread:$0]  %s7740_s8, 4096, %s126_s21, [#allocation15], %s7748_s6, %s7748_s6, %s7339_s28  }
  0xbd   :  { %s149_s20 = sshll.u32 %s7354_s7, 4  ;;  %s7355_s22 = smov [#allocation22]   ;;  %s150_s20 = int_to_ptr.vmem [resolvable:$true] %s149_s20 }
  0xbe   :  { %s173_s23 = sshll.u32 %s7355_s22, 4  ;;  %s7251_s11 = scalar_lea.hbm %s7742_s10, 6144  ;;  %s174_s23 = int_to_ptr.vmem [resolvable:$true] %s173_s23 }
  0xbf   :  { %p7252_p4 = scmp.ne.s32.totalorder %s7742_s10, %s7251_s11  ;;  %p7255_p5 = scmp.lt.u32.totalorder %s7251_s11, %s7742_s10 }
  0xc1   :  { %p7257_p6 = pnand %p7255_p5, %p7252_p4 }
  0xc3   :  { %7260 = shalt.err (!%p7257_p6)
}
  0xc4   :  { %s7261_s8 = scalar_lea.vmem %s150_s20, 6144  ;;  %p7266_p8 = scmp.lt.s32.totalorder %s150_s20, %s150_s20 }
  0xc5   :  { %p7262_p7 = scmp.ne.s32.totalorder %s150_s20, %s7261_s8  ;;  %p7267_p9 = scmp.lt.s32.totalorder %s7261_s8, %s7261_s8 }
  0xc7   :  { %p7268_p10 = por %p7267_p9, %p7266_p8 }
  0xc9   :  { %p7269_p11 = pnand %p7268_p10, %p7262_p7 }
  0xcb   :  { %7272 = shalt.err (!%p7269_p11)
}
  0xcc   :  { %155 = dma.hbm_to_vmem [thread:$0]  %s7742_s10, 6144, %s150_s20, [#allocation18], %s7335_s1, %s7335_s1, %s7336_s26  }
  0xcd   :  { %s7273_s9 = scalar_lea.hbm %s7744_s12, 1024 }
  0xce   :  { %p7274_p12 = scmp.ne.s32.totalorder %s7744_s12, %s7273_s9  ;;  %p7277_p13 = scmp.lt.u32.totalorder %s7273_s9, %s7744_s12 }
  0xd0   :  { %p7279_p0 = pnand %p7277_p13, %p7274_p12 }
  0xd2   :  { %7282 = shalt.err (!%p7279_p0)
}
  0xd3   :  { %s7283_s2 = scalar_lea.vmem %s174_s23, 1024  ;;  %p7288_p2 = scmp.lt.s32.totalorder %s174_s23, %s174_s23 }
  0xd4   :  { %p7284_p1 = scmp.ne.s32.totalorder %s174_s23, %s7283_s2  ;;  %p7289_p3 = scmp.lt.s32.totalorder %s7283_s2, %s7283_s2 }
  0xd6   :  { %p7290_p4 = por %p7289_p3, %p7288_p2 }
  0xd8   :  { %p7291_p5 = pnand %p7290_p4, %p7284_p1 }
  0xda   :  { %7294 = shalt.err (!%p7291_p5)
}
  0xdb   :  { %179 = dma.hbm_to_vmem [thread:$0]  %s7744_s12, 1024, %s174_s23, [#allocation21], %s7748_s6, %s7748_s6, %s7339_s28  }
  0xdc   :  { %7317 = dma.done.wait [#allocation3], 3584  }
  0xdd   :  { %7318 = vsyncadd [#allocation3], 4294963712 }
  0xde   :  { %7319 = dma.done.wait [#allocation6], 25472  }
  0xdf   :  { %7320 = vsyncadd [#allocation6], 4294941824 }
  0xe0   :  { %7321 = dma.done.wait [#allocation9], 14336  }
  0xe1   :  { %7322 = vsyncadd [#allocation9], 4294952960 }
  0xe2   :  { %7323 = dma.done.wait [#allocation12], 5120  }
  0xe3   :  { %7324 = vsyncadd [#allocation12], 4294962176 }
  0xe4   :  { %7325 = dma.done.wait [#allocation15], 12288  }
  0xe5   :  { %7326 = vsyncadd [#allocation15], 4294955008 }
  0xe6   :  { %7327 = dma.done.wait [#allocation18], 9216  }
  0xe7   :  { %7328 = vsyncadd [#allocation18], 4294958080 }
  0xe8   :  { %7329 = dma.done.wait [#allocation21], 3072  }
  0xe9   :  { %7330 = vsyncadd [#allocation21], 4294964224  ;;  %v7356_v0 = vmov 0   ;;  %v6251_v1 = vld [vmem:[#allocation7 + $0x4] ss:$16 sps:$4 sm:$0xff]   ;;  %v226_v9 = vld [vmem:[#allocation2 + $0x30] sm:$0xff] }
  0xea   :  { %1658 = vmatprep.mubr.bf16.mxu1 %v7356_v0  ;;  %v6253_v2 = vld [vmem:[#allocation7 + $0x604] ss:$16 sps:$4 sm:$0xff]   ;;  %1467 = vmatprep.subr.bf16.mxu0 %v6251_v1  ;;  %v6255_v3 = vld [vmem:[#allocation7] ss:$16 sps:$4 sm:$0xff]   ;;  %v6259_v6 = vld [vmem:[#allocation7 + $0x8] ss:$16 sps:$4 sm:$0xff]  }
  0xeb   :  { %v6256_v4 = vld [vmem:[#allocation7 + $0x600] ss:$16 sps:$4 sm:$0xff]   ;;  %1626 = vmatprep.subr.bf16.mxu1 %v6253_v2  ;;  %v6257_v5 = vld [vmem:[#allocation7 + $0x24] ss:$16 sps:$4 sm:$0xff]   ;;  %1468 = vmatpush1.bf16.msra.mxu0 %v6255_v3  ;;  %v6261_v7 = vld [vmem:[#allocation7 + $0xc] ss:$16 sps:$4 sm:$0xff]  }
  0xec   :  { %1627 = vmatpush1.bf16.msra.mxu1 %v6256_v4  ;;  %1469 = vmatprep.subr.bf16.mxu0 %v6257_v5  ;;  %v6262_v8 = vld [vmem:[#allocation7 + $0x20] ss:$16 sps:$4 sm:$0xff]   ;;  %vm1460_vm0 = vcmask 130048   ;;  %v6263_v12 = vld [vmem:[#allocation7 + $0x44] ss:$16 sps:$4 sm:$0xff]   ;;  %v240_v51 = vld [vmem:[#allocation2 + $0xa0] sm:$0xff] }
  0xed   :  { %v233_v10 = vld [vmem:[#allocation2 + $0x68] sm:$0xff]  ;;  %1679 = vmatprep.subr.bf16.mxu1 %v6261_v7  ;;  %v6265_v13 = vld [vmem:[#allocation7 + $0x28] ss:$16 sps:$4 sm:$0xff]   ;;  %v6267_v14 = vld [vmem:[#allocation7 + $0x2c] ss:$16 sps:$4 sm:$0xff]   ;;  %s7357_s12 = smov [#allocation23]  }
  0xee   :  { %v7632_v11 = vpack.c.bf16 %v233_v10, %v226_v9  ;;  %v6268_v15 = vld [vmem:[#allocation7 + $0x40] ss:$16 sps:$4 sm:$0xff]   ;;  %v6269_v16 = vld [vmem:[#allocation7 + $0x64] ss:$16 sps:$4 sm:$0xff]   ;;  %v6273_v17 = vld [vmem:[#allocation7 + $0x4c] ss:$16 sps:$4 sm:$0xff]  }
  0xef   :  { %1470 = vmatpush1.bf16.msra.mxu0 %v6262_v8  ;;  %v6274_v18 = vld [vmem:[#allocation7 + $0x60] ss:$16 sps:$4 sm:$0xff]   ;;  %v6271_v19 = vld [vmem:[#allocation7 + $0x48] ss:$16 sps:$4 sm:$0xff]   ;;  %v6275_v20 = vld [vmem:[#allocation7 + $0x84] ss:$16 sps:$4 sm:$0xff]  }
  0xf0   :  { %5529 = vmatmul.mubr.msk.bf16.vlgmr.msra.gmra.mrb[0].mxu1 %vm1460_vm0, %v7632_v11  ;;  %1471 = vmatprep.subr.bf16.mxu0 %v6263_v12  ;;  %v6279_v21 = vld [vmem:[#allocation7 + $0x6c] ss:$16 sps:$4 sm:$0xff]   ;;  %v6277_v22 = vld [vmem:[#allocation7 + $0x68] ss:$16 sps:$4 sm:$0xff]   ;;  %v6280_v23 = vld [vmem:[#allocation7 + $0x80] ss:$16 sps:$4 sm:$0xff]  }
  0xf1   :  { %1680 = vmatpush1.bf16.msra.mxu1 %v6259_v6  ;;  %1668 = vmatprep.mubr.bf16.mxu1 %v7356_v0  ;;  %v6281_v24 = vld [vmem:[#allocation7 + $0xa4] ss:$16 sps:$4 sm:$0xff]   ;;  %v6285_v25 = vld [vmem:[#allocation7 + $0x8c] ss:$16 sps:$4 sm:$0xff]   ;;  %v6286_v26 = vld [vmem:[#allocation7 + $0xa0] ss:$16 sps:$4 sm:$0xff]  }
  0xf2   :  { %1681 = vmatprep.subr.bf16.mxu1 %v6267_v14  ;;  %v6283_v27 = vld [vmem:[#allocation7 + $0x88] ss:$16 sps:$4 sm:$0xff]   ;;  %v6287_v28 = vld [vmem:[#allocation7 + $0xc4] ss:$16 sps:$4 sm:$0xff]   ;;  %v6291_v29 = vld [vmem:[#allocation7 + $0xac] ss:$16 sps:$4 sm:$0xff]  }
  0xf3   :  { %1472 = vmatpush1.bf16.msra.mxu0 %v6268_v15  ;;  %v6289_v30 = vld [vmem:[#allocation7 + $0xa8] ss:$16 sps:$4 sm:$0xff]   ;;  %v6292_v31 = vld [vmem:[#allocation7 + $0xc0] ss:$16 sps:$4 sm:$0xff]   ;;  %v6293_v32 = vld [vmem:[#allocation7 + $0xe4] ss:$16 sps:$4 sm:$0xff]  }
  0xf4   :  { %1473 = vmatprep.subr.bf16.mxu0 %v6269_v16  ;;  %v6297_v33 = vld [vmem:[#allocation7 + $0xcc] ss:$16 sps:$4 sm:$0xff]   ;;  %v6298_v34 = vld [vmem:[#allocation7 + $0xe0] ss:$16 sps:$4 sm:$0xff]   ;;  %v6295_v35 = vld [vmem:[#allocation7 + $0xc8] ss:$16 sps:$4 sm:$0xff]  }
  0xf5   :  { %1682 = vmatpush1.bf16.msra.mxu1 %v6265_v13  ;;  %v6299_v36 = vld [vmem:[#allocation7 + $0x104] ss:$16 sps:$4 sm:$0xff]   ;;  %v6303_v37 = vld [vmem:[#allocation7 + $0xec] ss:$16 sps:$4 sm:$0xff]   ;;  %v6301_v38 = vld [vmem:[#allocation7 + $0xe8] ss:$16 sps:$4 sm:$0xff]  }
  0xf6   :  { %1683 = vmatprep.subr.bf16.mxu1 %v6273_v17  ;;  %v6304_v39 = vld [vmem:[#allocation7 + $0x100] ss:$16 sps:$4 sm:$0xff]   ;;  %v6305_v40 = vld [vmem:[#allocation7 + $0x124] ss:$16 sps:$4 sm:$0xff]   ;;  %v6309_v41 = vld [vmem:[#allocation7 + $0x10c] ss:$16 sps:$4 sm:$0xff]  }
  0xf7   :  { %1474 = vmatpush1.bf16.msra.mxu0 %v6274_v18  ;;  %v6310_v42 = vld [vmem:[#allocation7 + $0x120] ss:$16 sps:$4 sm:$0xff]   ;;  %v6307_v43 = vld [vmem:[#allocation7 + $0x108] ss:$16 sps:$4 sm:$0xff]   ;;  %v6311_v44 = vld [vmem:[#allocation7 + $0x144] ss:$16 sps:$4 sm:$0xff]  }
  0xf8   :  { %1475 = vmatprep.subr.bf16.mxu0 %v6275_v20  ;;  %v6315_v45 = vld [vmem:[#allocation7 + $0x12c] ss:$16 sps:$4 sm:$0xff]   ;;  %v6313_v46 = vld [vmem:[#allocation7 + $0x128] ss:$16 sps:$4 sm:$0xff]   ;;  %v6316_v47 = vld [vmem:[#allocation7 + $0x140] ss:$16 sps:$4 sm:$0xff]  }
  0xf9   :  { %1684 = vmatpush1.bf16.msra.mxu1 %v6271_v19  ;;  %v6317_v48 = vld [vmem:[#allocation7 + $0x164] ss:$16 sps:$4 sm:$0xff]   ;;  %v6321_v49 = vld [vmem:[#allocation7 + $0x14c] ss:$16 sps:$4 sm:$0xff]   ;;  %v6322_v50 = vld [vmem:[#allocation7 + $0x160] ss:$16 sps:$4 sm:$0xff]  }
  0xfa   :  { %1685 = vmatprep.subr.bf16.mxu1 %v6279_v21  ;;  %v247_v52 = vld [vmem:[#allocation2 + $0xd8] sm:$0xff]  ;;  %v221_v54 = vld [vmem:[#allocation2 + $0x8] sm:$0xff]  ;;  %v228_v55 = vld [vmem:[#allocation2 + $0x40] sm:$0xff]  ;;  %s5315_s26 = sshll.u32 %s7357_s12, 4  ;;  %s5316_s26 = int_to_ptr.vmem [resolvable:$true] %s5315_s26 }
  0xfb   :  { %1476 = vmatpush1.bf16.msra.mxu0 %v6280_v23  ;;  %v7637_v53 = vpack.c.bf16 %v247_v52, %v240_v51  ;;  %v6319_v56 = vld [vmem:[#allocation7 + $0x148] ss:$16 sps:$4 sm:$0xff]   ;;  %v6323_v57 = vld [vmem:[#allocation7 + $0x184] ss:$16 sps:$4 sm:$0xff]   ;;  %v249_v58 = vpack.c.bf16 %v228_v55, %v221_v54  ;;  %v6327_v59 = vld [vmem:[#allocation7 + $0x16c] ss:$16 sps:$4 sm:$0xff]   ;;  %p7300_p7 = scmp.lt.s32.totalorder %s5316_s26, %s5316_s26 }
  0xfc   :  { %1477 = vmatprep.subr.bf16.mxu0 %v6281_v24  ;;  %v6325_v60 = vld [vmem:[#allocation7 + $0x168] ss:$16 sps:$4 sm:$0xff]   ;;  %v6328_v61 = vld [vmem:[#allocation7 + $0x180] ss:$16 sps:$4 sm:$0xff]   ;;  %v6329_v62 = vld [vmem:[#allocation7 + $0x1a4] ss:$16 sps:$4 sm:$0xff]  }
  0xfd   :  { %1686 = vmatpush1.bf16.msra.mxu1 %v6277_v22  ;;  %1499 = vmatprep.mubr.bf16.mxu0 %v249_v58  ;;  %v6333_v63 = vld [vmem:[#allocation7 + $0x18c] ss:$16 sps:$4 sm:$0xff]   ;;  %v6331_v1 = vld [vmem:[#allocation7 + $0x188] ss:$16 sps:$4 sm:$0xff]   ;;  %v6334_v2 = vld [vmem:[#allocation7 + $0x1a0] ss:$16 sps:$4 sm:$0xff]  }
  0xfe   :  { %1687 = vmatprep.subr.bf16.mxu1 %v6285_v25  ;;  %5530 = vmatmul.mubr.msk.bf16.gmra.mrb[4].mxu1 %vm1460_vm0, %v7637_v53  ;;  %v6335_v3 = vld [vmem:[#allocation7 + $0x1c4] ss:$16 sps:$4 sm:$0xff]   ;;  %v6339_v4 = vld [vmem:[#allocation7 + $0x1ac] ss:$16 sps:$4 sm:$0xff]   ;;  %v6337_v5 = vld [vmem:[#allocation7 + $0x1a8] ss:$16 sps:$4 sm:$0xff]  }
  0xff   :  { %1478 = vmatpush1.bf16.msra.mxu0 %v6286_v26  ;;  %1711 = vmatprep.mubr.bf16.mxu1 %v249_v58  ;;  %v6340_v6 = vld [vmem:[#allocation7 + $0x1c0] ss:$16 sps:$4 sm:$0xff]   ;;  %v6341_v7 = vld [vmem:[#allocation7 + $0x1e4] ss:$16 sps:$4 sm:$0xff]   ;;  %v6345_v8 = vld [vmem:[#allocation7 + $0x1cc] ss:$16 sps:$4 sm:$0xff]  }
 0x100   :  { %1479 = vmatprep.subr.bf16.mxu0 %v6287_v28  ;;  %v6343_v9 = vld [vmem:[#allocation7 + $0x1c8] ss:$16 sps:$4 sm:$0xff]   ;;  %v6346_v10 = vld [vmem:[#allocation7 + $0x1e0] ss:$16 sps:$4 sm:$0xff]   ;;  %v6349_v14 = vld [vmem:[#allocation7 + $0x204] ss:$16 sps:$4 sm:$0xff]  }
 0x101   :  { %1688 = vmatpush1.bf16.msra.mxu1 %v6283_v27  ;;  %v220_v12 = vld [vmem:[#allocation2] sm:$0xff]  ;;  %v227_v13 = vld [vmem:[#allocation2 + $0x38] sm:$0xff]  ;;  %v230_v51 = vld [vmem:[#allocation2 + $0x50] sm:$0xff]  ;;  %s7295_s5 = scalar_lea.vmem %s5316_s26, 256 }
 0x102   :  { %1689 = vmatprep.subr.bf16.mxu1 %v6291_v29  ;;  %v6352_v15 = vld [vmem:[#allocation7 + $0x1ec] ss:$16 sps:$4 sm:$0xff]   ;;  %v6347_v16 = vld [vmem:[#allocation7 + $0x200] ss:$16 sps:$4 sm:$0xff]   ;;  %v248_v17 = vpack.c.bf16 %v227_v13, %v220_v12  ;;  %v6350_v18 = vld [vmem:[#allocation7 + $0x1e8] ss:$16 sps:$4 sm:$0xff]   ;;  %p7296_p6 = scmp.ne.s32.totalorder %s5316_s26, %s7295_s5  ;;  %p7301_p8 = scmp.lt.s32.totalorder %s7295_s5, %s7295_s5 }
 0x103   :  { %1480 = vmatpush1.bf16.msra.mxu0 %v6292_v31  ;;  %v6355_v19 = vld [vmem:[#allocation7 + $0x224] ss:$16 sps:$4 sm:$0xff]   ;;  %v6358_v20 = vld [vmem:[#allocation7 + $0x20c] ss:$16 sps:$4 sm:$0xff]   ;;  %v6353_v21 = vld [vmem:[#allocation7 + $0x220] ss:$16 sps:$4 sm:$0xff]  }
 0x104   :  { %1481 = vmatprep.subr.bf16.mxu0 %v6293_v32  ;;  %v6356_v22 = vld [vmem:[#allocation7 + $0x208] ss:$16 sps:$4 sm:$0xff]   ;;  %v6361_v23 = vld [vmem:[#allocation7 + $0x244] ss:$16 sps:$4 sm:$0xff]   ;;  %v6364_v24 = vld [vmem:[#allocation7 + $0x22c] ss:$16 sps:$4 sm:$0xff]   ;;  %p7302_p9 = por %p7301_p8, %p7300_p7 }
 0x105   :  { %1690 = vmatpush1.bf16.msra.mxu1 %v6289_v30  ;;  %v6359_v25 = vld [vmem:[#allocation7 + $0x240] ss:$16 sps:$4 sm:$0xff]   ;;  %v6362_v26 = vld [vmem:[#allocation7 + $0x228] ss:$16 sps:$4 sm:$0xff]   ;;  %v6367_v27 = vld [vmem:[#allocation7 + $0x264] ss:$16 sps:$4 sm:$0xff]  }
 0x106   :  { %1691 = vmatprep.subr.bf16.mxu1 %v6297_v33  ;;  %v6370_v28 = vld [vmem:[#allocation7 + $0x24c] ss:$16 sps:$4 sm:$0xff]   ;;  %v6365_v29 = vld [vmem:[#allocation7 + $0x260] ss:$16 sps:$4 sm:$0xff]   ;;  %v6368_v30 = vld [vmem:[#allocation7 + $0x248] ss:$16 sps:$4 sm:$0xff]   ;;  %p7303_p10 = pnand %p7302_p9, %p7296_p6 }
 0x107   :  { %1482 = vmatpush1.bf16.msra.mxu0 %v6298_v34  ;;  %v6373_v31 = vld [vmem:[#allocation7 + $0x284] ss:$16 sps:$4 sm:$0xff]   ;;  %v6376_v32 = vld [vmem:[#allocation7 + $0x26c] ss:$16 sps:$4 sm:$0xff]   ;;  %v6371_v33 = vld [vmem:[#allocation7 + $0x280] ss:$16 sps:$4 sm:$0xff]  }
 0x108   :  { %1483 = vmatprep.subr.bf16.mxu0 %v6299_v36  ;;  %v6374_v34 = vld [vmem:[#allocation7 + $0x268] ss:$16 sps:$4 sm:$0xff]   ;;  %v6382_v36 = vld [vmem:[#allocation7 + $0x28c] ss:$16 sps:$4 sm:$0xff]   ;;  %v6389_v55 = vld [vmem:[#allocation7 + $0x2e0] ss:$16 sps:$4 sm:$0xff]  }
 0x109   :  { %1692 = vmatpush1.bf16.msra.mxu1 %v6295_v35  ;;  %v6379_v35 = vld [vmem:[#allocation7 + $0x2a4] ss:$16 sps:$4 sm:$0xff]   ;;  %v6394_v52 = vld [vmem:[#allocation7 + $0x2cc] ss:$16 sps:$4 sm:$0xff]   ;;  %v6419_v13 = vld [vmem:[#allocation7 + $0x380] ss:$16 sps:$4 sm:$0xff]  }
 0x10a   :  { %1693 = vmatprep.subr.bf16.mxu1 %v6303_v37  ;;  %v235_v37 = vld [vmem:[#allocation2 + $0x78] sm:$0xff]  ;;  %v6400_v58 = vld [vmem:[#allocation7 + $0x2ec] ss:$16 sps:$4 sm:$0xff]  }
 0x10b   :  { %1484 = vmatpush1.bf16.msra.mxu0 %v6304_v39  ;;  %v6377_v39 = vld [vmem:[#allocation7 + $0x2a0] ss:$16 sps:$4 sm:$0xff]   ;;  %v6424_v12 = vld [vmem:[#allocation7 + $0x36c] ss:$16 sps:$4 sm:$0xff]  }
 0x10c   :  { %1485 = vmatprep.subr.bf16.mxu0 %v6305_v40  ;;  %v6380_v40 = vld [vmem:[#allocation7 + $0x288] ss:$16 sps:$4 sm:$0xff]  }
 0x10d   :  { %1694 = vmatpush1.bf16.msra.mxu1 %v6301_v38  ;;  %v242_v38 = vld [vmem:[#allocation2 + $0xb0] sm:$0xff] }
 0x10e   :  { %1695 = vmatprep.subr.bf16.mxu1 %v6309_v41  ;;  %v256_v41 = vpack.c.bf16 %v242_v38, %v235_v37  ;;  %v6449_v38 = vld [vmem:[#allocation7 + $0x420] ss:$16 sps:$4 sm:$0xff]  }
 0x10f   :  { %1486 = vmatpush1.bf16.msra.mxu0 %v6310_v42  ;;  %v6385_v42 = vld [vmem:[#allocation7 + $0x2c4] ss:$16 sps:$4 sm:$0xff]  }
 0x110   :  { %1487 = vmatprep.subr.bf16.mxu0 %v6311_v44  ;;  %v234_v44 = vld [vmem:[#allocation2 + $0x70] sm:$0xff] }
 0x111   :  { %1696 = vmatpush1.bf16.msra.mxu1 %v6307_v43  ;;  %v6388_v43 = vld [vmem:[#allocation7 + $0x2ac] ss:$16 sps:$4 sm:$0xff]  }
 0x112   :  { %1697 = vmatprep.subr.bf16.mxu1 %v6315_v45  ;;  %v241_v45 = vld [vmem:[#allocation2 + $0xa8] sm:$0xff] }
 0x113   :  { %1488 = vmatpush1.bf16.msra.mxu0 %v6316_v47  ;;  %v255_v47 = vpack.c.bf16 %v241_v45, %v234_v44  ;;  %v6460_v44 = vld [vmem:[#allocation7 + $0x42c] ss:$16 sps:$4 sm:$0xff]   ;;  %v225_v45 = vld [vmem:[#allocation2 + $0x28] sm:$0xff] }
 0x114   :  { %1489 = vmatprep.subr.bf16.mxu0 %v6317_v48  ;;  %v6386_v48 = vld [vmem:[#allocation7 + $0x2a8] ss:$16 sps:$4 sm:$0xff]  }
 0x115   :  { %1698 = vmatpush1.bf16.msra.mxu1 %v6313_v46  ;;  %v6383_v46 = vld [vmem:[#allocation7 + $0x2c0] ss:$16 sps:$4 sm:$0xff]  }
 0x116   :  { %1699 = vmatprep.subr.bf16.mxu1 %v6321_v49  ;;  %v6391_v49 = vld [vmem:[#allocation7 + $0x2e4] ss:$16 sps:$4 sm:$0xff]  }
 0x117   :  { %1490 = vmatpush1.bf16.msra.mxu0 %v6322_v50  ;;  %v223_v50 = vld [vmem:[#allocation2 + $0x18] sm:$0xff] }
 0x118   :  { %1491 = vmatprep.subr.bf16.mxu0 %v6323_v57  ;;  %v251_v54 = vpack.c.bf16 %v230_v51, %v223_v50  ;;  %v6397_v57 = vld [vmem:[#allocation7 + $0x304] ss:$16 sps:$4 sm:$0xff]   ;;  %v6458_v50 = vld [vmem:[#allocation7 + $0x428] ss:$16 sps:$4 sm:$0xff]  }
 0x119   :  { %1700 = vmatpush1.bf16.msra.mxu1 %v6319_v56  ;;  %v6392_v56 = vld [vmem:[#allocation7 + $0x2c8] ss:$16 sps:$4 sm:$0xff]   ;;  %v6463_v51 = vld [vmem:[#allocation7 + $0x464] ss:$16 sps:$4 sm:$0xff]  }
 0x11a   :  { %1701 = vmatprep.subr.bf16.mxu1 %v6327_v59  ;;  %v6395_v59 = vld [vmem:[#allocation7 + $0x300] ss:$16 sps:$4 sm:$0xff]  }
 0x11b   :  { %1492 = vmatpush1.bf16.msra.mxu0 %v6328_v61  ;;  %v6403_v61 = vld [vmem:[#allocation7 + $0x324] ss:$16 sps:$4 sm:$0xff]  }
 0x11c   :  { %1493 = vmatprep.subr.bf16.mxu0 %v6329_v62  ;;  %v6406_v62 = vld [vmem:[#allocation7 + $0x30c] ss:$16 sps:$4 sm:$0xff]  }
 0x11d   :  { %1702 = vmatpush1.bf16.msra.mxu1 %v6325_v60  ;;  %v6398_v60 = vld [vmem:[#allocation7 + $0x2e8] ss:$16 sps:$4 sm:$0xff]  }
 0x11e   :  { %1703 = vmatprep.subr.bf16.mxu1 %v6333_v63  ;;  %v6401_v63 = vld [vmem:[#allocation7 + $0x320] ss:$16 sps:$4 sm:$0xff]  }
 0x11f   :  { %1494 = vmatpush1.bf16.msra.mxu0 %v6334_v2  ;;  %v6409_v2 = vld [vmem:[#allocation7 + $0x344] ss:$16 sps:$4 sm:$0xff]  }
 0x120   :  { %1495 = vmatprep.subr.bf16.mxu0 %v6335_v3  ;;  %v6412_v3 = vld [vmem:[#allocation7 + $0x32c] ss:$16 sps:$4 sm:$0xff]  }
 0x121   :  { %1704 = vmatpush1.bf16.msra.mxu1 %v6331_v1  ;;  %v6404_v1 = vld [vmem:[#allocation7 + $0x308] ss:$16 sps:$4 sm:$0xff]  }
 0x122   :  { %1705 = vmatprep.subr.bf16.mxu1 %v6339_v4  ;;  %v6407_v4 = vld [vmem:[#allocation7 + $0x340] ss:$16 sps:$4 sm:$0xff]  }
 0x123   :  { %1496 = vmatpush1.bf16.msra.mxu0 %v6340_v6  ;;  %v6415_v6 = vld [vmem:[#allocation7 + $0x364] ss:$16 sps:$4 sm:$0xff]  }
 0x124   :  { %1497 = vmatprep.subr.bf16.mxu0 %v6341_v7  ;;  %v6418_v7 = vld [vmem:[#allocation7 + $0x34c] ss:$16 sps:$4 sm:$0xff]  }
 0x125   :  { %1706 = vmatpush1.bf16.msra.mxu1 %v6337_v5  ;;  %v6410_v5 = vld [vmem:[#allocation7 + $0x328] ss:$16 sps:$4 sm:$0xff]  }
 0x126   :  { %1707 = vmatprep.subr.bf16.mxu1 %v6345_v8  ;;  %v6413_v8 = vld [vmem:[#allocation7 + $0x360] ss:$16 sps:$4 sm:$0xff]  }
 0x127   :  { %1498 = vmatpush1.bf16.msra.mxu0 %v6346_v10  ;;  %v6421_v10 = vld [vmem:[#allocation7 + $0x384] ss:$16 sps:$4 sm:$0xff]  }
 0x128   :  { %1520 = vmatprep.subr.bf16.mxu0 %v6349_v14  ;;  %v6422_v14 = vld [vmem:[#allocation7 + $0x368] ss:$16 sps:$4 sm:$0xff]  }
 0x129   :  { %1708 = vmatpush1.bf16.msra.mxu1 %v6343_v9  ;;  %v6416_v9 = vld [vmem:[#allocation7 + $0x348] ss:$16 sps:$4 sm:$0xff]  }
 0x12a   :  { %1709 = vmatprep.subr.bf16.mxu1 %v6352_v15  ;;  %1500 = vmatmul.mubr.bf16.vlgmr.msra.gmra.mrb[0].mxu0 %v248_v17  ;;  %v6427_v15 = vld [vmem:[#allocation7 + $0x3a4] ss:$16 sps:$4 sm:$0xff]  }
 0x12b   :  { %1521 = vmatpush1.bf16.msra.mxu0 %v6347_v16  ;;  %1509 = vmatprep.mubr.bf16.mxu0 %v256_v41  ;;  %v6430_v16 = vld [vmem:[#allocation7 + $0x38c] ss:$16 sps:$4 sm:$0xff]  }
 0x12c   :  { %1522 = vmatprep.subr.bf16.mxu0 %v6355_v19  ;;  %v6433_v19 = vld [vmem:[#allocation7 + $0x3c4] ss:$16 sps:$4 sm:$0xff]  }
 0x12d   :  { %1710 = vmatpush1.bf16.msra.mxu1 %v6350_v18  ;;  %v6428_v18 = vld [vmem:[#allocation7 + $0x388] ss:$16 sps:$4 sm:$0xff]  }
 0x12e   :  { %1732 = vmatprep.subr.bf16.mxu1 %v6358_v20  ;;  %v6436_v20 = vld [vmem:[#allocation7 + $0x3ac] ss:$16 sps:$4 sm:$0xff]  }
 0x12f   :  { %1523 = vmatpush1.bf16.msra.mxu0 %v6353_v21  ;;  %v6431_v21 = vld [vmem:[#allocation7 + $0x3c0] ss:$16 sps:$4 sm:$0xff]  }
 0x130   :  { %1712 = vmatmul.mubr.bf16.vlgmr.msra.gmra.mrb[8].mxu1 %v248_v17  ;;  %1524 = vmatprep.subr.bf16.mxu0 %v6361_v23  ;;  %v6425_v17 = vld [vmem:[#allocation7 + $0x3a0] ss:$16 sps:$4 sm:$0xff]   ;;  %v6439_v23 = vld [vmem:[#allocation7 + $0x3e4] ss:$16 sps:$4 sm:$0xff]  }
 0x131   :  { %1733 = vmatpush1.bf16.msra.mxu1 %v6356_v22  ;;  %1721 = vmatprep.mubr.bf16.mxu1 %v256_v41  ;;  %v6434_v22 = vld [vmem:[#allocation7 + $0x3a8] ss:$16 sps:$4 sm:$0xff]  }
 0x132   :  { %1734 = vmatprep.subr.bf16.mxu1 %v6364_v24  ;;  %1510 = vmatmul.mubr.bf16.gmra.mrb[4].mxu0 %v255_v47  ;;  %v6437_v24 = vld [vmem:[#allocation7 + $0x3e0] ss:$16 sps:$4 sm:$0xff]   ;;  %v236_v41 = vld [vmem:[#allocation2 + $0x80] sm:$0xff] }
 0x133   :  { %1525 = vmatpush1.bf16.msra.mxu0 %v6359_v25  ;;  %1552 = vmatprep.mubr.bf16.mxu0 %v251_v54  ;;  %v6442_v25 = vld [vmem:[#allocation7 + $0x3cc] ss:$16 sps:$4 sm:$0xff]  }
 0x134   :  { %1526 = vmatprep.subr.bf16.mxu0 %v6367_v27  ;;  %v222_v27 = vld [vmem:[#allocation2 + $0x10] sm:$0xff] }
 0x135   :  { %1735 = vmatpush1.bf16.msra.mxu1 %v6362_v26  ;;  %v6440_v26 = vld [vmem:[#allocation7 + $0x3c8] ss:$16 sps:$4 sm:$0xff]  }
 0x136   :  { %1736 = vmatprep.subr.bf16.mxu1 %v6370_v28  ;;  %v229_v28 = vld [vmem:[#allocation2 + $0x48] sm:$0xff] }
 0x137   :  { %1527 = vmatpush1.bf16.msra.mxu0 %v6365_v29  ;;  %v6445_v29 = vld [vmem:[#allocation7 + $0x404] ss:$16 sps:$4 sm:$0xff]  }
 0x138   :  { %1528 = vmatprep.subr.bf16.mxu0 %v6373_v31  ;;  %1722 = vmatmul.mubr.bf16.gmra.mrb[12].mxu1 %v255_v47  ;;  %v6443_v31 = vld [vmem:[#allocation7 + $0x400] ss:$16 sps:$4 sm:$0xff]   ;;  %v232_v47 = vld [vmem:[#allocation2 + $0x60] sm:$0xff] }
 0x139   :  { %1737 = vmatpush1.bf16.msra.mxu1 %v6368_v30  ;;  %1764 = vmatprep.mubr.bf16.mxu1 %v251_v54  ;;  %v6448_v30 = vld [vmem:[#allocation7 + $0x3ec] ss:$16 sps:$4 sm:$0xff]   ;;  %v6461_v54 = vld [vmem:[#allocation7 + $0x460] ss:$16 sps:$4 sm:$0xff]  }
 0x13a   :  { %1738 = vmatprep.subr.bf16.mxu1 %v6376_v32  ;;  %v250_v32 = vpack.c.bf16 %v229_v28, %v222_v27  ;;  %v6520_v27 = vld [vmem:[#allocation7 + $0x56c] ss:$16 sps:$4 sm:$0xff]   ;;  %v6515_v28 = vld [vmem:[#allocation7 + $0x580] ss:$16 sps:$4 sm:$0xff]  }
 0x13b   :  { %1529 = vmatpush1.bf16.msra.mxu0 %v6371_v33  ;;  %v6446_v33 = vld [vmem:[#allocation7 + $0x3e8] ss:$16 sps:$4 sm:$0xff]  }
 0x13c   :  { %1530 = vmatprep.subr.bf16.mxu0 %v6379_v35  ;;  %v244_v35 = vld [vmem:[#allocation2 + $0xc0] sm:$0xff] }
 0x13d   :  { %1739 = vmatpush1.bf16.msra.mxu1 %v6374_v34  ;;  %v237_v34 = vld [vmem:[#allocation2 + $0x88] sm:$0xff] }
 0x13e   :  { %1740 = vmatprep.subr.bf16.mxu1 %v6382_v36  ;;  %v6451_v36 = vld [vmem:[#allocation7 + $0x424] ss:$16 sps:$4 sm:$0xff]   ;;  %v258_v37 = vpack.c.bf16 %v244_v35, %v237_v34  ;;  %v6532_v35 = vld [vmem:[#allocation7 + $0x5ac] ss:$16 sps:$4 sm:$0xff]  }
 0x13f   :  { %1531 = vmatpush1.bf16.msra.mxu0 %v6377_v39  ;;  %v6454_v39 = vld [vmem:[#allocation7 + $0x40c] ss:$16 sps:$4 sm:$0xff]   ;;  %v6529_v34 = vld [vmem:[#allocation7 + $0x5c4] ss:$16 sps:$4 sm:$0xff]  }
 0x140   :  { %1532 = vmatprep.subr.bf16.mxu0 %v6385_v42  ;;  %v243_v42 = vld [vmem:[#allocation2 + $0xb8] sm:$0xff] }
 0x141   :  { %1741 = vmatpush1.bf16.msra.mxu1 %v6380_v40  ;;  %v6452_v40 = vld [vmem:[#allocation7 + $0x408] ss:$16 sps:$4 sm:$0xff]  }
 0x142   :  { %1742 = vmatprep.subr.bf16.mxu1 %v6388_v43  ;;  %v6457_v43 = vld [vmem:[#allocation7 + $0x444] ss:$16 sps:$4 sm:$0xff]  }
 0x143   :  { %1533 = vmatpush1.bf16.msra.mxu0 %v6383_v46  ;;  %v257_v46 = vpack.c.bf16 %v243_v42, %v236_v41  ;;  %v224_v41 = vld [vmem:[#allocation2 + $0x20] sm:$0xff]  ;;  %v231_v42 = vld [vmem:[#allocation2 + $0x58] sm:$0xff] }
 0x144   :  { %1534 = vmatprep.subr.bf16.mxu0 %v6391_v49  ;;  %v253_v49 = vpack.c.bf16 %v232_v47, %v225_v45  ;;  %v246_v45 = vld [vmem:[#allocation2 + $0xd0] sm:$0xff] }
 0x145   :  { %1743 = vmatpush1.bf16.msra.mxu1 %v6386_v48  ;;  %v6455_v48 = vld [vmem:[#allocation7 + $0x440] ss:$16 sps:$4 sm:$0xff]   ;;  %v6541_v47 = vld [vmem:[#allocation7 + $0x5ec] ss:$16 sps:$4 sm:$0xff]  }
 0x146   :  { %1744 = vmatprep.subr.bf16.mxu1 %v6394_v52  ;;  %v6466_v52 = vld [vmem:[#allocation7 + $0x44c] ss:$16 sps:$4 sm:$0xff]  }
 0x147   :  { %1535 = vmatpush1.bf16.msra.mxu0 %v6389_v55  ;;  %v6464_v55 = vld [vmem:[#allocation7 + $0x448] ss:$16 sps:$4 sm:$0xff]  }
 0x148   :  { %1536 = vmatprep.subr.bf16.mxu0 %v6397_v57  ;;  %v6472_v57 = vld [vmem:[#allocation7 + $0x46c] ss:$16 sps:$4 sm:$0xff]  }
 0x149   :  { %1745 = vmatpush1.bf16.msra.mxu1 %v6392_v56  ;;  %v6469_v56 = vld [vmem:[#allocation7 + $0x484] ss:$16 sps:$4 sm:$0xff]  }
 0x14a   :  { %1746 = vmatprep.subr.bf16.mxu1 %v6400_v58  ;;  %v6467_v58 = vld [vmem:[#allocation7 + $0x480] ss:$16 sps:$4 sm:$0xff]  }
 0x14b   :  { %1537 = vmatpush1.bf16.msra.mxu0 %v6395_v59  ;;  %v6470_v59 = vld [vmem:[#allocation7 + $0x468] ss:$16 sps:$4 sm:$0xff]  }
 0x14c   :  { %1538 = vmatprep.subr.bf16.mxu0 %v6403_v61  ;;  %v6478_v61 = vld [vmem:[#allocation7 + $0x48c] ss:$16 sps:$4 sm:$0xff]  }
 0x14d   :  { %1747 = vmatpush1.bf16.msra.mxu1 %v6398_v60  ;;  %v6475_v60 = vld [vmem:[#allocation7 + $0x4a4] ss:$16 sps:$4 sm:$0xff]  }
 0x14e   :  { %1748 = vmatprep.subr.bf16.mxu1 %v6406_v62  ;;  %v6473_v62 = vld [vmem:[#allocation7 + $0x4a0] ss:$16 sps:$4 sm:$0xff]  }
 0x14f   :  { %1539 = vmatpush1.bf16.msra.mxu0 %v6401_v63  ;;  %v6476_v63 = vld [vmem:[#allocation7 + $0x488] ss:$16 sps:$4 sm:$0xff]  }
 0x150   :  { %1540 = vmatprep.subr.bf16.mxu0 %v6409_v2  ;;  %v6484_v2 = vld [vmem:[#allocation7 + $0x4ac] ss:$16 sps:$4 sm:$0xff]  }
 0x151   :  { %1749 = vmatpush1.bf16.msra.mxu1 %v6404_v1  ;;  %v6481_v1 = vld [vmem:[#allocation7 + $0x4c4] ss:$16 sps:$4 sm:$0xff]  }
 0x152   :  { %1750 = vmatprep.subr.bf16.mxu1 %v6412_v3  ;;  %v6479_v3 = vld [vmem:[#allocation7 + $0x4c0] ss:$16 sps:$4 sm:$0xff]  }
 0x153   :  { %1541 = vmatpush1.bf16.msra.mxu0 %v6407_v4  ;;  %v6482_v4 = vld [vmem:[#allocation7 + $0x4a8] ss:$16 sps:$4 sm:$0xff]  }
 0x154   :  { %1542 = vmatprep.subr.bf16.mxu0 %v6415_v6  ;;  %v6490_v6 = vld [vmem:[#allocation7 + $0x4cc] ss:$16 sps:$4 sm:$0xff]  }
 0x155   :  { %1751 = vmatpush1.bf16.msra.mxu1 %v6410_v5  ;;  %v6487_v5 = vld [vmem:[#allocation7 + $0x4e4] ss:$16 sps:$4 sm:$0xff]  }
 0x156   :  { %1752 = vmatprep.subr.bf16.mxu1 %v6418_v7  ;;  %v6485_v7 = vld [vmem:[#allocation7 + $0x4e0] ss:$16 sps:$4 sm:$0xff]  }
 0x157   :  { %1543 = vmatpush1.bf16.msra.mxu0 %v6413_v8  ;;  %v6488_v8 = vld [vmem:[#allocation7 + $0x4c8] ss:$16 sps:$4 sm:$0xff]  }
 0x158   :  { %1544 = vmatprep.subr.bf16.mxu0 %v6421_v10  ;;  %v6496_v10 = vld [vmem:[#allocation7 + $0x4ec] ss:$16 sps:$4 sm:$0xff]  }
 0x159   :  { %1753 = vmatpush1.bf16.msra.mxu1 %v6416_v9  ;;  %v6493_v9 = vld [vmem:[#allocation7 + $0x504] ss:$16 sps:$4 sm:$0xff]  }
 0x15a   :  { %1754 = vmatprep.subr.bf16.mxu1 %v6424_v12  ;;  %v6491_v12 = vld [vmem:[#allocation7 + $0x500] ss:$16 sps:$4 sm:$0xff]  }
 0x15b   :  { %1545 = vmatpush1.bf16.msra.mxu0 %v6419_v13  ;;  %v6494_v13 = vld [vmem:[#allocation7 + $0x4e8] ss:$16 sps:$4 sm:$0xff]  }
 0x15c   :  { %1546 = vmatprep.subr.bf16.mxu0 %v6427_v15  ;;  %v6502_v15 = vld [vmem:[#allocation7 + $0x50c] ss:$16 sps:$4 sm:$0xff]  }
 0x15d   :  { %1755 = vmatpush1.bf16.msra.mxu1 %v6422_v14  ;;  %v6499_v14 = vld [vmem:[#allocation7 + $0x524] ss:$16 sps:$4 sm:$0xff]  }
 0x15e   :  { %1756 = vmatprep.subr.bf16.mxu1 %v6430_v16  ;;  %v6497_v16 = vld [vmem:[#allocation7 + $0x520] ss:$16 sps:$4 sm:$0xff]  }
 0x15f   :  { %1547 = vmatpush1.bf16.msra.mxu0 %v6425_v17  ;;  %v6500_v17 = vld [vmem:[#allocation7 + $0x508] ss:$16 sps:$4 sm:$0xff]  }
 0x160   :  { %1548 = vmatprep.subr.bf16.mxu0 %v6433_v19  ;;  %v6508_v19 = vld [vmem:[#allocation7 + $0x52c] ss:$16 sps:$4 sm:$0xff]  }
 0x161   :  { %1757 = vmatpush1.bf16.msra.mxu1 %v6428_v18  ;;  %v6505_v18 = vld [vmem:[#allocation7 + $0x544] ss:$16 sps:$4 sm:$0xff]  }
 0x162   :  { %1758 = vmatprep.subr.bf16.mxu1 %v6436_v20  ;;  %v6503_v20 = vld [vmem:[#allocation7 + $0x540] ss:$16 sps:$4 sm:$0xff]  }
 0x163   :  { %1549 = vmatpush1.bf16.msra.mxu0 %v6431_v21  ;;  %v6506_v21 = vld [vmem:[#allocation7 + $0x528] ss:$16 sps:$4 sm:$0xff]  }
 0x164   :  { %1550 = vmatprep.subr.bf16.mxu0 %v6439_v23  ;;  %v6514_v23 = vld [vmem:[#allocation7 + $0x54c] ss:$16 sps:$4 sm:$0xff]  }
 0x165   :  { %1759 = vmatpush1.bf16.msra.mxu1 %v6434_v22  ;;  %v6511_v22 = vld [vmem:[#allocation7 + $0x564] ss:$16 sps:$4 sm:$0xff]  }
 0x166   :  { %1760 = vmatprep.subr.bf16.mxu1 %v6442_v25  ;;  %v6512_v25 = vld [vmem:[#allocation7 + $0x548] ss:$16 sps:$4 sm:$0xff]  }
 0x167   :  { %1551 = vmatpush1.bf16.msra.mxu0 %v6437_v24  ;;  %v6509_v24 = vld [vmem:[#allocation7 + $0x560] ss:$16 sps:$4 sm:$0xff]  }
 0x168   :  { %1573 = vmatprep.subr.bf16.mxu0 %v6445_v29  ;;  %v6518_v29 = vld [vmem:[#allocation7 + $0x568] ss:$16 sps:$4 sm:$0xff]  }
 0x169   :  { %1761 = vmatpush1.bf16.msra.mxu1 %v6440_v26  ;;  %v6517_v26 = vld [vmem:[#allocation7 + $0x584] ss:$16 sps:$4 sm:$0xff]  }
 0x16a   :  { %1762 = vmatprep.subr.bf16.mxu1 %v6448_v30  ;;  %1553 = vmatmul.mubr.bf16.vlgmr.msra.gmra.mrb[0].mxu0 %v250_v32  ;;  %v6523_v30 = vld [vmem:[#allocation7 + $0x5a4] ss:$16 sps:$4 sm:$0xff]  }
 0x16b   :  { %1574 = vmatpush1.bf16.msra.mxu0 %v6443_v31  ;;  %1562 = vmatprep.mubr.bf16.mxu0 %v258_v37  ;;  %v6526_v31 = vld [vmem:[#allocation7 + $0x58c] ss:$16 sps:$4 sm:$0xff]  }
 0x16c   :  { %1575 = vmatprep.subr.bf16.mxu0 %v6451_v36  ;;  %v6527_v36 = vld [vmem:[#allocation7 + $0x5c0] ss:$16 sps:$4 sm:$0xff]  }
 0x16d   :  { %1763 = vmatpush1.bf16.msra.mxu1 %v6446_v33  ;;  %v6524_v33 = vld [vmem:[#allocation7 + $0x588] ss:$16 sps:$4 sm:$0xff]  }
 0x16e   :  { %1785 = vmatprep.subr.bf16.mxu1 %v6454_v39  ;;  %v6538_v39 = vld [vmem:[#allocation7 + $0x5cc] ss:$16 sps:$4 sm:$0xff]  }
 0x16f   :  { %1576 = vmatpush1.bf16.msra.mxu0 %v6449_v38  ;;  %v6535_v38 = vld [vmem:[#allocation7 + $0x5e4] ss:$16 sps:$4 sm:$0xff]  }
 0x170   :  { %1765 = vmatmul.mubr.bf16.vlgmr.msra.gmra.mrb[8].mxu1 %v250_v32  ;;  %1577 = vmatprep.subr.bf16.mxu0 %v6457_v43  ;;  %v6521_v32 = vld [vmem:[#allocation7 + $0x5a0] ss:$16 sps:$4 sm:$0xff]   ;;  %v6536_v43 = vld [vmem:[#allocation7 + $0x5c8] ss:$16 sps:$4 sm:$0xff]  }
 0x171   :  { %1786 = vmatpush1.bf16.msra.mxu1 %v6452_v40  ;;  %1774 = vmatprep.mubr.bf16.mxu1 %v258_v37  ;;  %v6530_v37 = vld [vmem:[#allocation7 + $0x5a8] ss:$16 sps:$4 sm:$0xff]   ;;  %v6533_v40 = vld [vmem:[#allocation7 + $0x5e0] ss:$16 sps:$4 sm:$0xff]  }
 0x172   :  { %1787 = vmatprep.subr.bf16.mxu1 %v6460_v44  ;;  %1563 = vmatmul.mubr.bf16.gmra.mrb[4].mxu0 %v257_v46  ;;  %v239_v44 = vld [vmem:[#allocation2 + $0x98] sm:$0xff] }
 0x173   :  { %1578 = vmatpush1.bf16.msra.mxu0 %v6455_v48  ;;  %1605 = vmatprep.mubr.bf16.mxu0 %v253_v49  ;;  %v6545_v48 = vld [vmem:[#allocation8] ss:$8 sps:$4 sm:$0xff]  }
 0x174   :  { %1579 = vmatprep.subr.bf16.mxu0 %v6463_v51  ;;  %v6550_v51 = vld [vmem:[#allocation8 + $0x14] ss:$8 sps:$4 sm:$0xff]  }
 0x175   :  { %1788 = vmatpush1.bf16.msra.mxu1 %v6458_v50  ;;  %v6539_v50 = vld [vmem:[#allocation7 + $0x5e8] ss:$16 sps:$4 sm:$0xff]  }
 0x176   :  { %1789 = vmatprep.subr.bf16.mxu1 %v6466_v52  ;;  %v260_v52 = vpack.c.bf16 %v246_v45, %v239_v44  ;;  %v6656_v44 = vld [vmem:[#allocation10 + $0x78] ss:$12 sps:$4 sm:$0xff]   ;;  %v6661_v45 = vld [vmem:[#allocation10 + $0x94] ss:$12 sps:$4 sm:$0xff]  }
 0x177   :  { %1580 = vmatpush1.bf16.msra.mxu0 %v6461_v54  ;;  %v6544_v54 = vld [vmem:[#allocation7 + $0x60c] ss:$16 sps:$4 sm:$0xff]  }
 0x178   :  { %1775 = vmatmul.mubr.bf16.gmra.mrb[12].mxu1 %v257_v46  ;;  %1581 = vmatprep.subr.bf16.mxu0 %v6469_v56  ;;  %v6547_v46 = vld [vmem:[#allocation8 + $0x4] ss:$8 sps:$4 sm:$0xff]   ;;  %v245_v56 = vld [vmem:[#allocation2 + $0xc8] sm:$0xff] }
 0x179   :  { %1790 = vmatpush1.bf16.msra.mxu1 %v6464_v55  ;;  %1817 = vmatprep.mubr.bf16.mxu1 %v253_v49  ;;  %v252_v49 = vpack.c.bf16 %v231_v42, %v224_v41  ;;  %v238_v55 = vld [vmem:[#allocation2 + $0x90] sm:$0xff]  ;;  %v6655_v41 = vld [vmem:[#allocation10 + $0x64] ss:$12 sps:$4 sm:$0xff]   ;;  %v6653_v42 = vld [vmem:[#allocation10 + $0x60] ss:$12 sps:$4 sm:$0xff]  }
 0x17a   :  { %1791 = vmatprep.subr.bf16.mxu1 %v6472_v57  ;;  %v6548_v57 = vld [vmem:[#allocation8 + $0x10] ss:$8 sps:$4 sm:$0xff]  }
 0x17b   :  { %1582 = vmatpush1.bf16.msra.mxu0 %v6467_v58  ;;  %v6542_v58 = vld [vmem:[#allocation7 + $0x608] ss:$16 sps:$4 sm:$0xff]  }
 0x17c   :  { %1583 = vmatprep.subr.bf16.mxu0 %v6475_v60  ;;  %v6551_v60 = vld [vmem:[#allocation8 + $0x20] ss:$8 sps:$4 sm:$0xff]  }
 0x17d   :  { %1792 = vmatpush1.bf16.msra.mxu1 %v6470_v59  ;;  %v6553_v59 = vld [vmem:[#allocation8 + $0x24] ss:$8 sps:$4 sm:$0xff]  }
 0x17e   :  { %1793 = vmatprep.subr.bf16.mxu1 %v6478_v61  ;;  %v259_v61 = vpack.c.bf16 %v245_v56, %v238_v55  ;;  %v6668_v55 = vld [vmem:[#allocation10 + $0xd8] ss:$12 sps:$4 sm:$0xff]  }
 0x17f   :  { %1584 = vmatpush1.bf16.msra.mxu0 %v6473_v62  ;;  %v6556_v62 = vld [vmem:[#allocation8 + $0x34] ss:$8 sps:$4 sm:$0xff]  }
 0x180   :  { %1585 = vmatprep.subr.bf16.mxu0 %v6481_v1  ;;  %v6559_v1 = vld [vmem:[#allocation8 + $0x44] ss:$8 sps:$4 sm:$0xff]  }
 0x181   :  { %1794 = vmatpush1.bf16.msra.mxu1 %v6476_v63  ;;  %v6554_v63 = vld [vmem:[#allocation8 + $0x30] ss:$8 sps:$4 sm:$0xff]  }
 0x182   :  { %1795 = vmatprep.subr.bf16.mxu1 %v6484_v2  ;;  %v6557_v2 = vld [vmem:[#allocation8 + $0x40] ss:$8 sps:$4 sm:$0xff]  }
 0x183   :  { %1586 = vmatpush1.bf16.msra.mxu0 %v6479_v3  ;;  %v6562_v3 = vld [vmem:[#allocation8 + $0x54] ss:$8 sps:$4 sm:$0xff]  }
 0x184   :  { %1587 = vmatprep.subr.bf16.mxu0 %v6487_v5  ;;  %v6565_v5 = vld [vmem:[#allocation8 + $0x64] ss:$8 sps:$4 sm:$0xff]  }
 0x185   :  { %1796 = vmatpush1.bf16.msra.mxu1 %v6482_v4  ;;  %v6560_v4 = vld [vmem:[#allocation8 + $0x50] ss:$8 sps:$4 sm:$0xff]  }
 0x186   :  { %1797 = vmatprep.subr.bf16.mxu1 %v6490_v6  ;;  %v6563_v6 = vld [vmem:[#allocation8 + $0x60] ss:$8 sps:$4 sm:$0xff]  }
 0x187   :  { %1588 = vmatpush1.bf16.msra.mxu0 %v6485_v7  ;;  %v6568_v7 = vld [vmem:[#allocation8 + $0x74] ss:$8 sps:$4 sm:$0xff]  }
 0x188   :  { %1589 = vmatprep.subr.bf16.mxu0 %v6493_v9 }
 0x189   :  { %1798 = vmatpush1.bf16.msra.mxu1 %v6488_v8  ;;  %v6566_v8 = vld [vmem:[#allocation8 + $0x70] ss:$8 sps:$4 sm:$0xff]  }
 0x18a   :  { %1799 = vmatprep.subr.bf16.mxu1 %v6496_v10  ;;  %v6571_v10 = vld [vmem:[#allocation8 + $0x84] ss:$8 sps:$4 sm:$0xff]  }
 0x18b   :  { %1590 = vmatpush1.bf16.msra.mxu0 %v6491_v12 }
 0x18c   :  { %1591 = vmatprep.subr.bf16.mxu0 %v6499_v14 }
 0x18d   :  { %1800 = vmatpush1.bf16.msra.mxu1 %v6494_v13 }
 0x18e   :  { %1801 = vmatprep.subr.bf16.mxu1 %v6502_v15  ;;  %v6569_v15 = vld [vmem:[#allocation8 + $0x80] ss:$8 sps:$4 sm:$0xff]  }
 0x18f   :  { %1592 = vmatpush1.bf16.msra.mxu0 %v6497_v16  ;;  %v6574_v16 = vld [vmem:[#allocation8 + $0x94] ss:$8 sps:$4 sm:$0xff]  }
 0x190   :  { %1593 = vmatprep.subr.bf16.mxu0 %v6505_v18  ;;  %v6575_v18 = vld [vmem:[#allocation8 + $0xa0] ss:$8 sps:$4 sm:$0xff]  }
 0x191   :  { %1802 = vmatpush1.bf16.msra.mxu1 %v6500_v17  ;;  %v6577_v17 = vld [vmem:[#allocation8 + $0xa4] ss:$8 sps:$4 sm:$0xff]  }
 0x192   :  { %1803 = vmatprep.subr.bf16.mxu1 %v6508_v19  ;;  %v6580_v19 = vld [vmem:[#allocation8 + $0xb4] ss:$8 sps:$4 sm:$0xff]  }
 0x193   :  { %1594 = vmatpush1.bf16.msra.mxu0 %v6503_v20  ;;  %v6578_v20 = vld [vmem:[#allocation8 + $0xb0] ss:$8 sps:$4 sm:$0xff]  }
 0x194   :  { %1595 = vmatprep.subr.bf16.mxu0 %v6511_v22  ;;  %v6581_v22 = vld [vmem:[#allocation8 + $0xc0] ss:$8 sps:$4 sm:$0xff]  }
 0x195   :  { %1804 = vmatpush1.bf16.msra.mxu1 %v6506_v21  ;;  %v6583_v21 = vld [vmem:[#allocation8 + $0xc4] ss:$8 sps:$4 sm:$0xff]  }
 0x196   :  { %1805 = vmatprep.subr.bf16.mxu1 %v6514_v23 }
 0x197   :  { %1596 = vmatpush1.bf16.msra.mxu0 %v6509_v24 }
 0x198   :  { %1597 = vmatprep.subr.bf16.mxu0 %v6517_v26  ;;  %v6586_v26 = vld [vmem:[#allocation8 + $0xd4] ss:$8 sps:$4 sm:$0xff]  }
 0x199   :  { %1806 = vmatpush1.bf16.msra.mxu1 %v6512_v25 }
 0x19a   :  { %1807 = vmatprep.subr.bf16.mxu1 %v6520_v27  ;;  %v6584_v27 = vld [vmem:[#allocation8 + $0xd0] ss:$8 sps:$4 sm:$0xff]  }
 0x19b   :  { %1598 = vmatpush1.bf16.msra.mxu0 %v6515_v28  ;;  %v6589_v28 = vld [vmem:[#allocation8 + $0xe4] ss:$8 sps:$4 sm:$0xff]  }
 0x19c   :  { %1599 = vmatprep.subr.bf16.mxu0 %v6523_v30  ;;  %v6592_v30 = vld [vmem:[#allocation8 + $0xf4] ss:$8 sps:$4 sm:$0xff]  }
 0x19d   :  { %1808 = vmatpush1.bf16.msra.mxu1 %v6518_v29  ;;  %v6587_v29 = vld [vmem:[#allocation8 + $0xe0] ss:$8 sps:$4 sm:$0xff]  }
 0x19e   :  { %1809 = vmatprep.subr.bf16.mxu1 %v6526_v31  ;;  %v6590_v31 = vld [vmem:[#allocation8 + $0xf0] ss:$8 sps:$4 sm:$0xff]  }
 0x19f   :  { %1600 = vmatpush1.bf16.msra.mxu0 %v6521_v32  ;;  %v6595_v32 = vld [vmem:[#allocation8 + $0x104] ss:$8 sps:$4 sm:$0xff]  }
 0x1a0   :  { %1601 = vmatprep.subr.bf16.mxu0 %v6529_v34  ;;  %v6643_v34 = vld [vmem:[#allocation10 + $0x4] ss:$12 sps:$4 sm:$0xff]  }
 0x1a1   :  { %1810 = vmatpush1.bf16.msra.mxu1 %v6524_v33  ;;  %v6641_v33 = vld [vmem:[#allocation10] ss:$12 sps:$4 sm:$0xff]  }
 0x1a2   :  { %1811 = vmatprep.subr.bf16.mxu1 %v6532_v35  ;;  %v6646_v35 = vld [vmem:[#allocation10 + $0x1c] ss:$12 sps:$4 sm:$0xff]  }
 0x1a3   :  { %1602 = vmatpush1.bf16.msra.mxu0 %v6527_v36  ;;  %v6644_v36 = vld [vmem:[#allocation10 + $0x18] ss:$12 sps:$4 sm:$0xff]  }
 0x1a4   :  { %1603 = vmatprep.subr.bf16.mxu0 %v6535_v38  ;;  %v6647_v38 = vld [vmem:[#allocation10 + $0x30] ss:$12 sps:$4 sm:$0xff]  }
 0x1a5   :  { %1812 = vmatpush1.bf16.msra.mxu1 %v6530_v37  ;;  %v6649_v37 = vld [vmem:[#allocation10 + $0x34] ss:$12 sps:$4 sm:$0xff]  }
 0x1a6   :  { %1813 = vmatprep.subr.bf16.mxu1 %v6538_v39  ;;  %v6652_v39 = vld [vmem:[#allocation10 + $0x4c] ss:$12 sps:$4 sm:$0xff]  }
 0x1a7   :  { %1604 = vmatpush1.bf16.msra.mxu0 %v6533_v40  ;;  %v6650_v40 = vld [vmem:[#allocation10 + $0x48] ss:$12 sps:$4 sm:$0xff]  }
 0x1a8   :  { %2311 = vmatprep.subr.bf16.mxu0 %v6547_v46  ;;  %v6659_v46 = vld [vmem:[#allocation10 + $0x90] ss:$12 sps:$4 sm:$0xff]  }
 0x1a9   :  { %1814 = vmatpush1.bf16.msra.mxu1 %v6536_v43  ;;  %v6658_v43 = vld [vmem:[#allocation10 + $0x7c] ss:$12 sps:$4 sm:$0xff]  }
 0x1aa   :  { %1815 = vmatprep.subr.bf16.mxu1 %v6541_v47  ;;  %1606 = vmatmul.mubr.bf16.vlgmr.msra.gmra.mrb[0].mxu0 %v252_v49  ;;  %v6664_v47 = vld [vmem:[#allocation10 + $0xac] ss:$12 sps:$4 sm:$0xff]  }
 0x1ab   :  { %1615 = vmatprep.mubr.bf16.mxu0 %v260_v52  ;;  %2312 = vmatpush1.bf16.msra.mxu0 %v6545_v48  ;;  %v6662_v48 = vld [vmem:[#allocation10 + $0xa8] ss:$12 sps:$4 sm:$0xff]  }
 0x1ac   :  { %2313 = vmatprep.subr.bf16.mxu0 %v6550_v51  ;;  %v6665_v51 = vld [vmem:[#allocation10 + $0xc0] ss:$12 sps:$4 sm:$0xff]  }
 0x1ad   :  { %1816 = vmatpush1.bf16.msra.mxu1 %v6539_v50  ;;  %v6667_v50 = vld [vmem:[#allocation10 + $0xc4] ss:$12 sps:$4 sm:$0xff]  }
 0x1ae   :  { %1838 = vmatprep.subr.bf16.mxu1 %v6544_v54  ;;  %v6670_v54 = vld [vmem:[#allocation10 + $0xdc] ss:$12 sps:$4 sm:$0xff]  }
 0x1af   :  { %2314 = vmatpush1.bf16.msra.mxu0 %v6548_v57  ;;  %v6673_v57 = vld [vmem:[#allocation10 + $0xf4] ss:$12 sps:$4 sm:$0xff]  }
 0x1b0   :  { %1818 = vmatmul.mubr.bf16.vlgmr.msra.gmra.mrb[8].mxu1 %v252_v49  ;;  %2315 = vmatprep.subr.bf16.mxu0 %v6553_v59  ;;  %v460_v49 = vlaneseq }
 0x1b1   :  { %1827 = vmatprep.mubr.bf16.mxu1 %v260_v52  ;;  %1839 = vmatpush1.bf16.msra.mxu1 %v6542_v58  ;;  %v7668_v58 = vld [vmem:[#allocation5] sm:$0xf] }
 0x1b2   :  { %1616 = vmatmul.mubr.bf16.gmra.mrb[4].mxu0 %v259_v61  ;;  %2766 = vmatprep.subr.bf16.mxu1 %v6643_v34  ;;  %v7663_v52 = vshrl.u32 %v460_v49, 7  ;;  %v6593_v34 = vld [vmem:[#allocation8 + $0x100] ss:$8 sps:$4 sm:$0xff]  }
 0x1b3   :  { %2316 = vmatpush1.bf16.msra.mxu0 %v6551_v60  ;;  %v6671_v60 = vld [vmem:[#allocation10 + $0xf0] ss:$12 sps:$4 sm:$0xff]  }
 0x1b4   :  { %2317 = vmatprep.subr.bf16.mxu0 %v6556_v62  ;;  %v7666_v56 = vsub.s32 0, %v7663_v52  ;;  %v7671_v59 = vsub.s32 1, %v7663_v52  ;;  %v6676_v62 = vld [vmem:[#allocation10 + $0x10c] ss:$12 sps:$4 sm:$0xff]  }
 0x1b7   :  { %2318 = vmatpush1.bf16.msra.mxu0 %v6554_v63  ;;  %v467_v63 = vrot.slane %v7668_v58, %v7671_v59 }
 0x1b8   :  { %1828 = vmatmul.mubr.bf16.gmra.mrb[12].mxu1 %v259_v61  ;;  %2319 = vmatprep.subr.bf16.mxu0 %v6559_v1  ;;  %v463_v61 = vrot.slane %v7668_v58, %v7666_v56 }
 0x1b9   :  { %1870 = vmatprep.mubr.bf16.mxu1 %v7356_v0 }
 0x1bb   :  { %2320 = vmatpush1.bf16.msra.mxu0 %v6557_v2  ;;  %v6674_v2 = vld [vmem:[#allocation10 + $0x108] ss:$12 sps:$4 sm:$0xff]  }
 0x1bc   :  { %2321 = vmatprep.subr.bf16.mxu0 %v6562_v3 }
 0x1bf   :  { %2322 = vmatpush1.bf16.msra.mxu0 %v6560_v4 }
 0x1c0   :  { %5531 = vmatmul.mubr.msk.bf16.vlgmr.msra.gmra.mrb[8].mxu1 %vm1460_vm0, %v7632_v11  ;;  %2323 = vmatprep.subr.bf16.mxu0 %v6565_v5  ;;  %v6572_v11 = vld [vmem:[#allocation8 + $0x90] ss:$8 sps:$4 sm:$0xff]  }
 0x1c1   :  { %1880 = vmatprep.mubr.bf16.mxu1 %v7356_v0  ;;  %2767 = vmatpush1.bf16.msra.mxu1 %v6641_v33  ;;  %v6679_v5 = vld [vmem:[#allocation10 + $0x124] ss:$12 sps:$4 sm:$0xff]  }
 0x1c2   :  { %2768 = vmatprep.subr.bf16.mxu1 %v6646_v35 }
 0x1c3   :  { %v7645_v9 = vpop.f32.mrb[0].mxu1  ;;  %2324 = vmatpush1.bf16.msra.mxu0 %v6563_v6 }
 0x1c4   :  { %v7647_v12 = vpop.f32.mrb[1].mxu1  ;;  %2325 = vmatprep.subr.bf16.mxu0 %v6568_v7 }
 0x1c5   :  { %v7649_v13 = vpop.f32.mrb[2].mxu1  ;;  %2769 = vmatpush1.bf16.msra.mxu1 %v6644_v36 }
 0x1c6   :  { %v7651_v14 = vpop.f32.mrb[3].mxu1  ;;  %2770 = vmatprep.subr.bf16.mxu1 %v6649_v37 }
 0x1c7   :  { %2326 = vmatpush1.bf16.msra.mxu0 %v6566_v8 }
 0x1c8   :  { %5532 = vmatmul.mubr.msk.bf16.gmra.mrb[12].mxu1 %vm1460_vm0, %v7637_v53  ;;  %2327 = vmatprep.subr.bf16.mxu0 %v6571_v10 }
 0x1c9   :  { %2771 = vmatpush1.bf16.msra.mxu1 %v6647_v38 }
 0x1ca   :  { %2772 = vmatprep.subr.bf16.mxu1 %v6652_v39 }
 0x1cb   :  { %2328 = vmatpush1.bf16.msra.mxu0 %v6569_v15 }
 0x1cc   :  { %2329 = vmatprep.subr.bf16.mxu0 %v6574_v16 }
 0x1cd   :  { %2773 = vmatpush1.bf16.msra.mxu1 %v6650_v40 }
 0x1ce   :  { %2774 = vmatprep.subr.bf16.mxu1 %v6655_v41  ;;  %v6596_v41 = vld [vmem:[#allocation8 + $0x110] ss:$8 sps:$4 sm:$0xff]  }
 0x1cf   :  { %2330 = vmatpush1.bf16.msra.mxu0 %v6572_v11 }
 0x1d0   :  { %2331 = vmatprep.subr.bf16.mxu0 %v6577_v17  ;;  %v6677_v17 = vld [vmem:[#allocation10 + $0x120] ss:$12 sps:$4 sm:$0xff]  }
 0x1d1   :  { %v7655_v23 = vpop.f32.mrb[4].mxu1  ;;  %2775 = vmatpush1.bf16.msra.mxu1 %v6653_v42  ;;  %v7686_v42 = vsub.s32 2, %v7663_v52 }
 0x1d2   :  { %v7657_v53 = vpop.f32.mrb[5].mxu1  ;;  %2776 = vmatprep.subr.bf16.mxu1 %v6658_v43 }
 0x1d3   :  { %2332 = vmatpush1.bf16.msra.mxu0 %v6575_v18  ;;  %v7659_v24 = vpop.f32.mrb[6].mxu1 }
 0x1d4   :  { %2333 = vmatprep.subr.bf16.mxu0 %v6580_v19  ;;  %v7661_v25 = vpop.f32.mrb[7].mxu1  ;;  %v6682_v19 = vld [vmem:[#allocation10 + $0x13c] ss:$12 sps:$4 sm:$0xff]  }
 0x1d5   :  { %2777 = vmatpush1.bf16.msra.mxu1 %v6656_v44  ;;  %v6601_v44 = vld [vmem:[#allocation8 + $0x124] ss:$8 sps:$4 sm:$0xff]  }
 0x1d6   :  { %2778 = vmatprep.subr.bf16.mxu1 %v6661_v45  ;;  %v474_v45 = vsub.s32 3, %v7663_v52 }
 0x1d7   :  { %2334 = vmatpush1.bf16.msra.mxu0 %v6578_v20 }
 0x1d8   :  { %2335 = vmatprep.subr.bf16.mxu0 %v6583_v21  ;;  %v475_v49 = vrot.slane %v7668_v58, %v474_v45 }
 0x1d9   :  { %2779 = vmatpush1.bf16.msra.mxu1 %v6659_v46 }
 0x1da   :  { %2780 = vmatprep.subr.bf16.mxu1 %v6664_v47 }
 0x1db   :  { %2336 = vmatpush1.bf16.msra.mxu0 %v6581_v22 }
 0x1dc   :  { %2337 = vmatprep.subr.bf16.mxu0 %v6586_v26 }
 0x1dd   :  { %2781 = vmatpush1.bf16.msra.mxu1 %v6662_v48 }
 0x1de   :  { %2782 = vmatprep.subr.bf16.mxu1 %v6667_v50  ;;  %v6604_v50 = vld [vmem:[#allocation8 + $0x134] ss:$8 sps:$4 sm:$0xff]  }
 0x1df   :  { %2338 = vmatpush1.bf16.msra.mxu0 %v6584_v27 }
 0x1e0   :  { %2339 = vmatprep.subr.bf16.mxu0 %v6589_v28 }
 0x1e1   :  { %2783 = vmatpush1.bf16.msra.mxu1 %v6665_v51 }
 0x1e2   :  { %2784 = vmatprep.subr.bf16.mxu1 %v6670_v54 }
 0x1e3   :  { %2340 = vmatpush1.bf16.msra.mxu0 %v6587_v29 }
 0x1e4   :  { %2341 = vmatprep.subr.bf16.mxu0 %v6592_v30 }
 0x1e5   :  { %2785 = vmatpush1.bf16.msra.mxu1 %v6668_v55 }
 0x1e6   :  { %2786 = vmatprep.subr.bf16.mxu1 %v6673_v57  ;;  %v6602_v57 = vld [vmem:[#allocation8 + $0x130] ss:$8 sps:$4 sm:$0xff]  }
 0x1e7   :  { %2342 = vmatpush1.bf16.msra.mxu0 %v6590_v31 }
 0x1e8   :  { %2364 = vmatprep.subr.bf16.mxu0 %v6595_v32 }
 0x1e9   :  { %2787 = vmatpush1.bf16.msra.mxu1 %v6671_v60 }
 0x1ea   :  { %2788 = vmatprep.subr.bf16.mxu1 %v6676_v62  ;;  %v6607_v62 = vld [vmem:[#allocation8 + $0x144] ss:$8 sps:$4 sm:$0xff]  }
 0x1ed   :  { %2789 = vmatpush1.bf16.msra.mxu1 %v6674_v2 }
 0x1ee   :  { %2790 = vmatprep.subr.bf16.mxu1 %v6679_v5  ;;  %v6605_v5 = vld [vmem:[#allocation8 + $0x140] ss:$8 sps:$4 sm:$0xff]  }
 0x1f1   :  { %2791 = vmatpush1.bf16.msra.mxu1 %v6677_v17  ;;  %v6608_v17 = vld [vmem:[#allocation8 + $0x150] ss:$8 sps:$4 sm:$0xff]  }
 0x1f2   :  { %2792 = vmatprep.subr.bf16.mxu1 %v6682_v19 }
 0x27d   :  { %v1607_v1 = vpop.f32.mrb[0].mxu0 }
 0x27e   :  { %v6130_v3 = vadd.f32 %v1607_v1, %v463_v61  ;;  %v1609_v4 = vpop.f32.mrb[1].mxu0 }
 0x27f   :  { %v6132_v6 = vadd.f32 %v1609_v4, %v467_v63  ;;  %v1611_v7 = vpop.f32.mrb[2].mxu0 }
 0x280   :  { %v6131_v8 = vadd.f32 %v6130_v3, %v7645_v9  ;;  %v6134_v10 = vadd.f32 %v1611_v7, %v463_v61  ;;  %v1613_v15 = vpop.f32.mrb[3].mxu0  ;;  %v6680_v9 = vld [vmem:[#allocation10 + $0x138] ss:$12 sps:$4 sm:$0xff]   ;;  %v6610_v7 = vld [vmem:[#allocation8 + $0x154] ss:$8 sps:$4 sm:$0xff]  }
 0x281   :  { %v6133_v16 = vadd.f32 %v6132_v6, %v7647_v12  ;;  %v6136_v11 = vadd.f32 %v1613_v15, %v467_v63  ;;  %2793 = vmatpush1.bf16.msra.mxu1 %v6680_v9  ;;  %v6611_v9 = vld [vmem:[#allocation8 + $0x160] ss:$8 sps:$4 sm:$0xff]  }
 0x282   :  { %v6135_v18 = vadd.f32 %v6134_v10, %v7649_v13  ;;  %v1891_v21 = vmax.f32 %v6131_v8, 0.0 }
 0x283   :  { %v6137_v20 = vadd.f32 %v6136_v11, %v7651_v14  ;;  %v1892_v26 = vmax.f32 %v6133_v16, 0.0  ;;  %v6598_v14 = vld [vmem:[#allocation8 + $0x114] ss:$8 sps:$4 sm:$0xff]  }
 0x284   :  { %v1895_v22 = vmax.f32 %v6135_v18, 0.0 }
 0x285   :  { %v1896_v27 = vmax.f32 %v6137_v20, 0.0  ;;  %v1617_v28 = vpop.f32.mrb[4].mxu0  ;;  %v6613_v20 = vld [vmem:[#allocation8 + $0x164] ss:$8 sps:$4 sm:$0xff]  }
 0x286   :  { %v1907_v29 = vpack.c.bf16 %v1895_v22, %v1891_v21  ;;  %v6138_v30 = vadd.f32 %v1617_v28, %v463_v61  ;;  %v1619_v31 = vpop.f32.mrb[5].mxu0 }
 0x287   :  { %v6140_v12 = vadd.f32 %v1619_v31, %v467_v63  ;;  %v1621_v32 = vpop.f32.mrb[6].mxu0  ;;  %v1908_v33 = vpack.c.bf16 %v1896_v27, %v1892_v26  ;;  %v6616_v31 = vld [vmem:[#allocation8 + $0x174] ss:$8 sps:$4 sm:$0xff]  }
 0x288   :  { %v6139_v13 = vadd.f32 %v6138_v30, %v7655_v23  ;;  %v6142_v35 = vadd.f32 %v1621_v32, %v463_v61  ;;  %v1623_v36 = vpop.f32.mrb[7].mxu0 }
 0x289   :  { %v6141_v37 = vadd.f32 %v6140_v12, %v7657_v53  ;;  %v6144_v38 = vadd.f32 %v1623_v36, %v467_v63  ;;  %2343 = vmatprep.mubr.bf16.mxu0 %v1908_v33  ;;  %v6614_v33 = vld [vmem:[#allocation8 + $0x170] ss:$8 sps:$4 sm:$0xff]  }
 0x28a   :  { %v6143_v39 = vadd.f32 %v6142_v35, %v7659_v24  ;;  %2344 = vmatmul.mubr.bf16.vlgmr.msra.gmra.mrb[8].mxu0 %v1907_v29  ;;  %v1899_v43 = vmax.f32 %v6139_v13, 0.0  ;;  %v471_v24 = vrot.slane %v7668_v58, %v7686_v42  ;;  %v6617_v13 = vld [vmem:[#allocation8 + $0x180] ss:$8 sps:$4 sm:$0xff]   ;;  %v6622_v35 = vld [vmem:[#allocation8 + $0x194] ss:$8 sps:$4 sm:$0xff]  }
 0x28b   :  { %v6145_v40 = vadd.f32 %v6144_v38, %v7661_v25  ;;  %2365 = vmatpush1.bf16.msra.mxu0 %v6593_v34  ;;  %v1900_v53 = vmax.f32 %v6141_v37, 0.0  ;;  %v6599_v25 = vld [vmem:[#allocation8 + $0x120] ss:$8 sps:$4 sm:$0xff]   ;;  %v6619_v34 = vld [vmem:[#allocation8 + $0x184] ss:$8 sps:$4 sm:$0xff]  }
 0x28c   :  { %v1903_v23 = vmax.f32 %v6143_v39, 0.0  ;;  %2366 = vmatprep.subr.bf16.mxu0 %v6598_v14  ;;  %v6620_v36 = vld [vmem:[#allocation8 + $0x190] ss:$8 sps:$4 sm:$0xff]   ;;  %v6625_v14 = vld [vmem:[#allocation8 + $0x1a4] ss:$8 sps:$4 sm:$0xff]  }
 0x28d   :  { %v1904_v46 = vmax.f32 %v6145_v40, 0.0  ;;  %v6623_v37 = vld [vmem:[#allocation8 + $0x1a0] ss:$8 sps:$4 sm:$0xff]   ;;  %v6628_v38 = vld [vmem:[#allocation8 + $0x1b4] ss:$8 sps:$4 sm:$0xff]  }
 0x28e   :  { %v1911_v47 = vpack.c.bf16 %v1903_v23, %v1899_v43  ;;  %v6626_v39 = vld [vmem:[#allocation8 + $0x1b0] ss:$8 sps:$4 sm:$0xff]   ;;  %v6631_v40 = vld [vmem:[#allocation8 + $0x1c4] ss:$8 sps:$4 sm:$0xff]   ;;  %v6634_v43 = vld [vmem:[#allocation8 + $0x1d4] ss:$8 sps:$4 sm:$0xff]  }
 0x28f   :  { %2367 = vmatpush1.bf16.msra.mxu0 %v6596_v41  ;;  %v1912_v48 = vpack.c.bf16 %v1904_v46, %v1900_v53  ;;  %v6629_v41 = vld [vmem:[#allocation8 + $0x1c0] ss:$8 sps:$4 sm:$0xff]   ;;  %v6632_v23 = vld [vmem:[#allocation8 + $0x1d0] ss:$8 sps:$4 sm:$0xff]   ;;  %v6640_v46 = vld [vmem:[#allocation8 + $0x1f4] ss:$8 sps:$4 sm:$0xff]  }
 0x290   :  { %2368 = vmatprep.subr.bf16.mxu0 %v6601_v44  ;;  %v6637_v44 = vld [vmem:[#allocation8 + $0x1e4] ss:$8 sps:$4 sm:$0xff]   ;;  %v6635_v53 = vld [vmem:[#allocation8 + $0x1e0] ss:$8 sps:$4 sm:$0xff]  }
 0x291   :  { %2353 = vmatprep.mubr.bf16.mxu0 %v1912_v48  ;;  %v6683_v48 = vld [vmem:[#allocation10 + $0x150] ss:$12 sps:$4 sm:$0xff]  }
 0x292   :  { %2354 = vmatmul.mubr.bf16.gmra.mrb[12].mxu0 %v1911_v47  ;;  %v6638_v47 = vld [vmem:[#allocation8 + $0x1f0] ss:$8 sps:$4 sm:$0xff]  }
 0x293   :  { %v1872_v51 = vpop.f32.mrb[8].mxu1  ;;  %2369 = vmatpush1.bf16.msra.mxu0 %v6599_v25  ;;  %v6688_v25 = vld [vmem:[#allocation10 + $0x16c] ss:$12 sps:$4 sm:$0xff]  }
 0x294   :  { %v6146_v54 = vadd.f32 %v1872_v51, %v471_v24  ;;  %v1874_v55 = vpop.f32.mrb[9].mxu1  ;;  %2370 = vmatprep.subr.bf16.mxu0 %v6604_v50  ;;  %v6689_v50 = vld [vmem:[#allocation10 + $0xc8] ss:$12 sps:$4 sm:$0xff]   ;;  %v1979_v51 = vld [vmem:[#allocation5 + $0x4] sm:$0x3] }
 0x295   :  { %v6147_v60 = vadd.f32 %v1874_v55, %v475_v49  ;;  %v1876_v61 = vpop.f32.mrb[10].mxu1  ;;  %v1988_v55 = vrot.slane %v1979_v51, %v7671_v59 }
 0x296   :  { %v6148_v63 = vadd.f32 %v1876_v61, %v471_v24  ;;  %v1878_v1 = vpop.f32.mrb[11].mxu1  ;;  %v1893_v3 = vmax.f32 %v6146_v54, 0.0  ;;  %v1984_v54 = vrot.slane %v1979_v51, %v7666_v56  ;;  %v6717_v51 = vld [vmem:[#allocation11 + $0x70] sm:$0xff]  }
 0x297   :  { %v6149_v2 = vadd.f32 %v1878_v1, %v475_v49  ;;  %2371 = vmatpush1.bf16.msra.mxu0 %v6602_v57  ;;  %v1894_v58 = vmax.f32 %v6147_v60, 0.0 }
 0x298   :  { %v1897_v4 = vmax.f32 %v6148_v63, 0.0  ;;  %2372 = vmatprep.subr.bf16.mxu0 %v6607_v62 }
 0x299   :  { %v1898_v6 = vmax.f32 %v6149_v2, 0.0 }
 0x29a   :  { %v1909_v8 = vpack.c.bf16 %v1897_v4, %v1893_v3 }
 0x29b   :  { %v1910_v10 = vpack.c.bf16 %v1898_v6, %v1894_v58  ;;  %v1882_v15 = vpop.f32.mrb[12].mxu1  ;;  %2373 = vmatpush1.bf16.msra.mxu0 %v6605_v5 }
 0x29c   :  { %v6150_v16 = vadd.f32 %v1882_v15, %v471_v24  ;;  %v1884_v11 = vpop.f32.mrb[13].mxu1  ;;  %2374 = vmatprep.subr.bf16.mxu0 %v6610_v7  ;;  %v6690_v15 = vld [vmem:[#allocation10 + $0x8] ss:$12 sps:$4 sm:$0xff]  }
 0x29d   :  { %v6151_v18 = vadd.f32 %v1884_v11, %v475_v49  ;;  %v1886_v19 = vpop.f32.mrb[14].mxu1  ;;  %2396 = vmatprep.mubr.bf16.mxu0 %v1910_v10 }
 0x29e   :  { %v6152_v21 = vadd.f32 %v1886_v19, %v471_v24  ;;  %v1888_v22 = vpop.f32.mrb[15].mxu1  ;;  %v1901_v27 = vmax.f32 %v6150_v16, 0.0  ;;  %v6685_v24 = vld [vmem:[#allocation10 + $0x154] ss:$12 sps:$4 sm:$0xff]  }
 0x29f   :  { %v6153_v26 = vadd.f32 %v1888_v22, %v475_v49  ;;  %2375 = vmatpush1.bf16.msra.mxu0 %v6608_v17  ;;  %v1902_v29 = vmax.f32 %v6151_v18, 0.0  ;;  %2794 = vmatprep.subr.bf16.mxu1 %v6685_v24  ;;  %v6686_v49 = vld [vmem:[#allocation10 + $0x168] ss:$12 sps:$4 sm:$0xff]   ;;  %v6691_v17 = vld [vmem:[#allocation10 + $0xe0] ss:$12 sps:$4 sm:$0xff]   ;;  %v6712_v24 = vld [vmem:[#allocation11 + $0x18] sm:$0xff]  }
 0x2a0   :  { %v1905_v28 = vmax.f32 %v6152_v21, 0.0  ;;  %2376 = vmatprep.subr.bf16.mxu0 %v6613_v20  ;;  %2795 = vmatpush1.bf16.msra.mxu1 %v6683_v48  ;;  %v6713_v48 = vld [vmem:[#allocation11 + $0x60] sm:$0xff]  }
 0x2a1   :  { %v1906_v30 = vmax.f32 %v6153_v26, 0.0  ;;  %2796 = vmatprep.subr.bf16.mxu1 %v6688_v25  ;;  %v6692_v26 = vld [vmem:[#allocation10 + $0x20] ss:$12 sps:$4 sm:$0xff]  }
 0x2a2   :  { %v1913_v12 = vpack.c.bf16 %v1905_v28, %v1901_v27  ;;  %v6714_v25 = vld [vmem:[#allocation11 + $0x20] sm:$0xff]  }
 0x2a3   :  { %v1914_v32 = vpack.c.bf16 %v1906_v30, %v1902_v29  ;;  %2377 = vmatpush1.bf16.msra.mxu0 %v6611_v9  ;;  %v6693_v9 = vld [vmem:[#allocation10 + $0xf8] ss:$12 sps:$4 sm:$0xff]  }
 0x2a4   :  { %2378 = vmatprep.subr.bf16.mxu0 %v6616_v31  ;;  %2797 = vmatpush1.bf16.msra.mxu1 %v6686_v49  ;;  %v6715_v49 = vld [vmem:[#allocation11 + $0x68] sm:$0xff]  }
 0x2a5   :  { %5900 = vmatprep.subr.bf16.mxu1 %v6689_v50  ;;  %v6716_v50 = vld [vmem:[#allocation11 + $0x28] sm:$0xff]  }
 0x2a7   :  { %2379 = vmatpush1.bf16.msra.mxu0 %v6614_v33  ;;  %v6695_v33 = vld [vmem:[#allocation10 + $0x110] ss:$12 sps:$4 sm:$0xff]  }
 0x2a8   :  { %2380 = vmatprep.subr.bf16.mxu0 %v6619_v34  ;;  %v6696_v34 = vld [vmem:[#allocation10 + $0x50] ss:$12 sps:$4 sm:$0xff]  }
 0x2ab   :  { %2381 = vmatpush1.bf16.msra.mxu0 %v6617_v13  ;;  %v6697_v13 = vld [vmem:[#allocation10 + $0x128] ss:$12 sps:$4 sm:$0xff]  }
 0x2ac   :  { %2382 = vmatprep.subr.bf16.mxu0 %v6622_v35  ;;  %v6698_v35 = vld [vmem:[#allocation10 + $0x68] ss:$12 sps:$4 sm:$0xff]  }
 0x2af   :  { %2383 = vmatpush1.bf16.msra.mxu0 %v6620_v36  ;;  %v6699_v36 = vld [vmem:[#allocation10 + $0x140] ss:$12 sps:$4 sm:$0xff]  }
 0x2b0   :  { %2384 = vmatprep.subr.bf16.mxu0 %v6625_v14  ;;  %v6700_v14 = vld [vmem:[#allocation10 + $0x80] ss:$12 sps:$4 sm:$0xff]  }
 0x2b3   :  { %2385 = vmatpush1.bf16.msra.mxu0 %v6623_v37  ;;  %v6701_v37 = vld [vmem:[#allocation10 + $0x158] ss:$12 sps:$4 sm:$0xff]  }
 0x2b4   :  { %2386 = vmatprep.subr.bf16.mxu0 %v6628_v38  ;;  %v6702_v38 = vld [vmem:[#allocation10 + $0x98] ss:$12 sps:$4 sm:$0xff]  }
 0x2b7   :  { %2387 = vmatpush1.bf16.msra.mxu0 %v6626_v39  ;;  %v6703_v39 = vld [vmem:[#allocation10 + $0x170] ss:$12 sps:$4 sm:$0xff]  }
 0x2b8   :  { %2388 = vmatprep.subr.bf16.mxu0 %v6631_v40  ;;  %v6704_v40 = vld [vmem:[#allocation10 + $0xb0] ss:$12 sps:$4 sm:$0xff]  }
 0x2bb   :  { %2389 = vmatpush1.bf16.msra.mxu0 %v6629_v41  ;;  %v6705_v41 = vld [vmem:[#allocation11 + $0x40] sm:$0xff]  }
 0x2bc   :  { %2390 = vmatprep.subr.bf16.mxu0 %v6634_v43  ;;  %v6706_v43 = vld [vmem:[#allocation11] sm:$0xff]  }
 0x2bf   :  { %2391 = vmatpush1.bf16.msra.mxu0 %v6632_v23  ;;  %v6707_v23 = vld [vmem:[#allocation11 + $0x48] sm:$0xff]  }
 0x2c0   :  { %2392 = vmatprep.subr.bf16.mxu0 %v6637_v44  ;;  %v6708_v44 = vld [vmem:[#allocation11 + $0x8] sm:$0xff]  }
 0x2c3   :  { %2393 = vmatpush1.bf16.msra.mxu0 %v6635_v53  ;;  %v6709_v53 = vld [vmem:[#allocation11 + $0x50] sm:$0xff]  }
 0x2c4   :  { %2394 = vmatprep.subr.bf16.mxu0 %v6640_v46  ;;  %v6710_v46 = vld [vmem:[#allocation11 + $0x10] sm:$0xff]  }
 0x2c7   :  { %2395 = vmatpush1.bf16.msra.mxu0 %v6638_v47  ;;  %v6711_v47 = vld [vmem:[#allocation11 + $0x58] sm:$0xff]  }
 0x2ca   :  { %2397 = vmatmul.mubr.bf16.vlgmr.msra.gmra.mrb[8].mxu0 %v1909_v8 }
 0x2cb   :  { %2406 = vmatprep.mubr.bf16.mxu0 %v1914_v32  ;;  %v6694_v32 = vld [vmem:[#allocation10 + $0x38] ss:$12 sps:$4 sm:$0xff]  }
 0x2d2   :  { %2407 = vmatmul.mubr.bf16.gmra.mrb[12].mxu0 %v1913_v12 }
 0x39d   :  { %v2398_v57 = vpop.f32.mrb[8].mxu0 }
 0x39e   :  { %v6154_v60 = vadd.f32 %v2398_v57, %v1984_v54  ;;  %v2400_v61 = vpop.f32.mrb[9].mxu0  ;;  %v6720_v57 = vld [vmem:[#allocation11 + $0x38] sm:$0xff]  }
 0x39f   :  { %v6155_v62 = vadd.f32 %v2400_v61, %v1988_v55  ;;  %v2402_v63 = vpop.f32.mrb[10].mxu0  ;;  %v6722_v61 = vld [vmem:[#allocation11 + $0x88] sm:$0xff]  }
 0x3a0   :  { %v6156_v1 = vadd.f32 %v2402_v63, %v1984_v54  ;;  %v2404_v2 = vpop.f32.mrb[11].mxu0  ;;  %v2417_v4 = vmax.f32 %v6154_v60, 0.0  ;;  %v6721_v60 = vld [vmem:[#allocation11 + $0x80] sm:$0xff]   ;;  %v6724_v63 = vld [vmem:[#allocation11 + $0x98] sm:$0xff]  }
 0x3a1   :  { %v6157_v3 = vadd.f32 %v2404_v2, %v1988_v55  ;;  %v2418_v58 = vmax.f32 %v6155_v62, 0.0  ;;  %6070 = vmatprep.subr.bf16.mxu0 %v6721_v60  ;;  %v6723_v62 = vld [vmem:[#allocation11 + $0x90] sm:$0xff]   ;;  %v6726_v2 = vld [vmem:[#allocation11 + $0xa8] sm:$0xff]  }
 0x3a2   :  { %v2419_v5 = vmax.f32 %v6156_v1, 0.0  ;;  %6071 = vmatpush3.bf16.msra.mxu0 %v6721_v60  ;;  %v6725_v1 = vld [vmem:[#allocation11 + $0xa0] sm:$0xff]  }
 0x3a3   :  { %v2420_v6 = vmax.f32 %v6157_v3, 0.0  ;;  %6072 = vmatprep.subr.bf16.mxu0 %v6722_v61  ;;  %v6727_v3 = vld [vmem:[#allocation11 + $0xb0] sm:$0xff]  }
 0x3a4   :  { %v2425_v7 = vpack.c.bf16 %v2419_v5, %v2417_v4  ;;  %v6728_v4 = vld [vmem:[#allocation11 + $0xb8] sm:$0xff]   ;;  %v2493_v5 = vld [vmem:[#allocation5 + $0x6] sm:$0x7] }
 0x3a5   :  { %v2426_v8 = vpack.c.bf16 %v2420_v6, %v2418_v58  ;;  %v2408_v10 = vpop.f32.mrb[12].mxu0  ;;  %v2498_v58 = vrot.slane %v2493_v5, %v7666_v56  ;;  %v2502_v6 = vrot.slane %v2493_v5, %v7671_v59 }
 0x3a6   :  { %v6158_v16 = vadd.f32 %v2408_v10, %v1984_v54  ;;  %v2410_v11 = vpop.f32.mrb[13].mxu0  ;;  %6073 = vmatpush3.bf16.msra.mxu0 %v6722_v61 }
 0x3a7   :  { %v6159_v18 = vadd.f32 %v2410_v11, %v1988_v55  ;;  %v2412_v19 = vpop.f32.mrb[14].mxu0  ;;  %2798 = vmatprep.mubr.bf16.mxu1 %v2426_v8  ;;  %6074 = vmatprep.subr.bf16.mxu0 %v6723_v62 }
 0x3a8   :  { %v6160_v20 = vadd.f32 %v2412_v19, %v1984_v54  ;;  %v2414_v21 = vpop.f32.mrb[15].mxu0  ;;  %2799 = vmatmul.mubr.bf16.vlgmr.msra.gmra.mrb[16].mxu1 %v2425_v7  ;;  %v2421_v27 = vmax.f32 %v6158_v16, 0.0  ;;  %v6718_v54 = vld [vmem:[#allocation11 + $0x30] sm:$0xff]  }
 0x3a9   :  { %v6161_v22 = vadd.f32 %v2414_v21, %v1988_v55  ;;  %5901 = vmatpush3.bf16.msra.mxu1 %v6690_v15  ;;  %v2422_v29 = vmax.f32 %v6159_v18, 0.0  ;;  %v6719_v55 = vld [vmem:[#allocation11 + $0x78] sm:$0xff]  }
 0x3aa   :  { %v2423_v28 = vmax.f32 %v6160_v20, 0.0  ;;  %5902 = vmatprep.subr.bf16.mxu1 %v6691_v17  ;;  %6075 = vmatpush3.bf16.msra.mxu0 %v6723_v62 }
 0x3ab   :  { %v2424_v30 = vmax.f32 %v6161_v22, 0.0  ;;  %6076 = vmatprep.subr.bf16.mxu0 %v6724_v63 }
 0x3ac   :  { %v2427_v31 = vpack.c.bf16 %v2423_v28, %v2421_v27 }
 0x3ad   :  { %v2428_v12 = vpack.c.bf16 %v2424_v30, %v2422_v29  ;;  %5903 = vmatpush3.bf16.msra.mxu1 %v6692_v26 }
 0x3ae   :  { %5904 = vmatprep.subr.bf16.mxu1 %v6693_v9  ;;  %6077 = vmatpush3.bf16.msra.mxu0 %v6724_v63 }
 0x3af   :  { %2808 = vmatprep.mubr.bf16.mxu1 %v2428_v12  ;;  %6078 = vmatprep.subr.bf16.mxu0 %v6725_v1 }
 0x3b0   :  { %2809 = vmatmul.mubr.bf16.gmra.mrb[20].mxu1 %v2427_v31 }
 0x3b1   :  { %5905 = vmatpush3.bf16.msra.mxu1 %v6694_v32  ;;  %2851 = vmatprep.mubr.bf16.mxu1 %v2426_v8 }
 0x3b2   :  { %5906 = vmatprep.subr.bf16.mxu1 %v6695_v33  ;;  %6079 = vmatpush3.bf16.msra.mxu0 %v6725_v1  ;;  %v6729_v1 = vld [vmem:[#allocation13] ss:$8 sps:$4 sm:$0xff]  }
 0x3b3   :  { %6080 = vmatprep.subr.bf16.mxu0 %v6726_v2 }
 0x3b5   :  { %5907 = vmatpush3.bf16.msra.mxu1 %v6696_v34 }
 0x3b6   :  { %5908 = vmatprep.subr.bf16.mxu1 %v6697_v13  ;;  %6081 = vmatpush3.bf16.msra.mxu0 %v6726_v2  ;;  %v6731_v2 = vld [vmem:[#allocation13 + $0x4] ss:$8 sps:$4 sm:$0xff]  }
 0x3b7   :  { %6082 = vmatprep.subr.bf16.mxu0 %v6727_v3 }
 0x3b9   :  { %5909 = vmatpush3.bf16.msra.mxu1 %v6698_v35 }
 0x3ba   :  { %5910 = vmatprep.subr.bf16.mxu1 %v6699_v36  ;;  %6083 = vmatpush3.bf16.msra.mxu0 %v6727_v3  ;;  %v6734_v3 = vld [vmem:[#allocation13 + $0x14] ss:$8 sps:$4 sm:$0xff]  }
 0x3bb   :  { %6084 = vmatprep.subr.bf16.mxu0 %v6728_v4 }
 0x3bd   :  { %5911 = vmatpush3.bf16.msra.mxu1 %v6700_v14 }
 0x3be   :  { %5912 = vmatprep.subr.bf16.mxu1 %v6701_v37  ;;  %6085 = vmatpush3.bf16.msra.mxu0 %v6728_v4  ;;  %v6732_v4 = vld [vmem:[#allocation13 + $0x10] ss:$8 sps:$4 sm:$0xff]  }
 0x3c1   :  { %5913 = vmatpush3.bf16.msra.mxu1 %v6702_v38 }
 0x3c2   :  { %5914 = vmatprep.subr.bf16.mxu1 %v6703_v39  ;;  %v2506_v39 = vrot.slane %v2493_v5, %v7686_v42  ;;  %v6737_v5 = vld [vmem:[#allocation13 + $0x24] ss:$8 sps:$4 sm:$0xff]  }
 0x3c5   :  { %5915 = vmatpush3.bf16.msra.mxu1 %v6704_v40 }
 0x3c6   :  { %5928 = vmatprep.subr.bf16.mxu1 %v6705_v41 }
 0x3c8   :  { %2852 = vmatmul.mubr.bf16.vlgmr.msra.gmra.mrb[24].mxu1 %v2425_v7 }
 0x3c9   :  { %2859 = vmatprep.mubr.bf16.mxu1 %v2428_v12  ;;  %5929 = vmatpush3.bf16.msra.mxu1 %v6706_v43 }
 0x3ca   :  { %5930 = vmatprep.subr.bf16.mxu1 %v6707_v23 }
 0x3cd   :  { %5931 = vmatpush3.bf16.msra.mxu1 %v6708_v44 }
 0x3ce   :  { %5932 = vmatprep.subr.bf16.mxu1 %v6709_v53 }
 0x3d0   :  { %2860 = vmatmul.mubr.bf16.gmra.mrb[28].mxu1 %v2427_v31 }
 0x3d1   :  { %5933 = vmatpush3.bf16.msra.mxu1 %v6710_v46 }
 0x3d2   :  { %5934 = vmatprep.subr.bf16.mxu1 %v6711_v47 }
 0x3d5   :  { %5935 = vmatpush3.bf16.msra.mxu1 %v6712_v24 }
 0x3d6   :  { %5936 = vmatprep.subr.bf16.mxu1 %v6713_v48 }
 0x3d9   :  { %5937 = vmatpush3.bf16.msra.mxu1 %v6714_v25 }
 0x3da   :  { %5938 = vmatprep.subr.bf16.mxu1 %v6715_v49 }
 0x3dd   :  { %5939 = vmatpush3.bf16.msra.mxu1 %v6716_v50 }
 0x3de   :  { %5940 = vmatprep.subr.bf16.mxu1 %v6717_v51 }
 0x3e1   :  { %5941 = vmatpush3.bf16.msra.mxu1 %v6718_v54 }
 0x3e2   :  { %5942 = vmatprep.subr.bf16.mxu1 %v6719_v55 }
 0x3e5   :  { %5943 = vmatpush3.bf16.msra.mxu1 %v6720_v57 }
 0x3e6   :  { %3297 = vmatprep.subr.bf16.mxu1 %v6731_v2 }
 0x47b   :  { %v2800_v7 = vpop.f32.mrb[16].mxu1 }
 0x47c   :  { %v2801_v8 = vadd.f32 %v2800_v7, %v2498_v58  ;;  %v2802_v10 = vpop.f32.mrb[17].mxu1  ;;  %v6738_v7 = vld [vmem:[#allocation13 + $0x30] ss:$8 sps:$4 sm:$0xff]  }
 0x47d   :  { %v2803_v15 = vadd.f32 %v2802_v10, %v2502_v6  ;;  %v2804_v16 = vpop.f32.mrb[18].mxu1  ;;  %v6741_v10 = vld [vmem:[#allocation13 + $0x40] ss:$8 sps:$4 sm:$0xff]  }
 0x47e   :  { %v2805_v11 = vadd.f32 %v2804_v16, %v2498_v58  ;;  %v2806_v17 = vpop.f32.mrb[19].mxu1  ;;  %v2868_v19 = vmax.f32 %v2801_v8, 0.0  ;;  %v6743_v8 = vld [vmem:[#allocation13 + $0x44] ss:$8 sps:$4 sm:$0xff]   ;;  %v6744_v16 = vld [vmem:[#allocation13 + $0x50] ss:$8 sps:$4 sm:$0xff]  }
 0x47f   :  { %v2807_v18 = vadd.f32 %v2806_v17, %v2502_v6  ;;  %v2869_v21 = vmax.f32 %v2803_v15, 0.0  ;;  %v6746_v15 = vld [vmem:[#allocation13 + $0x54] ss:$8 sps:$4 sm:$0xff]   ;;  %v6747_v17 = vld [vmem:[#allocation13 + $0x60] ss:$8 sps:$4 sm:$0xff]  }
 0x480   :  { %v2871_v20 = vmax.f32 %v2805_v11, 0.0  ;;  %v6749_v11 = vld [vmem:[#allocation13 + $0x64] ss:$8 sps:$4 sm:$0xff]  }
 0x481   :  { %v2872_v22 = vmax.f32 %v2807_v18, 0.0  ;;  %v6752_v18 = vld [vmem:[#allocation13 + $0x74] ss:$8 sps:$4 sm:$0xff]  }
 0x482   :  { %v2880_v26 = vpack.c.bf16 %v2871_v20, %v2868_v19  ;;  %v6750_v19 = vld [vmem:[#allocation13 + $0x70] ss:$8 sps:$4 sm:$0xff]  }
 0x483   :  { %v2881_v27 = vpack.c.bf16 %v2872_v22, %v2869_v21  ;;  %v2810_v28 = vpop.f32.mrb[20].mxu1  ;;  %v6753_v20 = vld [vmem:[#allocation14] ss:$16 sps:$4 sm:$0xff]   ;;  %v6755_v21 = vld [vmem:[#allocation14 + $0x4] ss:$16 sps:$4 sm:$0xff]  }
 0x484   :  { %v2811_v9 = vadd.f32 %v2810_v28, %v2498_v58  ;;  %v2812_v29 = vpop.f32.mrb[21].mxu1  ;;  %v6758_v22 = vld [vmem:[#allocation14 + $0xc] ss:$16 sps:$4 sm:$0xff]   ;;  %3768 = vmatprep.subr.bf16.mxu0 %v6755_v21  ;;  %v6767_v28 = vld [vmem:[#allocation14 + $0x44] ss:$16 sps:$4 sm:$0xff]  }
 0x485   :  { %v2813_v30 = vadd.f32 %v2812_v29, %v2502_v6  ;;  %v2814_v31 = vpop.f32.mrb[22].mxu1  ;;  %3117 = vmatprep.mubr.bf16.mxu1 %v2881_v27  ;;  %v6759_v27 = vld [vmem:[#allocation14 + $0x20] ss:$16 sps:$4 sm:$0xff]   ;;  %v6773_v29 = vld [vmem:[#allocation14 + $0x64] ss:$16 sps:$4 sm:$0xff]  }
 0x486   :  { %v2815_v12 = vadd.f32 %v2814_v31, %v2498_v58  ;;  %v2816_v32 = vpop.f32.mrb[23].mxu1  ;;  %3118 = vmatmul.mubr.bf16.vlgmr.msra.gmra.mrb[32].mxu1 %v2880_v26  ;;  %v2874_v34 = vmax.f32 %v2811_v9, 0.0  ;;  %v6735_v58 = vld [vmem:[#allocation13 + $0x20] ss:$8 sps:$4 sm:$0xff]   ;;  %v6761_v26 = vld [vmem:[#allocation14 + $0x24] ss:$16 sps:$4 sm:$0xff]  }
 0x487   :  { %v2817_v33 = vadd.f32 %v2816_v32, %v2502_v6  ;;  %v2875_v35 = vmax.f32 %v2813_v30, 0.0  ;;  %3298 = vmatpush1.bf16.msra.mxu1 %v6729_v1  ;;  %v6740_v6 = vld [vmem:[#allocation13 + $0x34] ss:$8 sps:$4 sm:$0xff]   ;;  %v6765_v9 = vld [vmem:[#allocation14 + $0x40] ss:$16 sps:$4 sm:$0xff]  }
 0x488   :  { %v2877_v13 = vmax.f32 %v2815_v12, 0.0  ;;  %3299 = vmatprep.subr.bf16.mxu1 %v6734_v3  ;;  %v6771_v30 = vld [vmem:[#allocation14 + $0x60] ss:$16 sps:$4 sm:$0xff]   ;;  %v6779_v31 = vld [vmem:[#allocation14 + $0x84] ss:$16 sps:$4 sm:$0xff]  }
 0x489   :  { %v2878_v36 = vmax.f32 %v2817_v33, 0.0  ;;  %v6777_v12 = vld [vmem:[#allocation14 + $0x80] ss:$16 sps:$4 sm:$0xff]   ;;  %v6785_v32 = vld [vmem:[#allocation14 + $0xa4] ss:$16 sps:$4 sm:$0xff]  }
 0x48a   :  { %v2883_v14 = vpack.c.bf16 %v2877_v13, %v2874_v34  ;;  %v6783_v33 = vld [vmem:[#allocation14 + $0xa0] ss:$16 sps:$4 sm:$0xff]   ;;  %v6791_v34 = vld [vmem:[#allocation14 + $0xc4] ss:$16 sps:$4 sm:$0xff]   ;;  %v6756_v21 = vld [vmem:[#allocation14 + $0x8] ss:$16 sps:$4 sm:$0xff]  }
 0x48b   :  { %v2884_v37 = vpack.c.bf16 %v2878_v36, %v2875_v35  ;;  %3300 = vmatpush1.bf16.msra.mxu1 %v6732_v4  ;;  %v6789_v13 = vld [vmem:[#allocation14 + $0xc0] ss:$16 sps:$4 sm:$0xff]   ;;  %v6797_v35 = vld [vmem:[#allocation14 + $0xe4] ss:$16 sps:$4 sm:$0xff]  }
 0x48c   :  { %3301 = vmatprep.subr.bf16.mxu1 %v6737_v5  ;;  %v6795_v36 = vld [vmem:[#allocation14 + $0xe0] ss:$16 sps:$4 sm:$0xff]  }
 0x48d   :  { %3125 = vmatprep.mubr.bf16.mxu1 %v2884_v37  ;;  %v6801_v37 = vld [vmem:[#allocation14 + $0x100] ss:$16 sps:$4 sm:$0xff]  }
 0x48e   :  { %3126 = vmatmul.mubr.bf16.gmra.mrb[36].mxu1 %v2883_v14  ;;  %v6803_v14 = vld [vmem:[#allocation14 + $0x104] ss:$16 sps:$4 sm:$0xff]  }
 0x48f   :  { %3329 = vmatprep.mubr.bf16.mxu1 %v7356_v0  ;;  %3302 = vmatpush1.bf16.msra.mxu1 %v6735_v58 }
 0x490   :  { %3303 = vmatprep.subr.bf16.mxu1 %v6740_v6 }
 0x493   :  { %3304 = vmatpush1.bf16.msra.mxu1 %v6738_v7 }
 0x494   :  { %3305 = vmatprep.subr.bf16.mxu1 %v6743_v8 }
 0x497   :  { %3306 = vmatpush1.bf16.msra.mxu1 %v6741_v10 }
 0x498   :  { %3307 = vmatprep.subr.bf16.mxu1 %v6746_v15 }
 0x49b   :  { %v5916_v38 = vpop.f32.mrb[24].mxu1  ;;  %3308 = vmatpush1.bf16.msra.mxu1 %v6744_v16 }
 0x49c   :  { %v5917_v40 = vpop.f32.mrb[25].mxu1  ;;  %3309 = vmatprep.subr.bf16.mxu1 %v6749_v11 }
 0x49d   :  { %v5918_v41 = vadd.f32 %v5917_v40, %v5916_v38  ;;  %v5919_v43 = vpop.f32.mrb[26].mxu1  ;;  %v6809_v38 = vld [vmem:[#allocation14 + $0x124] ss:$16 sps:$4 sm:$0xff]  }
 0x49e   :  { %v5920_v23 = vpop.f32.mrb[27].mxu1  ;;  %v6815_v40 = vld [vmem:[#allocation14 + $0x144] ss:$16 sps:$4 sm:$0xff]  }
 0x49f   :  { %v2854_v44 = vadd.f32 %v5918_v41, %v2506_v39  ;;  %v5921_v53 = vadd.f32 %v5920_v23, %v5919_v43  ;;  %3310 = vmatpush1.bf16.msra.mxu1 %v6747_v17  ;;  %v6813_v41 = vld [vmem:[#allocation14 + $0x140] ss:$16 sps:$4 sm:$0xff]   ;;  %v6821_v43 = vld [vmem:[#allocation14 + $0x164] ss:$16 sps:$4 sm:$0xff]  }
 0x4a0   :  { %3311 = vmatprep.subr.bf16.mxu1 %v6752_v18  ;;  %v6819_v23 = vld [vmem:[#allocation14 + $0x160] ss:$16 sps:$4 sm:$0xff]  }
 0x4a1   :  { %v2857_v46 = vadd.f32 %v5921_v53, %v2506_v39  ;;  %v2870_v47 = vmax.f32 %v2854_v44, 0.0  ;;  %v6827_v44 = vld [vmem:[#allocation14 + $0x184] ss:$16 sps:$4 sm:$0xff]   ;;  %v6825_v53 = vld [vmem:[#allocation14 + $0x180] ss:$16 sps:$4 sm:$0xff]  }
 0x4a3   :  { %v2873_v24 = vmax.f32 %v2857_v46, 0.0  ;;  %v5922_v48 = vpop.f32.mrb[28].mxu1  ;;  %3312 = vmatpush1.bf16.msra.mxu1 %v6750_v19  ;;  %v6833_v46 = vld [vmem:[#allocation14 + $0x1a4] ss:$16 sps:$4 sm:$0xff]  }
 0x4a4   :  { %v5923_v25 = vpop.f32.mrb[29].mxu1  ;;  %3821 = vmatprep.subr.bf16.mxu1 %v6758_v22 }
 0x4a5   :  { %v5924_v49 = vadd.f32 %v5923_v25, %v5922_v48  ;;  %v5925_v50 = vpop.f32.mrb[30].mxu1  ;;  %v2882_v51 = vpack.c.bf16 %v2873_v24, %v2870_v47  ;;  %v6831_v47 = vld [vmem:[#allocation14 + $0x1a0] ss:$16 sps:$4 sm:$0xff]  }
 0x4a6   :  { %v5926_v54 = vpop.f32.mrb[31].mxu1 }
 0x4a7   :  { %v2862_v55 = vadd.f32 %v5924_v49, %v2506_v39  ;;  %v5927_v57 = vadd.f32 %v5926_v54, %v5925_v50  ;;  %6086 = vmatprep.mubr.bf16.mxu0 %v2882_v51 }
 0x4a9   :  { %v2865_v60 = vadd.f32 %v5927_v57, %v2506_v39  ;;  %v2876_v61 = vmax.f32 %v2862_v55, 0.0  ;;  %v6807_v39 = vld [vmem:[#allocation14 + $0x120] ss:$16 sps:$4 sm:$0xff]  }
 0x4ab   :  { %v2879_v62 = vmax.f32 %v2865_v60, 0.0 }
 0x4ad   :  { %v2885_v63 = vpack.c.bf16 %v2879_v62, %v2876_v61 }
 0x4af   :  { %6087 = vmatmul.mubr.bf16.vlgmr.msra.gmra.mrb[16].mxu0 %v2885_v63  ;;  %v5645_v63 = vld [vmem:[#allocation5 + $0x9] ss:$0 sm:$0xff] }
 0x4b0   :  { %3769 = vmatpush1.bf16.msra.mxu0 %v6753_v20 }
 0x4b1   :  { %3770 = vmatprep.subr.bf16.mxu0 %v6761_v26  ;;  %v6764_v26 = vld [vmem:[#allocation14 + $0x2c] ss:$16 sps:$4 sm:$0xff]  }
 0x4b4   :  { %3771 = vmatpush1.bf16.msra.mxu0 %v6759_v27  ;;  %v6762_v27 = vld [vmem:[#allocation14 + $0x28] ss:$16 sps:$4 sm:$0xff]  }
 0x4b5   :  { %3772 = vmatprep.subr.bf16.mxu0 %v6767_v28  ;;  %v6770_v28 = vld [vmem:[#allocation14 + $0x4c] ss:$16 sps:$4 sm:$0xff]  }
 0x4b8   :  { %3773 = vmatpush1.bf16.msra.mxu0 %v6765_v9  ;;  %v6768_v9 = vld [vmem:[#allocation14 + $0x48] ss:$16 sps:$4 sm:$0xff]  }
 0x4b9   :  { %3774 = vmatprep.subr.bf16.mxu0 %v6773_v29  ;;  %v6776_v29 = vld [vmem:[#allocation14 + $0x6c] ss:$16 sps:$4 sm:$0xff]  }
 0x4bc   :  { %3775 = vmatpush1.bf16.msra.mxu0 %v6771_v30  ;;  %v6774_v30 = vld [vmem:[#allocation14 + $0x68] ss:$16 sps:$4 sm:$0xff]  }
 0x4bd   :  { %3776 = vmatprep.subr.bf16.mxu0 %v6779_v31  ;;  %v6782_v31 = vld [vmem:[#allocation14 + $0x8c] ss:$16 sps:$4 sm:$0xff]  }
 0x4c0   :  { %3777 = vmatpush1.bf16.msra.mxu0 %v6777_v12  ;;  %v6780_v12 = vld [vmem:[#allocation14 + $0x88] ss:$16 sps:$4 sm:$0xff]  }
 0x4c1   :  { %3778 = vmatprep.subr.bf16.mxu0 %v6785_v32  ;;  %v6788_v32 = vld [vmem:[#allocation14 + $0xac] ss:$16 sps:$4 sm:$0xff]  }
 0x4c4   :  { %3779 = vmatpush1.bf16.msra.mxu0 %v6783_v33  ;;  %v6786_v33 = vld [vmem:[#allocation14 + $0xa8] ss:$16 sps:$4 sm:$0xff]  }
 0x4c5   :  { %3780 = vmatprep.subr.bf16.mxu0 %v6791_v34  ;;  %v6794_v34 = vld [vmem:[#allocation14 + $0xcc] ss:$16 sps:$4 sm:$0xff]  }
 0x4c8   :  { %3781 = vmatpush1.bf16.msra.mxu0 %v6789_v13  ;;  %v6792_v13 = vld [vmem:[#allocation14 + $0xc8] ss:$16 sps:$4 sm:$0xff]  }
 0x4c9   :  { %3782 = vmatprep.subr.bf16.mxu0 %v6797_v35  ;;  %v6800_v35 = vld [vmem:[#allocation14 + $0xec] ss:$16 sps:$4 sm:$0xff]  }
 0x4cc   :  { %3783 = vmatpush1.bf16.msra.mxu0 %v6795_v36  ;;  %v6798_v36 = vld [vmem:[#allocation14 + $0xe8] ss:$16 sps:$4 sm:$0xff]  }
 0x4cd   :  { %3784 = vmatprep.subr.bf16.mxu0 %v6803_v14  ;;  %v6806_v14 = vld [vmem:[#allocation14 + $0x10c] ss:$16 sps:$4 sm:$0xff]  }
 0x4d0   :  { %3785 = vmatpush1.bf16.msra.mxu0 %v6801_v37  ;;  %v6804_v37 = vld [vmem:[#allocation14 + $0x108] ss:$16 sps:$4 sm:$0xff]  }
 0x4d1   :  { %3786 = vmatprep.subr.bf16.mxu0 %v6809_v38  ;;  %v6812_v38 = vld [vmem:[#allocation14 + $0x12c] ss:$16 sps:$4 sm:$0xff]  }
 0x4d4   :  { %3787 = vmatpush1.bf16.msra.mxu0 %v6807_v39  ;;  %v6810_v39 = vld [vmem:[#allocation14 + $0x128] ss:$16 sps:$4 sm:$0xff]  }
 0x4d5   :  { %3788 = vmatprep.subr.bf16.mxu0 %v6815_v40  ;;  %v6818_v40 = vld [vmem:[#allocation14 + $0x14c] ss:$16 sps:$4 sm:$0xff]  }
 0x4d8   :  { %3789 = vmatpush1.bf16.msra.mxu0 %v6813_v41  ;;  %v6816_v41 = vld [vmem:[#allocation14 + $0x148] ss:$16 sps:$4 sm:$0xff]  }
 0x4d9   :  { %3790 = vmatprep.subr.bf16.mxu0 %v6821_v43  ;;  %v6824_v43 = vld [vmem:[#allocation14 + $0x16c] ss:$16 sps:$4 sm:$0xff]  }
 0x4dc   :  { %3791 = vmatpush1.bf16.msra.mxu0 %v6819_v23  ;;  %v6822_v23 = vld [vmem:[#allocation14 + $0x168] ss:$16 sps:$4 sm:$0xff]  }
 0x4dd   :  { %3792 = vmatprep.subr.bf16.mxu0 %v6827_v44  ;;  %v6830_v44 = vld [vmem:[#allocation14 + $0x18c] ss:$16 sps:$4 sm:$0xff]  }
 0x4e0   :  { %3793 = vmatpush1.bf16.msra.mxu0 %v6825_v53  ;;  %v6828_v53 = vld [vmem:[#allocation14 + $0x188] ss:$16 sps:$4 sm:$0xff]  }
 0x4e1   :  { %3794 = vmatprep.subr.bf16.mxu0 %v6833_v46  ;;  %v6836_v46 = vld [vmem:[#allocation14 + $0x1ac] ss:$16 sps:$4 sm:$0xff]  }
 0x4e4   :  { %3795 = vmatpush1.bf16.msra.mxu0 %v6831_v47  ;;  %v6834_v47 = vld [vmem:[#allocation14 + $0x1a8] ss:$16 sps:$4 sm:$0xff]  }
 0x559   :  { %v5944_v24 = vpop.f32.mrb[32].mxu1 }
 0x55a   :  { %v5945_v48 = vpop.f32.mrb[33].mxu1 }
 0x55b   :  { %v5946_v25 = vadd.f32 %v5945_v48, %v5944_v24  ;;  %v5947_v49 = vpop.f32.mrb[34].mxu1  ;;  %v6839_v24 = vld [vmem:[#allocation14 + $0x1c4] ss:$16 sps:$4 sm:$0xff]   ;;  %v6842_v48 = vld [vmem:[#allocation14 + $0x1cc] ss:$16 sps:$4 sm:$0xff]  }
 0x55c   :  { %v5948_v50 = vpop.f32.mrb[35].mxu1  ;;  %3796 = vmatprep.subr.bf16.mxu0 %v6839_v24  ;;  %v6868_v24 = vld [vmem:[#allocation16 + $0xa0] sm:$0xff]  }
 0x55d   :  { %v5949_v51 = vadd.f32 %v5948_v50, %v5947_v49  ;;  %v3120_v3 = vadd.f32 %v5946_v25, %v5645_v63  ;;  %v6837_v25 = vld [vmem:[#allocation14 + $0x1c0] ss:$16 sps:$4 sm:$0xff]   ;;  %v6840_v49 = vld [vmem:[#allocation14 + $0x1c8] ss:$16 sps:$4 sm:$0xff]   ;;  %v6845_v50 = vld [vmem:[#allocation14 + $0x1e4] ss:$16 sps:$4 sm:$0xff]  }
 0x55e   :  { %3797 = vmatpush1.bf16.msra.mxu0 %v6837_v25  ;;  %v6870_v25 = vld [vmem:[#allocation16 + $0xe8] sm:$0xff]  }
 0x55f   :  { %v3123_v8 = vadd.f32 %v5949_v51, %v5645_v63  ;;  %v6848_v51 = vld [vmem:[#allocation14 + $0x1ec] ss:$16 sps:$4 sm:$0xff]   ;;  %3798 = vmatprep.subr.bf16.mxu0 %v6845_v50 }
 0x560   :  { %v6872_v50 = vld [vmem:[#allocation16 + $0xa8] sm:$0xff]  }
 0x561   :  { %v5950_v54 = vpop.f32.mrb[36].mxu1 }
 0x562   :  { %v5951_v55 = vpop.f32.mrb[37].mxu1 }
 0x563   :  { %v5952_v57 = vadd.f32 %v5951_v55, %v5950_v54  ;;  %v5953_v60 = vpop.f32.mrb[38].mxu1  ;;  %v6843_v54 = vld [vmem:[#allocation14 + $0x1e0] ss:$16 sps:$4 sm:$0xff]   ;;  %v6846_v55 = vld [vmem:[#allocation14 + $0x1e8] ss:$16 sps:$4 sm:$0xff]  }
 0x564   :  { %v5954_v61 = vpop.f32.mrb[39].mxu1  ;;  %3799 = vmatpush1.bf16.msra.mxu0 %v6843_v54  ;;  %v6874_v54 = vld [vmem:[#allocation16 + $0xf0] sm:$0xff]  }
 0x565   :  { %v5955_v62 = vadd.f32 %v5954_v61, %v5953_v60  ;;  %v3128_v1 = vadd.f32 %v5952_v57, %v5645_v63  ;;  %v6849_v57 = vld [vmem:[#allocation16 + $0x40] sm:$0xff]   ;;  %v3205_v61 = vld [vmem:[#allocation5 + $0xa] sm:$0x3] }
 0x566   :  { %v6850_v60 = vld [vmem:[#allocation16 + $0xc0] sm:$0xff]   ;;  %5966 = vmatprep.subr.bf16.mxu0 %v6849_v57  ;;  %v6876_v57 = vld [vmem:[#allocation16 + $0xb0] sm:$0xff]  }
 0x567   :  { %v3131_v58 = vadd.f32 %v5955_v62, %v5645_v63  ;;  %v3210_v62 = vrot.slane %v3205_v61, %v7666_v56  ;;  %v3214_v63 = vrot.slane %v3205_v61, %v7671_v59  ;;  %v6878_v61 = vld [vmem:[#allocation16 + $0xf8] sm:$0xff]  }
 0x582   :  { %v6088_v2 = vpop.f32.mrb[16].mxu0 }
 0x583   :  { %v3177_v4 = vadd.f32 %v6088_v2, %v3128_v1  ;;  %v3168_v5 = vpop.f32.mrb[17].mxu0 }
 0x584   :  { %v3169_v6 = vadd.f32 %v3168_v5, %v3120_v3  ;;  %v6089_v7 = vpop.f32.mrb[18].mxu0 }
 0x585   :  { %v3180_v10 = vadd.f32 %v6089_v7, %v3131_v58  ;;  %v3171_v15 = vpop.f32.mrb[19].mxu0  ;;  %v3185_v11 = vmax.f32 %v3177_v4, 0.0 }
 0x586   :  { %v3172_v16 = vadd.f32 %v3171_v15, %v3123_v8  ;;  %v3183_v18 = vmax.f32 %v3169_v6, 0.0 }
 0x587   :  { %v3186_v17 = vmax.f32 %v3180_v10, 0.0 }
 0x588   :  { %v3184_v19 = vmax.f32 %v3172_v16, 0.0 }
 0x589   :  { %v3188_v20 = vpack.c.bf16 %v3186_v17, %v3185_v11 }
 0x58a   :  { %v3187_v22 = vpack.c.bf16 %v3184_v19, %v3183_v18  ;;  %v6851_v19 = vld [vmem:[#allocation16] sm:$0xff]  }
 0x58c   :  { %3330 = vmatmul.mubr.bf16.vlgmr.msra.gmra.mrb[40].mxu1 %v3187_v22 }
 0x58d   :  { %3339 = vmatprep.mubr.bf16.mxu1 %v7356_v0  ;;  %3822 = vmatpush1.bf16.msra.mxu1 %v6756_v21 }
 0x58e   :  { %3823 = vmatprep.subr.bf16.mxu1 %v6764_v26  ;;  %v6853_v26 = vld [vmem:[#allocation16 + $0x48] sm:$0xff]  }
 0x591   :  { %3824 = vmatpush1.bf16.msra.mxu1 %v6762_v27  ;;  %v6854_v27 = vld [vmem:[#allocation16 + $0xc8] sm:$0xff]  }
 0x592   :  { %3825 = vmatprep.subr.bf16.mxu1 %v6770_v28 }
 0x594   :  { %3340 = vmatmul.mubr.bf16.gmra.mrb[44].mxu1 %v3188_v20  ;;  %v6852_v20 = vld [vmem:[#allocation16 + $0x80] sm:$0xff]  }
 0x595   :  { %3826 = vmatpush1.bf16.msra.mxu1 %v6768_v9 }
 0x596   :  { %3827 = vmatprep.subr.bf16.mxu1 %v6776_v29 }
 0x599   :  { %3828 = vmatpush1.bf16.msra.mxu1 %v6774_v30 }
 0x59a   :  { %3829 = vmatprep.subr.bf16.mxu1 %v6782_v31 }
 0x59d   :  { %3830 = vmatpush1.bf16.msra.mxu1 %v6780_v12  ;;  %v6855_v12 = vld [vmem:[#allocation16 + $0x8] sm:$0xff]  }
 0x59e   :  { %3831 = vmatprep.subr.bf16.mxu1 %v6788_v32  ;;  %v6856_v32 = vld [vmem:[#allocation16 + $0x88] sm:$0xff]  }
 0x5a1   :  { %3832 = vmatpush1.bf16.msra.mxu1 %v6786_v33 }
 0x5a2   :  { %3833 = vmatprep.subr.bf16.mxu1 %v6794_v34 }
 0x5a5   :  { %3834 = vmatpush1.bf16.msra.mxu1 %v6792_v13  ;;  %v6857_v13 = vld [vmem:[#allocation16 + $0x50] sm:$0xff]  }
 0x5a6   :  { %3835 = vmatprep.subr.bf16.mxu1 %v6800_v35  ;;  %v6858_v35 = vld [vmem:[#allocation16 + $0xd0] sm:$0xff]  }
 0x5a9   :  { %3836 = vmatpush1.bf16.msra.mxu1 %v6798_v36 }
 0x5aa   :  { %3837 = vmatprep.subr.bf16.mxu1 %v6806_v14 }
 0x5ad   :  { %3838 = vmatpush1.bf16.msra.mxu1 %v6804_v37 }
 0x5ae   :  { %3839 = vmatprep.subr.bf16.mxu1 %v6812_v38 }
 0x5b1   :  { %3840 = vmatpush1.bf16.msra.mxu1 %v6810_v39  ;;  %v6859_v39 = vld [vmem:[#allocation16 + $0x10] sm:$0xff]  }
 0x5b2   :  { %3841 = vmatprep.subr.bf16.mxu1 %v6818_v40  ;;  %v6860_v40 = vld [vmem:[#allocation16 + $0x90] sm:$0xff]  }
 0x5b5   :  { %3842 = vmatpush1.bf16.msra.mxu1 %v6816_v41  ;;  %v6861_v41 = vld [vmem:[#allocation16 + $0x58] sm:$0xff]  }
 0x5b6   :  { %3843 = vmatprep.subr.bf16.mxu1 %v6824_v43  ;;  %v6862_v43 = vld [vmem:[#allocation16 + $0xd8] sm:$0xff]  }
 0x5b9   :  { %3844 = vmatpush1.bf16.msra.mxu1 %v6822_v23  ;;  %v6863_v23 = vld [vmem:[#allocation16 + $0x18] sm:$0xff]  }
 0x5ba   :  { %3845 = vmatprep.subr.bf16.mxu1 %v6830_v44  ;;  %v6864_v44 = vld [vmem:[#allocation16 + $0x98] sm:$0xff]  }
 0x5bd   :  { %3846 = vmatpush1.bf16.msra.mxu1 %v6828_v53  ;;  %v6865_v53 = vld [vmem:[#allocation16 + $0x60] sm:$0xff]  }
 0x5be   :  { %3847 = vmatprep.subr.bf16.mxu1 %v6836_v46  ;;  %v6866_v46 = vld [vmem:[#allocation16 + $0xe0] sm:$0xff]  }
 0x5c1   :  { %3848 = vmatpush1.bf16.msra.mxu1 %v6834_v47  ;;  %v6867_v47 = vld [vmem:[#allocation16 + $0x20] sm:$0xff]  }
 0x5c2   :  { %3849 = vmatprep.subr.bf16.mxu1 %v6842_v48  ;;  %v6869_v48 = vld [vmem:[#allocation16 + $0x68] sm:$0xff]  }
 0x5c5   :  { %3850 = vmatpush1.bf16.msra.mxu1 %v6840_v49  ;;  %v6871_v49 = vld [vmem:[#allocation16 + $0x28] sm:$0xff]  }
 0x5c6   :  { %3851 = vmatprep.subr.bf16.mxu1 %v6848_v51  ;;  %v6873_v51 = vld [vmem:[#allocation16 + $0x70] sm:$0xff]  }
 0x5c9   :  { %3852 = vmatpush1.bf16.msra.mxu1 %v6846_v55  ;;  %v6875_v55 = vld [vmem:[#allocation16 + $0x30] sm:$0xff]  }
 0x5ca   :  { %5994 = vmatprep.subr.bf16.mxu1 %v6850_v60  ;;  %v6877_v60 = vld [vmem:[#allocation16 + $0x78] sm:$0xff]  }
 0x65f   :  { %v3331_v1 = vpop.f32.mrb[40].mxu1 }
 0x660   :  { %v3332_v2 = vadd.f32 %v3331_v1, %v3210_v62  ;;  %v3333_v3 = vpop.f32.mrb[41].mxu1  ;;  %v6883_v1 = vld [vmem:[#allocation17 + $0x4] ss:$12 sps:$4 sm:$0xff]  }
 0x661   :  { %v3334_v4 = vadd.f32 %v3333_v3, %v3214_v63  ;;  %v3335_v5 = vpop.f32.mrb[42].mxu1  ;;  %v3426_v3 = vld [vmem:[#allocation5 + $0xc] sm:$0xf] }
 0x662   :  { %v3336_v58 = vadd.f32 %v3335_v5, %v3210_v62  ;;  %v3337_v6 = vpop.f32.mrb[43].mxu1  ;;  %v3350_v8 = vmax.f32 %v3332_v2, 0.0  ;;  %v6890_v2 = vld [vmem:[#allocation17 + $0x8] ss:$12 sps:$4 sm:$0xff]   ;;  %v3439_v5 = vrot.slane %v3426_v3, %v7686_v42 }
 0x663   :  { %v3338_v7 = vadd.f32 %v3337_v6, %v3214_v63  ;;  %v3351_v15 = vmax.f32 %v3334_v4, 0.0  ;;  %v3431_v4 = vrot.slane %v3426_v3, %v7666_v56  ;;  %v3443_v6 = vrot.slane %v3426_v3, %v474_v45 }
 0x664   :  { %v3352_v10 = vmax.f32 %v3336_v58, 0.0  ;;  %v3435_v58 = vrot.slane %v3426_v3, %v7671_v59 }
 0x665   :  { %v3353_v16 = vmax.f32 %v3338_v7, 0.0 }
 0x666   :  { %v3358_v11 = vpack.c.bf16 %v3352_v10, %v3350_v8 }
 0x667   :  { %v3359_v17 = vpack.c.bf16 %v3353_v16, %v3351_v15  ;;  %v3341_v18 = vpop.f32.mrb[44].mxu1 }
 0x668   :  { %v3342_v21 = vadd.f32 %v3341_v18, %v3210_v62  ;;  %v3343_v22 = vpop.f32.mrb[45].mxu1 }
 0x669   :  { %v3344_v28 = vadd.f32 %v3343_v22, %v3214_v63  ;;  %v3345_v9 = vpop.f32.mrb[46].mxu1  ;;  %3800 = vmatprep.mubr.bf16.mxu0 %v3359_v17  ;;  %3853 = vmatprep.mubr.bf16.mxu1 %v3359_v17 }
 0x66a   :  { %v3346_v29 = vadd.f32 %v3345_v9, %v3210_v62  ;;  %v3347_v30 = vpop.f32.mrb[47].mxu1  ;;  %3801 = vmatmul.mubr.bf16.vlgmr.msra.gmra.mrb[20].mxu0 %v3358_v11  ;;  %3854 = vmatmul.mubr.bf16.vlgmr.msra.gmra.mrb[48].mxu1 %v3358_v11  ;;  %v3354_v33 = vmax.f32 %v3342_v21, 0.0  ;;  %v6879_v62 = vld [vmem:[#allocation16 + $0x38] sm:$0xff]  }
 0x66b   :  { %v3348_v31 = vadd.f32 %v3347_v30, %v3214_v63  ;;  %5967 = vmatpush3.bf16.msra.mxu0 %v6851_v19  ;;  %5995 = vmatpush3.bf16.msra.mxu1 %v6852_v20  ;;  %v3355_v36 = vmax.f32 %v3344_v28, 0.0  ;;  %v6880_v63 = vld [vmem:[#allocation16 + $0xb8] sm:$0xff]  }
 0x66c   :  { %v3356_v34 = vmax.f32 %v3346_v29, 0.0  ;;  %5968 = vmatprep.subr.bf16.mxu0 %v6853_v26  ;;  %5996 = vmatprep.subr.bf16.mxu1 %v6854_v27 }
 0x66d   :  { %v3357_v14 = vmax.f32 %v3348_v31, 0.0 }
 0x66e   :  { %v3360_v37 = vpack.c.bf16 %v3356_v34, %v3354_v33 }
 0x66f   :  { %v3361_v38 = vpack.c.bf16 %v3357_v14, %v3355_v36  ;;  %5969 = vmatpush3.bf16.msra.mxu0 %v6855_v12  ;;  %5997 = vmatpush3.bf16.msra.mxu1 %v6856_v32 }
 0x670   :  { %5970 = vmatprep.subr.bf16.mxu0 %v6857_v13  ;;  %5998 = vmatprep.subr.bf16.mxu1 %v6858_v35 }
 0x671   :  { %3810 = vmatprep.mubr.bf16.mxu0 %v3361_v38  ;;  %3863 = vmatprep.mubr.bf16.mxu1 %v3361_v38  ;;  %v6881_v38 = vld [vmem:[#allocation17] ss:$12 sps:$4 sm:$0xff]  }
 0x672   :  { %3811 = vmatmul.mubr.bf16.gmra.mrb[24].mxu0 %v3360_v37  ;;  %3864 = vmatmul.mubr.bf16.gmra.mrb[52].mxu1 %v3360_v37 }
 0x673   :  { %5971 = vmatpush3.bf16.msra.mxu0 %v6859_v39  ;;  %5999 = vmatpush3.bf16.msra.mxu1 %v6860_v40 }
 0x674   :  { %5972 = vmatprep.subr.bf16.mxu0 %v6861_v41  ;;  %6000 = vmatprep.subr.bf16.mxu1 %v6862_v43 }
 0x677   :  { %5973 = vmatpush3.bf16.msra.mxu0 %v6863_v23  ;;  %6001 = vmatpush3.bf16.msra.mxu1 %v6864_v44  ;;  %v6886_v23 = vld [vmem:[#allocation17 + $0x1c] ss:$12 sps:$4 sm:$0xff]   ;;  %v6894_v44 = vld [vmem:[#allocation17 + $0x20] ss:$12 sps:$4 sm:$0xff]  }
 0x678   :  { %5974 = vmatprep.subr.bf16.mxu0 %v6865_v53  ;;  %6002 = vmatprep.subr.bf16.mxu1 %v6866_v46 }
 0x67b   :  { %5975 = vmatpush3.bf16.msra.mxu0 %v6867_v47  ;;  %6003 = vmatpush3.bf16.msra.mxu1 %v6868_v24 }
 0x67c   :  { %5976 = vmatprep.subr.bf16.mxu0 %v6869_v48  ;;  %6004 = vmatprep.subr.bf16.mxu1 %v6870_v25 }
 0x67f   :  { %5977 = vmatpush3.bf16.msra.mxu0 %v6871_v49  ;;  %6005 = vmatpush3.bf16.msra.mxu1 %v6872_v50 }
 0x680   :  { %5978 = vmatprep.subr.bf16.mxu0 %v6873_v51  ;;  %6006 = vmatprep.subr.bf16.mxu1 %v6874_v54 }
 0x683   :  { %5979 = vmatpush3.bf16.msra.mxu0 %v6875_v55  ;;  %6007 = vmatpush3.bf16.msra.mxu1 %v6876_v57  ;;  %v6884_v55 = vld [vmem:[#allocation17 + $0x18] ss:$12 sps:$4 sm:$0xff]   ;;  %v6889_v57 = vld [vmem:[#allocation17 + $0x34] ss:$12 sps:$4 sm:$0xff]  }
 0x684   :  { %5980 = vmatprep.subr.bf16.mxu0 %v6877_v60  ;;  %6008 = vmatprep.subr.bf16.mxu1 %v6878_v61 }
 0x687   :  { %5981 = vmatpush3.bf16.msra.mxu0 %v6879_v62  ;;  %6009 = vmatpush3.bf16.msra.mxu1 %v6880_v63 }
 0x688   :  { %4442 = vmatprep.subr.bf16.mxu0 %v6883_v1  ;;  %6090 = vmatprep.subr.bf16.mxu1 %v6890_v2  ;;  %v6898_v1 = vld [vmem:[#allocation17 + $0x38] ss:$12 sps:$4 sm:$0xff]  }
 0x73d   :  { %v3802_v7 = vpop.f32.mrb[20].mxu0  ;;  %v3855_v8 = vpop.f32.mrb[48].mxu1 }
 0x73e   :  { %v3803_v10 = vadd.f32 %v3802_v7, %v3431_v4  ;;  %v3856_v15 = vadd.f32 %v3855_v8, %v3439_v5  ;;  %v3804_v16 = vpop.f32.mrb[21].mxu0  ;;  %v3857_v11 = vpop.f32.mrb[49].mxu1 }
 0x73f   :  { %v3805_v17 = vadd.f32 %v3804_v16, %v3435_v58  ;;  %v3858_v18 = vadd.f32 %v3857_v11, %v3443_v6  ;;  %v3806_v19 = vpop.f32.mrb[22].mxu0  ;;  %v3859_v20 = vpop.f32.mrb[50].mxu1  ;;  %v6891_v16 = vld [vmem:[#allocation17 + $0x48] ss:$12 sps:$4 sm:$0xff]   ;;  %v6897_v11 = vld [vmem:[#allocation17 + $0x64] ss:$12 sps:$4 sm:$0xff]  }
 0x740   :  { %v3807_v21 = vadd.f32 %v3806_v19, %v3431_v4  ;;  %v3860_v22 = vadd.f32 %v3859_v20, %v3439_v5  ;;  %v3808_v26 = vpop.f32.mrb[23].mxu0  ;;  %v3861_v27 = vpop.f32.mrb[51].mxu1  ;;  %v3874_v29 = vmax.f32 %v3803_v10, 0.0  ;;  %v3876_v30 = vmax.f32 %v3856_v15, 0.0  ;;  %v6902_v19 = vld [vmem:[#allocation17 + $0x50] ss:$12 sps:$4 sm:$0xff]  }
 0x741   :  { %v3809_v28 = vadd.f32 %v3808_v26, %v3435_v58  ;;  %v3862_v9 = vadd.f32 %v3861_v27, %v3443_v6  ;;  %v3875_v31 = vmax.f32 %v3805_v17, 0.0  ;;  %v3877_v12 = vmax.f32 %v3858_v18, 0.0  ;;  %v6895_v17 = vld [vmem:[#allocation17 + $0x60] ss:$12 sps:$4 sm:$0xff]   ;;  %v6901_v18 = vld [vmem:[#allocation17 + $0x7c] ss:$12 sps:$4 sm:$0xff]  }
 0x742   :  { %v3878_v52 = vmax.f32 %v3807_v21, 0.0  ;;  %v3880_v45 = vmax.f32 %v3860_v22, 0.0  ;;  %v6899_v20 = vld [vmem:[#allocation17 + $0x78] ss:$12 sps:$4 sm:$0xff]   ;;  %v6905_v21 = vld [vmem:[#allocation17 + $0x94] ss:$12 sps:$4 sm:$0xff]  }
 0x743   :  { %v3879_v32 = vmax.f32 %v3809_v28, 0.0  ;;  %v3881_v33 = vmax.f32 %v3862_v9, 0.0  ;;  %v6906_v22 = vld [vmem:[#allocation17 + $0x68] ss:$12 sps:$4 sm:$0xff]   ;;  %v6903_v26 = vld [vmem:[#allocation17 + $0x90] ss:$12 sps:$4 sm:$0xff]  }
 0x744   :  { %v3890_v34 = vpack.c.bf16 %v3878_v52, %v3874_v29  ;;  %v3892_v13 = vpack.c.bf16 %v3880_v45, %v3876_v30  ;;  %v6909_v27 = vld [vmem:[#allocation17 + $0xac] ss:$12 sps:$4 sm:$0xff]   ;;  %v6907_v9 = vld [vmem:[#allocation17 + $0xa8] ss:$12 sps:$4 sm:$0xff]   ;;  %v6912_v30 = vld [vmem:[#allocation17 + $0xb0] ss:$12 sps:$4 sm:$0xff]  }
 0x745   :  { %v3891_v35 = vpack.c.bf16 %v3879_v32, %v3875_v31  ;;  %v3893_v36 = vpack.c.bf16 %v3881_v33, %v3877_v12  ;;  %v3812_v14 = vpop.f32.mrb[24].mxu0  ;;  %v3865_v37 = vpop.f32.mrb[52].mxu1  ;;  %v6910_v28 = vld [vmem:[#allocation17 + $0x80] ss:$12 sps:$4 sm:$0xff]   ;;  %v6911_v29 = vld [vmem:[#allocation17 + $0x98] ss:$12 sps:$4 sm:$0xff]  }
 0x746   :  { %v3813_v39 = vadd.f32 %v3812_v14, %v3431_v4  ;;  %v3866_v40 = vadd.f32 %v3865_v37, %v3439_v5  ;;  %v3814_v41 = vpop.f32.mrb[25].mxu0  ;;  %v3867_v43 = vpop.f32.mrb[53].mxu1  ;;  %v6915_v52 = vld [vmem:[#allocation19 + $0x4] ss:$8 sps:$4 sm:$0xff]   ;;  %v5750_v12 = vld [vmem:[#allocation5 + $0x10] ss:$0 sm:$0xff] }
 0x747   :  { %v3815_v53 = vadd.f32 %v3814_v41, %v3435_v58  ;;  %v3868_v46 = vadd.f32 %v3867_v43, %v3443_v6  ;;  %v3816_v47 = vpop.f32.mrb[26].mxu0  ;;  %v3869_v24 = vpop.f32.mrb[54].mxu1  ;;  %4193 = vmatprep.mubr.bf16.mxu0 %v3891_v35  ;;  %4242 = vmatprep.mubr.bf16.mxu1 %v3893_v36 }
 0x748   :  { %v3817_v48 = vadd.f32 %v3816_v47, %v3431_v4  ;;  %v3870_v25 = vadd.f32 %v3869_v24, %v3439_v5  ;;  %v3818_v49 = vpop.f32.mrb[27].mxu0  ;;  %v3871_v50 = vpop.f32.mrb[55].mxu1  ;;  %4194 = vmatmul.mubr.bf16.vlgmr.msra.gmra.mrb[28].mxu0 %v3890_v34  ;;  %4243 = vmatmul.mubr.bf16.vlgmr.msra.gmra.mrb[56].mxu1 %v3892_v13  ;;  %v3882_v60 = vmax.f32 %v3813_v39, 0.0  ;;  %v3884_v61 = vmax.f32 %v3866_v40, 0.0 }
 0x749   :  { %v3819_v51 = vadd.f32 %v3818_v49, %v3435_v58  ;;  %v3872_v54 = vadd.f32 %v3871_v50, %v3443_v6  ;;  %4443 = vmatpush1.bf16.msra.mxu0 %v6881_v38  ;;  %6091 = vmatpush3.bf16.msra.mxu1 %v6890_v2  ;;  %v3883_v3 = vmax.f32 %v3815_v53, 0.0  ;;  %v3885_v4 = vmax.f32 %v3868_v46, 0.0  ;;  %v6887_v6 = vld [vmem:[#allocation17 + $0x30] ss:$12 sps:$4 sm:$0xff]   ;;  %v6893_v2 = vld [vmem:[#allocation17 + $0x4c] ss:$12 sps:$4 sm:$0xff]  }
 0x74a   :  { %v3886_v62 = vmax.f32 %v3817_v48, 0.0  ;;  %v3888_v63 = vmax.f32 %v3870_v25, 0.0  ;;  %4444 = vmatprep.subr.bf16.mxu0 %v6886_v23  ;;  %6092 = vmatprep.subr.bf16.mxu1 %v6894_v44 }
 0x74b   :  { %v3887_v5 = vmax.f32 %v3819_v51, 0.0  ;;  %v3889_v7 = vmax.f32 %v3872_v54, 0.0 }
 0x74c   :  { %v3894_v8 = vpack.c.bf16 %v3886_v62, %v3882_v60  ;;  %v3896_v10 = vpack.c.bf16 %v3888_v63, %v3884_v61 }
 0x74d   :  { %v3895_v15 = vpack.c.bf16 %v3887_v5, %v3883_v3  ;;  %v3897_v58 = vpack.c.bf16 %v3889_v7, %v3885_v4  ;;  %4445 = vmatpush1.bf16.msra.mxu0 %v6884_v55  ;;  %6093 = vmatpush3.bf16.msra.mxu1 %v6894_v44  ;;  %v6916_v5 = vld [vmem:[#allocation19 + $0x10] ss:$8 sps:$4 sm:$0xff]  }
 0x74e   :  { %4446 = vmatprep.subr.bf16.mxu0 %v6889_v57  ;;  %6094 = vmatprep.subr.bf16.mxu1 %v6898_v1  ;;  %v6913_v57 = vld [vmem:[#allocation19] ss:$8 sps:$4 sm:$0xff]  }
 0x74f   :  { %4201 = vmatprep.mubr.bf16.mxu0 %v3895_v15  ;;  %4250 = vmatprep.mubr.bf16.mxu1 %v3897_v58  ;;  %v6919_v58 = vld [vmem:[#allocation19 + $0x20] ss:$8 sps:$4 sm:$0xff]  }
 0x750   :  { %4202 = vmatmul.mubr.bf16.gmra.mrb[32].mxu0 %v3894_v8  ;;  %4251 = vmatmul.mubr.bf16.gmra.mrb[60].mxu1 %v3896_v10  ;;  %v6921_v8 = vld [vmem:[#allocation19 + $0x24] ss:$8 sps:$4 sm:$0xff]  }
 0x751   :  { %4447 = vmatpush1.bf16.msra.mxu0 %v6887_v6  ;;  %6095 = vmatpush3.bf16.msra.mxu1 %v6898_v1  ;;  %v6918_v1 = vld [vmem:[#allocation19 + $0x14] ss:$8 sps:$4 sm:$0xff]  }
 0x752   :  { %4448 = vmatprep.subr.bf16.mxu0 %v6893_v2  ;;  %4474 = vmatprep.mubr.bf16.mxu0 %v7356_v0  ;;  %v6924_v2 = vld [vmem:[#allocation19 + $0x34] ss:$8 sps:$4 sm:$0xff]  }
 0x753   :  { %6096 = vmatprep.subr.bf16.mxu1 %v6902_v19 }
 0x755   :  { %4449 = vmatpush1.bf16.msra.mxu0 %v6891_v16  ;;  %6097 = vmatpush3.bf16.msra.mxu1 %v6902_v19  ;;  %v6922_v16 = vld [vmem:[#allocation19 + $0x30] ss:$8 sps:$4 sm:$0xff]  }
 0x756   :  { %4450 = vmatprep.subr.bf16.mxu0 %v6897_v11  ;;  %6098 = vmatprep.subr.bf16.mxu1 %v6906_v22  ;;  %v6927_v11 = vld [vmem:[#allocation19 + $0x44] ss:$8 sps:$4 sm:$0xff]   ;;  %v6928_v19 = vld [vmem:[#allocation19 + $0x50] ss:$8 sps:$4 sm:$0xff]  }
 0x759   :  { %4451 = vmatpush1.bf16.msra.mxu0 %v6895_v17  ;;  %6099 = vmatpush3.bf16.msra.mxu1 %v6906_v22  ;;  %v6925_v17 = vld [vmem:[#allocation19 + $0x40] ss:$8 sps:$4 sm:$0xff]   ;;  %v6936_v22 = vld [vmem:[#allocation19 + $0x74] ss:$8 sps:$4 sm:$0xff]  }
 0x75a   :  { %4452 = vmatprep.subr.bf16.mxu0 %v6901_v18  ;;  %6100 = vmatprep.subr.bf16.mxu1 %v6910_v28  ;;  %v6930_v18 = vld [vmem:[#allocation19 + $0x54] ss:$8 sps:$4 sm:$0xff]  }
 0x75d   :  { %4453 = vmatpush1.bf16.msra.mxu0 %v6899_v20  ;;  %6101 = vmatpush3.bf16.msra.mxu1 %v6910_v28  ;;  %v6933_v20 = vld [vmem:[#allocation19 + $0x64] ss:$8 sps:$4 sm:$0xff]   ;;  %v6937_v28 = vld [vmem:[#allocation19 + $0x80] ss:$8 sps:$4 sm:$0xff]  }
 0x75e   :  { %4454 = vmatprep.subr.bf16.mxu0 %v6905_v21  ;;  %6102 = vmatprep.subr.bf16.mxu1 %v6911_v29  ;;  %v6931_v21 = vld [vmem:[#allocation19 + $0x60] ss:$8 sps:$4 sm:$0xff]  }
 0x761   :  { %4455 = vmatpush1.bf16.msra.mxu0 %v6903_v26  ;;  %6103 = vmatpush3.bf16.msra.mxu1 %v6911_v29  ;;  %v6934_v26 = vld [vmem:[#allocation19 + $0x70] ss:$8 sps:$4 sm:$0xff]  }
 0x762   :  { %4456 = vmatprep.subr.bf16.mxu0 %v6909_v27  ;;  %6104 = vmatprep.subr.bf16.mxu1 %v6912_v30  ;;  %v6939_v27 = vld [vmem:[#allocation19 + $0x84] ss:$8 sps:$4 sm:$0xff]   ;;  %v6940_v29 = vld [vmem:[#allocation19 + $0x90] ss:$8 sps:$4 sm:$0xff]  }
 0x765   :  { %4457 = vmatpush1.bf16.msra.mxu0 %v6907_v9  ;;  %6105 = vmatpush3.bf16.msra.mxu1 %v6912_v30  ;;  %v6942_v9 = vld [vmem:[#allocation19 + $0x94] ss:$8 sps:$4 sm:$0xff]   ;;  %v6945_v30 = vld [vmem:[#allocation19 + $0xa4] ss:$8 sps:$4 sm:$0xff]  }
 0x766   :  { %4862 = vmatprep.subr.bf16.mxu0 %v6915_v52  ;;  %v6943_v52 = vld [vmem:[#allocation19 + $0xa0] ss:$8 sps:$4 sm:$0xff]  }
 0x81b   :  { %v5982_v45 = vpop.f32.mrb[28].mxu0  ;;  %v6010_v31 = vpop.f32.mrb[56].mxu1 }
 0x81c   :  { %v5983_v32 = vpop.f32.mrb[29].mxu0  ;;  %v6011_v33 = vpop.f32.mrb[57].mxu1 }
 0x81d   :  { %v5984_v34 = vadd.f32 %v5983_v32, %v5982_v45  ;;  %v6012_v13 = vadd.f32 %v6011_v33, %v6010_v31  ;;  %v5985_v35 = vpop.f32.mrb[30].mxu0  ;;  %v6013_v36 = vpop.f32.mrb[58].mxu1  ;;  %v6948_v45 = vld [vmem:[#allocation19 + $0xb4] ss:$8 sps:$4 sm:$0xff]   ;;  %v6946_v31 = vld [vmem:[#allocation19 + $0xb0] ss:$8 sps:$4 sm:$0xff]  }
 0x81e   :  { %v5986_v14 = vpop.f32.mrb[31].mxu0  ;;  %v6014_v37 = vpop.f32.mrb[59].mxu1  ;;  %v6949_v32 = vld [vmem:[#allocation19 + $0xc0] ss:$8 sps:$4 sm:$0xff]   ;;  %v6954_v33 = vld [vmem:[#allocation19 + $0xd4] ss:$8 sps:$4 sm:$0xff]  }
 0x81f   :  { %v4196_v38 = vadd.f32 %v5984_v34, %v5750_v12  ;;  %v5987_v39 = vadd.f32 %v5986_v14, %v5985_v35  ;;  %v6015_v40 = vadd.f32 %v6014_v37, %v6013_v36  ;;  %v6952_v34 = vld [vmem:[#allocation19 + $0xd0] ss:$8 sps:$4 sm:$0xff]   ;;  %v6955_v35 = vld [vmem:[#allocation19 + $0xe0] ss:$8 sps:$4 sm:$0xff]   ;;  %v6960_v36 = vld [vmem:[#allocation19 + $0xf4] ss:$8 sps:$4 sm:$0xff]  }
 0x820   :  { %v6958_v14 = vld [vmem:[#allocation19 + $0xf0] ss:$8 sps:$4 sm:$0xff]   ;;  %v6963_v37 = vld [vmem:[#allocation19 + $0x104] ss:$8 sps:$4 sm:$0xff]  }
 0x821   :  { %v4245_v41 = vadd.f32 %v6012_v13, %v4196_v38  ;;  %v4199_v43 = vadd.f32 %v5987_v39, %v5750_v12  ;;  %v6957_v13 = vld [vmem:[#allocation19 + $0xe4] ss:$8 sps:$4 sm:$0xff]  }
 0x822   :  { %v6985_v38 = vld [vmem:[#allocation20 + $0x40] sm:$0xff]  }
 0x823   :  { %v4248_v23 = vadd.f32 %v6015_v40, %v4199_v43  ;;  %v5988_v44 = vpop.f32.mrb[32].mxu0  ;;  %v6016_v53 = vpop.f32.mrb[60].mxu1  ;;  %v4259_v24 = vmax.f32 %v4245_v41, 0.0  ;;  %v6986_v39 = vld [vmem:[#allocation20] sm:$0xff]   ;;  %v6987_v40 = vld [vmem:[#allocation20 + $0x48] sm:$0xff]   ;;  %6032 = vmatprep.subr.bf16.mxu1 %v6985_v38  ;;  %v6989_v43 = vld [vmem:[#allocation20 + $0x50] sm:$0xff]  }
 0x824   :  { %v5989_v46 = vpop.f32.mrb[33].mxu0  ;;  %v6017_v47 = vpop.f32.mrb[61].mxu1  ;;  %v6988_v41 = vld [vmem:[#allocation20 + $0x8] sm:$0xff]  }
 0x825   :  { %v4260_v48 = vmax.f32 %v4248_v23, 0.0  ;;  %v5990_v25 = vadd.f32 %v5989_v46, %v5988_v44  ;;  %v6018_v49 = vadd.f32 %v6017_v47, %v6016_v53  ;;  %v5991_v50 = vpop.f32.mrb[34].mxu0  ;;  %v6019_v51 = vpop.f32.mrb[62].mxu1  ;;  %v6990_v23 = vld [vmem:[#allocation20 + $0x10] sm:$0xff]   ;;  %v6991_v44 = vld [vmem:[#allocation20 + $0x58] sm:$0xff]   ;;  %v6993_v46 = vld [vmem:[#allocation20 + $0x60] sm:$0xff]  }
 0x826   :  { %v5992_v54 = vpop.f32.mrb[35].mxu0  ;;  %v6020_v55 = vpop.f32.mrb[63].mxu1  ;;  %v6992_v53 = vld [vmem:[#allocation20 + $0x18] sm:$0xff]   ;;  %v6994_v47 = vld [vmem:[#allocation20 + $0x20] sm:$0xff]  }
 0x827   :  { %v4263_v60 = vpack.c.bf16 %v4260_v48, %v4259_v24  ;;  %v4204_v61 = vadd.f32 %v5990_v25, %v5750_v12  ;;  %v5993_v62 = vadd.f32 %v5992_v54, %v5991_v50  ;;  %v6021_v63 = vadd.f32 %v6020_v55, %v6019_v51  ;;  %v6995_v24 = vld [vmem:[#allocation20 + $0x68] sm:$0xff]   ;;  %v4297_v48 = vld [vmem:[#allocation5 + $0x11] sm:$0x7] }
 0x828   :  { %v4302_v25 = vrot.slane %v4297_v48, %v7666_v56  ;;  %v6967_v38 = vld [vmem:[#allocation19 + $0x120] ss:$8 sps:$4 sm:$0xff]  }
 0x829   :  { %v4253_v3 = vadd.f32 %v6018_v49, %v4204_v61  ;;  %v4207_v4 = vadd.f32 %v5993_v62, %v5750_v12  ;;  %4475 = vmatmul.mubr.bf16.vlgmr.msra.gmra.mrb[36].mxu0 %v4263_v60  ;;  %6106 = vmatprep.mubr.bf16.mxu1 %v4263_v60  ;;  %v6951_v12 = vld [vmem:[#allocation19 + $0xc4] ss:$8 sps:$4 sm:$0xff]   ;;  %v4306_v49 = vrot.slane %v4297_v48, %v7671_v59 }
 0x82a   :  { %4484 = vmatprep.mubr.bf16.mxu0 %v7356_v0  ;;  %4863 = vmatpush1.bf16.msra.mxu0 %v6913_v57 }
 0x82b   :  { %v4256_v7 = vadd.f32 %v6021_v63, %v4207_v4  ;;  %4864 = vmatprep.subr.bf16.mxu0 %v6918_v1  ;;  %v4261_v10 = vmax.f32 %v4253_v3, 0.0  ;;  %v4310_v3 = vrot.slane %v4297_v48, %v7686_v42  ;;  %v6996_v48 = vld [vmem:[#allocation20 + $0x28] sm:$0xff]  }
 0x82d   :  { %v4262_v15 = vmax.f32 %v4256_v7, 0.0 }
 0x82e   :  { %4865 = vmatpush1.bf16.msra.mxu0 %v6916_v5 }
 0x82f   :  { %v4264_v6 = vpack.c.bf16 %v4262_v15, %v4261_v10  ;;  %4866 = vmatprep.subr.bf16.mxu0 %v6921_v8 }
 0x831   :  { %4485 = vmatmul.mubr.bf16.gmra.mrb[40].mxu0 %v4264_v6  ;;  %6107 = vmatmul.mubr.bf16.vlgmr.msra.gmra.mrb[64].mxu1 %v4264_v6 }
 0x832   :  { %4867 = vmatpush1.bf16.msra.mxu0 %v6919_v58  ;;  %6033 = vmatpush3.bf16.msra.mxu1 %v6986_v39  ;;  %v6961_v58 = vld [vmem:[#allocation19 + $0x100] ss:$8 sps:$4 sm:$0xff]   ;;  %v6972_v39 = vld [vmem:[#allocation19 + $0x134] ss:$8 sps:$4 sm:$0xff]  }
 0x833   :  { %4868 = vmatprep.subr.bf16.mxu0 %v6924_v2  ;;  %6034 = vmatprep.subr.bf16.mxu1 %v6987_v40  ;;  %v6970_v40 = vld [vmem:[#allocation19 + $0x130] ss:$8 sps:$4 sm:$0xff]  }
 0x836   :  { %4869 = vmatpush1.bf16.msra.mxu0 %v6922_v16  ;;  %6035 = vmatpush3.bf16.msra.mxu1 %v6988_v41  ;;  %v6975_v41 = vld [vmem:[#allocation19 + $0x144] ss:$8 sps:$4 sm:$0xff]  }
 0x837   :  { %4870 = vmatprep.subr.bf16.mxu0 %v6927_v11  ;;  %6036 = vmatprep.subr.bf16.mxu1 %v6989_v43  ;;  %v6973_v43 = vld [vmem:[#allocation19 + $0x140] ss:$8 sps:$4 sm:$0xff]  }
 0x83a   :  { %4871 = vmatpush1.bf16.msra.mxu0 %v6925_v17  ;;  %6037 = vmatpush3.bf16.msra.mxu1 %v6990_v23  ;;  %v6966_v17 = vld [vmem:[#allocation19 + $0x114] ss:$8 sps:$4 sm:$0xff]  }
 0x83b   :  { %4872 = vmatprep.subr.bf16.mxu0 %v6930_v18  ;;  %6038 = vmatprep.subr.bf16.mxu1 %v6991_v44  ;;  %v6978_v23 = vld [vmem:[#allocation19 + $0x154] ss:$8 sps:$4 sm:$0xff]   ;;  %v6976_v44 = vld [vmem:[#allocation19 + $0x150] ss:$8 sps:$4 sm:$0xff]  }
 0x83e   :  { %4873 = vmatpush1.bf16.msra.mxu0 %v6928_v19  ;;  %6039 = vmatpush3.bf16.msra.mxu1 %v6992_v53  ;;  %v6981_v53 = vld [vmem:[#allocation19 + $0x164] ss:$8 sps:$4 sm:$0xff]  }
 0x83f   :  { %4874 = vmatprep.subr.bf16.mxu0 %v6933_v20  ;;  %6040 = vmatprep.subr.bf16.mxu1 %v6993_v46  ;;  %v6979_v46 = vld [vmem:[#allocation19 + $0x160] ss:$8 sps:$4 sm:$0xff]  }
 0x842   :  { %4875 = vmatpush1.bf16.msra.mxu0 %v6931_v21  ;;  %6041 = vmatpush3.bf16.msra.mxu1 %v6994_v47  ;;  %v6984_v47 = vld [vmem:[#allocation19 + $0x174] ss:$8 sps:$4 sm:$0xff]  }
 0x843   :  { %4876 = vmatprep.subr.bf16.mxu0 %v6936_v22  ;;  %6042 = vmatprep.subr.bf16.mxu1 %v6995_v24  ;;  %v6982_v24 = vld [vmem:[#allocation19 + $0x170] ss:$8 sps:$4 sm:$0xff]  }
 0x846   :  { %4877 = vmatpush1.bf16.msra.mxu0 %v6934_v26  ;;  %6043 = vmatpush3.bf16.msra.mxu1 %v6996_v48 }
 0x847   :  { %4878 = vmatprep.subr.bf16.mxu0 %v6939_v27 }
 0x84a   :  { %4879 = vmatpush1.bf16.msra.mxu0 %v6937_v28 }
 0x84b   :  { %4880 = vmatprep.subr.bf16.mxu0 %v6942_v9 }
 0x84e   :  { %4881 = vmatpush1.bf16.msra.mxu0 %v6940_v29  ;;  %v6964_v29 = vld [vmem:[#allocation19 + $0x110] ss:$8 sps:$4 sm:$0xff]  }
 0x84f   :  { %4882 = vmatprep.subr.bf16.mxu0 %v6945_v30 }
 0x852   :  { %4883 = vmatpush1.bf16.msra.mxu0 %v6943_v52 }
 0x853   :  { %4884 = vmatprep.subr.bf16.mxu0 %v6948_v45 }
 0x856   :  { %4885 = vmatpush1.bf16.msra.mxu0 %v6946_v31 }
 0x857   :  { %4886 = vmatprep.subr.bf16.mxu0 %v6951_v12  ;;  %v6969_v12 = vld [vmem:[#allocation19 + $0x124] ss:$8 sps:$4 sm:$0xff]  }
 0x85a   :  { %4887 = vmatpush1.bf16.msra.mxu0 %v6949_v32 }
 0x85b   :  { %4888 = vmatprep.subr.bf16.mxu0 %v6954_v33 }
 0x85e   :  { %4889 = vmatpush1.bf16.msra.mxu0 %v6952_v34 }
 0x85f   :  { %4890 = vmatprep.subr.bf16.mxu0 %v6957_v13 }
 0x862   :  { %4891 = vmatpush1.bf16.msra.mxu0 %v6955_v35 }
 0x863   :  { %4892 = vmatprep.subr.bf16.mxu0 %v6960_v36 }
 0x866   :  { %4893 = vmatpush1.bf16.msra.mxu0 %v6958_v14 }
 0x867   :  { %4915 = vmatprep.subr.bf16.mxu0 %v6963_v37 }
 0x8fc   :  { %v4476_v50 = vpop.f32.mrb[36].mxu0 }
 0x8fd   :  { %v4477_v51 = vadd.f32 %v4476_v50, %v4302_v25  ;;  %v4478_v54 = vpop.f32.mrb[37].mxu0  ;;  %v6999_v50 = vld [vmem:[#allocation20 + $0x78] sm:$0xff]  }
 0x8fe   :  { %v4479_v55 = vadd.f32 %v4478_v54, %v4306_v49  ;;  %v4480_v57 = vpop.f32.mrb[38].mxu0  ;;  %v7001_v54 = vld [vmem:[#allocation22] sm:$0xff]  }
 0x8ff   :  { %v4481_v60 = vadd.f32 %v4480_v57, %v4302_v25  ;;  %v4482_v61 = vpop.f32.mrb[39].mxu0  ;;  %v4544_v63 = vmax.f32 %v4477_v51, 0.0  ;;  %v7000_v51 = vld [vmem:[#allocation20 + $0x38] sm:$0xff]  }
 0x900   :  { %v4483_v62 = vadd.f32 %v4482_v61, %v4306_v49  ;;  %v4545_v4 = vmax.f32 %v4479_v55, 0.0  ;;  %v4610_v55 = vld [vmem:[#allocation5 + $0x14] sm:$0x3] }
 0x901   :  { %v4547_v1 = vmax.f32 %v4481_v60, 0.0  ;;  %v4615_v57 = vrot.slane %v4610_v55, %v7666_v56  ;;  %v4619_v60 = vrot.slane %v4610_v55, %v7671_v59  ;;  %v7002_v56 = vld [vmem:[#allocation22 + $0x8] sm:$0xff]  }
 0x902   :  { %v4548_v5 = vmax.f32 %v4483_v62, 0.0 }
 0x903   :  { %v4556_v7 = vpack.c.bf16 %v4547_v1, %v4544_v63 }
 0x904   :  { %v4557_v8 = vpack.c.bf16 %v4548_v5, %v4545_v4  ;;  %v4486_v10 = vpop.f32.mrb[40].mxu0  ;;  %v6108_v15 = vpop.f32.mrb[64].mxu1 }
 0x905   :  { %v4487_v6 = vadd.f32 %v4486_v10, %v4302_v25  ;;  %v4538_v2 = vadd.f32 %v6108_v15, %v4310_v3  ;;  %v4488_v16 = vpop.f32.mrb[41].mxu0  ;;  %v4529_v11 = vpop.f32.mrb[65].mxu1 }
 0x906   :  { %v4489_v18 = vadd.f32 %v4488_v16, %v4306_v49  ;;  %v4530_v19 = vadd.f32 %v4529_v11, %v4310_v3  ;;  %v4490_v20 = vpop.f32.mrb[42].mxu0  ;;  %v6109_v21 = vpop.f32.mrb[66].mxu1  ;;  %4894 = vmatprep.mubr.bf16.mxu0 %v4557_v8 }
 0x907   :  { %v4491_v22 = vadd.f32 %v4490_v20, %v4302_v25  ;;  %v4541_v26 = vadd.f32 %v6109_v21, %v4310_v3  ;;  %v4492_v42 = vpop.f32.mrb[43].mxu0  ;;  %v4532_v27 = vpop.f32.mrb[67].mxu1  ;;  %4895 = vmatmul.mubr.bf16.vlgmr.msra.gmra.mrb[44].mxu0 %v4556_v7  ;;  %v4550_v30 = vmax.f32 %v4487_v6, 0.0  ;;  %v4552_v52 = vmax.f32 %v4538_v2, 0.0  ;;  %v6997_v25 = vld [vmem:[#allocation20 + $0x70] sm:$0xff]  }
 0x908   :  { %v4493_v28 = vadd.f32 %v4492_v42, %v4306_v49  ;;  %v4533_v9 = vadd.f32 %v4532_v27, %v4310_v3  ;;  %4916 = vmatpush1.bf16.msra.mxu0 %v6961_v58  ;;  %v4551_v32 = vmax.f32 %v4489_v18, 0.0  ;;  %v4546_v33 = vmax.f32 %v4530_v19, 0.0  ;;  %v6998_v49 = vld [vmem:[#allocation20 + $0x30] sm:$0xff]   ;;  %6044 = vmatprep.subr.bf16.mxu1 %v6997_v25 }
 0x909   :  { %v4553_v45 = vmax.f32 %v4491_v22, 0.0  ;;  %v4555_v31 = vmax.f32 %v4541_v26, 0.0  ;;  %4917 = vmatprep.subr.bf16.mxu0 %v6966_v17  ;;  %6045 = vmatpush3.bf16.msra.mxu1 %v6998_v49  ;;  %v7003_v26 = vld [vmem:[#allocation22 + $0x10] sm:$0xff]  }
 0x90a   :  { %v4554_v34 = vmax.f32 %v4493_v28, 0.0  ;;  %v4549_v13 = vmax.f32 %v4533_v9, 0.0  ;;  %6046 = vmatprep.subr.bf16.mxu1 %v6999_v50 }
 0x90b   :  { %v4559_v35 = vpack.c.bf16 %v4553_v45, %v4550_v30  ;;  %v4561_v36 = vpack.c.bf16 %v4555_v31, %v4552_v52  ;;  %v7005_v30 = vld [vmem:[#allocation22 + $0x20] sm:$0xff]   ;;  %v7006_v52 = vld [vmem:[#allocation22 + $0x28] sm:$0xff]   ;;  %v7007_v45 = vld [vmem:[#allocation22 + $0x30] sm:$0xff]  }
 0x90c   :  { %v4560_v14 = vpack.c.bf16 %v4554_v34, %v4551_v32  ;;  %v4558_v37 = vpack.c.bf16 %v4549_v13, %v4546_v33  ;;  %4918 = vmatpush1.bf16.msra.mxu0 %v6964_v29  ;;  %v7004_v29 = vld [vmem:[#allocation22 + $0x18] sm:$0xff]  }
 0x90d   :  { %4919 = vmatprep.subr.bf16.mxu0 %v6969_v12  ;;  %6047 = vmatpush3.bf16.msra.mxu1 %v7000_v51  ;;  %v7008_v31 = vld [vmem:[#allocation22 + $0x38] sm:$0xff]  }
 0x90e   :  { %4904 = vmatprep.mubr.bf16.mxu0 %v4560_v14  ;;  %6110 = vmatprep.subr.bf16.mxu1 %v7001_v54  ;;  %v5855_v32 = vld [vmem:[#allocation5 + $0x16] ss:$0 sm:$0xff]  ;;  %v5872_v51 = vld [vmem:[#allocation5 + $0x17] ss:$0 sm:$0xff] }
 0x90f   :  { %4905 = vmatmul.mubr.bf16.gmra.mrb[48].mxu0 %v4559_v35 }
 0x910   :  { %4920 = vmatpush1.bf16.msra.mxu0 %v6967_v38  ;;  %4947 = vmatprep.mubr.bf16.mxu0 %v7356_v0 }
 0x911   :  { %4921 = vmatprep.subr.bf16.mxu0 %v6972_v39 }
 0x914   :  { %4922 = vmatpush1.bf16.msra.mxu0 %v6970_v40 }
 0x915   :  { %4923 = vmatprep.subr.bf16.mxu0 %v6975_v41 }
 0x918   :  { %4924 = vmatpush1.bf16.msra.mxu0 %v6973_v43 }
 0x919   :  { %4925 = vmatprep.subr.bf16.mxu0 %v6978_v23 }
 0x91c   :  { %4926 = vmatpush1.bf16.msra.mxu0 %v6976_v44 }
 0x91d   :  { %4927 = vmatprep.subr.bf16.mxu0 %v6981_v53 }
 0x920   :  { %4928 = vmatpush1.bf16.msra.mxu0 %v6979_v46 }
 0x921   :  { %4929 = vmatprep.subr.bf16.mxu0 %v6984_v47 }
 0x924   :  { %4930 = vmatpush1.bf16.msra.mxu0 %v6982_v24 }
 0x927   :  { %4948 = vmatmul.mubr.bf16.vlgmr.msra.gmra.mrb[44].mxu0 %v4558_v37 }
 0x928   :  { %4957 = vmatprep.mubr.bf16.mxu0 %v7356_v0 }
 0x92f   :  { %4958 = vmatmul.mubr.bf16.gmra.mrb[48].mxu0 %v4561_v36 }
 0x9fa   :  { %v4949_v61 = vpop.f32.mrb[44].mxu0 }
 0x9fb   :  { %v6162_v0 = vadd.f32 %v4949_v61, %v4615_v57  ;;  %v4951_v62 = vpop.f32.mrb[45].mxu0 }
 0x9fc   :  { %v6163_v63 = vadd.f32 %v4951_v62, %v4619_v60  ;;  %v4953_v1 = vpop.f32.mrb[46].mxu0 }
 0x9fd   :  { %v6164_v3 = vadd.f32 %v4953_v1, %v4615_v57  ;;  %v4955_v4 = vpop.f32.mrb[47].mxu0  ;;  %v4968_v7 = vmax.f32 %v6162_v0, 0.0 }
 0x9fe   :  { %v6165_v5 = vadd.f32 %v4955_v4, %v4619_v60  ;;  %v4969_v10 = vmax.f32 %v6163_v63, 0.0 }
 0x9ff   :  { %v4970_v8 = vmax.f32 %v6164_v3, 0.0 }
 0xa00   :  { %v4971_v15 = vmax.f32 %v6165_v5, 0.0 }
 0xa01   :  { %v4976_v58 = vpack.c.bf16 %v4970_v8, %v4968_v7 }
 0xa02   :  { %v4977_v6 = vpack.c.bf16 %v4971_v15, %v4969_v10  ;;  %v4959_v2 = vpop.f32.mrb[48].mxu0 }
 0xa03   :  { %v6166_v16 = vadd.f32 %v4959_v2, %v4615_v57  ;;  %v4961_v11 = vpop.f32.mrb[49].mxu0 }
 0xa04   :  { %v6167_v17 = vadd.f32 %v4961_v11, %v4619_v60  ;;  %v4963_v59 = vpop.f32.mrb[50].mxu0  ;;  %5147 = vmatprep.mubr.bf16.mxu1 %v4977_v6 }
 0xa05   :  { %v6168_v18 = vadd.f32 %v4963_v59, %v4615_v57  ;;  %v4965_v19 = vpop.f32.mrb[51].mxu0  ;;  %5148 = vmatmul.mubr.bf16.vlgmr.msra.gmra.mrb[68].mxu1 %v4976_v58  ;;  %v4972_v21 = vmax.f32 %v6166_v16, 0.0 }
 0xa06   :  { %v6169_v20 = vadd.f32 %v4965_v19, %v4619_v60  ;;  %6111 = vmatpush3.bf16.msra.mxu1 %v7001_v54  ;;  %v4973_v42 = vmax.f32 %v6167_v17, 0.0 }
 0xa07   :  { %v4974_v22 = vmax.f32 %v6168_v18, 0.0  ;;  %6112 = vmatprep.subr.bf16.mxu1 %v7002_v56 }
 0xa08   :  { %v4975_v27 = vmax.f32 %v6169_v20, 0.0 }
 0xa09   :  { %v4978_v28 = vpack.c.bf16 %v4974_v22, %v4972_v21 }
 0xa0a   :  { %v4979_v9 = vpack.c.bf16 %v4975_v27, %v4973_v42  ;;  %6113 = vmatpush3.bf16.msra.mxu1 %v7002_v56 }
 0xa0b   :  { %6114 = vmatprep.subr.bf16.mxu1 %v7003_v26 }
 0xa0c   :  { %5155 = vmatprep.mubr.bf16.mxu1 %v4979_v9 }
 0xa0d   :  { %5156 = vmatmul.mubr.bf16.gmra.mrb[72].mxu1 %v4978_v28 }
 0xa0e   :  { %6115 = vmatpush3.bf16.msra.mxu1 %v7003_v26 }
 0xa0f   :  { %6116 = vmatprep.subr.bf16.mxu1 %v7004_v29 }
 0xa12   :  { %6117 = vmatpush3.bf16.msra.mxu1 %v7004_v29 }
 0xa13   :  { %6118 = vmatprep.subr.bf16.mxu1 %v7005_v30 }
 0xa16   :  { %6119 = vmatpush3.bf16.msra.mxu1 %v7005_v30 }
 0xa17   :  { %6120 = vmatprep.subr.bf16.mxu1 %v7006_v52 }
 0xa1a   :  { %6121 = vmatpush3.bf16.msra.mxu1 %v7006_v52 }
 0xa1b   :  { %6122 = vmatprep.subr.bf16.mxu1 %v7007_v45 }
 0xa1e   :  { %6123 = vmatpush3.bf16.msra.mxu1 %v7007_v45 }
 0xa1f   :  { %6124 = vmatprep.subr.bf16.mxu1 %v7008_v31 }
 0xa22   :  { %6125 = vmatpush3.bf16.msra.mxu1 %v7008_v31 }
 0xad8   :  { %v6048_v12 = vpop.f32.mrb[68].mxu1 }
 0xad9   :  { %v6049_v33 = vpop.f32.mrb[69].mxu1 }
 0xada   :  { %v6050_v34 = vadd.f32 %v6049_v33, %v6048_v12  ;;  %v6051_v13 = vpop.f32.mrb[70].mxu1 }
 0xadb   :  { %v6052_v35 = vpop.f32.mrb[71].mxu1 }
 0xadc   :  { %v5150_v36 = vadd.f32 %v6050_v34, %v5855_v32  ;;  %v6053_v14 = vadd.f32 %v6052_v35, %v6051_v13 }
 0xade   :  { %v5153_v37 = vadd.f32 %v6053_v14, %v5855_v32  ;;  %v5164_v38 = vmax.f32 %v5150_v36, 0.0 }
 0xae0   :  { %v5165_v39 = vmax.f32 %v5153_v37, 0.0  ;;  %v6054_v40 = vpop.f32.mrb[72].mxu1 }
 0xae1   :  { %v6055_v41 = vpop.f32.mrb[73].mxu1 }
 0xae2   :  { %v6056_v43 = vadd.f32 %v6055_v41, %v6054_v40  ;;  %v6057_v23 = vpop.f32.mrb[74].mxu1  ;;  %v5168_v44 = vpack.c.bf16 %v5165_v39, %v5164_v38 }
 0xae3   :  { %v6058_v53 = vpop.f32.mrb[75].mxu1 }
 0xae4   :  { %v5158_v46 = vadd.f32 %v6056_v43, %v5855_v32  ;;  %v6059_v47 = vadd.f32 %v6058_v53, %v6057_v23  ;;  %6126 = vmatprep.mubr.bf16.mxu1 %v5168_v44 }
 0xae6   :  { %v5161_v24 = vadd.f32 %v6059_v47, %v5855_v32  ;;  %v5166_v48 = vmax.f32 %v5158_v46, 0.0 }
 0xae8   :  { %v5167_v25 = vmax.f32 %v5161_v24, 0.0 }
 0xaea   :  { %v5169_v49 = vpack.c.bf16 %v5167_v25, %v5166_v48 }
 0xaec   :  { %6127 = vmatmul.mubr.bf16.vlgmr.msra.gmra.mrb[76].mxu1 %v5169_v49 }
 0xbbf   :  { %v6128_v50 = vpop.f32.mrb[76].mxu1 }
 0xbc0   :  { %v5275_v54 = vpop.f32.mrb[77].mxu1  ;;  %v5284_v57 = vadd.f32 %v6128_v50, %v5872_v51 }
 0xbc1   :  { %v6129_v55 = vpop.f32.mrb[78].mxu1  ;;  %v5276_v0 = vadd.f32 %v5872_v51, %v5275_v54 }
 0xbc2   :  { %v5287_v60 = vadd.f32 %v6129_v55, %v5872_v51  ;;  %v5278_v61 = vpop.f32.mrb[79].mxu1 }
 0xbc3   :  { %v5279_v62 = vadd.f32 %v5872_v51, %v5278_v61 }
 0xbc4   :  { %v5897_v63 = vpack.c.bf16 %v5287_v60, %v5284_v57 }
 0xbc5   :  { %v5892_v1 = vpack.c.bf16 %v5279_v62, %v5276_v0 }
 0xbc6   :  { %5899 = vst [vmem:[#allocation23 + $0x8] sm:$0xff] %v5897_v63  }
 0xbc7   :  { %5893 = vst [vmem:[#allocation23] sm:$0xff] %v5892_v1  }
 0xbc8   :  { %7306 = shalt.err (!%p7303_p10)
}
 0xbc9   :  { %s7307_s20 = scalar_lea.hbm %s7745_s13, 256 }
 0xbca   :  { %p7308_p11 = scmp.ne.s32.totalorder %s7745_s13, %s7307_s20  ;;  %p7311_p12 = scmp.lt.u32.totalorder %s7307_s20, %s7745_s13 }
 0xbcc   :  { %p7313_p13 = pnand %p7311_p12, %p7308_p11 }
 0xbce   :  { %7316 = shalt.err (!%p7313_p13)
}
 0xbcf   :  { %5321 = dma.vmem_to_hbm [thread:$0]  %s5316_s26, 256, %s7745_s13, [#allocation4], %s7748_s6, %s7748_s6, %s7339_s28  }
 0xbd0   :  { %7331 = dma.done.wait [#allocation4], 256  }
 0xbd1   :  { %7332 = vsyncadd [#allocation4], 4294967040 }
 0xbd2   :  { %5325 = vsyncpa [#allocation3], 1 }
 0xbd3   :  { %5326 = vsyncpa [#allocation6], 1 }
 0xbd4   :  { %5327 = vsyncpa [#allocation9], 1 }
 0xbd5   :  { %5328 = vsyncpa [#allocation12], 1 }
 0xbd6   :  { %5329 = vsyncpa [#allocation15], 1 }
 0xbd7   :  { %5330 = vsyncpa [#allocation18], 1 }
 0xbd8   :  { %5331 = vsyncpa [#allocation21], 1 }
 0xbd9   :  { %5332 = vsyncpa [#allocation4], 1 }

// kernel: tpu_custom_call.1
= control target key start
LH: loop header
LB: loop body
LE: loop exit
PB: predicated region body
PF: predicated region fallthrough
CT: control target
= control target key end

     0   :  { %18 = vsyncpa [#allocation3], 0  ;;  %s7732_s0 = inlined_call_operand.hbm [shape: f32[32,784], index: 0, kind: input, shape index: {}]   ;;  %s7733_s1 = inlined_call_operand.hbm [shape: f32[1,3072], index: 1, kind: input, shape index: {}]   ;;  %s7734_s2 = inlined_call_operand.hbm [shape: bf16[784,512], index: 2, kind: input, shape index: {}]   ;;  %s7735_s3 = inlined_call_operand.hbm [shape: bf16[512,256], index: 3, kind: input, shape index: {}]   ;;  %s7736_s4 = inlined_call_operand.hbm [shape: bf16[256,384], index: 4, kind: input, shape index: {}]   ;;  %s7737_s5 = inlined_call_operand.hbm [shape: bf16[384,128], index: 5, kind: input, shape index: {}]   ;;  %s7738_s6 = inlined_call_operand.hbm [shape: bf16[128,256], index: 6, kind: input, shape index: {}]   ;;  %s7739_s7 = inlined_call_operand.hbm [shape: bf16[256,512], index: 7, kind: input, shape index: {}]   ;;  %s7740_s8 = inlined_call_operand.hbm [shape: bf16[512,128], index: 8, kind: input, shape index: {}]   ;;  %s7741_s9 = inlined_call_operand.hbm [shape: bf16[128,384], index: 9, kind: input, shape index: {}]   ;;  %s7742_s10 = inlined_call_operand.hbm [shape: bf16[384,256], index: 10, kind: input, shape index: {}]   ;;  %s7743_s11 = inlined_call_operand.hbm [shape: bf16[256,128], index: 11, kind: input, shape index: {}]   ;;  %s7744_s12 = inlined_call_operand.hbm [shape: bf16[128,128], index: 12, kind: input, shape index: {}]   ;;  %s7745_s13 = inlined_call_operand.hbm [shape: bf16[32,128], index: 13, kind: output, shape index: {}]  }
   0x1   :  { %19 = vsyncpa [#allocation6], 0 }
   0x2   :  { %20 = vsyncpa [#allocation9], 0 }
   0x3   :  { %21 = vsyncpa [#allocation12], 0 }
   0x4   :  { %22 = vsyncpa [#allocation15], 0 }
   0x5   :  { %23 = vsyncpa [#allocation18], 0 }
   0x6   :  { %24 = vsyncpa [#allocation21], 0 }
   0x7   :  { %25 = vsyncpa [#allocation4], 0  ;;  %s7333_s25 = smov [#allocation5]   ;;  %s7334_s27 = smov [#allocation8]  }
   0x8   :  { %s44_s26 = sshll.u32 %s7333_s25, 4  ;;  %s65_s28 = sshll.u32 %s7334_s27, 4  ;;  %s45_s26 = int_to_ptr.vmem [resolvable:$true] %s44_s26  ;;  %s7428_s28 = int_to_ptr.vmem [resolvable:$true] %s65_s28 }
   0x9   :  { %s7009_s14 = scalar_lea.hbm %s7733_s1, 384 }
   0xa   :  { %p7010_p0 = scmp.ne.s32.totalorder %s7733_s1, %s7009_s14  ;;  %p7013_p1 = scmp.lt.u32.totalorder %s7009_s14, %s7733_s1 }
   0xc   :  { %p7015_p2 = pnand %p7013_p1, %p7010_p0 }
   0xe   :  { %7018 = shalt.err (!%p7015_p2)
}
   0xf   :  { %s7019_s19 = scalar_lea.vmem %s45_s26, 384  ;;  %p7024_p4 = scmp.lt.s32.totalorder %s45_s26, %s45_s26 }
  0x10   :  { %p7020_p3 = scmp.ne.s32.totalorder %s45_s26, %s7019_s19  ;;  %p7025_p5 = scmp.lt.s32.totalorder %s7019_s19, %s7019_s19 }
  0x12   :  { %p7026_p6 = por %p7025_p5, %p7024_p4 }
  0x14   :  { %p7027_p7 = pnand %p7026_p6, %p7020_p3 }
  0x16   :  { %7030 = shalt.err (!%p7027_p7)
}
  0x17   :  { %47 = dma.hbm_to_vmem [thread:$0]  %s7733_s1, 384, %s45_s26, [#allocation6]  }
  0x18   :  { %s7031_s24 = scalar_lea.hbm %s7735_s3, 8192 }
  0x19   :  { %p7032_p8 = scmp.ne.s32.totalorder %s7735_s3, %s7031_s24  ;;  %p7035_p9 = scmp.lt.u32.totalorder %s7031_s24, %s7735_s3 }
  0x1b   :  { %p7037_p10 = pnand %p7035_p9, %p7032_p8 }
  0x1d   :  { %7040 = shalt.err (!%p7037_p10)
}
  0x1e   :  { %s7041_s14 = scalar_lea.vmem %s7428_s28, 8192  ;;  %p7046_p12 = scmp.lt.s32.totalorder %s7428_s28, %s7428_s28 }
  0x1f   :  { %p7042_p11 = scmp.ne.s32.totalorder %s7428_s28, %s7041_s14  ;;  %p7047_p13 = scmp.lt.s32.totalorder %s7041_s14, %s7041_s14 }
  0x21   :  { %p7048_p0 = por %p7047_p13, %p7046_p12 }
  0x23   :  { %p7049_p1 = pnand %p7048_p0, %p7042_p11 }
  0x25   :  { %7052 = shalt.err (!%p7049_p1)
}
  0x26   :  { %s7335_s1 = smov 128   ;;  %s7336_s26 = smov 8  }
  0x27   :  { %71 = dma.hbm_to_vmem [thread:$0]  %s7735_s3, 8192, %s7428_s28, [#allocation9], %s7335_s1, %s7335_s1, %s7336_s26  }
  0x28   :  { %s7337_s17 = smov [#allocation11]   ;;  %s7053_s21 = scalar_lea.hbm %s7737_s5, 3072 }
  0x29   :  { %s89_s18 = sshll.u32 %s7337_s17, 4  ;;  %p7054_p2 = scmp.ne.s32.totalorder %s7737_s5, %s7053_s21  ;;  %s90_s18 = int_to_ptr.vmem [resolvable:$true] %s89_s18 }
  0x2a   :  { %p7057_p3 = scmp.lt.u32.totalorder %s7053_s21, %s7737_s5 }
  0x2c   :  { %p7059_p4 = pnand %p7057_p3, %p7054_p2 }
  0x2e   :  { %7062 = shalt.err (!%p7059_p4)
}
  0x2f   :  { %s7063_s27 = scalar_lea.vmem %s90_s18, 3072  ;;  %p7068_p6 = scmp.lt.s32.totalorder %s90_s18, %s90_s18 }
  0x30   :  { %p7064_p5 = scmp.ne.s32.totalorder %s90_s18, %s7063_s27  ;;  %p7069_p7 = scmp.lt.s32.totalorder %s7063_s27, %s7063_s27 }
  0x32   :  { %p7070_p8 = por %p7069_p7, %p7068_p6 }
  0x34   :  { %p7071_p9 = pnand %p7070_p8, %p7064_p5 }
  0x36   :  { %7074 = shalt.err (!%p7071_p9)
}
  0x37   :  { %s7746_s3 = smov 64   ;;  %s7339_s28 = smov 4  }
  0x38   :  { %95 = dma.hbm_to_vmem [thread:$0]  %s7737_s5, 3072, %s90_s18, [#allocation12], %s7746_s3, %s7746_s3, %s7339_s28  }
  0x39   :  { %s7340_s14 = smov [#allocation14]   ;;  %s7075_s19 = scalar_lea.hbm %s7739_s7, 8192 }
  0x3a   :  { %s113_s15 = sshll.u32 %s7340_s14, 4  ;;  %p7076_p10 = scmp.ne.s32.totalorder %s7739_s7, %s7075_s19  ;;  %s114_s15 = int_to_ptr.vmem [resolvable:$true] %s113_s15 }
  0x3b   :  { %p7079_p11 = scmp.lt.u32.totalorder %s7075_s19, %s7739_s7 }
  0x3d   :  { %p7081_p12 = pnand %p7079_p11, %p7076_p10 }
  0x3f   :  { %7084 = shalt.err (!%p7081_p12)
}
  0x40   :  { %s7085_s24 = scalar_lea.vmem %s114_s15, 8192  ;;  %p7090_p0 = scmp.lt.s32.totalorder %s114_s15, %s114_s15 }
  0x41   :  { %p7086_p13 = scmp.ne.s32.totalorder %s114_s15, %s7085_s24  ;;  %p7091_p1 = scmp.lt.s32.totalorder %s7085_s24, %s7085_s24 }
  0x43   :  { %p7092_p2 = por %p7091_p1, %p7090_p0 }
  0x45   :  { %p7093_p3 = pnand %p7092_p2, %p7086_p13 }
  0x47   :  { %7096 = shalt.err (!%p7093_p3)
}
  0x48   :  { %s7341_s5 = smov 256   ;;  %s7342_s18 = smov 16  }
  0x49   :  { %119 = dma.hbm_to_vmem [thread:$0]  %s7739_s7, 8192, %s114_s15, [#allocation15], %s7341_s5, %s7341_s5, %s7342_s18  }
  0x4a   :  { %s7343_s29 = smov [#allocation17]   ;;  %s7344_s14 = smov [#allocation20]  }
  0x4b   :  { %s137_s30 = sshll.u32 %s7343_s29, 4  ;;  %s161_s16 = sshll.u32 %s7344_s14, 4  ;;  %s138_s30 = int_to_ptr.vmem [resolvable:$true] %s137_s30  ;;  %s7492_s16 = int_to_ptr.vmem [resolvable:$true] %s161_s16 }
  0x4c   :  { %s7097_s20 = scalar_lea.hbm %s7741_s9, 3072 }
  0x4d   :  { %p7098_p4 = scmp.ne.s32.totalorder %s7741_s9, %s7097_s20  ;;  %p7101_p5 = scmp.lt.u32.totalorder %s7097_s20, %s7741_s9 }
  0x4f   :  { %p7103_p6 = pnand %p7101_p5, %p7098_p4 }
  0x51   :  { %7106 = shalt.err (!%p7103_p6)
}
  0x52   :  { %s7107_s7 = scalar_lea.vmem %s138_s30, 3072  ;;  %p7112_p8 = scmp.lt.s32.totalorder %s138_s30, %s138_s30 }
  0x53   :  { %p7108_p7 = scmp.ne.s32.totalorder %s138_s30, %s7107_s7  ;;  %p7113_p9 = scmp.lt.s32.totalorder %s7107_s7, %s7107_s7 }
  0x55   :  { %p7114_p10 = por %p7113_p9, %p7112_p8 }
  0x57   :  { %p7115_p11 = pnand %p7114_p10, %p7108_p7 }
  0x59   :  { %7118 = shalt.err (!%p7115_p11)
}
  0x5a   :  { %s7345_s15 = smov 192   ;;  %s7346_s25 = smov 12  }
  0x5b   :  { %143 = dma.hbm_to_vmem [thread:$0]  %s7741_s9, 3072, %s138_s30, [#allocation18], %s7345_s15, %s7345_s15, %s7346_s25  }
  0x5c   :  { %s7119_s19 = scalar_lea.hbm %s7743_s11, 2048 }
  0x5d   :  { %p7120_p12 = scmp.ne.s32.totalorder %s7743_s11, %s7119_s19  ;;  %p7123_p13 = scmp.lt.u32.totalorder %s7119_s19, %s7743_s11 }
  0x5f   :  { %p7125_p0 = pnand %p7123_p13, %p7120_p12 }
  0x61   :  { %7128 = shalt.err (!%p7125_p0)
}
  0x62   :  { %s7129_s24 = scalar_lea.vmem %s7492_s16, 2048  ;;  %p7134_p2 = scmp.lt.s32.totalorder %s7492_s16, %s7492_s16 }
  0x63   :  { %p7130_p1 = scmp.ne.s32.totalorder %s7492_s16, %s7129_s24  ;;  %p7135_p3 = scmp.lt.s32.totalorder %s7129_s24, %s7129_s24 }
  0x65   :  { %p7136_p4 = por %p7135_p3, %p7134_p2 }
  0x67   :  { %p7137_p5 = pnand %p7136_p4, %p7130_p1 }
  0x69   :  { %7140 = shalt.err (!%p7137_p5)
}
  0x6a   :  { %167 = dma.hbm_to_vmem [thread:$0]  %s7743_s11, 2048, %s7492_s16, [#allocation21], %s7746_s3, %s7746_s3, %s7339_s28  }
  0x6b   :  { %s7347_s7 = smov [#allocation2]   ;;  %s7141_s17 = scalar_lea.hbm %s7732_s0, 3584 }
  0x6c   :  { %s31_s27 = sshll.u32 %s7347_s7, 4  ;;  %p7142_p6 = scmp.ne.s32.totalorder %s7732_s0, %s7141_s17  ;;  %s32_s27 = int_to_ptr.vmem [resolvable:$true] %s31_s27 }
  0x6d   :  { %p7145_p7 = scmp.lt.u32.totalorder %s7141_s17, %s7732_s0 }
  0x6f   :  { %p7147_p8 = pnand %p7145_p7, %p7142_p6 }
  0x71   :  { %7150 = shalt.err (!%p7147_p8)
}
  0x72   :  { %s7151_s23 = scalar_lea.vmem %s32_s27, 3584  ;;  %p7156_p10 = scmp.lt.s32.totalorder %s32_s27, %s32_s27 }
  0x73   :  { %p7152_p9 = scmp.ne.s32.totalorder %s32_s27, %s7151_s23  ;;  %p7157_p11 = scmp.lt.s32.totalorder %s7151_s23, %s7151_s23 }
  0x75   :  { %p7158_p12 = por %p7157_p11, %p7156_p10 }
  0x77   :  { %p7159_p13 = pnand %p7158_p12, %p7152_p9 }
  0x79   :  { %7162 = shalt.err (!%p7159_p13)
}
  0x7a   :  { %s7348_s11 = smov 896   ;;  %s7349_s16 = smov 56  }
  0x7b   :  { %37 = dma.hbm_to_vmem [thread:$0]  %s7732_s0, 3584, %s32_s27, [#allocation3], %s7348_s11, %s7348_s11, %s7349_s16  }
  0x7c   :  { %s7350_s30 = smov [#allocation7]   ;;  %s7351_s29 = smov [#allocation10]  }
  0x7d   :  { %s53_s7 = sshll.u32 %s7350_s30, 4  ;;  %s77_s14 = sshll.u32 %s7351_s29, 4  ;;  %s54_s7 = int_to_ptr.vmem [resolvable:$true] %s53_s7  ;;  %s78_s14 = int_to_ptr.vmem [resolvable:$true] %s77_s14 }
  0x7e   :  { %s7163_s20 = scalar_lea.hbm %s7734_s2, 25088 }
  0x7f   :  { %p7164_p0 = scmp.ne.s32.totalorder %s7734_s2, %s7163_s20  ;;  %p7167_p1 = scmp.lt.u32.totalorder %s7163_s20, %s7734_s2 }
  0x81   :  { %p7169_p2 = pnand %p7167_p1, %p7164_p0 }
  0x83   :  { %7172 = shalt.err (!%p7169_p2)
}
  0x84   :  { %s7173_s0 = scalar_lea.vmem %s54_s7, 25088  ;;  %p7178_p4 = scmp.lt.s32.totalorder %s54_s7, %s54_s7 }
  0x85   :  { %p7174_p3 = scmp.ne.s32.totalorder %s54_s7, %s7173_s0  ;;  %p7179_p5 = scmp.lt.s32.totalorder %s7173_s0, %s7173_s0 }
  0x87   :  { %p7180_p6 = por %p7179_p5, %p7178_p4 }
  0x89   :  { %p7181_p7 = pnand %p7180_p6, %p7174_p3 }
  0x8b   :  { %7184 = shalt.err (!%p7181_p7)
}
  0x8c   :  { %59 = dma.hbm_to_vmem [thread:$0]  %s7734_s2, 25088, %s54_s7, [#allocation6], %s7341_s5, %s7341_s5, %s7342_s18  }
  0x8d   :  { %s7185_s24 = scalar_lea.hbm %s7736_s4, 6144 }
  0x8e   :  { %p7186_p8 = scmp.ne.s32.totalorder %s7736_s4, %s7185_s24  ;;  %p7189_p9 = scmp.lt.u32.totalorder %s7185_s24, %s7736_s4 }
  0x90   :  { %p7191_p10 = pnand %p7189_p9, %p7186_p8 }
  0x92   :  { %7194 = shalt.err (!%p7191_p10)
}
  0x93   :  { %s7195_s19 = scalar_lea.vmem %s78_s14, 6144  ;;  %p7200_p12 = scmp.lt.s32.totalorder %s78_s14, %s78_s14 }
  0x94   :  { %p7196_p11 = scmp.ne.s32.totalorder %s78_s14, %s7195_s19  ;;  %p7201_p13 = scmp.lt.s32.totalorder %s7195_s19, %s7195_s19 }
  0x96   :  { %p7202_p0 = por %p7201_p13, %p7200_p12 }
  0x98   :  { %p7203_p1 = pnand %p7202_p0, %p7196_p11 }
  0x9a   :  { %7206 = shalt.err (!%p7203_p1)
}
  0x9b   :  { %83 = dma.hbm_to_vmem [thread:$0]  %s7736_s4, 6144, %s78_s14, [#allocation9], %s7345_s15, %s7345_s15, %s7346_s25  }
  0x9c   :  { %s7352_s18 = smov [#allocation13]   ;;  %s7353_s20 = smov [#allocation16]  }
  0x9d   :  { %s101_s7 = sshll.u32 %s7352_s18, 4  ;;  %s125_s21 = sshll.u32 %s7353_s20, 4  ;;  %s102_s7 = int_to_ptr.vmem [resolvable:$true] %s101_s7  ;;  %s126_s21 = int_to_ptr.vmem [resolvable:$true] %s125_s21 }
  0x9e   :  { %s7207_s0 = scalar_lea.hbm %s7738_s6, 2048 }
  0x9f   :  { %p7208_p2 = scmp.ne.s32.totalorder %s7738_s6, %s7207_s0  ;;  %p7211_p3 = scmp.lt.u32.totalorder %s7207_s0, %s7738_s6 }
  0xa1   :  { %p7213_p4 = pnand %p7211_p3, %p7208_p2 }
  0xa3   :  { %7216 = shalt.err (!%p7213_p4)
}
  0xa4   :  { %s7217_s4 = scalar_lea.vmem %s102_s7, 2048  ;;  %p7222_p6 = scmp.lt.s32.totalorder %s102_s7, %s102_s7 }
  0xa5   :  { %p7218_p5 = scmp.ne.s32.totalorder %s102_s7, %s7217_s4  ;;  %p7223_p7 = scmp.lt.s32.totalorder %s7217_s4, %s7217_s4 }
  0xa7   :  { %p7224_p8 = por %p7223_p7, %p7222_p6 }
  0xa9   :  { %p7225_p9 = pnand %p7224_p8, %p7218_p5 }
  0xab   :  { %7228 = shalt.err (!%p7225_p9)
}
  0xac   :  { %107 = dma.hbm_to_vmem [thread:$0]  %s7738_s6, 2048, %s102_s7, [#allocation12], %s7335_s1, %s7335_s1, %s7336_s26  }
  0xad   :  { %s7229_s9 = scalar_lea.hbm %s7740_s8, 4096 }
  0xae   :  { %p7230_p10 = scmp.ne.s32.totalorder %s7740_s8, %s7229_s9  ;;  %p7233_p11 = scmp.lt.u32.totalorder %s7229_s9, %s7740_s8 }
  0xb0   :  { %p7235_p12 = pnand %p7233_p11, %p7230_p10 }
  0xb2   :  { %7238 = shalt.err (!%p7235_p12)
}
  0xb3   :  { %s7239_s2 = scalar_lea.vmem %s126_s21, 4096  ;;  %p7244_p0 = scmp.lt.s32.totalorder %s126_s21, %s126_s21 }
  0xb4   :  { %p7240_p13 = scmp.ne.s32.totalorder %s126_s21, %s7239_s2  ;;  %p7245_p1 = scmp.lt.s32.totalorder %s7239_s2, %s7239_s2 }
  0xb6   :  { %p7246_p2 = por %p7245_p1, %p7244_p0 }
  0xb8   :  { %p7247_p3 = pnand %p7246_p2, %p7240_p13 }
  0xba   :  { %7250 = shalt.err (!%p7247_p3)
}
  0xbb   :  { %s7748_s6 = smov 64   ;;  %s7354_s7 = smov [#allocation19]  }
  0xbc   :  { %131 = dma.hbm_to_vmem [thread:$0]  %s7740_s8, 4096, %s126_s21, [#allocation15], %s7748_s6, %s7748_s6, %s7339_s28  }
  0xbd   :  { %s149_s20 = sshll.u32 %s7354_s7, 4  ;;  %s7355_s22 = smov [#allocation22]   ;;  %s150_s20 = int_to_ptr.vmem [resolvable:$true] %s149_s20 }
  0xbe   :  { %s173_s23 = sshll.u32 %s7355_s22, 4  ;;  %s7251_s11 = scalar_lea.hbm %s7742_s10, 6144  ;;  %s174_s23 = int_to_ptr.vmem [resolvable:$true] %s173_s23 }
  0xbf   :  { %p7252_p4 = scmp.ne.s32.totalorder %s7742_s10, %s7251_s11  ;;  %p7255_p5 = scmp.lt.u32.totalorder %s7251_s11, %s7742_s10 }
  0xc1   :  { %p7257_p6 = pnand %p7255_p5, %p7252_p4 }
  0xc3   :  { %7260 = shalt.err (!%p7257_p6)
}
  0xc4   :  { %s7261_s8 = scalar_lea.vmem %s150_s20, 6144  ;;  %p7266_p8 = scmp.lt.s32.totalorder %s150_s20, %s150_s20 }
  0xc5   :  { %p7262_p7 = scmp.ne.s32.totalorder %s150_s20, %s7261_s8  ;;  %p7267_p9 = scmp.lt.s32.totalorder %s7261_s8, %s7261_s8 }
  0xc7   :  { %p7268_p10 = por %p7267_p9, %p7266_p8 }
  0xc9   :  { %p7269_p11 = pnand %p7268_p10, %p7262_p7 }
  0xcb   :  { %7272 = shalt.err (!%p7269_p11)
}
  0xcc   :  { %155 = dma.hbm_to_vmem [thread:$0]  %s7742_s10, 6144, %s150_s20, [#allocation18], %s7335_s1, %s7335_s1, %s7336_s26  }
  0xcd   :  { %s7273_s9 = scalar_lea.hbm %s7744_s12, 1024 }
  0xce   :  { %p7274_p12 = scmp.ne.s32.totalorder %s7744_s12, %s7273_s9  ;;  %p7277_p13 = scmp.lt.u32.totalorder %s7273_s9, %s7744_s12 }
  0xd0   :  { %p7279_p0 = pnand %p7277_p13, %p7274_p12 }
  0xd2   :  { %7282 = shalt.err (!%p7279_p0)
}
  0xd3   :  { %s7283_s2 = scalar_lea.vmem %s174_s23, 1024  ;;  %p7288_p2 = scmp.lt.s32.totalorder %s174_s23, %s174_s23 }
  0xd4   :  { %p7284_p1 = scmp.ne.s32.totalorder %s174_s23, %s7283_s2  ;;  %p7289_p3 = scmp.lt.s32.totalorder %s7283_s2, %s7283_s2 }
  0xd6   :  { %p7290_p4 = por %p7289_p3, %p7288_p2 }
  0xd8   :  { %p7291_p5 = pnand %p7290_p4, %p7284_p1 }
  0xda   :  { %7294 = shalt.err (!%p7291_p5)
}
  0xdb   :  { %179 = dma.hbm_to_vmem [thread:$0]  %s7744_s12, 1024, %s174_s23, [#allocation21], %s7748_s6, %s7748_s6, %s7339_s28  }
  0xdc   :  { %7317 = dma.done.wait [#allocation3], 3584  }
  0xdd   :  { %7318 = vsyncadd [#allocation3], 4294963712 }
  0xde   :  { %7319 = dma.done.wait [#allocation6], 25472  }
  0xdf   :  { %7320 = vsyncadd [#allocation6], 4294941824 }
  0xe0   :  { %7321 = dma.done.wait [#allocation9], 14336  }
  0xe1   :  { %7322 = vsyncadd [#allocation9], 4294952960 }
  0xe2   :  { %7323 = dma.done.wait [#allocation12], 5120  }
  0xe3   :  { %7324 = vsyncadd [#allocation12], 4294962176 }
  0xe4   :  { %7325 = dma.done.wait [#allocation15], 12288  }
  0xe5   :  { %7326 = vsyncadd [#allocation15], 4294955008 }
  0xe6   :  { %7327 = dma.done.wait [#allocation18], 9216  }
  0xe7   :  { %7328 = vsyncadd [#allocation18], 4294958080 }
  0xe8   :  { %7329 = dma.done.wait [#allocation21], 3072  }
  0xe9   :  { %7330 = vsyncadd [#allocation21], 4294964224  ;;  %v7356_v0 = vmov 0   ;;  %v6251_v1 = vld [vmem:[#allocation7 + $0x4] ss:$16 sps:$4 sm:$0xff]   ;;  %v226_v9 = vld [vmem:[#allocation2 + $0x30] sm:$0xff] }
  0xea   :  { %1658 = vmatprep.mubr.bf16.mxu1 %v7356_v0  ;;  %v6253_v2 = vld [vmem:[#allocation7 + $0x604] ss:$16 sps:$4 sm:$0xff]   ;;  %1467 = vmatprep.subr.bf16.mxu0 %v6251_v1  ;;  %v6255_v3 = vld [vmem:[#allocation7] ss:$16 sps:$4 sm:$0xff]   ;;  %v6259_v6 = vld [vmem:[#allocation7 + $0x8] ss:$16 sps:$4 sm:$0xff]  }
  0xeb   :  { %v6256_v4 = vld [vmem:[#allocation7 + $0x600] ss:$16 sps:$4 sm:$0xff]   ;;  %1626 = vmatprep.subr.bf16.mxu1 %v6253_v2  ;;  %v6257_v5 = vld [vmem:[#allocation7 + $0x24] ss:$16 sps:$4 sm:$0xff]   ;;  %1468 = vmatpush1.bf16.msra.mxu0 %v6255_v3  ;;  %v6261_v7 = vld [vmem:[#allocation7 + $0xc] ss:$16 sps:$4 sm:$0xff]  }
  0xec   :  { %1627 = vmatpush1.bf16.msra.mxu1 %v6256_v4  ;;  %1469 = vmatprep.subr.bf16.mxu0 %v6257_v5  ;;  %v6262_v8 = vld [vmem:[#allocation7 + $0x20] ss:$16 sps:$4 sm:$0xff]   ;;  %vm1460_vm0 = vcmask 130048   ;;  %v6263_v12 = vld [vmem:[#allocation7 + $0x44] ss:$16 sps:$4 sm:$0xff]   ;;  %v240_v51 = vld [vmem:[#allocation2 + $0xa0] sm:$0xff] }
  0xed   :  { %v233_v10 = vld [vmem:[#allocation2 + $0x68] sm:$0xff]  ;;  %1679 = vmatprep.subr.bf16.mxu1 %v6261_v7  ;;  %v6265_v13 = vld [vmem:[#allocation7 + $0x28] ss:$16 sps:$4 sm:$0xff]   ;;  %v6267_v14 = vld [vmem:[#allocation7 + $0x2c] ss:$16 sps:$4 sm:$0xff]   ;;  %s7357_s12 = smov [#allocation23]  }
  0xee   :  { %v7632_v11 = vpack.c.bf16 %v233_v10, %v226_v9  ;;  %v6268_v15 = vld [vmem:[#allocation7 + $0x40] ss:$16 sps:$4 sm:$0xff]   ;;  %v6269_v16 = vld [vmem:[#allocation7 + $0x64] ss:$16 sps:$4 sm:$0xff]   ;;  %v6273_v17 = vld [vmem:[#allocation7 + $0x4c] ss:$16 sps:$4 sm:$0xff]  }
  0xef   :  { %1470 = vmatpush1.bf16.msra.mxu0 %v6262_v8  ;;  %v6274_v18 = vld [vmem:[#allocation7 + $0x60] ss:$16 sps:$4 sm:$0xff]   ;;  %v6271_v19 = vld [vmem:[#allocation7 + $0x48] ss:$16 sps:$4 sm:$0xff]   ;;  %v6275_v20 = vld [vmem:[#allocation7 + $0x84] ss:$16 sps:$4 sm:$0xff]  }
  0xf0   :  { %5529 = vmatmul.mubr.msk.bf16.vlgmr.msra.gmra.mrb[0].mxu1 %vm1460_vm0, %v7632_v11  ;;  %1471 = vmatprep.subr.bf16.mxu0 %v6263_v12  ;;  %v6279_v21 = vld [vmem:[#allocation7 + $0x6c] ss:$16 sps:$4 sm:$0xff]   ;;  %v6277_v22 = vld [vmem:[#allocation7 + $0x68] ss:$16 sps:$4 sm:$0xff]   ;;  %v6280_v23 = vld [vmem:[#allocation7 + $0x80] ss:$16 sps:$4 sm:$0xff]  }
  0xf1   :  { %1680 = vmatpush1.bf16.msra.mxu1 %v6259_v6  ;;  %1668 = vmatprep.mubr.bf16.mxu1 %v7356_v0  ;;  %v6281_v24 = vld [vmem:[#allocation7 + $0xa4] ss:$16 sps:$4 sm:$0xff]   ;;  %v6285_v25 = vld [vmem:[#allocation7 + $0x8c] ss:$16 sps:$4 sm:$0xff]   ;;  %v6286_v26 = vld [vmem:[#allocation7 + $0xa0] ss:$16 sps:$4 sm:$0xff]  }
  0xf2   :  { %1681 = vmatprep.subr.bf16.mxu1 %v6267_v14  ;;  %v6283_v27 = vld [vmem:[#allocation7 + $0x88] ss:$16 sps:$4 sm:$0xff]   ;;  %v6287_v28 = vld [vmem:[#allocation7 + $0xc4] ss:$16 sps:$4 sm:$0xff]   ;;  %v6291_v29 = vld [vmem:[#allocation7 + $0xac] ss:$16 sps:$4 sm:$0xff]  }
  0xf3   :  { %1472 = vmatpush1.bf16.msra.mxu0 %v6268_v15  ;;  %v6289_v30 = vld [vmem:[#allocation7 + $0xa8] ss:$16 sps:$4 sm:$0xff]   ;;  %v6292_v31 = vld [vmem:[#allocation7 + $0xc0] ss:$16 sps:$4 sm:$0xff]   ;;  %v6293_v32 = vld [vmem:[#allocation7 + $0xe4] ss:$16 sps:$4 sm:$0xff]  }
  0xf4   :  { %1473 = vmatprep.subr.bf16.mxu0 %v6269_v16  ;;  %v6297_v33 = vld [vmem:[#allocation7 + $0xcc] ss:$16 sps:$4 sm:$0xff]   ;;  %v6298_v34 = vld [vmem:[#allocation7 + $0xe0] ss:$16 sps:$4 sm:$0xff]   ;;  %v6295_v35 = vld [vmem:[#allocation7 + $0xc8] ss:$16 sps:$4 sm:$0xff]  }
  0xf5   :  { %1682 = vmatpush1.bf16.msra.mxu1 %v6265_v13  ;;  %v6299_v36 = vld [vmem:[#allocation7 + $0x104] ss:$16 sps:$4 sm:$0xff]   ;;  %v6303_v37 = vld [vmem:[#allocation7 + $0xec] ss:$16 sps:$4 sm:$0xff]   ;;  %v6301_v38 = vld [vmem:[#allocation7 + $0xe8] ss:$16 sps:$4 sm:$0xff]  }
  0xf6   :  { %1683 = vmatprep.subr.bf16.mxu1 %v6273_v17  ;;  %v6304_v39 = vld [vmem:[#allocation7 + $0x100] ss:$16 sps:$4 sm:$0xff]   ;;  %v6305_v40 = vld [vmem:[#allocation7 + $0x124] ss:$16 sps:$4 sm:$0xff]   ;;  %v6309_v41 = vld [vmem:[#allocation7 + $0x10c] ss:$16 sps:$4 sm:$0xff]  }
  0xf7   :  { %1474 = vmatpush1.bf16.msra.mxu0 %v6274_v18  ;;  %v6310_v42 = vld [vmem:[#allocation7 + $0x120] ss:$16 sps:$4 sm:$0xff]   ;;  %v6307_v43 = vld [vmem:[#allocation7 + $0x108] ss:$16 sps:$4 sm:$0xff]   ;;  %v6311_v44 = vld [vmem:[#allocation7 + $0x144] ss:$16 sps:$4 sm:$0xff]  }
  0xf8   :  { %1475 = vmatprep.subr.bf16.mxu0 %v6275_v20  ;;  %v6315_v45 = vld [vmem:[#allocation7 + $0x12c] ss:$16 sps:$4 sm:$0xff]   ;;  %v6313_v46 = vld [vmem:[#allocation7 + $0x128] ss:$16 sps:$4 sm:$0xff]   ;;  %v6316_v47 = vld [vmem:[#allocation7 + $0x140] ss:$16 sps:$4 sm:$0xff]  }
  0xf9   :  { %1684 = vmatpush1.bf16.msra.mxu1 %v6271_v19  ;;  %v6317_v48 = vld [vmem:[#allocation7 + $0x164] ss:$16 sps:$4 sm:$0xff]   ;;  %v6321_v49 = vld [vmem:[#allocation7 + $0x14c] ss:$16 sps:$4 sm:$0xff]   ;;  %v6322_v50 = vld [vmem:[#allocation7 + $0x160] ss:$16 sps:$4 sm:$0xff]  }
  0xfa   :  { %1685 = vmatprep.subr.bf16.mxu1 %v6279_v21  ;;  %v247_v52 = vld [vmem:[#allocation2 + $0xd8] sm:$0xff]  ;;  %v221_v54 = vld [vmem:[#allocation2 + $0x8] sm:$0xff]  ;;  %v228_v55 = vld [vmem:[#allocation2 + $0x40] sm:$0xff]  ;;  %s5315_s26 = sshll.u32 %s7357_s12, 4  ;;  %s5316_s26 = int_to_ptr.vmem [resolvable:$true] %s5315_s26 }
  0xfb   :  { %1476 = vmatpush1.bf16.msra.mxu0 %v6280_v23  ;;  %v7637_v53 = vpack.c.bf16 %v247_v52, %v240_v51  ;;  %v6319_v56 = vld [vmem:[#allocation7 + $0x148] ss:$16 sps:$4 sm:$0xff]   ;;  %v6323_v57 = vld [vmem:[#allocation7 + $0x184] ss:$16 sps:$4 sm:$0xff]   ;;  %v249_v58 = vpack.c.bf16 %v228_v55, %v221_v54  ;;  %v6327_v59 = vld [vmem:[#allocation7 + $0x16c] ss:$16 sps:$4 sm:$0xff]   ;;  %p7300_p7 = scmp.lt.s32.totalorder %s5316_s26, %s5316_s26 }
  0xfc   :  { %1477 = vmatprep.subr.bf16.mxu0 %v6281_v24  ;;  %v6325_v60 = vld [vmem:[#allocation7 + $0x168] ss:$16 sps:$4 sm:$0xff]   ;;  %v6328_v61 = vld [vmem:[#allocation7 + $0x180] ss:$16 sps:$4 sm:$0xff]   ;;  %v6329_v62 = vld [vmem:[#allocation7 + $0x1a4] ss:$16 sps:$4 sm:$0xff]  }
  0xfd   :  { %1686 = vmatpush1.bf16.msra.mxu1 %v6277_v22  ;;  %1499 = vmatprep.mubr.bf16.mxu0 %v249_v58  ;;  %v6333_v63 = vld [vmem:[#allocation7 + $0x18c] ss:$16 sps:$4 sm:$0xff]   ;;  %v6331_v1 = vld [vmem:[#allocation7 + $0x188] ss:$16 sps:$4 sm:$0xff]   ;;  %v6334_v2 = vld [vmem:[#allocation7 + $0x1a0] ss:$16 sps:$4 sm:$0xff]  }
  0xfe   :  { %1687 = vmatprep.subr.bf16.mxu1 %v6285_v25  ;;  %5530 = vmatmul.mubr.msk.bf16.gmra.mrb[4].mxu1 %vm1460_vm0, %v7637_v53  ;;  %v6335_v3 = vld [vmem:[#allocation7 + $0x1c4] ss:$16 sps:$4 sm:$0xff]   ;;  %v6339_v4 = vld [vmem:[#allocation7 + $0x1ac] ss:$16 sps:$4 sm:$0xff]   ;;  %v6337_v5 = vld [vmem:[#allocation7 + $0x1a8] ss:$16 sps:$4 sm:$0xff]  }
  0xff   :  { %1478 = vmatpush1.bf16.msra.mxu0 %v6286_v26  ;;  %1711 = vmatprep.mubr.bf16.mxu1 %v249_v58  ;;  %v6340_v6 = vld [vmem:[#allocation7 + $0x1c0] ss:$16 sps:$4 sm:$0xff]   ;;  %v6341_v7 = vld [vmem:[#allocation7 + $0x1e4] ss:$16 sps:$4 sm:$0xff]   ;;  %v6345_v8 = vld [vmem:[#allocation7 + $0x1cc] ss:$16 sps:$4 sm:$0xff]  }
 0x100   :  { %1479 = vmatprep.subr.bf16.mxu0 %v6287_v28  ;;  %v6343_v9 = vld [vmem:[#allocation7 + $0x1c8] ss:$16 sps:$4 sm:$0xff]   ;;  %v6346_v10 = vld [vmem:[#allocation7 + $0x1e0] ss:$16 sps:$4 sm:$0xff]   ;;  %v6349_v14 = vld [vmem:[#allocation7 + $0x204] ss:$16 sps:$4 sm:$0xff]  }
 0x101   :  { %1688 = vmatpush1.bf16.msra.mxu1 %v6283_v27  ;;  %v220_v12 = vld [vmem:[#allocation2] sm:$0xff]  ;;  %v227_v13 = vld [vmem:[#allocation2 + $0x38] sm:$0xff]  ;;  %v230_v51 = vld [vmem:[#allocation2 + $0x50] sm:$0xff]  ;;  %s7295_s5 = scalar_lea.vmem %s5316_s26, 256 }
 0x102   :  { %1689 = vmatprep.subr.bf16.mxu1 %v6291_v29  ;;  %v6352_v15 = vld [vmem:[#allocation7 + $0x1ec] ss:$16 sps:$4 sm:$0xff]   ;;  %v6347_v16 = vld [vmem:[#allocation7 + $0x200] ss:$16 sps:$4 sm:$0xff]   ;;  %v248_v17 = vpack.c.bf16 %v227_v13, %v220_v12  ;;  %v6350_v18 = vld [vmem:[#allocation7 + $0x1e8] ss:$16 sps:$4 sm:$0xff]   ;;  %p7296_p6 = scmp.ne.s32.totalorder %s5316_s26, %s7295_s5  ;;  %p7301_p8 = scmp.lt.s32.totalorder %s7295_s5, %s7295_s5 }
 0x103   :  { %1480 = vmatpush1.bf16.msra.mxu0 %v6292_v31  ;;  %v6355_v19 = vld [vmem:[#allocation7 + $0x224] ss:$16 sps:$4 sm:$0xff]   ;;  %v6358_v20 = vld [vmem:[#allocation7 + $0x20c] ss:$16 sps:$4 sm:$0xff]   ;;  %v6353_v21 = vld [vmem:[#allocation7 + $0x220] ss:$16 sps:$4 sm:$0xff]  }
 0x104   :  { %1481 = vmatprep.subr.bf16.mxu0 %v6293_v32  ;;  %v6356_v22 = vld [vmem:[#allocation7 + $0x208] ss:$16 sps:$4 sm:$0xff]   ;;  %v6361_v23 = vld [vmem:[#allocation7 + $0x244] ss:$16 sps:$4 sm:$0xff]   ;;  %v6364_v24 = vld [vmem:[#allocation7 + $0x22c] ss:$16 sps:$4 sm:$0xff]   ;;  %p7302_p9 = por %p7301_p8, %p7300_p7 }
 0x105   :  { %1690 = vmatpush1.bf16.msra.mxu1 %v6289_v30  ;;  %v6359_v25 = vld [vmem:[#allocation7 + $0x240] ss:$16 sps:$4 sm:$0xff]   ;;  %v6362_v26 = vld [vmem:[#allocation7 + $0x228] ss:$16 sps:$4 sm:$0xff]   ;;  %v6367_v27 = vld [vmem:[#allocation7 + $0x264] ss:$16 sps:$4 sm:$0xff]  }
 0x106   :  { %1691 = vmatprep.subr.bf16.mxu1 %v6297_v33  ;;  %v6370_v28 = vld [vmem:[#allocation7 + $0x24c] ss:$16 sps:$4 sm:$0xff]   ;;  %v6365_v29 = vld [vmem:[#allocation7 + $0x260] ss:$16 sps:$4 sm:$0xff]   ;;  %v6368_v30 = vld [vmem:[#allocation7 + $0x248] ss:$16 sps:$4 sm:$0xff]   ;;  %p7303_p10 = pnand %p7302_p9, %p7296_p6 }
 0x107   :  { %1482 = vmatpush1.bf16.msra.mxu0 %v6298_v34  ;;  %v6373_v31 = vld [vmem:[#allocation7 + $0x284] ss:$16 sps:$4 sm:$0xff]   ;;  %v6376_v32 = vld [vmem:[#allocation7 + $0x26c] ss:$16 sps:$4 sm:$0xff]   ;;  %v6371_v33 = vld [vmem:[#allocation7 + $0x280] ss:$16 sps:$4 sm:$0xff]  }
 0x108   :  { %1483 = vmatprep.subr.bf16.mxu0 %v6299_v36  ;;  %v6374_v34 = vld [vmem:[#allocation7 + $0x268] ss:$16 sps:$4 sm:$0xff]   ;;  %v6382_v36 = vld [vmem:[#allocation7 + $0x28c] ss:$16 sps:$4 sm:$0xff]   ;;  %v6389_v55 = vld [vmem:[#allocation7 + $0x2e0] ss:$16 sps:$4 sm:$0xff]  }
 0x109   :  { %1692 = vmatpush1.bf16.msra.mxu1 %v6295_v35  ;;  %v6379_v35 = vld [vmem:[#allocation7 + $0x2a4] ss:$16 sps:$4 sm:$0xff]   ;;  %v6394_v52 = vld [vmem:[#allocation7 + $0x2cc] ss:$16 sps:$4 sm:$0xff]   ;;  %v6419_v13 = vld [vmem:[#allocation7 + $0x380] ss:$16 sps:$4 sm:$0xff]  }
 0x10a   :  { %1693 = vmatprep.subr.bf16.mxu1 %v6303_v37  ;;  %v235_v37 = vld [vmem:[#allocation2 + $0x78] sm:$0xff]  ;;  %v6400_v58 = vld [vmem:[#allocation7 + $0x2ec] ss:$16 sps:$4 sm:$0xff]  }
 0x10b   :  { %1484 = vmatpush1.bf16.msra.mxu0 %v6304_v39  ;;  %v6377_v39 = vld [vmem:[#allocation7 + $0x2a0] ss:$16 sps:$4 sm:$0xff]   ;;  %v6424_v12 = vld [vmem:[#allocation7 + $0x36c] ss:$16 sps:$4 sm:$0xff]  }
 0x10c   :  { %1485 = vmatprep.subr.bf16.mxu0 %v6305_v40  ;;  %v6380_v40 = vld [vmem:[#allocation7 + $0x288] ss:$16 sps:$4 sm:$0xff]  }
 0x10d   :  { %1694 = vmatpush1.bf16.msra.mxu1 %v6301_v38  ;;  %v242_v38 = vld [vmem:[#allocation2 + $0xb0] sm:$0xff] }
 0x10e   :  { %1695 = vmatprep.subr.bf16.mxu1 %v6309_v41  ;;  %v256_v41 = vpack.c.bf16 %v242_v38, %v235_v37  ;;  %v6449_v38 = vld [vmem:[#allocation7 + $0x420] ss:$16 sps:$4 sm:$0xff]  }
 0x10f   :  { %1486 = vmatpush1.bf16.msra.mxu0 %v6310_v42  ;;  %v6385_v42 = vld [vmem:[#allocation7 + $0x2c4] ss:$16 sps:$4 sm:$0xff]  }
 0x110   :  { %1487 = vmatprep.subr.bf16.mxu0 %v6311_v44  ;;  %v234_v44 = vld [vmem:[#allocation2 + $0x70] sm:$0xff] }
 0x111   :  { %1696 = vmatpush1.bf16.msra.mxu1 %v6307_v43  ;;  %v6388_v43 = vld [vmem:[#allocation7 + $0x2ac] ss:$16 sps:$4 sm:$0xff]  }
 0x112   :  { %1697 = vmatprep.subr.bf16.mxu1 %v6315_v45  ;;  %v241_v45 = vld [vmem:[#allocation2 + $0xa8] sm:$0xff] }
 0x113   :  { %1488 = vmatpush1.bf16.msra.mxu0 %v6316_v47  ;;  %v255_v47 = vpack.c.bf16 %v241_v45, %v234_v44  ;;  %v6460_v44 = vld [vmem:[#allocation7 + $0x42c] ss:$16 sps:$4 sm:$0xff]   ;;  %v225_v45 = vld [vmem:[#allocation2 + $0x28] sm:$0xff] }
 0x114   :  { %1489 = vmatprep.subr.bf16.mxu0 %v6317_v48  ;;  %v6386_v48 = vld [vmem:[#allocation7 + $0x2a8] ss:$16 sps:$4 sm:$0xff]  }
 0x115   :  { %1698 = vmatpush1.bf16.msra.mxu1 %v6313_v46  ;;  %v6383_v46 = vld [vmem:[#allocation7 + $0x2c0] ss:$16 sps:$4 sm:$0xff]  }
 0x116   :  { %1699 = vmatprep.subr.bf16.mxu1 %v6321_v49  ;;  %v6391_v49 = vld [vmem:[#allocation7 + $0x2e4] ss:$16 sps:$4 sm:$0xff]  }
 0x117   :  { %1490 = vmatpush1.bf16.msra.mxu0 %v6322_v50  ;;  %v223_v50 = vld [vmem:[#allocation2 + $0x18] sm:$0xff] }
 0x118   :  { %1491 = vmatprep.subr.bf16.mxu0 %v6323_v57  ;;  %v251_v54 = vpack.c.bf16 %v230_v51, %v223_v50  ;;  %v6397_v57 = vld [vmem:[#allocation7 + $0x304] ss:$16 sps:$4 sm:$0xff]   ;;  %v6458_v50 = vld [vmem:[#allocation7 + $0x428] ss:$16 sps:$4 sm:$0xff]  }
 0x119   :  { %1700 = vmatpush1.bf16.msra.mxu1 %v6319_v56  ;;  %v6392_v56 = vld [vmem:[#allocation7 + $0x2c8] ss:$16 sps:$4 sm:$0xff]   ;;  %v6463_v51 = vld [vmem:[#allocation7 + $0x464] ss:$16 sps:$4 sm:$0xff]  }
 0x11a   :  { %1701 = vmatprep.subr.bf16.mxu1 %v6327_v59  ;;  %v6395_v59 = vld [vmem:[#allocation7 + $0x300] ss:$16 sps:$4 sm:$0xff]  }
 0x11b   :  { %1492 = vmatpush1.bf16.msra.mxu0 %v6328_v61  ;;  %v6403_v61 = vld [vmem:[#allocation7 + $0x324] ss:$16 sps:$4 sm:$0xff]  }
 0x11c   :  { %1493 = vmatprep.subr.bf16.mxu0 %v6329_v62  ;;  %v6406_v62 = vld [vmem:[#allocation7 + $0x30c] ss:$16 sps:$4 sm:$0xff]  }
 0x11d   :  { %1702 = vmatpush1.bf16.msra.mxu1 %v6325_v60  ;;  %v6398_v60 = vld [vmem:[#allocation7 + $0x2e8] ss:$16 sps:$4 sm:$0xff]  }
 0x11e   :  { %1703 = vmatprep.subr.bf16.mxu1 %v6333_v63  ;;  %v6401_v63 = vld [vmem:[#allocation7 + $0x320] ss:$16 sps:$4 sm:$0xff]  }
 0x11f   :  { %1494 = vmatpush1.bf16.msra.mxu0 %v6334_v2  ;;  %v6409_v2 = vld [vmem:[#allocation7 + $0x344] ss:$16 sps:$4 sm:$0xff]  }
 0x120   :  { %1495 = vmatprep.subr.bf16.mxu0 %v6335_v3  ;;  %v6412_v3 = vld [vmem:[#allocation7 + $0x32c] ss:$16 sps:$4 sm:$0xff]  }
 0x121   :  { %1704 = vmatpush1.bf16.msra.mxu1 %v6331_v1  ;;  %v6404_v1 = vld [vmem:[#allocation7 + $0x308] ss:$16 sps:$4 sm:$0xff]  }
 0x122   :  { %1705 = vmatprep.subr.bf16.mxu1 %v6339_v4  ;;  %v6407_v4 = vld [vmem:[#allocation7 + $0x340] ss:$16 sps:$4 sm:$0xff]  }
 0x123   :  { %1496 = vmatpush1.bf16.msra.mxu0 %v6340_v6  ;;  %v6415_v6 = vld [vmem:[#allocation7 + $0x364] ss:$16 sps:$4 sm:$0xff]  }
 0x124   :  { %1497 = vmatprep.subr.bf16.mxu0 %v6341_v7  ;;  %v6418_v7 = vld [vmem:[#allocation7 + $0x34c] ss:$16 sps:$4 sm:$0xff]  }
 0x125   :  { %1706 = vmatpush1.bf16.msra.mxu1 %v6337_v5  ;;  %v6410_v5 = vld [vmem:[#allocation7 + $0x328] ss:$16 sps:$4 sm:$0xff]  }
 0x126   :  { %1707 = vmatprep.subr.bf16.mxu1 %v6345_v8  ;;  %v6413_v8 = vld [vmem:[#allocation7 + $0x360] ss:$16 sps:$4 sm:$0xff]  }
 0x127   :  { %1498 = vmatpush1.bf16.msra.mxu0 %v6346_v10  ;;  %v6421_v10 = vld [vmem:[#allocation7 + $0x384] ss:$16 sps:$4 sm:$0xff]  }
 0x128   :  { %1520 = vmatprep.subr.bf16.mxu0 %v6349_v14  ;;  %v6422_v14 = vld [vmem:[#allocation7 + $0x368] ss:$16 sps:$4 sm:$0xff]  }
 0x129   :  { %1708 = vmatpush1.bf16.msra.mxu1 %v6343_v9  ;;  %v6416_v9 = vld [vmem:[#allocation7 + $0x348] ss:$16 sps:$4 sm:$0xff]  }
 0x12a   :  { %1709 = vmatprep.subr.bf16.mxu1 %v6352_v15  ;;  %1500 = vmatmul.mubr.bf16.vlgmr.msra.gmra.mrb[0].mxu0 %v248_v17  ;;  %v6427_v15 = vld [vmem:[#allocation7 + $0x3a4] ss:$16 sps:$4 sm:$0xff]  }
 0x12b   :  { %1521 = vmatpush1.bf16.msra.mxu0 %v6347_v16  ;;  %1509 = vmatprep.mubr.bf16.mxu0 %v256_v41  ;;  %v6430_v16 = vld [vmem:[#allocation7 + $0x38c] ss:$16 sps:$4 sm:$0xff]  }
 0x12c   :  { %1522 = vmatprep.subr.bf16.mxu0 %v6355_v19  ;;  %v6433_v19 = vld [vmem:[#allocation7 + $0x3c4] ss:$16 sps:$4 sm:$0xff]  }
 0x12d   :  { %1710 = vmatpush1.bf16.msra.mxu1 %v6350_v18  ;;  %v6428_v18 = vld [vmem:[#allocation7 + $0x388] ss:$16 sps:$4 sm:$0xff]  }
 0x12e   :  { %1732 = vmatprep.subr.bf16.mxu1 %v6358_v20  ;;  %v6436_v20 = vld [vmem:[#allocation7 + $0x3ac] ss:$16 sps:$4 sm:$0xff]  }
 0x12f   :  { %1523 = vmatpush1.bf16.msra.mxu0 %v6353_v21  ;;  %v6431_v21 = vld [vmem:[#allocation7 + $0x3c0] ss:$16 sps:$4 sm:$0xff]  }
 0x130   :  { %1712 = vmatmul.mubr.bf16.vlgmr.msra.gmra.mrb[8].mxu1 %v248_v17  ;;  %1524 = vmatprep.subr.bf16.mxu0 %v6361_v23  ;;  %v6425_v17 = vld [vmem:[#allocation7 + $0x3a0] ss:$16 sps:$4 sm:$0xff]   ;;  %v6439_v23 = vld [vmem:[#allocation7 + $0x3e4] ss:$16 sps:$4 sm:$0xff]  }
 0x131   :  { %1733 = vmatpush1.bf16.msra.mxu1 %v6356_v22  ;;  %1721 = vmatprep.mubr.bf16.mxu1 %v256_v41  ;;  %v6434_v22 = vld [vmem:[#allocation7 + $0x3a8] ss:$16 sps:$4 sm:$0xff]  }
 0x132   :  { %1734 = vmatprep.subr.bf16.mxu1 %v6364_v24  ;;  %1510 = vmatmul.mubr.bf16.gmra.mrb[4].mxu0 %v255_v47  ;;  %v6437_v24 = vld [vmem:[#allocation7 + $0x3e0] ss:$16 sps:$4 sm:$0xff]   ;;  %v236_v41 = vld [vmem:[#allocation2 + $0x80] sm:$0xff] }
 0x133   :  { %1525 = vmatpush1.bf16.msra.mxu0 %v6359_v25  ;;  %1552 = vmatprep.mubr.bf16.mxu0 %v251_v54  ;;  %v6442_v25 = vld [vmem:[#allocation7 + $0x3cc] ss:$16 sps:$4 sm:$0xff]  }
 0x134   :  { %1526 = vmatprep.subr.bf16.mxu0 %v6367_v27  ;;  %v222_v27 = vld [vmem:[#allocation2 + $0x10] sm:$0xff] }
 0x135   :  { %1735 = vmatpush1.bf16.msra.mxu1 %v6362_v26  ;;  %v6440_v26 = vld [vmem:[#allocation7 + $0x3c8] ss:$16 sps:$4 sm:$0xff]  }
 0x136   :  { %1736 = vmatprep.subr.bf16.mxu1 %v6370_v28  ;;  %v229_v28 = vld [vmem:[#allocation2 + $0x48] sm:$0xff] }
 0x137   :  { %1527 = vmatpush1.bf16.msra.mxu0 %v6365_v29  ;;  %v6445_v29 = vld [vmem:[#allocation7 + $0x404] ss:$16 sps:$4 sm:$0xff]  }
 0x138   :  { %1528 = vmatprep.subr.bf16.mxu0 %v6373_v31  ;;  %1722 = vmatmul.mubr.bf16.gmra.mrb[12].mxu1 %v255_v47  ;;  %v6443_v31 = vld [vmem:[#allocation7 + $0x400] ss:$16 sps:$4 sm:$0xff]   ;;  %v232_v47 = vld [vmem:[#allocation2 + $0x60] sm:$0xff] }
 0x139   :  { %1737 = vmatpush1.bf16.msra.mxu1 %v6368_v30  ;;  %1764 = vmatprep.mubr.bf16.mxu1 %v251_v54  ;;  %v6448_v30 = vld [vmem:[#allocation7 + $0x3ec] ss:$16 sps:$4 sm:$0xff]   ;;  %v6461_v54 = vld [vmem:[#allocation7 + $0x460] ss:$16 sps:$4 sm:$0xff]  }
 0x13a   :  { %1738 = vmatprep.subr.bf16.mxu1 %v6376_v32  ;;  %v250_v32 = vpack.c.bf16 %v229_v28, %v222_v27  ;;  %v6520_v27 = vld [vmem:[#allocation7 + $0x56c] ss:$16 sps:$4 sm:$0xff]   ;;  %v6515_v28 = vld [vmem:[#allocation7 + $0x580] ss:$16 sps:$4 sm:$0xff]  }
 0x13b   :  { %1529 = vmatpush1.bf16.msra.mxu0 %v6371_v33  ;;  %v6446_v33 = vld [vmem:[#allocation7 + $0x3e8] ss:$16 sps:$4 sm:$0xff]  }
 0x13c   :  { %1530 = vmatprep.subr.bf16.mxu0 %v6379_v35  ;;  %v244_v35 = vld [vmem:[#allocation2 + $0xc0] sm:$0xff] }
 0x13d   :  { %1739 = vmatpush1.bf16.msra.mxu1 %v6374_v34  ;;  %v237_v34 = vld [vmem:[#allocation2 + $0x88] sm:$0xff] }
 0x13e   :  { %1740 = vmatprep.subr.bf16.mxu1 %v6382_v36  ;;  %v6451_v36 = vld [vmem:[#allocation7 + $0x424] ss:$16 sps:$4 sm:$0xff]   ;;  %v258_v37 = vpack.c.bf16 %v244_v35, %v237_v34  ;;  %v6532_v35 = vld [vmem:[#allocation7 + $0x5ac] ss:$16 sps:$4 sm:$0xff]  }
 0x13f   :  { %1531 = vmatpush1.bf16.msra.mxu0 %v6377_v39  ;;  %v6454_v39 = vld [vmem:[#allocation7 + $0x40c] ss:$16 sps:$4 sm:$0xff]   ;;  %v6529_v34 = vld [vmem:[#allocation7 + $0x5c4] ss:$16 sps:$4 sm:$0xff]  }
 0x140   :  { %1532 = vmatprep.subr.bf16.mxu0 %v6385_v42  ;;  %v243_v42 = vld [vmem:[#allocation2 + $0xb8] sm:$0xff] }
 0x141   :  { %1741 = vmatpush1.bf16.msra.mxu1 %v6380_v40  ;;  %v6452_v40 = vld [vmem:[#allocation7 + $0x408] ss:$16 sps:$4 sm:$0xff]  }
 0x142   :  { %1742 = vmatprep.subr.bf16.mxu1 %v6388_v43  ;;  %v6457_v43 = vld [vmem:[#allocation7 + $0x444] ss:$16 sps:$4 sm:$0xff]  }
 0x143   :  { %1533 = vmatpush1.bf16.msra.mxu0 %v6383_v46  ;;  %v257_v46 = vpack.c.bf16 %v243_v42, %v236_v41  ;;  %v224_v41 = vld [vmem:[#allocation2 + $0x20] sm:$0xff]  ;;  %v231_v42 = vld [vmem:[#allocation2 + $0x58] sm:$0xff] }
 0x144   :  { %1534 = vmatprep.subr.bf16.mxu0 %v6391_v49  ;;  %v253_v49 = vpack.c.bf16 %v232_v47, %v225_v45  ;;  %v246_v45 = vld [vmem:[#allocation2 + $0xd0] sm:$0xff] }
 0x145   :  { %1743 = vmatpush1.bf16.msra.mxu1 %v6386_v48  ;;  %v6455_v48 = vld [vmem:[#allocation7 + $0x440] ss:$16 sps:$4 sm:$0xff]   ;;  %v6541_v47 = vld [vmem:[#allocation7 + $0x5ec] ss:$16 sps:$4 sm:$0xff]  }
 0x146   :  { %1744 = vmatprep.subr.bf16.mxu1 %v6394_v52  ;;  %v6466_v52 = vld [vmem:[#allocation7 + $0x44c] ss:$16 sps:$4 sm:$0xff]  }
 0x147   :  { %1535 = vmatpush1.bf16.msra.mxu0 %v6389_v55  ;;  %v6464_v55 = vld [vmem:[#allocation7 + $0x448] ss:$16 sps:$4 sm:$0xff]  }
 0x148   :  { %1536 = vmatprep.subr.bf16.mxu0 %v6397_v57  ;;  %v6472_v57 = vld [vmem:[#allocation7 + $0x46c] ss:$16 sps:$4 sm:$0xff]  }
 0x149   :  { %1745 = vmatpush1.bf16.msra.mxu1 %v6392_v56  ;;  %v6469_v56 = vld [vmem:[#allocation7 + $0x484] ss:$16 sps:$4 sm:$0xff]  }
 0x14a   :  { %1746 = vmatprep.subr.bf16.mxu1 %v6400_v58  ;;  %v6467_v58 = vld [vmem:[#allocation7 + $0x480] ss:$16 sps:$4 sm:$0xff]  }
 0x14b   :  { %1537 = vmatpush1.bf16.msra.mxu0 %v6395_v59  ;;  %v6470_v59 = vld [vmem:[#allocation7 + $0x468] ss:$16 sps:$4 sm:$0xff]  }
 0x14c   :  { %1538 = vmatprep.subr.bf16.mxu0 %v6403_v61  ;;  %v6478_v61 = vld [vmem:[#allocation7 + $0x48c] ss:$16 sps:$4 sm:$0xff]  }
 0x14d   :  { %1747 = vmatpush1.bf16.msra.mxu1 %v6398_v60  ;;  %v6475_v60 = vld [vmem:[#allocation7 + $0x4a4] ss:$16 sps:$4 sm:$0xff]  }
 0x14e   :  { %1748 = vmatprep.subr.bf16.mxu1 %v6406_v62  ;;  %v6473_v62 = vld [vmem:[#allocation7 + $0x4a0] ss:$16 sps:$4 sm:$0xff]  }
 0x14f   :  { %1539 = vmatpush1.bf16.msra.mxu0 %v6401_v63  ;;  %v6476_v63 = vld [vmem:[#allocation7 + $0x488] ss:$16 sps:$4 sm:$0xff]  }
 0x150   :  { %1540 = vmatprep.subr.bf16.mxu0 %v6409_v2  ;;  %v6484_v2 = vld [vmem:[#allocation7 + $0x4ac] ss:$16 sps:$4 sm:$0xff]  }
 0x151   :  { %1749 = vmatpush1.bf16.msra.mxu1 %v6404_v1  ;;  %v6481_v1 = vld [vmem:[#allocation7 + $0x4c4] ss:$16 sps:$4 sm:$0xff]  }
 0x152   :  { %1750 = vmatprep.subr.bf16.mxu1 %v6412_v3  ;;  %v6479_v3 = vld [vmem:[#allocation7 + $0x4c0] ss:$16 sps:$4 sm:$0xff]  }
 0x153   :  { %1541 = vmatpush1.bf16.msra.mxu0 %v6407_v4  ;;  %v6482_v4 = vld [vmem:[#allocation7 + $0x4a8] ss:$16 sps:$4 sm:$0xff]  }
 0x154   :  { %1542 = vmatprep.subr.bf16.mxu0 %v6415_v6  ;;  %v6490_v6 = vld [vmem:[#allocation7 + $0x4cc] ss:$16 sps:$4 sm:$0xff]  }
 0x155   :  { %1751 = vmatpush1.bf16.msra.mxu1 %v6410_v5  ;;  %v6487_v5 = vld [vmem:[#allocation7 + $0x4e4] ss:$16 sps:$4 sm:$0xff]  }
 0x156   :  { %1752 = vmatprep.subr.bf16.mxu1 %v6418_v7  ;;  %v6485_v7 = vld [vmem:[#allocation7 + $0x4e0] ss:$16 sps:$4 sm:$0xff]  }
 0x157   :  { %1543 = vmatpush1.bf16.msra.mxu0 %v6413_v8  ;;  %v6488_v8 = vld [vmem:[#allocation7 + $0x4c8] ss:$16 sps:$4 sm:$0xff]  }
 0x158   :  { %1544 = vmatprep.subr.bf16.mxu0 %v6421_v10  ;;  %v6496_v10 = vld [vmem:[#allocation7 + $0x4ec] ss:$16 sps:$4 sm:$0xff]  }
 0x159   :  { %1753 = vmatpush1.bf16.msra.mxu1 %v6416_v9  ;;  %v6493_v9 = vld [vmem:[#allocation7 + $0x504] ss:$16 sps:$4 sm:$0xff]  }
 0x15a   :  { %1754 = vmatprep.subr.bf16.mxu1 %v6424_v12  ;;  %v6491_v12 = vld [vmem:[#allocation7 + $0x500] ss:$16 sps:$4 sm:$0xff]  }
 0x15b   :  { %1545 = vmatpush1.bf16.msra.mxu0 %v6419_v13  ;;  %v6494_v13 = vld [vmem:[#allocation7 + $0x4e8] ss:$16 sps:$4 sm:$0xff]  }
 0x15c   :  { %1546 = vmatprep.subr.bf16.mxu0 %v6427_v15  ;;  %v6502_v15 = vld [vmem:[#allocation7 + $0x50c] ss:$16 sps:$4 sm:$0xff]  }
 0x15d   :  { %1755 = vmatpush1.bf16.msra.mxu1 %v6422_v14  ;;  %v6499_v14 = vld [vmem:[#allocation7 + $0x524] ss:$16 sps:$4 sm:$0xff]  }
 0x15e   :  { %1756 = vmatprep.subr.bf16.mxu1 %v6430_v16  ;;  %v6497_v16 = vld [vmem:[#allocation7 + $0x520] ss:$16 sps:$4 sm:$0xff]  }
 0x15f   :  { %1547 = vmatpush1.bf16.msra.mxu0 %v6425_v17  ;;  %v6500_v17 = vld [vmem:[#allocation7 + $0x508] ss:$16 sps:$4 sm:$0xff]  }
 0x160   :  { %1548 = vmatprep.subr.bf16.mxu0 %v6433_v19  ;;  %v6508_v19 = vld [vmem:[#allocation7 + $0x52c] ss:$16 sps:$4 sm:$0xff]  }
 0x161   :  { %1757 = vmatpush1.bf16.msra.mxu1 %v6428_v18  ;;  %v6505_v18 = vld [vmem:[#allocation7 + $0x544] ss:$16 sps:$4 sm:$0xff]  }
 0x162   :  { %1758 = vmatprep.subr.bf16.mxu1 %v6436_v20  ;;  %v6503_v20 = vld [vmem:[#allocation7 + $0x540] ss:$16 sps:$4 sm:$0xff]  }
 0x163   :  { %1549 = vmatpush1.bf16.msra.mxu0 %v6431_v21  ;;  %v6506_v21 = vld [vmem:[#allocation7 + $0x528] ss:$16 sps:$4 sm:$0xff]  }
 0x164   :  { %1550 = vmatprep.subr.bf16.mxu0 %v6439_v23  ;;  %v6514_v23 = vld [vmem:[#allocation7 + $0x54c] ss:$16 sps:$4 sm:$0xff]  }
 0x165   :  { %1759 = vmatpush1.bf16.msra.mxu1 %v6434_v22  ;;  %v6511_v22 = vld [vmem:[#allocation7 + $0x564] ss:$16 sps:$4 sm:$0xff]  }
 0x166   :  { %1760 = vmatprep.subr.bf16.mxu1 %v6442_v25  ;;  %v6512_v25 = vld [vmem:[#allocation7 + $0x548] ss:$16 sps:$4 sm:$0xff]  }
 0x167   :  { %1551 = vmatpush1.bf16.msra.mxu0 %v6437_v24  ;;  %v6509_v24 = vld [vmem:[#allocation7 + $0x560] ss:$16 sps:$4 sm:$0xff]  }
 0x168   :  { %1573 = vmatprep.subr.bf16.mxu0 %v6445_v29  ;;  %v6518_v29 = vld [vmem:[#allocation7 + $0x568] ss:$16 sps:$4 sm:$0xff]  }
 0x169   :  { %1761 = vmatpush1.bf16.msra.mxu1 %v6440_v26  ;;  %v6517_v26 = vld [vmem:[#allocation7 + $0x584] ss:$16 sps:$4 sm:$0xff]  }
 0x16a   :  { %1762 = vmatprep.subr.bf16.mxu1 %v6448_v30  ;;  %1553 = vmatmul.mubr.bf16.vlgmr.msra.gmra.mrb[0].mxu0 %v250_v32  ;;  %v6523_v30 = vld [vmem:[#allocation7 + $0x5a4] ss:$16 sps:$4 sm:$0xff]  }
 0x16b   :  { %1574 = vmatpush1.bf16.msra.mxu0 %v6443_v31  ;;  %1562 = vmatprep.mubr.bf16.mxu0 %v258_v37  ;;  %v6526_v31 = vld [vmem:[#allocation7 + $0x58c] ss:$16 sps:$4 sm:$0xff]  }
 0x16c   :  { %1575 = vmatprep.subr.bf16.mxu0 %v6451_v36  ;;  %v6527_v36 = vld [vmem:[#allocation7 + $0x5c0] ss:$16 sps:$4 sm:$0xff]  }
 0x16d   :  { %1763 = vmatpush1.bf16.msra.mxu1 %v6446_v33  ;;  %v6524_v33 = vld [vmem:[#allocation7 + $0x588] ss:$16 sps:$4 sm:$0xff]  }
 0x16e   :  { %1785 = vmatprep.subr.bf16.mxu1 %v6454_v39  ;;  %v6538_v39 = vld [vmem:[#allocation7 + $0x5cc] ss:$16 sps:$4 sm:$0xff]  }
 0x16f   :  { %1576 = vmatpush1.bf16.msra.mxu0 %v6449_v38  ;;  %v6535_v38 = vld [vmem:[#allocation7 + $0x5e4] ss:$16 sps:$4 sm:$0xff]  }
 0x170   :  { %1765 = vmatmul.mubr.bf16.vlgmr.msra.gmra.mrb[8].mxu1 %v250_v32  ;;  %1577 = vmatprep.subr.bf16.mxu0 %v6457_v43  ;;  %v6521_v32 = vld [vmem:[#allocation7 + $0x5a0] ss:$16 sps:$4 sm:$0xff]   ;;  %v6536_v43 = vld [vmem:[#allocation7 + $0x5c8] ss:$16 sps:$4 sm:$0xff]  }
 0x171   :  { %1786 = vmatpush1.bf16.msra.mxu1 %v6452_v40  ;;  %1774 = vmatprep.mubr.bf16.mxu1 %v258_v37  ;;  %v6530_v37 = vld [vmem:[#allocation7 + $0x5a8] ss:$16 sps:$4 sm:$0xff]   ;;  %v6533_v40 = vld [vmem:[#allocation7 + $0x5e0] ss:$16 sps:$4 sm:$0xff]  }
 0x172   :  { %1787 = vmatprep.subr.bf16.mxu1 %v6460_v44  ;;  %1563 = vmatmul.mubr.bf16.gmra.mrb[4].mxu0 %v257_v46  ;;  %v239_v44 = vld [vmem:[#allocation2 + $0x98] sm:$0xff] }
 0x173   :  { %1578 = vmatpush1.bf16.msra.mxu0 %v6455_v48  ;;  %1605 = vmatprep.mubr.bf16.mxu0 %v253_v49  ;;  %v6545_v48 = vld [vmem:[#allocation8] ss:$8 sps:$4 sm:$0xff]  }
 0x174   :  { %1579 = vmatprep.subr.bf16.mxu0 %v6463_v51  ;;  %v6550_v51 = vld [vmem:[#allocation8 + $0x14] ss:$8 sps:$4 sm:$0xff]  }
 0x175   :  { %1788 = vmatpush1.bf16.msra.mxu1 %v6458_v50  ;;  %v6539_v50 = vld [vmem:[#allocation7 + $0x5e8] ss:$16 sps:$4 sm:$0xff]  }
 0x176   :  { %1789 = vmatprep.subr.bf16.mxu1 %v6466_v52  ;;  %v260_v52 = vpack.c.bf16 %v246_v45, %v239_v44  ;;  %v6656_v44 = vld [vmem:[#allocation10 + $0x78] ss:$12 sps:$4 sm:$0xff]   ;;  %v6661_v45 = vld [vmem:[#allocation10 + $0x94] ss:$12 sps:$4 sm:$0xff]  }
 0x177   :  { %1580 = vmatpush1.bf16.msra.mxu0 %v6461_v54  ;;  %v6544_v54 = vld [vmem:[#allocation7 + $0x60c] ss:$16 sps:$4 sm:$0xff]  }
 0x178   :  { %1775 = vmatmul.mubr.bf16.gmra.mrb[12].mxu1 %v257_v46  ;;  %1581 = vmatprep.subr.bf16.mxu0 %v6469_v56  ;;  %v6547_v46 = vld [vmem:[#allocation8 + $0x4] ss:$8 sps:$4 sm:$0xff]   ;;  %v245_v56 = vld [vmem:[#allocation2 + $0xc8] sm:$0xff] }
 0x179   :  { %1790 = vmatpush1.bf16.msra.mxu1 %v6464_v55  ;;  %1817 = vmatprep.mubr.bf16.mxu1 %v253_v49  ;;  %v252_v49 = vpack.c.bf16 %v231_v42, %v224_v41  ;;  %v238_v55 = vld [vmem:[#allocation2 + $0x90] sm:$0xff]  ;;  %v6655_v41 = vld [vmem:[#allocation10 + $0x64] ss:$12 sps:$4 sm:$0xff]   ;;  %v6653_v42 = vld [vmem:[#allocation10 + $0x60] ss:$12 sps:$4 sm:$0xff]  }
 0x17a   :  { %1791 = vmatprep.subr.bf16.mxu1 %v6472_v57  ;;  %v6548_v57 = vld [vmem:[#allocation8 + $0x10] ss:$8 sps:$4 sm:$0xff]  }
 0x17b   :  { %1582 = vmatpush1.bf16.msra.mxu0 %v6467_v58  ;;  %v6542_v58 = vld [vmem:[#allocation7 + $0x608] ss:$16 sps:$4 sm:$0xff]  }
 0x17c   :  { %1583 = vmatprep.subr.bf16.mxu0 %v6475_v60  ;;  %v6551_v60 = vld [vmem:[#allocation8 + $0x20] ss:$8 sps:$4 sm:$0xff]  }
 0x17d   :  { %1792 = vmatpush1.bf16.msra.mxu1 %v6470_v59  ;;  %v6553_v59 = vld [vmem:[#allocation8 + $0x24] ss:$8 sps:$4 sm:$0xff]  }
 0x17e   :  { %1793 = vmatprep.subr.bf16.mxu1 %v6478_v61  ;;  %v259_v61 = vpack.c.bf16 %v245_v56, %v238_v55  ;;  %v6668_v55 = vld [vmem:[#allocation10 + $0xd8] ss:$12 sps:$4 sm:$0xff]  }
 0x17f   :  { %1584 = vmatpush1.bf16.msra.mxu0 %v6473_v62  ;;  %v6556_v62 = vld [vmem:[#allocation8 + $0x34] ss:$8 sps:$4 sm:$0xff]  }
 0x180   :  { %1585 = vmatprep.subr.bf16.mxu0 %v6481_v1  ;;  %v6559_v1 = vld [vmem:[#allocation8 + $0x44] ss:$8 sps:$4 sm:$0xff]  }
 0x181   :  { %1794 = vmatpush1.bf16.msra.mxu1 %v6476_v63  ;;  %v6554_v63 = vld [vmem:[#allocation8 + $0x30] ss:$8 sps:$4 sm:$0xff]  }
 0x182   :  { %1795 = vmatprep.subr.bf16.mxu1 %v6484_v2  ;;  %v6557_v2 = vld [vmem:[#allocation8 + $0x40] ss:$8 sps:$4 sm:$0xff]  }
 0x183   :  { %1586 = vmatpush1.bf16.msra.mxu0 %v6479_v3  ;;  %v6562_v3 = vld [vmem:[#allocation8 + $0x54] ss:$8 sps:$4 sm:$0xff]  }
 0x184   :  { %1587 = vmatprep.subr.bf16.mxu0 %v6487_v5  ;;  %v6565_v5 = vld [vmem:[#allocation8 + $0x64] ss:$8 sps:$4 sm:$0xff]  }
 0x185   :  { %1796 = vmatpush1.bf16.msra.mxu1 %v6482_v4  ;;  %v6560_v4 = vld [vmem:[#allocation8 + $0x50] ss:$8 sps:$4 sm:$0xff]  }
 0x186   :  { %1797 = vmatprep.subr.bf16.mxu1 %v6490_v6  ;;  %v6563_v6 = vld [vmem:[#allocation8 + $0x60] ss:$8 sps:$4 sm:$0xff]  }
 0x187   :  { %1588 = vmatpush1.bf16.msra.mxu0 %v6485_v7  ;;  %v6568_v7 = vld [vmem:[#allocation8 + $0x74] ss:$8 sps:$4 sm:$0xff]  }
 0x188   :  { %1589 = vmatprep.subr.bf16.mxu0 %v6493_v9 }
 0x189   :  { %1798 = vmatpush1.bf16.msra.mxu1 %v6488_v8  ;;  %v6566_v8 = vld [vmem:[#allocation8 + $0x70] ss:$8 sps:$4 sm:$0xff]  }
 0x18a   :  { %1799 = vmatprep.subr.bf16.mxu1 %v6496_v10  ;;  %v6571_v10 = vld [vmem:[#allocation8 + $0x84] ss:$8 sps:$4 sm:$0xff]  }
 0x18b   :  { %1590 = vmatpush1.bf16.msra.mxu0 %v6491_v12 }
 0x18c   :  { %1591 = vmatprep.subr.bf16.mxu0 %v6499_v14 }
 0x18d   :  { %1800 = vmatpush1.bf16.msra.mxu1 %v6494_v13 }
 0x18e   :  { %1801 = vmatprep.subr.bf16.mxu1 %v6502_v15  ;;  %v6569_v15 = vld [vmem:[#allocation8 + $0x80] ss:$8 sps:$4 sm:$0xff]  }
 0x18f   :  { %1592 = vmatpush1.bf16.msra.mxu0 %v6497_v16  ;;  %v6574_v16 = vld [vmem:[#allocation8 + $0x94] ss:$8 sps:$4 sm:$0xff]  }
 0x190   :  { %1593 = vmatprep.subr.bf16.mxu0 %v6505_v18  ;;  %v6575_v18 = vld [vmem:[#allocation8 + $0xa0] ss:$8 sps:$4 sm:$0xff]  }
 0x191   :  { %1802 = vmatpush1.bf16.msra.mxu1 %v6500_v17  ;;  %v6577_v17 = vld [vmem:[#allocation8 + $0xa4] ss:$8 sps:$4 sm:$0xff]  }
 0x192   :  { %1803 = vmatprep.subr.bf16.mxu1 %v6508_v19  ;;  %v6580_v19 = vld [vmem:[#allocation8 + $0xb4] ss:$8 sps:$4 sm:$0xff]  }
 0x193   :  { %1594 = vmatpush1.bf16.msra.mxu0 %v6503_v20  ;;  %v6578_v20 = vld [vmem:[#allocation8 + $0xb0] ss:$8 sps:$4 sm:$0xff]  }
 0x194   :  { %1595 = vmatprep.subr.bf16.mxu0 %v6511_v22  ;;  %v6581_v22 = vld [vmem:[#allocation8 + $0xc0] ss:$8 sps:$4 sm:$0xff]  }
 0x195   :  { %1804 = vmatpush1.bf16.msra.mxu1 %v6506_v21  ;;  %v6583_v21 = vld [vmem:[#allocation8 + $0xc4] ss:$8 sps:$4 sm:$0xff]  }
 0x196   :  { %1805 = vmatprep.subr.bf16.mxu1 %v6514_v23 }
 0x197   :  { %1596 = vmatpush1.bf16.msra.mxu0 %v6509_v24 }
 0x198   :  { %1597 = vmatprep.subr.bf16.mxu0 %v6517_v26  ;;  %v6586_v26 = vld [vmem:[#allocation8 + $0xd4] ss:$8 sps:$4 sm:$0xff]  }
 0x199   :  { %1806 = vmatpush1.bf16.msra.mxu1 %v6512_v25 }
 0x19a   :  { %1807 = vmatprep.subr.bf16.mxu1 %v6520_v27  ;;  %v6584_v27 = vld [vmem:[#allocation8 + $0xd0] ss:$8 sps:$4 sm:$0xff]  }
 0x19b   :  { %1598 = vmatpush1.bf16.msra.mxu0 %v6515_v28  ;;  %v6589_v28 = vld [vmem:[#allocation8 + $0xe4] ss:$8 sps:$4 sm:$0xff]  }
 0x19c   :  { %1599 = vmatprep.subr.bf16.mxu0 %v6523_v30  ;;  %v6592_v30 = vld [vmem:[#allocation8 + $0xf4] ss:$8 sps:$4 sm:$0xff]  }
 0x19d   :  { %1808 = vmatpush1.bf16.msra.mxu1 %v6518_v29  ;;  %v6587_v29 = vld [vmem:[#allocation8 + $0xe0] ss:$8 sps:$4 sm:$0xff]  }
 0x19e   :  { %1809 = vmatprep.subr.bf16.mxu1 %v6526_v31  ;;  %v6590_v31 = vld [vmem:[#allocation8 + $0xf0] ss:$8 sps:$4 sm:$0xff]  }
 0x19f   :  { %1600 = vmatpush1.bf16.msra.mxu0 %v6521_v32  ;;  %v6595_v32 = vld [vmem:[#allocation8 + $0x104] ss:$8 sps:$4 sm:$0xff]  }
 0x1a0   :  { %1601 = vmatprep.subr.bf16.mxu0 %v6529_v34  ;;  %v6643_v34 = vld [vmem:[#allocation10 + $0x4] ss:$12 sps:$4 sm:$0xff]  }
 0x1a1   :  { %1810 = vmatpush1.bf16.msra.mxu1 %v6524_v33  ;;  %v6641_v33 = vld [vmem:[#allocation10] ss:$12 sps:$4 sm:$0xff]  }
 0x1a2   :  { %1811 = vmatprep.subr.bf16.mxu1 %v6532_v35  ;;  %v6646_v35 = vld [vmem:[#allocation10 + $0x1c] ss:$12 sps:$4 sm:$0xff]  }
 0x1a3   :  { %1602 = vmatpush1.bf16.msra.mxu0 %v6527_v36  ;;  %v6644_v36 = vld [vmem:[#allocation10 + $0x18] ss:$12 sps:$4 sm:$0xff]  }
 0x1a4   :  { %1603 = vmatprep.subr.bf16.mxu0 %v6535_v38  ;;  %v6647_v38 = vld [vmem:[#allocation10 + $0x30] ss:$12 sps:$4 sm:$0xff]  }
 0x1a5   :  { %1812 = vmatpush1.bf16.msra.mxu1 %v6530_v37  ;;  %v6649_v37 = vld [vmem:[#allocation10 + $0x34] ss:$12 sps:$4 sm:$0xff]  }
 0x1a6   :  { %1813 = vmatprep.subr.bf16.mxu1 %v6538_v39  ;;  %v6652_v39 = vld [vmem:[#allocation10 + $0x4c] ss:$12 sps:$4 sm:$0xff]  }
 0x1a7   :  { %1604 = vmatpush1.bf16.msra.mxu0 %v6533_v40  ;;  %v6650_v40 = vld [vmem:[#allocation10 + $0x48] ss:$12 sps:$4 sm:$0xff]  }
 0x1a8   :  { %2311 = vmatprep.subr.bf16.mxu0 %v6547_v46  ;;  %v6659_v46 = vld [vmem:[#allocation10 + $0x90] ss:$12 sps:$4 sm:$0xff]  }
 0x1a9   :  { %1814 = vmatpush1.bf16.msra.mxu1 %v6536_v43  ;;  %v6658_v43 = vld [vmem:[#allocation10 + $0x7c] ss:$12 sps:$4 sm:$0xff]  }
 0x1aa   :  { %1815 = vmatprep.subr.bf16.mxu1 %v6541_v47  ;;  %1606 = vmatmul.mubr.bf16.vlgmr.msra.gmra.mrb[0].mxu0 %v252_v49  ;;  %v6664_v47 = vld [vmem:[#allocation10 + $0xac] ss:$12 sps:$4 sm:$0xff]  }
 0x1ab   :  { %1615 = vmatprep.mubr.bf16.mxu0 %v260_v52  ;;  %2312 = vmatpush1.bf16.msra.mxu0 %v6545_v48  ;;  %v6662_v48 = vld [vmem:[#allocation10 + $0xa8] ss:$12 sps:$4 sm:$0xff]  }
 0x1ac   :  { %2313 = vmatprep.subr.bf16.mxu0 %v6550_v51  ;;  %v6665_v51 = vld [vmem:[#allocation10 + $0xc0] ss:$12 sps:$4 sm:$0xff]  }
 0x1ad   :  { %1816 = vmatpush1.bf16.msra.mxu1 %v6539_v50  ;;  %v6667_v50 = vld [vmem:[#allocation10 + $0xc4] ss:$12 sps:$4 sm:$0xff]  }
 0x1ae   :  { %1838 = vmatprep.subr.bf16.mxu1 %v6544_v54  ;;  %v6670_v54 = vld [vmem:[#allocation10 + $0xdc] ss:$12 sps:$4 sm:$0xff]  }
 0x1af   :  { %2314 = vmatpush1.bf16.msra.mxu0 %v6548_v57  ;;  %v6673_v57 = vld [vmem:[#allocation10 + $0xf4] ss:$12 sps:$4 sm:$0xff]  }
 0x1b0   :  { %1818 = vmatmul.mubr.bf16.vlgmr.msra.gmra.mrb[8].mxu1 %v252_v49  ;;  %2315 = vmatprep.subr.bf16.mxu0 %v6553_v59  ;;  %v460_v49 = vlaneseq }
 0x1b1   :  { %1827 = vmatprep.mubr.bf16.mxu1 %v260_v52  ;;  %1839 = vmatpush1.bf16.msra.mxu1 %v6542_v58  ;;  %v7668_v58 = vld [vmem:[#allocation5] sm:$0xf] }
 0x1b2   :  { %1616 = vmatmul.mubr.bf16.gmra.mrb[4].mxu0 %v259_v61  ;;  %2766 = vmatprep.subr.bf16.mxu1 %v6643_v34  ;;  %v7663_v52 = vshrl.u32 %v460_v49, 7  ;;  %v6593_v34 = vld [vmem:[#allocation8 + $0x100] ss:$8 sps:$4 sm:$0xff]  }
 0x1b3   :  { %2316 = vmatpush1.bf16.msra.mxu0 %v6551_v60  ;;  %v6671_v60 = vld [vmem:[#allocation10 + $0xf0] ss:$12 sps:$4 sm:$0xff]  }
 0x1b4   :  { %2317 = vmatprep.subr.bf16.mxu0 %v6556_v62  ;;  %v7666_v56 = vsub.s32 0, %v7663_v52  ;;  %v7671_v59 = vsub.s32 1, %v7663_v52  ;;  %v6676_v62 = vld [vmem:[#allocation10 + $0x10c] ss:$12 sps:$4 sm:$0xff]  }
 0x1b7   :  { %2318 = vmatpush1.bf16.msra.mxu0 %v6554_v63  ;;  %v467_v63 = vrot.slane %v7668_v58, %v7671_v59 }
 0x1b8   :  { %1828 = vmatmul.mubr.bf16.gmra.mrb[12].mxu1 %v259_v61  ;;  %2319 = vmatprep.subr.bf16.mxu0 %v6559_v1  ;;  %v463_v61 = vrot.slane %v7668_v58, %v7666_v56 }
 0x1b9   :  { %1870 = vmatprep.mubr.bf16.mxu1 %v7356_v0 }
 0x1bb   :  { %2320 = vmatpush1.bf16.msra.mxu0 %v6557_v2  ;;  %v6674_v2 = vld [vmem:[#allocation10 + $0x108] ss:$12 sps:$4 sm:$0xff]  }
 0x1bc   :  { %2321 = vmatprep.subr.bf16.mxu0 %v6562_v3 }
 0x1bf   :  { %2322 = vmatpush1.bf16.msra.mxu0 %v6560_v4 }
 0x1c0   :  { %5531 = vmatmul.mubr.msk.bf16.vlgmr.msra.gmra.mrb[8].mxu1 %vm1460_vm0, %v7632_v11  ;;  %2323 = vmatprep.subr.bf16.mxu0 %v6565_v5  ;;  %v6572_v11 = vld [vmem:[#allocation8 + $0x90] ss:$8 sps:$4 sm:$0xff]  }
 0x1c1   :  { %1880 = vmatprep.mubr.bf16.mxu1 %v7356_v0  ;;  %2767 = vmatpush1.bf16.msra.mxu1 %v6641_v33  ;;  %v6679_v5 = vld [vmem:[#allocation10 + $0x124] ss:$12 sps:$4 sm:$0xff]  }
 0x1c2   :  { %2768 = vmatprep.subr.bf16.mxu1 %v6646_v35 }
 0x1c3   :  { %v7645_v9 = vpop.f32.mrb[0].mxu1  ;;  %2324 = vmatpush1.bf16.msra.mxu0 %v6563_v6 }
 0x1c4   :  { %v7647_v12 = vpop.f32.mrb[1].mxu1  ;;  %2325 = vmatprep.subr.bf16.mxu0 %v6568_v7 }
 0x1c5   :  { %v7649_v13 = vpop.f32.mrb[2].mxu1  ;;  %2769 = vmatpush1.bf16.msra.mxu1 %v6644_v36 }
 0x1c6   :  { %v7651_v14 = vpop.f32.mrb[3].mxu1  ;;  %2770 = vmatprep.subr.bf16.mxu1 %v6649_v37 }
 0x1c7   :  { %2326 = vmatpush1.bf16.msra.mxu0 %v6566_v8 }
 0x1c8   :  { %5532 = vmatmul.mubr.msk.bf16.gmra.mrb[12].mxu1 %vm1460_vm0, %v7637_v53  ;;  %2327 = vmatprep.subr.bf16.mxu0 %v6571_v10 }
 0x1c9   :  { %2771 = vmatpush1.bf16.msra.mxu1 %v6647_v38 }
 0x1ca   :  { %2772 = vmatprep.subr.bf16.mxu1 %v6652_v39 }
 0x1cb   :  { %2328 = vmatpush1.bf16.msra.mxu0 %v6569_v15 }
 0x1cc   :  { %2329 = vmatprep.subr.bf16.mxu0 %v6574_v16 }
 0x1cd   :  { %2773 = vmatpush1.bf16.msra.mxu1 %v6650_v40 }
 0x1ce   :  { %2774 = vmatprep.subr.bf16.mxu1 %v6655_v41  ;;  %v6596_v41 = vld [vmem:[#allocation8 + $0x110] ss:$8 sps:$4 sm:$0xff]  }
 0x1cf   :  { %2330 = vmatpush1.bf16.msra.mxu0 %v6572_v11 }
 0x1d0   :  { %2331 = vmatprep.subr.bf16.mxu0 %v6577_v17  ;;  %v6677_v17 = vld [vmem:[#allocation10 + $0x120] ss:$12 sps:$4 sm:$0xff]  }
 0x1d1   :  { %v7655_v23 = vpop.f32.mrb[4].mxu1  ;;  %2775 = vmatpush1.bf16.msra.mxu1 %v6653_v42  ;;  %v7686_v42 = vsub.s32 2, %v7663_v52 }
 0x1d2   :  { %v7657_v53 = vpop.f32.mrb[5].mxu1  ;;  %2776 = vmatprep.subr.bf16.mxu1 %v6658_v43 }
 0x1d3   :  { %2332 = vmatpush1.bf16.msra.mxu0 %v6575_v18  ;;  %v7659_v24 = vpop.f32.mrb[6].mxu1 }
 0x1d4   :  { %2333 = vmatprep.subr.bf16.mxu0 %v6580_v19  ;;  %v7661_v25 = vpop.f32.mrb[7].mxu1  ;;  %v6682_v19 = vld [vmem:[#allocation10 + $0x13c] ss:$12 sps:$4 sm:$0xff]  }
 0x1d5   :  { %2777 = vmatpush1.bf16.msra.mxu1 %v6656_v44  ;;  %v6601_v44 = vld [vmem:[#allocation8 + $0x124] ss:$8 sps:$4 sm:$0xff]  }
 0x1d6   :  { %2778 = vmatprep.subr.bf16.mxu1 %v6661_v45  ;;  %v474_v45 = vsub.s32 3, %v7663_v52 }
 0x1d7   :  { %2334 = vmatpush1.bf16.msra.mxu0 %v6578_v20 }
 0x1d8   :  { %2335 = vmatprep.subr.bf16.mxu0 %v6583_v21  ;;  %v475_v49 = vrot.slane %v7668_v58, %v474_v45 }
 0x1d9   :  { %2779 = vmatpush1.bf16.msra.mxu1 %v6659_v46 }
 0x1da   :  { %2780 = vmatprep.subr.bf16.mxu1 %v6664_v47 }
 0x1db   :  { %2336 = vmatpush1.bf16.msra.mxu0 %v6581_v22 }
 0x1dc   :  { %2337 = vmatprep.subr.bf16.mxu0 %v6586_v26 }
 0x1dd   :  { %2781 = vmatpush1.bf16.msra.mxu1 %v6662_v48 }
 0x1de   :  { %2782 = vmatprep.subr.bf16.mxu1 %v6667_v50  ;;  %v6604_v50 = vld [vmem:[#allocation8 + $0x134] ss:$8 sps:$4 sm:$0xff]  }
 0x1df   :  { %2338 = vmatpush1.bf16.msra.mxu0 %v6584_v27 }
 0x1e0   :  { %2339 = vmatprep.subr.bf16.mxu0 %v6589_v28 }
 0x1e1   :  { %2783 = vmatpush1.bf16.msra.mxu1 %v6665_v51 }
 0x1e2   :  { %2784 = vmatprep.subr.bf16.mxu1 %v6670_v54 }
 0x1e3   :  { %2340 = vmatpush1.bf16.msra.mxu0 %v6587_v29 }
 0x1e4   :  { %2341 = vmatprep.subr.bf16.mxu0 %v6592_v30 }
 0x1e5   :  { %2785 = vmatpush1.bf16.msra.mxu1 %v6668_v55 }
 0x1e6   :  { %2786 = vmatprep.subr.bf16.mxu1 %v6673_v57  ;;  %v6602_v57 = vld [vmem:[#allocation8 + $0x130] ss:$8 sps:$4 sm:$0xff]  }
 0x1e7   :  { %2342 = vmatpush1.bf16.msra.mxu0 %v6590_v31 }
 0x1e8   :  { %2364 = vmatprep.subr.bf16.mxu0 %v6595_v32 }
 0x1e9   :  { %2787 = vmatpush1.bf16.msra.mxu1 %v6671_v60 }
 0x1ea   :  { %2788 = vmatprep.subr.bf16.mxu1 %v6676_v62  ;;  %v6607_v62 = vld [vmem:[#allocation8 + $0x144] ss:$8 sps:$4 sm:$0xff]  }
 0x1ed   :  { %2789 = vmatpush1.bf16.msra.mxu1 %v6674_v2 }
 0x1ee   :  { %2790 = vmatprep.subr.bf16.mxu1 %v6679_v5  ;;  %v6605_v5 = vld [vmem:[#allocation8 + $0x140] ss:$8 sps:$4 sm:$0xff]  }
 0x1f1   :  { %2791 = vmatpush1.bf16.msra.mxu1 %v6677_v17  ;;  %v6608_v17 = vld [vmem:[#allocation8 + $0x150] ss:$8 sps:$4 sm:$0xff]  }
 0x1f2   :  { %2792 = vmatprep.subr.bf16.mxu1 %v6682_v19 }
 0x27d   :  { %v1607_v1 = vpop.f32.mrb[0].mxu0 }
 0x27e   :  { %v6130_v3 = vadd.f32 %v1607_v1, %v463_v61  ;;  %v1609_v4 = vpop.f32.mrb[1].mxu0 }
 0x27f   :  { %v6132_v6 = vadd.f32 %v1609_v4, %v467_v63  ;;  %v1611_v7 = vpop.f32.mrb[2].mxu0 }
 0x280   :  { %v6131_v8 = vadd.f32 %v6130_v3, %v7645_v9  ;;  %v6134_v10 = vadd.f32 %v1611_v7, %v463_v61  ;;  %v1613_v15 = vpop.f32.mrb[3].mxu0  ;;  %v6680_v9 = vld [vmem:[#allocation10 + $0x138] ss:$12 sps:$4 sm:$0xff]   ;;  %v6610_v7 = vld [vmem:[#allocation8 + $0x154] ss:$8 sps:$4 sm:$0xff]  }
 0x281   :  { %v6133_v16 = vadd.f32 %v6132_v6, %v7647_v12  ;;  %v6136_v11 = vadd.f32 %v1613_v15, %v467_v63  ;;  %2793 = vmatpush1.bf16.msra.mxu1 %v6680_v9  ;;  %v6611_v9 = vld [vmem:[#allocation8 + $0x160] ss:$8 sps:$4 sm:$0xff]  }
 0x282   :  { %v6135_v18 = vadd.f32 %v6134_v10, %v7649_v13  ;;  %v1891_v21 = vmax.f32 %v6131_v8, 0.0 }
 0x283   :  { %v6137_v20 = vadd.f32 %v6136_v11, %v7651_v14  ;;  %v1892_v26 = vmax.f32 %v6133_v16, 0.0  ;;  %v6598_v14 = vld [vmem:[#allocation8 + $0x114] ss:$8 sps:$4 sm:$0xff]  }
 0x284   :  { %v1895_v22 = vmax.f32 %v6135_v18, 0.0 }
 0x285   :  { %v1896_v27 = vmax.f32 %v6137_v20, 0.0  ;;  %v1617_v28 = vpop.f32.mrb[4].mxu0  ;;  %v6613_v20 = vld [vmem:[#allocation8 + $0x164] ss:$8 sps:$4 sm:$0xff]  }
 0x286   :  { %v1907_v29 = vpack.c.bf16 %v1895_v22, %v1891_v21  ;;  %v6138_v30 = vadd.f32 %v1617_v28, %v463_v61  ;;  %v1619_v31 = vpop.f32.mrb[5].mxu0 }
 0x287   :  { %v6140_v12 = vadd.f32 %v1619_v31, %v467_v63  ;;  %v1621_v32 = vpop.f32.mrb[6].mxu0  ;;  %v1908_v33 = vpack.c.bf16 %v1896_v27, %v1892_v26  ;;  %v6616_v31 = vld [vmem:[#allocation8 + $0x174] ss:$8 sps:$4 sm:$0xff]  }
 0x288   :  { %v6139_v13 = vadd.f32 %v6138_v30, %v7655_v23  ;;  %v6142_v35 = vadd.f32 %v1621_v32, %v463_v61  ;;  %v1623_v36 = vpop.f32.mrb[7].mxu0 }
 0x289   :  { %v6141_v37 = vadd.f32 %v6140_v12, %v7657_v53  ;;  %v6144_v38 = vadd.f32 %v1623_v36, %v467_v63  ;;  %2343 = vmatprep.mubr.bf16.mxu0 %v1908_v33  ;;  %v6614_v33 = vld [vmem:[#allocation8 + $0x170] ss:$8 sps:$4 sm:$0xff]  }
 0x28a   :  { %v6143_v39 = vadd.f32 %v6142_v35, %v7659_v24  ;;  %2344 = vmatmul.mubr.bf16.vlgmr.msra.gmra.mrb[8].mxu0 %v1907_v29  ;;  %v1899_v43 = vmax.f32 %v6139_v13, 0.0  ;;  %v471_v24 = vrot.slane %v7668_v58, %v7686_v42  ;;  %v6617_v13 = vld [vmem:[#allocation8 + $0x180] ss:$8 sps:$4 sm:$0xff]   ;;  %v6622_v35 = vld [vmem:[#allocation8 + $0x194] ss:$8 sps:$4 sm:$0xff]  }
 0x28b   :  { %v6145_v40 = vadd.f32 %v6144_v38, %v7661_v25  ;;  %2365 = vmatpush1.bf16.msra.mxu0 %v6593_v34  ;;  %v1900_v53 = vmax.f32 %v6141_v37, 0.0  ;;  %v6599_v25 = vld [vmem:[#allocation8 + $0x120] ss:$8 sps:$4 sm:$0xff]   ;;  %v6619_v34 = vld [vmem:[#allocation8 + $0x184] ss:$8 sps:$4 sm:$0xff]  }
 0x28c   :  { %v1903_v23 = vmax.f32 %v6143_v39, 0.0  ;;  %2366 = vmatprep.subr.bf16.mxu0 %v6598_v14  ;;  %v6620_v36 = vld [vmem:[#allocation8 + $0x190] ss:$8 sps:$4 sm:$0xff]   ;;  %v6625_v14 = vld [vmem:[#allocation8 + $0x1a4] ss:$8 sps:$4 sm:$0xff]  }
 0x28d   :  { %v1904_v46 = vmax.f32 %v6145_v40, 0.0  ;;  %v6623_v37 = vld [vmem:[#allocation8 + $0x1a0] ss:$8 sps:$4 sm:$0xff]   ;;  %v6628_v38 = vld [vmem:[#allocation8 + $0x1b4] ss:$8 sps:$4 sm:$0xff]  }
 0x28e   :  { %v1911_v47 = vpack.c.bf16 %v1903_v23, %v1899_v43  ;;  %v6626_v39 = vld [vmem:[#allocation8 + $0x1b0] ss:$8 sps:$4 sm:$0xff]   ;;  %v6631_v40 = vld [vmem:[#allocation8 + $0x1c4] ss:$8 sps:$4 sm:$0xff]   ;;  %v6634_v43 = vld [vmem:[#allocation8 + $0x1d4] ss:$8 sps:$4 sm:$0xff]  }
 0x28f   :  { %2367 = vmatpush1.bf16.msra.mxu0 %v6596_v41  ;;  %v1912_v48 = vpack.c.bf16 %v1904_v46, %v1900_v53  ;;  %v6629_v41 = vld [vmem:[#allocation8 + $0x1c0] ss:$8 sps:$4 sm:$0xff]   ;;  %v6632_v23 = vld [vmem:[#allocation8 + $0x1d0] ss:$8 sps:$4 sm:$0xff]   ;;  %v6640_v46 = vld [vmem:[#allocation8 + $0x1f4] ss:$8 sps:$4 sm:$0xff]  }
 0x290   :  { %2368 = vmatprep.subr.bf16.mxu0 %v6601_v44  ;;  %v6637_v44 = vld [vmem:[#allocation8 + $0x1e4] ss:$8 sps:$4 sm:$0xff]   ;;  %v6635_v53 = vld [vmem:[#allocation8 + $0x1e0] ss:$8 sps:$4 sm:$0xff]  }
 0x291   :  { %2353 = vmatprep.mubr.bf16.mxu0 %v1912_v48  ;;  %v6683_v48 = vld [vmem:[#allocation10 + $0x150] ss:$12 sps:$4 sm:$0xff]  }
 0x292   :  { %2354 = vmatmul.mubr.bf16.gmra.mrb[12].mxu0 %v1911_v47  ;;  %v6638_v47 = vld [vmem:[#allocation8 + $0x1f0] ss:$8 sps:$4 sm:$0xff]  }
 0x293   :  { %v1872_v51 = vpop.f32.mrb[8].mxu1  ;;  %2369 = vmatpush1.bf16.msra.mxu0 %v6599_v25  ;;  %v6688_v25 = vld [vmem:[#allocation10 + $0x16c] ss:$12 sps:$4 sm:$0xff]  }
 0x294   :  { %v6146_v54 = vadd.f32 %v1872_v51, %v471_v24  ;;  %v1874_v55 = vpop.f32.mrb[9].mxu1  ;;  %2370 = vmatprep.subr.bf16.mxu0 %v6604_v50  ;;  %v6689_v50 = vld [vmem:[#allocation10 + $0xc8] ss:$12 sps:$4 sm:$0xff]   ;;  %v1979_v51 = vld [vmem:[#allocation5 + $0x4] sm:$0x3] }
 0x295   :  { %v6147_v60 = vadd.f32 %v1874_v55, %v475_v49  ;;  %v1876_v61 = vpop.f32.mrb[10].mxu1  ;;  %v1988_v55 = vrot.slane %v1979_v51, %v7671_v59 }
 0x296   :  { %v6148_v63 = vadd.f32 %v1876_v61, %v471_v24  ;;  %v1878_v1 = vpop.f32.mrb[11].mxu1  ;;  %v1893_v3 = vmax.f32 %v6146_v54, 0.0  ;;  %v1984_v54 = vrot.slane %v1979_v51, %v7666_v56  ;;  %v6717_v51 = vld [vmem:[#allocation11 + $0x70] sm:$0xff]  }
 0x297   :  { %v6149_v2 = vadd.f32 %v1878_v1, %v475_v49  ;;  %2371 = vmatpush1.bf16.msra.mxu0 %v6602_v57  ;;  %v1894_v58 = vmax.f32 %v6147_v60, 0.0 }
 0x298   :  { %v1897_v4 = vmax.f32 %v6148_v63, 0.0  ;;  %2372 = vmatprep.subr.bf16.mxu0 %v6607_v62 }
 0x299   :  { %v1898_v6 = vmax.f32 %v6149_v2, 0.0 }
 0x29a   :  { %v1909_v8 = vpack.c.bf16 %v1897_v4, %v1893_v3 }
 0x29b   :  { %v1910_v10 = vpack.c.bf16 %v1898_v6, %v1894_v58  ;;  %v1882_v15 = vpop.f32.mrb[12].mxu1  ;;  %2373 = vmatpush1.bf16.msra.mxu0 %v6605_v5 }
 0x29c   :  { %v6150_v16 = vadd.f32 %v1882_v15, %v471_v24  ;;  %v1884_v11 = vpop.f32.mrb[13].mxu1  ;;  %2374 = vmatprep.subr.bf16.mxu0 %v6610_v7  ;;  %v6690_v15 = vld [vmem:[#allocation10 + $0x8] ss:$12 sps:$4 sm:$0xff]  }
 0x29d   :  { %v6151_v18 = vadd.f32 %v1884_v11, %v475_v49  ;;  %v1886_v19 = vpop.f32.mrb[14].mxu1  ;;  %2396 = vmatprep.mubr.bf16.mxu0 %v1910_v10 }
 0x29e   :  { %v6152_v21 = vadd.f32 %v1886_v19, %v471_v24  ;;  %v1888_v22 = vpop.f32.mrb[15].mxu1  ;;  %v1901_v27 = vmax.f32 %v6150_v16, 0.0  ;;  %v6685_v24 = vld [vmem:[#allocation10 + $0x154] ss:$12 sps:$4 sm:$0xff]  }
 0x29f   :  { %v6153_v26 = vadd.f32 %v1888_v22, %v475_v49  ;;  %2375 = vmatpush1.bf16.msra.mxu0 %v6608_v17  ;;  %v1902_v29 = vmax.f32 %v6151_v18, 0.0  ;;  %2794 = vmatprep.subr.bf16.mxu1 %v6685_v24  ;;  %v6686_v49 = vld [vmem:[#allocation10 + $0x168] ss:$12 sps:$4 sm:$0xff]   ;;  %v6691_v17 = vld [vmem:[#allocation10 + $0xe0] ss:$12 sps:$4 sm:$0xff]   ;;  %v6712_v24 = vld [vmem:[#allocation11 + $0x18] sm:$0xff]  }
 0x2a0   :  { %v1905_v28 = vmax.f32 %v6152_v21, 0.0  ;;  %2376 = vmatprep.subr.bf16.mxu0 %v6613_v20  ;;  %2795 = vmatpush1.bf16.msra.mxu1 %v6683_v48  ;;  %v6713_v48 = vld [vmem:[#allocation11 + $0x60] sm:$0xff]  }
 0x2a1   :  { %v1906_v30 = vmax.f32 %v6153_v26, 0.0  ;;  %2796 = vmatprep.subr.bf16.mxu1 %v6688_v25  ;;  %v6692_v26 = vld [vmem:[#allocation10 + $0x20] ss:$12 sps:$4 sm:$0xff]  }
 0x2a2   :  { %v1913_v12 = vpack.c.bf16 %v1905_v28, %v1901_v27  ;;  %v6714_v25 = vld [vmem:[#allocation11 + $0x20] sm:$0xff]  }
 0x2a3   :  { %v1914_v32 = vpack.c.bf16 %v1906_v30, %v1902_v29  ;;  %2377 = vmatpush1.bf16.msra.mxu0 %v6611_v9  ;;  %v6693_v9 = vld [vmem:[#allocation10 + $0xf8] ss:$12 sps:$4 sm:$0xff]  }
 0x2a4   :  { %2378 = vmatprep.subr.bf16.mxu0 %v6616_v31  ;;  %2797 = vmatpush1.bf16.msra.mxu1 %v6686_v49  ;;  %v6715_v49 = vld [vmem:[#allocation11 + $0x68] sm:$0xff]  }
 0x2a5   :  { %5900 = vmatprep.subr.bf16.mxu1 %v6689_v50  ;;  %v6716_v50 = vld [vmem:[#allocation11 + $0x28] sm:$0xff]  }
 0x2a7   :  { %2379 = vmatpush1.bf16.msra.mxu0 %v6614_v33  ;;  %v6695_v33 = vld [vmem:[#allocation10 + $0x110] ss:$12 sps:$4 sm:$0xff]  }
 0x2a8   :  { %2380 = vmatprep.subr.bf16.mxu0 %v6619_v34  ;;  %v6696_v34 = vld [vmem:[#allocation10 + $0x50] ss:$12 sps:$4 sm:$0xff]  }
 0x2ab   :  { %2381 = vmatpush1.bf16.msra.mxu0 %v6617_v13  ;;  %v6697_v13 = vld [vmem:[#allocation10 + $0x128] ss:$12 sps:$4 sm:$0xff]  }
 0x2ac   :  { %2382 = vmatprep.subr.bf16.mxu0 %v6622_v35  ;;  %v6698_v35 = vld [vmem:[#allocation10 + $0x68] ss:$12 sps:$4 sm:$0xff]  }
 0x2af   :  { %2383 = vmatpush1.bf16.msra.mxu0 %v6620_v36  ;;  %v6699_v36 = vld [vmem:[#allocation10 + $0x140] ss:$12 sps:$4 sm:$0xff]  }
 0x2b0   :  { %2384 = vmatprep.subr.bf16.mxu0 %v6625_v14  ;;  %v6700_v14 = vld [vmem:[#allocation10 + $0x80] ss:$12 sps:$4 sm:$0xff]  }
 0x2b3   :  { %2385 = vmatpush1.bf16.msra.mxu0 %v6623_v37  ;;  %v6701_v37 = vld [vmem:[#allocation10 + $0x158] ss:$12 sps:$4 sm:$0xff]  }
 0x2b4   :  { %2386 = vmatprep.subr.bf16.mxu0 %v6628_v38  ;;  %v6702_v38 = vld [vmem:[#allocation10 + $0x98] ss:$12 sps:$4 sm:$0xff]  }
 0x2b7   :  { %2387 = vmatpush1.bf16.msra.mxu0 %v6626_v39  ;;  %v6703_v39 = vld [vmem:[#allocation10 + $0x170] ss:$12 sps:$4 sm:$0xff]  }
 0x2b8   :  { %2388 = vmatprep.subr.bf16.mxu0 %v6631_v40  ;;  %v6704_v40 = vld [vmem:[#allocation10 + $0xb0] ss:$12 sps:$4 sm:$0xff]  }
 0x2bb   :  { %2389 = vmatpush1.bf16.msra.mxu0 %v6629_v41  ;;  %v6705_v41 = vld [vmem:[#allocation11 + $0x40] sm:$0xff]  }
 0x2bc   :  { %2390 = vmatprep.subr.bf16.mxu0 %v6634_v43  ;;  %v6706_v43 = vld [vmem:[#allocation11] sm:$0xff]  }
 0x2bf   :  { %2391 = vmatpush1.bf16.msra.mxu0 %v6632_v23  ;;  %v6707_v23 = vld [vmem:[#allocation11 + $0x48] sm:$0xff]  }
 0x2c0   :  { %2392 = vmatprep.subr.bf16.mxu0 %v6637_v44  ;;  %v6708_v44 = vld [vmem:[#allocation11 + $0x8] sm:$0xff]  }
 0x2c3   :  { %2393 = vmatpush1.bf16.msra.mxu0 %v6635_v53  ;;  %v6709_v53 = vld [vmem:[#allocation11 + $0x50] sm:$0xff]  }
 0x2c4   :  { %2394 = vmatprep.subr.bf16.mxu0 %v6640_v46  ;;  %v6710_v46 = vld [vmem:[#allocation11 + $0x10] sm:$0xff]  }
 0x2c7   :  { %2395 = vmatpush1.bf16.msra.mxu0 %v6638_v47  ;;  %v6711_v47 = vld [vmem:[#allocation11 + $0x58] sm:$0xff]  }
 0x2ca   :  { %2397 = vmatmul.mubr.bf16.vlgmr.msra.gmra.mrb[8].mxu0 %v1909_v8 }
 0x2cb   :  { %2406 = vmatprep.mubr.bf16.mxu0 %v1914_v32  ;;  %v6694_v32 = vld [vmem:[#allocation10 + $0x38] ss:$12 sps:$4 sm:$0xff]  }
 0x2d2   :  { %2407 = vmatmul.mubr.bf16.gmra.mrb[12].mxu0 %v1913_v12 }
 0x39d   :  { %v2398_v57 = vpop.f32.mrb[8].mxu0 }
 0x39e   :  { %v6154_v60 = vadd.f32 %v2398_v57, %v1984_v54  ;;  %v2400_v61 = vpop.f32.mrb[9].mxu0  ;;  %v6720_v57 = vld [vmem:[#allocation11 + $0x38] sm:$0xff]  }
 0x39f   :  { %v6155_v62 = vadd.f32 %v2400_v61, %v1988_v55  ;;  %v2402_v63 = vpop.f32.mrb[10].mxu0  ;;  %v6722_v61 = vld [vmem:[#allocation11 + $0x88] sm:$0xff]  }
 0x3a0   :  { %v6156_v1 = vadd.f32 %v2402_v63, %v1984_v54  ;;  %v2404_v2 = vpop.f32.mrb[11].mxu0  ;;  %v2417_v4 = vmax.f32 %v6154_v60, 0.0  ;;  %v6721_v60 = vld [vmem:[#allocation11 + $0x80] sm:$0xff]   ;;  %v6724_v63 = vld [vmem:[#allocation11 + $0x98] sm:$0xff]  }
 0x3a1   :  { %v6157_v3 = vadd.f32 %v2404_v2, %v1988_v55  ;;  %v2418_v58 = vmax.f32 %v6155_v62, 0.0  ;;  %6070 = vmatprep.subr.bf16.mxu0 %v6721_v60  ;;  %v6723_v62 = vld [vmem:[#allocation11 + $0x90] sm:$0xff]   ;;  %v6726_v2 = vld [vmem:[#allocation11 + $0xa8] sm:$0xff]  }
 0x3a2   :  { %v2419_v5 = vmax.f32 %v6156_v1, 0.0  ;;  %6071 = vmatpush3.bf16.msra.mxu0 %v6721_v60  ;;  %v6725_v1 = vld [vmem:[#allocation11 + $0xa0] sm:$0xff]  }
 0x3a3   :  { %v2420_v6 = vmax.f32 %v6157_v3, 0.0  ;;  %6072 = vmatprep.subr.bf16.mxu0 %v6722_v61  ;;  %v6727_v3 = vld [vmem:[#allocation11 + $0xb0] sm:$0xff]  }
 0x3a4   :  { %v2425_v7 = vpack.c.bf16 %v2419_v5, %v2417_v4  ;;  %v6728_v4 = vld [vmem:[#allocation11 + $0xb8] sm:$0xff]   ;;  %v2493_v5 = vld [vmem:[#allocation5 + $0x6] sm:$0x7] }
 0x3a5   :  { %v2426_v8 = vpack.c.bf16 %v2420_v6, %v2418_v58  ;;  %v2408_v10 = vpop.f32.mrb[12].mxu0  ;;  %v2498_v58 = vrot.slane %v2493_v5, %v7666_v56  ;;  %v2502_v6 = vrot.slane %v2493_v5, %v7671_v59 }
 0x3a6   :  { %v6158_v16 = vadd.f32 %v2408_v10, %v1984_v54  ;;  %v2410_v11 = vpop.f32.mrb[13].mxu0  ;;  %6073 = vmatpush3.bf16.msra.mxu0 %v6722_v61 }
 0x3a7   :  { %v6159_v18 = vadd.f32 %v2410_v11, %v1988_v55  ;;  %v2412_v19 = vpop.f32.mrb[14].mxu0  ;;  %2798 = vmatprep.mubr.bf16.mxu1 %v2426_v8  ;;  %6074 = vmatprep.subr.bf16.mxu0 %v6723_v62 }
 0x3a8   :  { %v6160_v20 = vadd.f32 %v2412_v19, %v1984_v54  ;;  %v2414_v21 = vpop.f32.mrb[15].mxu0  ;;  %2799 = vmatmul.mubr.bf16.vlgmr.msra.gmra.mrb[16].mxu1 %v2425_v7  ;;  %v2421_v27 = vmax.f32 %v6158_v16, 0.0  ;;  %v6718_v54 = vld [vmem:[#allocation11 + $0x30] sm:$0xff]  }
 0x3a9   :  { %v6161_v22 = vadd.f32 %v2414_v21, %v1988_v55  ;;  %5901 = vmatpush3.bf16.msra.mxu1 %v6690_v15  ;;  %v2422_v29 = vmax.f32 %v6159_v18, 0.0  ;;  %v6719_v55 = vld [vmem:[#allocation11 + $0x78] sm:$0xff]  }
 0x3aa   :  { %v2423_v28 = vmax.f32 %v6160_v20, 0.0  ;;  %5902 = vmatprep.subr.bf16.mxu1 %v6691_v17  ;;  %6075 = vmatpush3.bf16.msra.mxu0 %v6723_v62 }
 0x3ab   :  { %v2424_v30 = vmax.f32 %v6161_v22, 0.0  ;;  %6076 = vmatprep.subr.bf16.mxu0 %v6724_v63 }
 0x3ac   :  { %v2427_v31 = vpack.c.bf16 %v2423_v28, %v2421_v27 }
 0x3ad   :  { %v2428_v12 = vpack.c.bf16 %v2424_v30, %v2422_v29  ;;  %5903 = vmatpush3.bf16.msra.mxu1 %v6692_v26 }
 0x3ae   :  { %5904 = vmatprep.subr.bf16.mxu1 %v6693_v9  ;;  %6077 = vmatpush3.bf16.msra.mxu0 %v6724_v63 }
 0x3af   :  { %2808 = vmatprep.mubr.bf16.mxu1 %v2428_v12  ;;  %6078 = vmatprep.subr.bf16.mxu0 %v6725_v1 }
 0x3b0   :  { %2809 = vmatmul.mubr.bf16.gmra.mrb[20].mxu1 %v2427_v31 }
 0x3b1   :  { %5905 = vmatpush3.bf16.msra.mxu1 %v6694_v32  ;;  %2851 = vmatprep.mubr.bf16.mxu1 %v2426_v8 }
 0x3b2   :  { %5906 = vmatprep.subr.bf16.mxu1 %v6695_v33  ;;  %6079 = vmatpush3.bf16.msra.mxu0 %v6725_v1  ;;  %v6729_v1 = vld [vmem:[#allocation13] ss:$8 sps:$4 sm:$0xff]  }
 0x3b3   :  { %6080 = vmatprep.subr.bf16.mxu0 %v6726_v2 }
 0x3b5   :  { %5907 = vmatpush3.bf16.msra.mxu1 %v6696_v34 }
 0x3b6   :  { %5908 = vmatprep.subr.bf16.mxu1 %v6697_v13  ;;  %6081 = vmatpush3.bf16.msra.mxu0 %v6726_v2  ;;  %v6731_v2 = vld [vmem:[#allocation13 + $0x4] ss:$8 sps:$4 sm:$0xff]  }
 0x3b7   :  { %6082 = vmatprep.subr.bf16.mxu0 %v6727_v3 }
 0x3b9   :  { %5909 = vmatpush3.bf16.msra.mxu1 %v6698_v35 }
 0x3ba   :  { %5910 = vmatprep.subr.bf16.mxu1 %v6699_v36  ;;  %6083 = vmatpush3.bf16.msra.mxu0 %v6727_v3  ;;  %v6734_v3 = vld [vmem:[#allocation13 + $0x14] ss:$8 sps:$4 sm:$0xff]  }
 0x3bb   :  { %6084 = vmatprep.subr.bf16.mxu0 %v6728_v4 }
 0x3bd   :  { %5911 = vmatpush3.bf16.msra.mxu1 %v6700_v14 }
 0x3be   :  { %5912 = vmatprep.subr.bf16.mxu1 %v6701_v37  ;;  %6085 = vmatpush3.bf16.msra.mxu0 %v6728_v4  ;;  %v6732_v4 = vld [vmem:[#allocation13 + $0x10] ss:$8 sps:$4 sm:$0xff]  }
 0x3c1   :  { %5913 = vmatpush3.bf16.msra.mxu1 %v6702_v38 }
 0x3c2   :  { %5914 = vmatprep.subr.bf16.mxu1 %v6703_v39  ;;  %v2506_v39 = vrot.slane %v2493_v5, %v7686_v42  ;;  %v6737_v5 = vld [vmem:[#allocation13 + $0x24] ss:$8 sps:$4 sm:$0xff]  }
 0x3c5   :  { %5915 = vmatpush3.bf16.msra.mxu1 %v6704_v40 }
 0x3c6   :  { %5928 = vmatprep.subr.bf16.mxu1 %v6705_v41 }
 0x3c8   :  { %2852 = vmatmul.mubr.bf16.vlgmr.msra.gmra.mrb[24].mxu1 %v2425_v7 }
 0x3c9   :  { %2859 = vmatprep.mubr.bf16.mxu1 %v2428_v12  ;;  %5929 = vmatpush3.bf16.msra.mxu1 %v6706_v43 }
 0x3ca   :  { %5930 = vmatprep.subr.bf16.mxu1 %v6707_v23 }
 0x3cd   :  { %5931 = vmatpush3.bf16.msra.mxu1 %v6708_v44 }
 0x3ce   :  { %5932 = vmatprep.subr.bf16.mxu1 %v6709_v53 }
 0x3d0   :  { %2860 = vmatmul.mubr.bf16.gmra.mrb[28].mxu1 %v2427_v31 }
 0x3d1   :  { %5933 = vmatpush3.bf16.msra.mxu1 %v6710_v46 }
 0x3d2   :  { %5934 = vmatprep.subr.bf16.mxu1 %v6711_v47 }
 0x3d5   :  { %5935 = vmatpush3.bf16.msra.mxu1 %v6712_v24 }
 0x3d6   :  { %5936 = vmatprep.subr.bf16.mxu1 %v6713_v48 }
 0x3d9   :  { %5937 = vmatpush3.bf16.msra.mxu1 %v6714_v25 }
 0x3da   :  { %5938 = vmatprep.subr.bf16.mxu1 %v6715_v49 }
 0x3dd   :  { %5939 = vmatpush3.bf16.msra.mxu1 %v6716_v50 }
 0x3de   :  { %5940 = vmatprep.subr.bf16.mxu1 %v6717_v51 }
 0x3e1   :  { %5941 = vmatpush3.bf16.msra.mxu1 %v6718_v54 }
 0x3e2   :  { %5942 = vmatprep.subr.bf16.mxu1 %v6719_v55 }
 0x3e5   :  { %5943 = vmatpush3.bf16.msra.mxu1 %v6720_v57 }
 0x3e6   :  { %3297 = vmatprep.subr.bf16.mxu1 %v6731_v2 }
 0x47b   :  { %v2800_v7 = vpop.f32.mrb[16].mxu1 }
 0x47c   :  { %v2801_v8 = vadd.f32 %v2800_v7, %v2498_v58  ;;  %v2802_v10 = vpop.f32.mrb[17].mxu1  ;;  %v6738_v7 = vld [vmem:[#allocation13 + $0x30] ss:$8 sps:$4 sm:$0xff]  }
 0x47d   :  { %v2803_v15 = vadd.f32 %v2802_v10, %v2502_v6  ;;  %v2804_v16 = vpop.f32.mrb[18].mxu1  ;;  %v6741_v10 = vld [vmem:[#allocation13 + $0x40] ss:$8 sps:$4 sm:$0xff]  }
 0x47e   :  { %v2805_v11 = vadd.f32 %v2804_v16, %v2498_v58  ;;  %v2806_v17 = vpop.f32.mrb[19].mxu1  ;;  %v2868_v19 = vmax.f32 %v2801_v8, 0.0  ;;  %v6743_v8 = vld [vmem:[#allocation13 + $0x44] ss:$8 sps:$4 sm:$0xff]   ;;  %v6744_v16 = vld [vmem:[#allocation13 + $0x50] ss:$8 sps:$4 sm:$0xff]  }
 0x47f   :  { %v2807_v18 = vadd.f32 %v2806_v17, %v2502_v6  ;;  %v2869_v21 = vmax.f32 %v2803_v15, 0.0  ;;  %v6746_v15 = vld [vmem:[#allocation13 + $0x54] ss:$8 sps:$4 sm:$0xff]   ;;  %v6747_v17 = vld [vmem:[#allocation13 + $0x60] ss:$8 sps:$4 sm:$0xff]  }
 0x480   :  { %v2871_v20 = vmax.f32 %v2805_v11, 0.0  ;;  %v6749_v11 = vld [vmem:[#allocation13 + $0x64] ss:$8 sps:$4 sm:$0xff]  }
 0x481   :  { %v2872_v22 = vmax.f32 %v2807_v18, 0.0  ;;  %v6752_v18 = vld [vmem:[#allocation13 + $0x74] ss:$8 sps:$4 sm:$0xff]  }
 0x482   :  { %v2880_v26 = vpack.c.bf16 %v2871_v20, %v2868_v19  ;;  %v6750_v19 = vld [vmem:[#allocation13 + $0x70] ss:$8 sps:$4 sm:$0xff]  }
 0x483   :  { %v2881_v27 = vpack.c.bf16 %v2872_v22, %v2869_v21  ;;  %v2810_v28 = vpop.f32.mrb[20].mxu1  ;;  %v6753_v20 = vld [vmem:[#allocation14] ss:$16 sps:$4 sm:$0xff]   ;;  %v6755_v21 = vld [vmem:[#allocation14 + $0x4] ss:$16 sps:$4 sm:$0xff]  }
 0x484   :  { %v2811_v9 = vadd.f32 %v2810_v28, %v2498_v58  ;;  %v2812_v29 = vpop.f32.mrb[21].mxu1  ;;  %v6758_v22 = vld [vmem:[#allocation14 + $0xc] ss:$16 sps:$4 sm:$0xff]   ;;  %3768 = vmatprep.subr.bf16.mxu0 %v6755_v21  ;;  %v6767_v28 = vld [vmem:[#allocation14 + $0x44] ss:$16 sps:$4 sm:$0xff]  }
 0x485   :  { %v2813_v30 = vadd.f32 %v2812_v29, %v2502_v6  ;;  %v2814_v31 = vpop.f32.mrb[22].mxu1  ;;  %3117 = vmatprep.mubr.bf16.mxu1 %v2881_v27  ;;  %v6759_v27 = vld [vmem:[#allocation14 + $0x20] ss:$16 sps:$4 sm:$0xff]   ;;  %v6773_v29 = vld [vmem:[#allocation14 + $0x64] ss:$16 sps:$4 sm:$0xff]  }
 0x486   :  { %v2815_v12 = vadd.f32 %v2814_v31, %v2498_v58  ;;  %v2816_v32 = vpop.f32.mrb[23].mxu1  ;;  %3118 = vmatmul.mubr.bf16.vlgmr.msra.gmra.mrb[32].mxu1 %v2880_v26  ;;  %v2874_v34 = vmax.f32 %v2811_v9, 0.0  ;;  %v6735_v58 = vld [vmem:[#allocation13 + $0x20] ss:$8 sps:$4 sm:$0xff]   ;;  %v6761_v26 = vld [vmem:[#allocation14 + $0x24] ss:$16 sps:$4 sm:$0xff]  }
 0x487   :  { %v2817_v33 = vadd.f32 %v2816_v32, %v2502_v6  ;;  %v2875_v35 = vmax.f32 %v2813_v30, 0.0  ;;  %3298 = vmatpush1.bf16.msra.mxu1 %v6729_v1  ;;  %v6740_v6 = vld [vmem:[#allocation13 + $0x34] ss:$8 sps:$4 sm:$0xff]   ;;  %v6765_v9 = vld [vmem:[#allocation14 + $0x40] ss:$16 sps:$4 sm:$0xff]  }
 0x488   :  { %v2877_v13 = vmax.f32 %v2815_v12, 0.0  ;;  %3299 = vmatprep.subr.bf16.mxu1 %v6734_v3  ;;  %v6771_v30 = vld [vmem:[#allocation14 + $0x60] ss:$16 sps:$4 sm:$0xff]   ;;  %v6779_v31 = vld [vmem:[#allocation14 + $0x84] ss:$16 sps:$4 sm:$0xff]  }
 0x489   :  { %v2878_v36 = vmax.f32 %v2817_v33, 0.0  ;;  %v6777_v12 = vld [vmem:[#allocation14 + $0x80] ss:$16 sps:$4 sm:$0xff]   ;;  %v6785_v32 = vld [vmem:[#allocation14 + $0xa4] ss:$16 sps:$4 sm:$0xff]  }
 0x48a   :  { %v2883_v14 = vpack.c.bf16 %v2877_v13, %v2874_v34  ;;  %v6783_v33 = vld [vmem:[#allocation14 + $0xa0] ss:$16 sps:$4 sm:$0xff]   ;;  %v6791_v34 = vld [vmem:[#allocation14 + $0xc4] ss:$16 sps:$4 sm:$0xff]   ;;  %v6756_v21 = vld [vmem:[#allocation14 + $0x8] ss:$16 sps:$4 sm:$0xff]  }
 0x48b   :  { %v2884_v37 = vpack.c.bf16 %v2878_v36, %v2875_v35  ;;  %3300 = vmatpush1.bf16.msra.mxu1 %v6732_v4  ;;  %v6789_v13 = vld [vmem:[#allocation14 + $0xc0] ss:$16 sps:$4 sm:$0xff]   ;;  %v6797_v35 = vld [vmem:[#allocation14 + $0xe4] ss:$16 sps:$4 sm:$0xff]  }
 0x48c   :  { %3301 = vmatprep.subr.bf16.mxu1 %v6737_v5  ;;  %v6795_v36 = vld [vmem:[#allocation14 + $0xe0] ss:$16 sps:$4 sm:$0xff]  }
 0x48d   :  { %3125 = vmatprep.mubr.bf16.mxu1 %v2884_v37  ;;  %v6801_v37 = vld [vmem:[#allocation14 + $0x100] ss:$16 sps:$4 sm:$0xff]  }
 0x48e   :  { %3126 = vmatmul.mubr.bf16.gmra.mrb[36].mxu1 %v2883_v14  ;;  %v6803_v14 = vld [vmem:[#allocation14 + $0x104] ss:$16 sps:$4 sm:$0xff]  }
 0x48f   :  { %3329 = vmatprep.mubr.bf16.mxu1 %v7356_v0  ;;  %3302 = vmatpush1.bf16.msra.mxu1 %v6735_v58 }
 0x490   :  { %3303 = vmatprep.subr.bf16.mxu1 %v6740_v6 }
 0x493   :  { %3304 = vmatpush1.bf16.msra.mxu1 %v6738_v7 }
 0x494   :  { %3305 = vmatprep.subr.bf16.mxu1 %v6743_v8 }
 0x497   :  { %3306 = vmatpush1.bf16.msra.mxu1 %v6741_v10 }
 0x498   :  { %3307 = vmatprep.subr.bf16.mxu1 %v6746_v15 }
 0x49b   :  { %v5916_v38 = vpop.f32.mrb[24].mxu1  ;;  %3308 = vmatpush1.bf16.msra.mxu1 %v6744_v16 }
 0x49c   :  { %v5917_v40 = vpop.f32.mrb[25].mxu1  ;;  %3309 = vmatprep.subr.bf16.mxu1 %v6749_v11 }
 0x49d   :  { %v5918_v41 = vadd.f32 %v5917_v40, %v5916_v38  ;;  %v5919_v43 = vpop.f32.mrb[26].mxu1  ;;  %v6809_v38 = vld [vmem:[#allocation14 + $0x124] ss:$16 sps:$4 sm:$0xff]  }
 0x49e   :  { %v5920_v23 = vpop.f32.mrb[27].mxu1  ;;  %v6815_v40 = vld [vmem:[#allocation14 + $0x144] ss:$16 sps:$4 sm:$0xff]  }
 0x49f   :  { %v2854_v44 = vadd.f32 %v5918_v41, %v2506_v39  ;;  %v5921_v53 = vadd.f32 %v5920_v23, %v5919_v43  ;;  %3310 = vmatpush1.bf16.msra.mxu1 %v6747_v17  ;;  %v6813_v41 = vld [vmem:[#allocation14 + $0x140] ss:$16 sps:$4 sm:$0xff]   ;;  %v6821_v43 = vld [vmem:[#allocation14 + $0x164] ss:$16 sps:$4 sm:$0xff]  }
 0x4a0   :  { %3311 = vmatprep.subr.bf16.mxu1 %v6752_v18  ;;  %v6819_v23 = vld [vmem:[#allocation14 + $0x160] ss:$16 sps:$4 sm:$0xff]  }
 0x4a1   :  { %v2857_v46 = vadd.f32 %v5921_v53, %v2506_v39  ;;  %v2870_v47 = vmax.f32 %v2854_v44, 0.0  ;;  %v6827_v44 = vld [vmem:[#allocation14 + $0x184] ss:$16 sps:$4 sm:$0xff]   ;;  %v6825_v53 = vld [vmem:[#allocation14 + $0x180] ss:$16 sps:$4 sm:$0xff]  }
 0x4a3   :  { %v2873_v24 = vmax.f32 %v2857_v46, 0.0  ;;  %v5922_v48 = vpop.f32.mrb[28].mxu1  ;;  %3312 = vmatpush1.bf16.msra.mxu1 %v6750_v19  ;;  %v6833_v46 = vld [vmem:[#allocation14 + $0x1a4] ss:$16 sps:$4 sm:$0xff]  }
 0x4a4   :  { %v5923_v25 = vpop.f32.mrb[29].mxu1  ;;  %3821 = vmatprep.subr.bf16.mxu1 %v6758_v22 }
 0x4a5   :  { %v5924_v49 = vadd.f32 %v5923_v25, %v5922_v48  ;;  %v5925_v50 = vpop.f32.mrb[30].mxu1  ;;  %v2882_v51 = vpack.c.bf16 %v2873_v24, %v2870_v47  ;;  %v6831_v47 = vld [vmem:[#allocation14 + $0x1a0] ss:$16 sps:$4 sm:$0xff]  }
 0x4a6   :  { %v5926_v54 = vpop.f32.mrb[31].mxu1 }
 0x4a7   :  { %v2862_v55 = vadd.f32 %v5924_v49, %v2506_v39  ;;  %v5927_v57 = vadd.f32 %v5926_v54, %v5925_v50  ;;  %6086 = vmatprep.mubr.bf16.mxu0 %v2882_v51 }
 0x4a9   :  { %v2865_v60 = vadd.f32 %v5927_v57, %v2506_v39  ;;  %v2876_v61 = vmax.f32 %v2862_v55, 0.0  ;;  %v6807_v39 = vld [vmem:[#allocation14 + $0x120] ss:$16 sps:$4 sm:$0xff]  }
 0x4ab   :  { %v2879_v62 = vmax.f32 %v2865_v60, 0.0 }
 0x4ad   :  { %v2885_v63 = vpack.c.bf16 %v2879_v62, %v2876_v61 }
 0x4af   :  { %6087 = vmatmul.mubr.bf16.vlgmr.msra.gmra.mrb[16].mxu0 %v2885_v63  ;;  %v5645_v63 = vld [vmem:[#allocation5 + $0x9] ss:$0 sm:$0xff] }
 0x4b0   :  { %3769 = vmatpush1.bf16.msra.mxu0 %v6753_v20 }
 0x4b1   :  { %3770 = vmatprep.subr.bf16.mxu0 %v6761_v26  ;;  %v6764_v26 = vld [vmem:[#allocation14 + $0x2c] ss:$16 sps:$4 sm:$0xff]  }
 0x4b4   :  { %3771 = vmatpush1.bf16.msra.mxu0 %v6759_v27  ;;  %v6762_v27 = vld [vmem:[#allocation14 + $0x28] ss:$16 sps:$4 sm:$0xff]  }
 0x4b5   :  { %3772 = vmatprep.subr.bf16.mxu0 %v6767_v28  ;;  %v6770_v28 = vld [vmem:[#allocation14 + $0x4c] ss:$16 sps:$4 sm:$0xff]  }
 0x4b8   :  { %3773 = vmatpush1.bf16.msra.mxu0 %v6765_v9  ;;  %v6768_v9 = vld [vmem:[#allocation14 + $0x48] ss:$16 sps:$4 sm:$0xff]  }
 0x4b9   :  { %3774 = vmatprep.subr.bf16.mxu0 %v6773_v29  ;;  %v6776_v29 = vld [vmem:[#allocation14 + $0x6c] ss:$16 sps:$4 sm:$0xff]  }
 0x4bc   :  { %3775 = vmatpush1.bf16.msra.mxu0 %v6771_v30  ;;  %v6774_v30 = vld [vmem:[#allocation14 + $0x68] ss:$16 sps:$4 sm:$0xff]  }
 0x4bd   :  { %3776 = vmatprep.subr.bf16.mxu0 %v6779_v31  ;;  %v6782_v31 = vld [vmem:[#allocation14 + $0x8c] ss:$16 sps:$4 sm:$0xff]  }
 0x4c0   :  { %3777 = vmatpush1.bf16.msra.mxu0 %v6777_v12  ;;  %v6780_v12 = vld [vmem:[#allocation14 + $0x88] ss:$16 sps:$4 sm:$0xff]  }
 0x4c1   :  { %3778 = vmatprep.subr.bf16.mxu0 %v6785_v32  ;;  %v6788_v32 = vld [vmem:[#allocation14 + $0xac] ss:$16 sps:$4 sm:$0xff]  }
 0x4c4   :  { %3779 = vmatpush1.bf16.msra.mxu0 %v6783_v33  ;;  %v6786_v33 = vld [vmem:[#allocation14 + $0xa8] ss:$16 sps:$4 sm:$0xff]  }
 0x4c5   :  { %3780 = vmatprep.subr.bf16.mxu0 %v6791_v34  ;;  %v6794_v34 = vld [vmem:[#allocation14 + $0xcc] ss:$16 sps:$4 sm:$0xff]  }
 0x4c8   :  { %3781 = vmatpush1.bf16.msra.mxu0 %v6789_v13  ;;  %v6792_v13 = vld [vmem:[#allocation14 + $0xc8] ss:$16 sps:$4 sm:$0xff]  }
 0x4c9   :  { %3782 = vmatprep.subr.bf16.mxu0 %v6797_v35  ;;  %v6800_v35 = vld [vmem:[#allocation14 + $0xec] ss:$16 sps:$4 sm:$0xff]  }
 0x4cc   :  { %3783 = vmatpush1.bf16.msra.mxu0 %v6795_v36  ;;  %v6798_v36 = vld [vmem:[#allocation14 + $0xe8] ss:$16 sps:$4 sm:$0xff]  }
 0x4cd   :  { %3784 = vmatprep.subr.bf16.mxu0 %v6803_v14  ;;  %v6806_v14 = vld [vmem:[#allocation14 + $0x10c] ss:$16 sps:$4 sm:$0xff]  }
 0x4d0   :  { %3785 = vmatpush1.bf16.msra.mxu0 %v6801_v37  ;;  %v6804_v37 = vld [vmem:[#allocation14 + $0x108] ss:$16 sps:$4 sm:$0xff]  }
 0x4d1   :  { %3786 = vmatprep.subr.bf16.mxu0 %v6809_v38  ;;  %v6812_v38 = vld [vmem:[#allocation14 + $0x12c] ss:$16 sps:$4 sm:$0xff]  }
 0x4d4   :  { %3787 = vmatpush1.bf16.msra.mxu0 %v6807_v39  ;;  %v6810_v39 = vld [vmem:[#allocation14 + $0x128] ss:$16 sps:$4 sm:$0xff]  }
 0x4d5   :  { %3788 = vmatprep.subr.bf16.mxu0 %v6815_v40  ;;  %v6818_v40 = vld [vmem:[#allocation14 + $0x14c] ss:$16 sps:$4 sm:$0xff]  }
 0x4d8   :  { %3789 = vmatpush1.bf16.msra.mxu0 %v6813_v41  ;;  %v6816_v41 = vld [vmem:[#allocation14 + $0x148] ss:$16 sps:$4 sm:$0xff]  }
 0x4d9   :  { %3790 = vmatprep.subr.bf16.mxu0 %v6821_v43  ;;  %v6824_v43 = vld [vmem:[#allocation14 + $0x16c] ss:$16 sps:$4 sm:$0xff]  }
 0x4dc   :  { %3791 = vmatpush1.bf16.msra.mxu0 %v6819_v23  ;;  %v6822_v23 = vld [vmem:[#allocation14 + $0x168] ss:$16 sps:$4 sm:$0xff]  }
 0x4dd   :  { %3792 = vmatprep.subr.bf16.mxu0 %v6827_v44  ;;  %v6830_v44 = vld [vmem:[#allocation14 + $0x18c] ss:$16 sps:$4 sm:$0xff]  }
 0x4e0   :  { %3793 = vmatpush1.bf16.msra.mxu0 %v6825_v53  ;;  %v6828_v53 = vld [vmem:[#allocation14 + $0x188] ss:$16 sps:$4 sm:$0xff]  }
 0x4e1   :  { %3794 = vmatprep.subr.bf16.mxu0 %v6833_v46  ;;  %v6836_v46 = vld [vmem:[#allocation14 + $0x1ac] ss:$16 sps:$4 sm:$0xff]  }
 0x4e4   :  { %3795 = vmatpush1.bf16.msra.mxu0 %v6831_v47  ;;  %v6834_v47 = vld [vmem:[#allocation14 + $0x1a8] ss:$16 sps:$4 sm:$0xff]  }
 0x559   :  { %v5944_v24 = vpop.f32.mrb[32].mxu1 }
 0x55a   :  { %v5945_v48 = vpop.f32.mrb[33].mxu1 }
 0x55b   :  { %v5946_v25 = vadd.f32 %v5945_v48, %v5944_v24  ;;  %v5947_v49 = vpop.f32.mrb[34].mxu1  ;;  %v6839_v24 = vld [vmem:[#allocation14 + $0x1c4] ss:$16 sps:$4 sm:$0xff]   ;;  %v6842_v48 = vld [vmem:[#allocation14 + $0x1cc] ss:$16 sps:$4 sm:$0xff]  }
 0x55c   :  { %v5948_v50 = vpop.f32.mrb[35].mxu1  ;;  %3796 = vmatprep.subr.bf16.mxu0 %v6839_v24  ;;  %v6868_v24 = vld [vmem:[#allocation16 + $0xa0] sm:$0xff]  }
 0x55d   :  { %v5949_v51 = vadd.f32 %v5948_v50, %v5947_v49  ;;  %v3120_v3 = vadd.f32 %v5946_v25, %v5645_v63  ;;  %v6837_v25 = vld [vmem:[#allocation14 + $0x1c0] ss:$16 sps:$4 sm:$0xff]   ;;  %v6840_v49 = vld [vmem:[#allocation14 + $0x1c8] ss:$16 sps:$4 sm:$0xff]   ;;  %v6845_v50 = vld [vmem:[#allocation14 + $0x1e4] ss:$16 sps:$4 sm:$0xff]  }
 0x55e   :  { %3797 = vmatpush1.bf16.msra.mxu0 %v6837_v25  ;;  %v6870_v25 = vld [vmem:[#allocation16 + $0xe8] sm:$0xff]  }
 0x55f   :  { %v3123_v8 = vadd.f32 %v5949_v51, %v5645_v63  ;;  %v6848_v51 = vld [vmem:[#allocation14 + $0x1ec] ss:$16 sps:$4 sm:$0xff]   ;;  %3798 = vmatprep.subr.bf16.mxu0 %v6845_v50 }
 0x560   :  { %v6872_v50 = vld [vmem:[#allocation16 + $0xa8] sm:$0xff]  }
 0x561   :  { %v5950_v54 = vpop.f32.mrb[36].mxu1 }
 0x562   :  { %v5951_v55 = vpop.f32.mrb[37].mxu1 }
 0x563   :  { %v5952_v57 = vadd.f32 %v5951_v55, %v5950_v54  ;;  %v5953_v60 = vpop.f32.mrb[38].mxu1  ;;  %v6843_v54 = vld [vmem:[#allocation14 + $0x1e0] ss:$16 sps:$4 sm:$0xff]   ;;  %v6846_v55 = vld [vmem:[#allocation14 + $0x1e8] ss:$16 sps:$4 sm:$0xff]  }
 0x564   :  { %v5954_v61 = vpop.f32.mrb[39].mxu1  ;;  %3799 = vmatpush1.bf16.msra.mxu0 %v6843_v54  ;;  %v6874_v54 = vld [vmem:[#allocation16 + $0xf0] sm:$0xff]  }
 0x565   :  { %v5955_v62 = vadd.f32 %v5954_v61, %v5953_v60  ;;  %v3128_v1 = vadd.f32 %v5952_v57, %v5645_v63  ;;  %v6849_v57 = vld [vmem:[#allocation16 + $0x40] sm:$0xff]   ;;  %v3205_v61 = vld [vmem:[#allocation5 + $0xa] sm:$0x3] }
 0x566   :  { %v6850_v60 = vld [vmem:[#allocation16 + $0xc0] sm:$0xff]   ;;  %5966 = vmatprep.subr.bf16.mxu0 %v6849_v57  ;;  %v6876_v57 = vld [vmem:[#allocation16 + $0xb0] sm:$0xff]  }
 0x567   :  { %v3131_v58 = vadd.f32 %v5955_v62, %v5645_v63  ;;  %v3210_v62 = vrot.slane %v3205_v61, %v7666_v56  ;;  %v3214_v63 = vrot.slane %v3205_v61, %v7671_v59  ;;  %v6878_v61 = vld [vmem:[#allocation16 + $0xf8] sm:$0xff]  }
 0x582   :  { %v6088_v2 = vpop.f32.mrb[16].mxu0 }
 0x583   :  { %v3177_v4 = vadd.f32 %v6088_v2, %v3128_v1  ;;  %v3168_v5 = vpop.f32.mrb[17].mxu0 }
 0x584   :  { %v3169_v6 = vadd.f32 %v3168_v5, %v3120_v3  ;;  %v6089_v7 = vpop.f32.mrb[18].mxu0 }
 0x585   :  { %v3180_v10 = vadd.f32 %v6089_v7, %v3131_v58  ;;  %v3171_v15 = vpop.f32.mrb[19].mxu0  ;;  %v3185_v11 = vmax.f32 %v3177_v4, 0.0 }
 0x586   :  { %v3172_v16 = vadd.f32 %v3171_v15, %v3123_v8  ;;  %v3183_v18 = vmax.f32 %v3169_v6, 0.0 }
 0x587   :  { %v3186_v17 = vmax.f32 %v3180_v10, 0.0 }
 0x588   :  { %v3184_v19 = vmax.f32 %v3172_v16, 0.0 }
 0x589   :  { %v3188_v20 = vpack.c.bf16 %v3186_v17, %v3185_v11 }
 0x58a   :  { %v3187_v22 = vpack.c.bf16 %v3184_v19, %v3183_v18  ;;  %v6851_v19 = vld [vmem:[#allocation16] sm:$0xff]  }
 0x58c   :  { %3330 = vmatmul.mubr.bf16.vlgmr.msra.gmra.mrb[40].mxu1 %v3187_v22 }
 0x58d   :  { %3339 = vmatprep.mubr.bf16.mxu1 %v7356_v0  ;;  %3822 = vmatpush1.bf16.msra.mxu1 %v6756_v21 }
 0x58e   :  { %3823 = vmatprep.subr.bf16.mxu1 %v6764_v26  ;;  %v6853_v26 = vld [vmem:[#allocation16 + $0x48] sm:$0xff]  }
 0x591   :  { %3824 = vmatpush1.bf16.msra.mxu1 %v6762_v27  ;;  %v6854_v27 = vld [vmem:[#allocation16 + $0xc8] sm:$0xff]  }
 0x592   :  { %3825 = vmatprep.subr.bf16.mxu1 %v6770_v28 }
 0x594   :  { %3340 = vmatmul.mubr.bf16.gmra.mrb[44].mxu1 %v3188_v20  ;;  %v6852_v20 = vld [vmem:[#allocation16 + $0x80] sm:$0xff]  }
 0x595   :  { %3826 = vmatpush1.bf16.msra.mxu1 %v6768_v9 }
 0x596   :  { %3827 = vmatprep.subr.bf16.mxu1 %v6776_v29 }
 0x599   :  { %3828 = vmatpush1.bf16.msra.mxu1 %v6774_v30 }
 0x59a   :  { %3829 = vmatprep.subr.bf16.mxu1 %v6782_v31 }
 0x59d   :  { %3830 = vmatpush1.bf16.msra.mxu1 %v6780_v12  ;;  %v6855_v12 = vld [vmem:[#allocation16 + $0x8] sm:$0xff]  }
 0x59e   :  { %3831 = vmatprep.subr.bf16.mxu1 %v6788_v32  ;;  %v6856_v32 = vld [vmem:[#allocation16 + $0x88] sm:$0xff]  }
 0x5a1   :  { %3832 = vmatpush1.bf16.msra.mxu1 %v6786_v33 }
 0x5a2   :  { %3833 = vmatprep.subr.bf16.mxu1 %v6794_v34 }
 0x5a5   :  { %3834 = vmatpush1.bf16.msra.mxu1 %v6792_v13  ;;  %v6857_v13 = vld [vmem:[#allocation16 + $0x50] sm:$0xff]  }
 0x5a6   :  { %3835 = vmatprep.subr.bf16.mxu1 %v6800_v35  ;;  %v6858_v35 = vld [vmem:[#allocation16 + $0xd0] sm:$0xff]  }
 0x5a9   :  { %3836 = vmatpush1.bf16.msra.mxu1 %v6798_v36 }
 0x5aa   :  { %3837 = vmatprep.subr.bf16.mxu1 %v6806_v14 }
 0x5ad   :  { %3838 = vmatpush1.bf16.msra.mxu1 %v6804_v37 }
 0x5ae   :  { %3839 = vmatprep.subr.bf16.mxu1 %v6812_v38 }
 0x5b1   :  { %3840 = vmatpush1.bf16.msra.mxu1 %v6810_v39  ;;  %v6859_v39 = vld [vmem:[#allocation16 + $0x10] sm:$0xff]  }
 0x5b2   :  { %3841 = vmatprep.subr.bf16.mxu1 %v6818_v40  ;;  %v6860_v40 = vld [vmem:[#allocation16 + $0x90] sm:$0xff]  }
 0x5b5   :  { %3842 = vmatpush1.bf16.msra.mxu1 %v6816_v41  ;;  %v6861_v41 = vld [vmem:[#allocation16 + $0x58] sm:$0xff]  }
 0x5b6   :  { %3843 = vmatprep.subr.bf16.mxu1 %v6824_v43  ;;  %v6862_v43 = vld [vmem:[#allocation16 + $0xd8] sm:$0xff]  }
 0x5b9   :  { %3844 = vmatpush1.bf16.msra.mxu1 %v6822_v23  ;;  %v6863_v23 = vld [vmem:[#allocation16 + $0x18] sm:$0xff]  }
 0x5ba   :  { %3845 = vmatprep.subr.bf16.mxu1 %v6830_v44  ;;  %v6864_v44 = vld [vmem:[#allocation16 + $0x98] sm:$0xff]  }
 0x5bd   :  { %3846 = vmatpush1.bf16.msra.mxu1 %v6828_v53  ;;  %v6865_v53 = vld [vmem:[#allocation16 + $0x60] sm:$0xff]  }
 0x5be   :  { %3847 = vmatprep.subr.bf16.mxu1 %v6836_v46  ;;  %v6866_v46 = vld [vmem:[#allocation16 + $0xe0] sm:$0xff]  }
 0x5c1   :  { %3848 = vmatpush1.bf16.msra.mxu1 %v6834_v47  ;;  %v6867_v47 = vld [vmem:[#allocation16 + $0x20] sm:$0xff]  }
 0x5c2   :  { %3849 = vmatprep.subr.bf16.mxu1 %v6842_v48  ;;  %v6869_v48 = vld [vmem:[#allocation16 + $0x68] sm:$0xff]  }
 0x5c5   :  { %3850 = vmatpush1.bf16.msra.mxu1 %v6840_v49  ;;  %v6871_v49 = vld [vmem:[#allocation16 + $0x28] sm:$0xff]  }
 0x5c6   :  { %3851 = vmatprep.subr.bf16.mxu1 %v6848_v51  ;;  %v6873_v51 = vld [vmem:[#allocation16 + $0x70] sm:$0xff]  }
 0x5c9   :  { %3852 = vmatpush1.bf16.msra.mxu1 %v6846_v55  ;;  %v6875_v55 = vld [vmem:[#allocation16 + $0x30] sm:$0xff]  }
 0x5ca   :  { %5994 = vmatprep.subr.bf16.mxu1 %v6850_v60  ;;  %v6877_v60 = vld [vmem:[#allocation16 + $0x78] sm:$0xff]  }
 0x65f   :  { %v3331_v1 = vpop.f32.mrb[40].mxu1 }
 0x660   :  { %v3332_v2 = vadd.f32 %v3331_v1, %v3210_v62  ;;  %v3333_v3 = vpop.f32.mrb[41].mxu1  ;;  %v6883_v1 = vld [vmem:[#allocation17 + $0x4] ss:$12 sps:$4 sm:$0xff]  }
 0x661   :  { %v3334_v4 = vadd.f32 %v3333_v3, %v3214_v63  ;;  %v3335_v5 = vpop.f32.mrb[42].mxu1  ;;  %v3426_v3 = vld [vmem:[#allocation5 + $0xc] sm:$0xf] }
 0x662   :  { %v3336_v58 = vadd.f32 %v3335_v5, %v3210_v62  ;;  %v3337_v6 = vpop.f32.mrb[43].mxu1  ;;  %v3350_v8 = vmax.f32 %v3332_v2, 0.0  ;;  %v6890_v2 = vld [vmem:[#allocation17 + $0x8] ss:$12 sps:$4 sm:$0xff]   ;;  %v3439_v5 = vrot.slane %v3426_v3, %v7686_v42 }
 0x663   :  { %v3338_v7 = vadd.f32 %v3337_v6, %v3214_v63  ;;  %v3351_v15 = vmax.f32 %v3334_v4, 0.0  ;;  %v3431_v4 = vrot.slane %v3426_v3, %v7666_v56  ;;  %v3443_v6 = vrot.slane %v3426_v3, %v474_v45 }
 0x664   :  { %v3352_v10 = vmax.f32 %v3336_v58, 0.0  ;;  %v3435_v58 = vrot.slane %v3426_v3, %v7671_v59 }
 0x665   :  { %v3353_v16 = vmax.f32 %v3338_v7, 0.0 }
 0x666   :  { %v3358_v11 = vpack.c.bf16 %v3352_v10, %v3350_v8 }
 0x667   :  { %v3359_v17 = vpack.c.bf16 %v3353_v16, %v3351_v15  ;;  %v3341_v18 = vpop.f32.mrb[44].mxu1 }
 0x668   :  { %v3342_v21 = vadd.f32 %v3341_v18, %v3210_v62  ;;  %v3343_v22 = vpop.f32.mrb[45].mxu1 }
 0x669   :  { %v3344_v28 = vadd.f32 %v3343_v22, %v3214_v63  ;;  %v3345_v9 = vpop.f32.mrb[46].mxu1  ;;  %3800 = vmatprep.mubr.bf16.mxu0 %v3359_v17  ;;  %3853 = vmatprep.mubr.bf16.mxu1 %v3359_v17 }
 0x66a   :  { %v3346_v29 = vadd.f32 %v3345_v9, %v3210_v62  ;;  %v3347_v30 = vpop.f32.mrb[47].mxu1  ;;  %3801 = vmatmul.mubr.bf16.vlgmr.msra.gmra.mrb[20].mxu0 %v3358_v11  ;;  %3854 = vmatmul.mubr.bf16.vlgmr.msra.gmra.mrb[48].mxu1 %v3358_v11  ;;  %v3354_v33 = vmax.f32 %v3342_v21, 0.0  ;;  %v6879_v62 = vld [vmem:[#allocation16 + $0x38] sm:$0xff]  }
 0x66b   :  { %v3348_v31 = vadd.f32 %v3347_v30, %v3214_v63  ;;  %5967 = vmatpush3.bf16.msra.mxu0 %v6851_v19  ;;  %5995 = vmatpush3.bf16.msra.mxu1 %v6852_v20  ;;  %v3355_v36 = vmax.f32 %v3344_v28, 0.0  ;;  %v6880_v63 = vld [vmem:[#allocation16 + $0xb8] sm:$0xff]  }
 0x66c   :  { %v3356_v34 = vmax.f32 %v3346_v29, 0.0  ;;  %5968 = vmatprep.subr.bf16.mxu0 %v6853_v26  ;;  %5996 = vmatprep.subr.bf16.mxu1 %v6854_v27 }
 0x66d   :  { %v3357_v14 = vmax.f32 %v3348_v31, 0.0 }
 0x66e   :  { %v3360_v37 = vpack.c.bf16 %v3356_v34, %v3354_v33 }
 0x66f   :  { %v3361_v38 = vpack.c.bf16 %v3357_v14, %v3355_v36  ;;  %5969 = vmatpush3.bf16.msra.mxu0 %v6855_v12  ;;  %5997 = vmatpush3.bf16.msra.mxu1 %v6856_v32 }
 0x670   :  { %5970 = vmatprep.subr.bf16.mxu0 %v6857_v13  ;;  %5998 = vmatprep.subr.bf16.mxu1 %v6858_v35 }
 0x671   :  { %3810 = vmatprep.mubr.bf16.mxu0 %v3361_v38  ;;  %3863 = vmatprep.mubr.bf16.mxu1 %v3361_v38  ;;  %v6881_v38 = vld [vmem:[#allocation17] ss:$12 sps:$4 sm:$0xff]  }
 0x672   :  { %3811 = vmatmul.mubr.bf16.gmra.mrb[24].mxu0 %v3360_v37  ;;  %3864 = vmatmul.mubr.bf16.gmra.mrb[52].mxu1 %v3360_v37 }
 0x673   :  { %5971 = vmatpush3.bf16.msra.mxu0 %v6859_v39  ;;  %5999 = vmatpush3.bf16.msra.mxu1 %v6860_v40 }
 0x674   :  { %5972 = vmatprep.subr.bf16.mxu0 %v6861_v41  ;;  %6000 = vmatprep.subr.bf16.mxu1 %v6862_v43 }
 0x677   :  { %5973 = vmatpush3.bf16.msra.mxu0 %v6863_v23  ;;  %6001 = vmatpush3.bf16.msra.mxu1 %v6864_v44  ;;  %v6886_v23 = vld [vmem:[#allocation17 + $0x1c] ss:$12 sps:$4 sm:$0xff]   ;;  %v6894_v44 = vld [vmem:[#allocation17 + $0x20] ss:$12 sps:$4 sm:$0xff]  }
 0x678   :  { %5974 = vmatprep.subr.bf16.mxu0 %v6865_v53  ;;  %6002 = vmatprep.subr.bf16.mxu1 %v6866_v46 }
 0x67b   :  { %5975 = vmatpush3.bf16.msra.mxu0 %v6867_v47  ;;  %6003 = vmatpush3.bf16.msra.mxu1 %v6868_v24 }
 0x67c   :  { %5976 = vmatprep.subr.bf16.mxu0 %v6869_v48  ;;  %6004 = vmatprep.subr.bf16.mxu1 %v6870_v25 }
 0x67f   :  { %5977 = vmatpush3.bf16.msra.mxu0 %v6871_v49  ;;  %6005 = vmatpush3.bf16.msra.mxu1 %v6872_v50 }
 0x680   :  { %5978 = vmatprep.subr.bf16.mxu0 %v6873_v51  ;;  %6006 = vmatprep.subr.bf16.mxu1 %v6874_v54 }
 0x683   :  { %5979 = vmatpush3.bf16.msra.mxu0 %v6875_v55  ;;  %6007 = vmatpush3.bf16.msra.mxu1 %v6876_v57  ;;  %v6884_v55 = vld [vmem:[#allocation17 + $0x18] ss:$12 sps:$4 sm:$0xff]   ;;  %v6889_v57 = vld [vmem:[#allocation17 + $0x34] ss:$12 sps:$4 sm:$0xff]  }
 0x684   :  { %5980 = vmatprep.subr.bf16.mxu0 %v6877_v60  ;;  %6008 = vmatprep.subr.bf16.mxu1 %v6878_v61 }
 0x687   :  { %5981 = vmatpush3.bf16.msra.mxu0 %v6879_v62  ;;  %6009 = vmatpush3.bf16.msra.mxu1 %v6880_v63 }
 0x688   :  { %4442 = vmatprep.subr.bf16.mxu0 %v6883_v1  ;;  %6090 = vmatprep.subr.bf16.mxu1 %v6890_v2  ;;  %v6898_v1 = vld [vmem:[#allocation17 + $0x38] ss:$12 sps:$4 sm:$0xff]  }
 0x73d   :  { %v3802_v7 = vpop.f32.mrb[20].mxu0  ;;  %v3855_v8 = vpop.f32.mrb[48].mxu1 }
 0x73e   :  { %v3803_v10 = vadd.f32 %v3802_v7, %v3431_v4  ;;  %v3856_v15 = vadd.f32 %v3855_v8, %v3439_v5  ;;  %v3804_v16 = vpop.f32.mrb[21].mxu0  ;;  %v3857_v11 = vpop.f32.mrb[49].mxu1 }
 0x73f   :  { %v3805_v17 = vadd.f32 %v3804_v16, %v3435_v58  ;;  %v3858_v18 = vadd.f32 %v3857_v11, %v3443_v6  ;;  %v3806_v19 = vpop.f32.mrb[22].mxu0  ;;  %v3859_v20 = vpop.f32.mrb[50].mxu1  ;;  %v6891_v16 = vld [vmem:[#allocation17 + $0x48] ss:$12 sps:$4 sm:$0xff]   ;;  %v6897_v11 = vld [vmem:[#allocation17 + $0x64] ss:$12 sps:$4 sm:$0xff]  }
 0x740   :  { %v3807_v21 = vadd.f32 %v3806_v19, %v3431_v4  ;;  %v3860_v22 = vadd.f32 %v3859_v20, %v3439_v5  ;;  %v3808_v26 = vpop.f32.mrb[23].mxu0  ;;  %v3861_v27 = vpop.f32.mrb[51].mxu1  ;;  %v3874_v29 = vmax.f32 %v3803_v10, 0.0  ;;  %v3876_v30 = vmax.f32 %v3856_v15, 0.0  ;;  %v6902_v19 = vld [vmem:[#allocation17 + $0x50] ss:$12 sps:$4 sm:$0xff]  }
 0x741   :  { %v3809_v28 = vadd.f32 %v3808_v26, %v3435_v58  ;;  %v3862_v9 = vadd.f32 %v3861_v27, %v3443_v6  ;;  %v3875_v31 = vmax.f32 %v3805_v17, 0.0  ;;  %v3877_v12 = vmax.f32 %v3858_v18, 0.0  ;;  %v6895_v17 = vld [vmem:[#allocation17 + $0x60] ss:$12 sps:$4 sm:$0xff]   ;;  %v6901_v18 = vld [vmem:[#allocation17 + $0x7c] ss:$12 sps:$4 sm:$0xff]  }
 0x742   :  { %v3878_v52 = vmax.f32 %v3807_v21, 0.0  ;;  %v3880_v45 = vmax.f32 %v3860_v22, 0.0  ;;  %v6899_v20 = vld [vmem:[#allocation17 + $0x78] ss:$12 sps:$4 sm:$0xff]   ;;  %v6905_v21 = vld [vmem:[#allocation17 + $0x94] ss:$12 sps:$4 sm:$0xff]  }
 0x743   :  { %v3879_v32 = vmax.f32 %v3809_v28, 0.0  ;;  %v3881_v33 = vmax.f32 %v3862_v9, 0.0  ;;  %v6906_v22 = vld [vmem:[#allocation17 + $0x68] ss:$12 sps:$4 sm:$0xff]   ;;  %v6903_v26 = vld [vmem:[#allocation17 + $0x90] ss:$12 sps:$4 sm:$0xff]  }
 0x744   :  { %v3890_v34 = vpack.c.bf16 %v3878_v52, %v3874_v29  ;;  %v3892_v13 = vpack.c.bf16 %v3880_v45, %v3876_v30  ;;  %v6909_v27 = vld [vmem:[#allocation17 + $0xac] ss:$12 sps:$4 sm:$0xff]   ;;  %v6907_v9 = vld [vmem:[#allocation17 + $0xa8] ss:$12 sps:$4 sm:$0xff]   ;;  %v6912_v30 = vld [vmem:[#allocation17 + $0xb0] ss:$12 sps:$4 sm:$0xff]  }
 0x745   :  { %v3891_v35 = vpack.c.bf16 %v3879_v32, %v3875_v31  ;;  %v3893_v36 = vpack.c.bf16 %v3881_v33, %v3877_v12  ;;  %v3812_v14 = vpop.f32.mrb[24].mxu0  ;;  %v3865_v37 = vpop.f32.mrb[52].mxu1  ;;  %v6910_v28 = vld [vmem:[#allocation17 + $0x80] ss:$12 sps:$4 sm:$0xff]   ;;  %v6911_v29 = vld [vmem:[#allocation17 + $0x98] ss:$12 sps:$4 sm:$0xff]  }
 0x746   :  { %v3813_v39 = vadd.f32 %v3812_v14, %v3431_v4  ;;  %v3866_v40 = vadd.f32 %v3865_v37, %v3439_v5  ;;  %v3814_v41 = vpop.f32.mrb[25].mxu0  ;;  %v3867_v43 = vpop.f32.mrb[53].mxu1  ;;  %v6915_v52 = vld [vmem:[#allocation19 + $0x4] ss:$8 sps:$4 sm:$0xff]   ;;  %v5750_v12 = vld [vmem:[#allocation5 + $0x10] ss:$0 sm:$0xff] }
 0x747   :  { %v3815_v53 = vadd.f32 %v3814_v41, %v3435_v58  ;;  %v3868_v46 = vadd.f32 %v3867_v43, %v3443_v6  ;;  %v3816_v47 = vpop.f32.mrb[26].mxu0  ;;  %v3869_v24 = vpop.f32.mrb[54].mxu1  ;;  %4193 = vmatprep.mubr.bf16.mxu0 %v3891_v35  ;;  %4242 = vmatprep.mubr.bf16.mxu1 %v3893_v36 }
 0x748   :  { %v3817_v48 = vadd.f32 %v3816_v47, %v3431_v4  ;;  %v3870_v25 = vadd.f32 %v3869_v24, %v3439_v5  ;;  %v3818_v49 = vpop.f32.mrb[27].mxu0  ;;  %v3871_v50 = vpop.f32.mrb[55].mxu1  ;;  %4194 = vmatmul.mubr.bf16.vlgmr.msra.gmra.mrb[28].mxu0 %v3890_v34  ;;  %4243 = vmatmul.mubr.bf16.vlgmr.msra.gmra.mrb[56].mxu1 %v3892_v13  ;;  %v3882_v60 = vmax.f32 %v3813_v39, 0.0  ;;  %v3884_v61 = vmax.f32 %v3866_v40, 0.0 }
 0x749   :  { %v3819_v51 = vadd.f32 %v3818_v49, %v3435_v58  ;;  %v3872_v54 = vadd.f32 %v3871_v50, %v3443_v6  ;;  %4443 = vmatpush1.bf16.msra.mxu0 %v6881_v38  ;;  %6091 = vmatpush3.bf16.msra.mxu1 %v6890_v2  ;;  %v3883_v3 = vmax.f32 %v3815_v53, 0.0  ;;  %v3885_v4 = vmax.f32 %v3868_v46, 0.0  ;;  %v6887_v6 = vld [vmem:[#allocation17 + $0x30] ss:$12 sps:$4 sm:$0xff]   ;;  %v6893_v2 = vld [vmem:[#allocation17 + $0x4c] ss:$12 sps:$4 sm:$0xff]  }
 0x74a   :  { %v3886_v62 = vmax.f32 %v3817_v48, 0.0  ;;  %v3888_v63 = vmax.f32 %v3870_v25, 0.0  ;;  %4444 = vmatprep.subr.bf16.mxu0 %v6886_v23  ;;  %6092 = vmatprep.subr.bf16.mxu1 %v6894_v44 }
 0x74b   :  { %v3887_v5 = vmax.f32 %v3819_v51, 0.0  ;;  %v3889_v7 = vmax.f32 %v3872_v54, 0.0 }
 0x74c   :  { %v3894_v8 = vpack.c.bf16 %v3886_v62, %v3882_v60  ;;  %v3896_v10 = vpack.c.bf16 %v3888_v63, %v3884_v61 }
 0x74d   :  { %v3895_v15 = vpack.c.bf16 %v3887_v5, %v3883_v3  ;;  %v3897_v58 = vpack.c.bf16 %v3889_v7, %v3885_v4  ;;  %4445 = vmatpush1.bf16.msra.mxu0 %v6884_v55  ;;  %6093 = vmatpush3.bf16.msra.mxu1 %v6894_v44  ;;  %v6916_v5 = vld [vmem:[#allocation19 + $0x10] ss:$8 sps:$4 sm:$0xff]  }
 0x74e   :  { %4446 = vmatprep.subr.bf16.mxu0 %v6889_v57  ;;  %6094 = vmatprep.subr.bf16.mxu1 %v6898_v1  ;;  %v6913_v57 = vld [vmem:[#allocation19] ss:$8 sps:$4 sm:$0xff]  }
 0x74f   :  { %4201 = vmatprep.mubr.bf16.mxu0 %v3895_v15  ;;  %4250 = vmatprep.mubr.bf16.mxu1 %v3897_v58  ;;  %v6919_v58 = vld [vmem:[#allocation19 + $0x20] ss:$8 sps:$4 sm:$0xff]  }
 0x750   :  { %4202 = vmatmul.mubr.bf16.gmra.mrb[32].mxu0 %v3894_v8  ;;  %4251 = vmatmul.mubr.bf16.gmra.mrb[60].mxu1 %v3896_v10  ;;  %v6921_v8 = vld [vmem:[#allocation19 + $0x24] ss:$8 sps:$4 sm:$0xff]  }
 0x751   :  { %4447 = vmatpush1.bf16.msra.mxu0 %v6887_v6  ;;  %6095 = vmatpush3.bf16.msra.mxu1 %v6898_v1  ;;  %v6918_v1 = vld [vmem:[#allocation19 + $0x14] ss:$8 sps:$4 sm:$0xff]  }
 0x752   :  { %4448 = vmatprep.subr.bf16.mxu0 %v6893_v2  ;;  %4474 = vmatprep.mubr.bf16.mxu0 %v7356_v0  ;;  %v6924_v2 = vld [vmem:[#allocation19 + $0x34] ss:$8 sps:$4 sm:$0xff]  }
 0x753   :  { %6096 = vmatprep.subr.bf16.mxu1 %v6902_v19 }
 0x755   :  { %4449 = vmatpush1.bf16.msra.mxu0 %v6891_v16  ;;  %6097 = vmatpush3.bf16.msra.mxu1 %v6902_v19  ;;  %v6922_v16 = vld [vmem:[#allocation19 + $0x30] ss:$8 sps:$4 sm:$0xff]  }
 0x756   :  { %4450 = vmatprep.subr.bf16.mxu0 %v6897_v11  ;;  %6098 = vmatprep.subr.bf16.mxu1 %v6906_v22  ;;  %v6927_v11 = vld [vmem:[#allocation19 + $0x44] ss:$8 sps:$4 sm:$0xff]   ;;  %v6928_v19 = vld [vmem:[#allocation19 + $0x50] ss:$8 sps:$4 sm:$0xff]  }
 0x759   :  { %4451 = vmatpush1.bf16.msra.mxu0 %v6895_v17  ;;  %6099 = vmatpush3.bf16.msra.mxu1 %v6906_v22  ;;  %v6925_v17 = vld [vmem:[#allocation19 + $0x40] ss:$8 sps:$4 sm:$0xff]   ;;  %v6936_v22 = vld [vmem:[#allocation19 + $0x74] ss:$8 sps:$4 sm:$0xff]  }
 0x75a   :  { %4452 = vmatprep.subr.bf16.mxu0 %v6901_v18  ;;  %6100 = vmatprep.subr.bf16.mxu1 %v6910_v28  ;;  %v6930_v18 = vld [vmem:[#allocation19 + $0x54] ss:$8 sps:$4 sm:$0xff]  }
 0x75d   :  { %4453 = vmatpush1.bf16.msra.mxu0 %v6899_v20  ;;  %6101 = vmatpush3.bf16.msra.mxu1 %v6910_v28  ;;  %v6933_v20 = vld [vmem:[#allocation19 + $0x64] ss:$8 sps:$4 sm:$0xff]   ;;  %v6937_v28 = vld [vmem:[#allocation19 + $0x80] ss:$8 sps:$4 sm:$0xff]  }
 0x75e   :  { %4454 = vmatprep.subr.bf16.mxu0 %v6905_v21  ;;  %6102 = vmatprep.subr.bf16.mxu1 %v6911_v29  ;;  %v6931_v21 = vld [vmem:[#allocation19 + $0x60] ss:$8 sps:$4 sm:$0xff]  }
 0x761   :  { %4455 = vmatpush1.bf16.msra.mxu0 %v6903_v26  ;;  %6103 = vmatpush3.bf16.msra.mxu1 %v6911_v29  ;;  %v6934_v26 = vld [vmem:[#allocation19 + $0x70] ss:$8 sps:$4 sm:$0xff]  }
 0x762   :  { %4456 = vmatprep.subr.bf16.mxu0 %v6909_v27  ;;  %6104 = vmatprep.subr.bf16.mxu1 %v6912_v30  ;;  %v6939_v27 = vld [vmem:[#allocation19 + $0x84] ss:$8 sps:$4 sm:$0xff]   ;;  %v6940_v29 = vld [vmem:[#allocation19 + $0x90] ss:$8 sps:$4 sm:$0xff]  }
 0x765   :  { %4457 = vmatpush1.bf16.msra.mxu0 %v6907_v9  ;;  %6105 = vmatpush3.bf16.msra.mxu1 %v6912_v30  ;;  %v6942_v9 = vld [vmem:[#allocation19 + $0x94] ss:$8 sps:$4 sm:$0xff]   ;;  %v6945_v30 = vld [vmem:[#allocation19 + $0xa4] ss:$8 sps:$4 sm:$0xff]  }
 0x766   :  { %4862 = vmatprep.subr.bf16.mxu0 %v6915_v52  ;;  %v6943_v52 = vld [vmem:[#allocation19 + $0xa0] ss:$8 sps:$4 sm:$0xff]  }
 0x81b   :  { %v5982_v45 = vpop.f32.mrb[28].mxu0  ;;  %v6010_v31 = vpop.f32.mrb[56].mxu1 }
 0x81c   :  { %v5983_v32 = vpop.f32.mrb[29].mxu0  ;;  %v6011_v33 = vpop.f32.mrb[57].mxu1 }
 0x81d   :  { %v5984_v34 = vadd.f32 %v5983_v32, %v5982_v45  ;;  %v6012_v13 = vadd.f32 %v6011_v33, %v6010_v31  ;;  %v5985_v35 = vpop.f32.mrb[30].mxu0  ;;  %v6013_v36 = vpop.f32.mrb[58].mxu1  ;;  %v6948_v45 = vld [vmem:[#allocation19 + $0xb4] ss:$8 sps:$4 sm:$0xff]   ;;  %v6946_v31 = vld [vmem:[#allocation19 + $0xb0] ss:$8 sps:$4 sm:$0xff]  }
 0x81e   :  { %v5986_v14 = vpop.f32.mrb[31].mxu0  ;;  %v6014_v37 = vpop.f32.mrb[59].mxu1  ;;  %v6949_v32 = vld [vmem:[#allocation19 + $0xc0] ss:$8 sps:$4 sm:$0xff]   ;;  %v6954_v33 = vld [vmem:[#allocation19 + $0xd4] ss:$8 sps:$4 sm:$0xff]  }
 0x81f   :  { %v4196_v38 = vadd.f32 %v5984_v34, %v5750_v12  ;;  %v5987_v39 = vadd.f32 %v5986_v14, %v5985_v35  ;;  %v6015_v40 = vadd.f32 %v6014_v37, %v6013_v36  ;;  %v6952_v34 = vld [vmem:[#allocation19 + $0xd0] ss:$8 sps:$4 sm:$0xff]   ;;  %v6955_v35 = vld [vmem:[#allocation19 + $0xe0] ss:$8 sps:$4 sm:$0xff]   ;;  %v6960_v36 = vld [vmem:[#allocation19 + $0xf4] ss:$8 sps:$4 sm:$0xff]  }
 0x820   :  { %v6958_v14 = vld [vmem:[#allocation19 + $0xf0] ss:$8 sps:$4 sm:$0xff]   ;;  %v6963_v37 = vld [vmem:[#allocation19 + $0x104] ss:$8 sps:$4 sm:$0xff]  }
 0x821   :  { %v4245_v41 = vadd.f32 %v6012_v13, %v4196_v38  ;;  %v4199_v43 = vadd.f32 %v5987_v39, %v5750_v12  ;;  %v6957_v13 = vld [vmem:[#allocation19 + $0xe4] ss:$8 sps:$4 sm:$0xff]  }
 0x822   :  { %v6985_v38 = vld [vmem:[#allocation20 + $0x40] sm:$0xff]  }
 0x823   :  { %v4248_v23 = vadd.f32 %v6015_v40, %v4199_v43  ;;  %v5988_v44 = vpop.f32.mrb[32].mxu0  ;;  %v6016_v53 = vpop.f32.mrb[60].mxu1  ;;  %v4259_v24 = vmax.f32 %v4245_v41, 0.0  ;;  %v6986_v39 = vld [vmem:[#allocation20] sm:$0xff]   ;;  %v6987_v40 = vld [vmem:[#allocation20 + $0x48] sm:$0xff]   ;;  %6032 = vmatprep.subr.bf16.mxu1 %v6985_v38  ;;  %v6989_v43 = vld [vmem:[#allocation20 + $0x50] sm:$0xff]  }
 0x824   :  { %v5989_v46 = vpop.f32.mrb[33].mxu0  ;;  %v6017_v47 = vpop.f32.mrb[61].mxu1  ;;  %v6988_v41 = vld [vmem:[#allocation20 + $0x8] sm:$0xff]  }
 0x825   :  { %v4260_v48 = vmax.f32 %v4248_v23, 0.0  ;;  %v5990_v25 = vadd.f32 %v5989_v46, %v5988_v44  ;;  %v6018_v49 = vadd.f32 %v6017_v47, %v6016_v53  ;;  %v5991_v50 = vpop.f32.mrb[34].mxu0  ;;  %v6019_v51 = vpop.f32.mrb[62].mxu1  ;;  %v6990_v23 = vld [vmem:[#allocation20 + $0x10] sm:$0xff]   ;;  %v6991_v44 = vld [vmem:[#allocation20 + $0x58] sm:$0xff]   ;;  %v6993_v46 = vld [vmem:[#allocation20 + $0x60] sm:$0xff]  }
 0x826   :  { %v5992_v54 = vpop.f32.mrb[35].mxu0  ;;  %v6020_v55 = vpop.f32.mrb[63].mxu1  ;;  %v6992_v53 = vld [vmem:[#allocation20 + $0x18] sm:$0xff]   ;;  %v6994_v47 = vld [vmem:[#allocation20 + $0x20] sm:$0xff]  }
 0x827   :  { %v4263_v60 = vpack.c.bf16 %v4260_v48, %v4259_v24  ;;  %v4204_v61 = vadd.f32 %v5990_v25, %v5750_v12  ;;  %v5993_v62 = vadd.f32 %v5992_v54, %v5991_v50  ;;  %v6021_v63 = vadd.f32 %v6020_v55, %v6019_v51  ;;  %v6995_v24 = vld [vmem:[#allocation20 + $0x68] sm:$0xff]   ;;  %v4297_v48 = vld [vmem:[#allocation5 + $0x11] sm:$0x7] }
 0x828   :  { %v4302_v25 = vrot.slane %v4297_v48, %v7666_v56  ;;  %v6967_v38 = vld [vmem:[#allocation19 + $0x120] ss:$8 sps:$4 sm:$0xff]  }
 0x829   :  { %v4253_v3 = vadd.f32 %v6018_v49, %v4204_v61  ;;  %v4207_v4 = vadd.f32 %v5993_v62, %v5750_v12  ;;  %4475 = vmatmul.mubr.bf16.vlgmr.msra.gmra.mrb[36].mxu0 %v4263_v60  ;;  %6106 = vmatprep.mubr.bf16.mxu1 %v4263_v60  ;;  %v6951_v12 = vld [vmem:[#allocation19 + $0xc4] ss:$8 sps:$4 sm:$0xff]   ;;  %v4306_v49 = vrot.slane %v4297_v48, %v7671_v59 }
 0x82a   :  { %4484 = vmatprep.mubr.bf16.mxu0 %v7356_v0  ;;  %4863 = vmatpush1.bf16.msra.mxu0 %v6913_v57 }
 0x82b   :  { %v4256_v7 = vadd.f32 %v6021_v63, %v4207_v4  ;;  %4864 = vmatprep.subr.bf16.mxu0 %v6918_v1  ;;  %v4261_v10 = vmax.f32 %v4253_v3, 0.0  ;;  %v4310_v3 = vrot.slane %v4297_v48, %v7686_v42  ;;  %v6996_v48 = vld [vmem:[#allocation20 + $0x28] sm:$0xff]  }
 0x82d   :  { %v4262_v15 = vmax.f32 %v4256_v7, 0.0 }
 0x82e   :  { %4865 = vmatpush1.bf16.msra.mxu0 %v6916_v5 }
 0x82f   :  { %v4264_v6 = vpack.c.bf16 %v4262_v15, %v4261_v10  ;;  %4866 = vmatprep.subr.bf16.mxu0 %v6921_v8 }
 0x831   :  { %4485 = vmatmul.mubr.bf16.gmra.mrb[40].mxu0 %v4264_v6  ;;  %6107 = vmatmul.mubr.bf16.vlgmr.msra.gmra.mrb[64].mxu1 %v4264_v6 }
 0x832   :  { %4867 = vmatpush1.bf16.msra.mxu0 %v6919_v58  ;;  %6033 = vmatpush3.bf16.msra.mxu1 %v6986_v39  ;;  %v6961_v58 = vld [vmem:[#allocation19 + $0x100] ss:$8 sps:$4 sm:$0xff]   ;;  %v6972_v39 = vld [vmem:[#allocation19 + $0x134] ss:$8 sps:$4 sm:$0xff]  }
 0x833   :  { %4868 = vmatprep.subr.bf16.mxu0 %v6924_v2  ;;  %6034 = vmatprep.subr.bf16.mxu1 %v6987_v40  ;;  %v6970_v40 = vld [vmem:[#allocation19 + $0x130] ss:$8 sps:$4 sm:$0xff]  }
 0x836   :  { %4869 = vmatpush1.bf16.msra.mxu0 %v6922_v16  ;;  %6035 = vmatpush3.bf16.msra.mxu1 %v6988_v41  ;;  %v6975_v41 = vld [vmem:[#allocation19 + $0x144] ss:$8 sps:$4 sm:$0xff]  }
 0x837   :  { %4870 = vmatprep.subr.bf16.mxu0 %v6927_v11  ;;  %6036 = vmatprep.subr.bf16.mxu1 %v6989_v43  ;;  %v6973_v43 = vld [vmem:[#allocation19 + $0x140] ss:$8 sps:$4 sm:$0xff]  }
 0x83a   :  { %4871 = vmatpush1.bf16.msra.mxu0 %v6925_v17  ;;  %6037 = vmatpush3.bf16.msra.mxu1 %v6990_v23  ;;  %v6966_v17 = vld [vmem:[#allocation19 + $0x114] ss:$8 sps:$4 sm:$0xff]  }
 0x83b   :  { %4872 = vmatprep.subr.bf16.mxu0 %v6930_v18  ;;  %6038 = vmatprep.subr.bf16.mxu1 %v6991_v44  ;;  %v6978_v23 = vld [vmem:[#allocation19 + $0x154] ss:$8 sps:$4 sm:$0xff]   ;;  %v6976_v44 = vld [vmem:[#allocation19 + $0x150] ss:$8 sps:$4 sm:$0xff]  }
 0x83e   :  { %4873 = vmatpush1.bf16.msra.mxu0 %v6928_v19  ;;  %6039 = vmatpush3.bf16.msra.mxu1 %v6992_v53  ;;  %v6981_v53 = vld [vmem:[#allocation19 + $0x164] ss:$8 sps:$4 sm:$0xff]  }
 0x83f   :  { %4874 = vmatprep.subr.bf16.mxu0 %v6933_v20  ;;  %6040 = vmatprep.subr.bf16.mxu1 %v6993_v46  ;;  %v6979_v46 = vld [vmem:[#allocation19 + $0x160] ss:$8 sps:$4 sm:$0xff]  }
 0x842   :  { %4875 = vmatpush1.bf16.msra.mxu0 %v6931_v21  ;;  %6041 = vmatpush3.bf16.msra.mxu1 %v6994_v47  ;;  %v6984_v47 = vld [vmem:[#allocation19 + $0x174] ss:$8 sps:$4 sm:$0xff]  }
 0x843   :  { %4876 = vmatprep.subr.bf16.mxu0 %v6936_v22  ;;  %6042 = vmatprep.subr.bf16.mxu1 %v6995_v24  ;;  %v6982_v24 = vld [vmem:[#allocation19 + $0x170] ss:$8 sps:$4 sm:$0xff]  }
 0x846   :  { %4877 = vmatpush1.bf16.msra.mxu0 %v6934_v26  ;;  %6043 = vmatpush3.bf16.msra.mxu1 %v6996_v48 }
 0x847   :  { %4878 = vmatprep.subr.bf16.mxu0 %v6939_v27 }
 0x84a   :  { %4879 = vmatpush1.bf16.msra.mxu0 %v6937_v28 }
 0x84b   :  { %4880 = vmatprep.subr.bf16.mxu0 %v6942_v9 }
 0x84e   :  { %4881 = vmatpush1.bf16.msra.mxu0 %v6940_v29  ;;  %v6964_v29 = vld [vmem:[#allocation19 + $0x110] ss:$8 sps:$4 sm:$0xff]  }
 0x84f   :  { %4882 = vmatprep.subr.bf16.mxu0 %v6945_v30 }
 0x852   :  { %4883 = vmatpush1.bf16.msra.mxu0 %v6943_v52 }
 0x853   :  { %4884 = vmatprep.subr.bf16.mxu0 %v6948_v45 }
 0x856   :  { %4885 = vmatpush1.bf16.msra.mxu0 %v6946_v31 }
 0x857   :  { %4886 = vmatprep.subr.bf16.mxu0 %v6951_v12  ;;  %v6969_v12 = vld [vmem:[#allocation19 + $0x124] ss:$8 sps:$4 sm:$0xff]  }
 0x85a   :  { %4887 = vmatpush1.bf16.msra.mxu0 %v6949_v32 }
 0x85b   :  { %4888 = vmatprep.subr.bf16.mxu0 %v6954_v33 }
 0x85e   :  { %4889 = vmatpush1.bf16.msra.mxu0 %v6952_v34 }
 0x85f   :  { %4890 = vmatprep.subr.bf16.mxu0 %v6957_v13 }
 0x862   :  { %4891 = vmatpush1.bf16.msra.mxu0 %v6955_v35 }
 0x863   :  { %4892 = vmatprep.subr.bf16.mxu0 %v6960_v36 }
 0x866   :  { %4893 = vmatpush1.bf16.msra.mxu0 %v6958_v14 }
 0x867   :  { %4915 = vmatprep.subr.bf16.mxu0 %v6963_v37 }
 0x8fc   :  { %v4476_v50 = vpop.f32.mrb[36].mxu0 }
 0x8fd   :  { %v4477_v51 = vadd.f32 %v4476_v50, %v4302_v25  ;;  %v4478_v54 = vpop.f32.mrb[37].mxu0  ;;  %v6999_v50 = vld [vmem:[#allocation20 + $0x78] sm:$0xff]  }
 0x8fe   :  { %v4479_v55 = vadd.f32 %v4478_v54, %v4306_v49  ;;  %v4480_v57 = vpop.f32.mrb[38].mxu0  ;;  %v7001_v54 = vld [vmem:[#allocation22] sm:$0xff]  }
 0x8ff   :  { %v4481_v60 = vadd.f32 %v4480_v57, %v4302_v25  ;;  %v4482_v61 = vpop.f32.mrb[39].mxu0  ;;  %v4544_v63 = vmax.f32 %v4477_v51, 0.0  ;;  %v7000_v51 = vld [vmem:[#allocation20 + $0x38] sm:$0xff]  }
 0x900   :  { %v4483_v62 = vadd.f32 %v4482_v61, %v4306_v49  ;;  %v4545_v4 = vmax.f32 %v4479_v55, 0.0  ;;  %v4610_v55 = vld [vmem:[#allocation5 + $0x14] sm:$0x3] }
 0x901   :  { %v4547_v1 = vmax.f32 %v4481_v60, 0.0  ;;  %v4615_v57 = vrot.slane %v4610_v55, %v7666_v56  ;;  %v4619_v60 = vrot.slane %v4610_v55, %v7671_v59  ;;  %v7002_v56 = vld [vmem:[#allocation22 + $0x8] sm:$0xff]  }
 0x902   :  { %v4548_v5 = vmax.f32 %v4483_v62, 0.0 }
 0x903   :  { %v4556_v7 = vpack.c.bf16 %v4547_v1, %v4544_v63 }
 0x904   :  { %v4557_v8 = vpack.c.bf16 %v4548_v5, %v4545_v4  ;;  %v4486_v10 = vpop.f32.mrb[40].mxu0  ;;  %v6108_v15 = vpop.f32.mrb[64].mxu1 }
 0x905   :  { %v4487_v6 = vadd.f32 %v4486_v10, %v4302_v25  ;;  %v4538_v2 = vadd.f32 %v6108_v15, %v4310_v3  ;;  %v4488_v16 = vpop.f32.mrb[41].mxu0  ;;  %v4529_v11 = vpop.f32.mrb[65].mxu1 }
 0x906   :  { %v4489_v18 = vadd.f32 %v4488_v16, %v4306_v49  ;;  %v4530_v19 = vadd.f32 %v4529_v11, %v4310_v3  ;;  %v4490_v20 = vpop.f32.mrb[42].mxu0  ;;  %v6109_v21 = vpop.f32.mrb[66].mxu1  ;;  %4894 = vmatprep.mubr.bf16.mxu0 %v4557_v8 }
 0x907   :  { %v4491_v22 = vadd.f32 %v4490_v20, %v4302_v25  ;;  %v4541_v26 = vadd.f32 %v6109_v21, %v4310_v3  ;;  %v4492_v42 = vpop.f32.mrb[43].mxu0  ;;  %v4532_v27 = vpop.f32.mrb[67].mxu1  ;;  %4895 = vmatmul.mubr.bf16.vlgmr.msra.gmra.mrb[44].mxu0 %v4556_v7  ;;  %v4550_v30 = vmax.f32 %v4487_v6, 0.0  ;;  %v4552_v52 = vmax.f32 %v4538_v2, 0.0  ;;  %v6997_v25 = vld [vmem:[#allocation20 + $0x70] sm:$0xff]  }
 0x908   :  { %v4493_v28 = vadd.f32 %v4492_v42, %v4306_v49  ;;  %v4533_v9 = vadd.f32 %v4532_v27, %v4310_v3  ;;  %4916 = vmatpush1.bf16.msra.mxu0 %v6961_v58  ;;  %v4551_v32 = vmax.f32 %v4489_v18, 0.0  ;;  %v4546_v33 = vmax.f32 %v4530_v19, 0.0  ;;  %v6998_v49 = vld [vmem:[#allocation20 + $0x30] sm:$0xff]   ;;  %6044 = vmatprep.subr.bf16.mxu1 %v6997_v25 }
 0x909   :  { %v4553_v45 = vmax.f32 %v4491_v22, 0.0  ;;  %v4555_v31 = vmax.f32 %v4541_v26, 0.0  ;;  %4917 = vmatprep.subr.bf16.mxu0 %v6966_v17  ;;  %6045 = vmatpush3.bf16.msra.mxu1 %v6998_v49  ;;  %v7003_v26 = vld [vmem:[#allocation22 + $0x10] sm:$0xff]  }
 0x90a   :  { %v4554_v34 = vmax.f32 %v4493_v28, 0.0  ;;  %v4549_v13 = vmax.f32 %v4533_v9, 0.0  ;;  %6046 = vmatprep.subr.bf16.mxu1 %v6999_v50 }
 0x90b   :  { %v4559_v35 = vpack.c.bf16 %v4553_v45, %v4550_v30  ;;  %v4561_v36 = vpack.c.bf16 %v4555_v31, %v4552_v52  ;;  %v7005_v30 = vld [vmem:[#allocation22 + $0x20] sm:$0xff]   ;;  %v7006_v52 = vld [vmem:[#allocation22 + $0x28] sm:$0xff]   ;;  %v7007_v45 = vld [vmem:[#allocation22 + $0x30] sm:$0xff]  }
 0x90c   :  { %v4560_v14 = vpack.c.bf16 %v4554_v34, %v4551_v32  ;;  %v4558_v37 = vpack.c.bf16 %v4549_v13, %v4546_v33  ;;  %4918 = vmatpush1.bf16.msra.mxu0 %v6964_v29  ;;  %v7004_v29 = vld [vmem:[#allocation22 + $0x18] sm:$0xff]  }
 0x90d   :  { %4919 = vmatprep.subr.bf16.mxu0 %v6969_v12  ;;  %6047 = vmatpush3.bf16.msra.mxu1 %v7000_v51  ;;  %v7008_v31 = vld [vmem:[#allocation22 + $0x38] sm:$0xff]  }
 0x90e   :  { %4904 = vmatprep.mubr.bf16.mxu0 %v4560_v14  ;;  %6110 = vmatprep.subr.bf16.mxu1 %v7001_v54  ;;  %v5855_v32 = vld [vmem:[#allocation5 + $0x16] ss:$0 sm:$0xff]  ;;  %v5872_v51 = vld [vmem:[#allocation5 + $0x17] ss:$0 sm:$0xff] }
 0x90f   :  { %4905 = vmatmul.mubr.bf16.gmra.mrb[48].mxu0 %v4559_v35 }
 0x910   :  { %4920 = vmatpush1.bf16.msra.mxu0 %v6967_v38  ;;  %4947 = vmatprep.mubr.bf16.mxu0 %v7356_v0 }
 0x911   :  { %4921 = vmatprep.subr.bf16.mxu0 %v6972_v39 }
 0x914   :  { %4922 = vmatpush1.bf16.msra.mxu0 %v6970_v40 }
 0x915   :  { %4923 = vmatprep.subr.bf16.mxu0 %v6975_v41 }
 0x918   :  { %4924 = vmatpush1.bf16.msra.mxu0 %v6973_v43 }
 0x919   :  { %4925 = vmatprep.subr.bf16.mxu0 %v6978_v23 }
 0x91c   :  { %4926 = vmatpush1.bf16.msra.mxu0 %v6976_v44 }
 0x91d   :  { %4927 = vmatprep.subr.bf16.mxu0 %v6981_v53 }
 0x920   :  { %4928 = vmatpush1.bf16.msra.mxu0 %v6979_v46 }
 0x921   :  { %4929 = vmatprep.subr.bf16.mxu0 %v6984_v47 }
 0x924   :  { %4930 = vmatpush1.bf16.msra.mxu0 %v6982_v24 }
 0x927   :  { %4948 = vmatmul.mubr.bf16.vlgmr.msra.gmra.mrb[44].mxu0 %v4558_v37 }
 0x928   :  { %4957 = vmatprep.mubr.bf16.mxu0 %v7356_v0 }
 0x92f   :  { %4958 = vmatmul.mubr.bf16.gmra.mrb[48].mxu0 %v4561_v36 }
 0x9fa   :  { %v4949_v61 = vpop.f32.mrb[44].mxu0 }
 0x9fb   :  { %v6162_v0 = vadd.f32 %v4949_v61, %v4615_v57  ;;  %v4951_v62 = vpop.f32.mrb[45].mxu0 }
 0x9fc   :  { %v6163_v63 = vadd.f32 %v4951_v62, %v4619_v60  ;;  %v4953_v1 = vpop.f32.mrb[46].mxu0 }
 0x9fd   :  { %v6164_v3 = vadd.f32 %v4953_v1, %v4615_v57  ;;  %v4955_v4 = vpop.f32.mrb[47].mxu0  ;;  %v4968_v7 = vmax.f32 %v6162_v0, 0.0 }
 0x9fe   :  { %v6165_v5 = vadd.f32 %v4955_v4, %v4619_v60  ;;  %v4969_v10 = vmax.f32 %v6163_v63, 0.0 }
 0x9ff   :  { %v4970_v8 = vmax.f32 %v6164_v3, 0.0 }
 0xa00   :  { %v4971_v15 = vmax.f32 %v6165_v5, 0.0 }
 0xa01   :  { %v4976_v58 = vpack.c.bf16 %v4970_v8, %v4968_v7 }
 0xa02   :  { %v4977_v6 = vpack.c.bf16 %v4971_v15, %v4969_v10  ;;  %v4959_v2 = vpop.f32.mrb[48].mxu0 }
 0xa03   :  { %v6166_v16 = vadd.f32 %v4959_v2, %v4615_v57  ;;  %v4961_v11 = vpop.f32.mrb[49].mxu0 }
 0xa04   :  { %v6167_v17 = vadd.f32 %v4961_v11, %v4619_v60  ;;  %v4963_v59 = vpop.f32.mrb[50].mxu0  ;;  %5147 = vmatprep.mubr.bf16.mxu1 %v4977_v6 }
 0xa05   :  { %v6168_v18 = vadd.f32 %v4963_v59, %v4615_v57  ;;  %v4965_v19 = vpop.f32.mrb[51].mxu0  ;;  %5148 = vmatmul.mubr.bf16.vlgmr.msra.gmra.mrb[68].mxu1 %v4976_v58  ;;  %v4972_v21 = vmax.f32 %v6166_v16, 0.0 }
 0xa06   :  { %v6169_v20 = vadd.f32 %v4965_v19, %v4619_v60  ;;  %6111 = vmatpush3.bf16.msra.mxu1 %v7001_v54  ;;  %v4973_v42 = vmax.f32 %v6167_v17, 0.0 }
 0xa07   :  { %v4974_v22 = vmax.f32 %v6168_v18, 0.0  ;;  %6112 = vmatprep.subr.bf16.mxu1 %v7002_v56 }
 0xa08   :  { %v4975_v27 = vmax.f32 %v6169_v20, 0.0 }
 0xa09   :  { %v4978_v28 = vpack.c.bf16 %v4974_v22, %v4972_v21 }
 0xa0a   :  { %v4979_v9 = vpack.c.bf16 %v4975_v27, %v4973_v42  ;;  %6113 = vmatpush3.bf16.msra.mxu1 %v7002_v56 }
 0xa0b   :  { %6114 = vmatprep.subr.bf16.mxu1 %v7003_v26 }
 0xa0c   :  { %5155 = vmatprep.mubr.bf16.mxu1 %v4979_v9 }
 0xa0d   :  { %5156 = vmatmul.mubr.bf16.gmra.mrb[72].mxu1 %v4978_v28 }
 0xa0e   :  { %6115 = vmatpush3.bf16.msra.mxu1 %v7003_v26 }
 0xa0f   :  { %6116 = vmatprep.subr.bf16.mxu1 %v7004_v29 }
 0xa12   :  { %6117 = vmatpush3.bf16.msra.mxu1 %v7004_v29 }
 0xa13   :  { %6118 = vmatprep.subr.bf16.mxu1 %v7005_v30 }
 0xa16   :  { %6119 = vmatpush3.bf16.msra.mxu1 %v7005_v30 }
 0xa17   :  { %6120 = vmatprep.subr.bf16.mxu1 %v7006_v52 }
 0xa1a   :  { %6121 = vmatpush3.bf16.msra.mxu1 %v7006_v52 }
 0xa1b   :  { %6122 = vmatprep.subr.bf16.mxu1 %v7007_v45 }
 0xa1e   :  { %6123 = vmatpush3.bf16.msra.mxu1 %v7007_v45 }
 0xa1f   :  { %6124 = vmatprep.subr.bf16.mxu1 %v7008_v31 }
 0xa22   :  { %6125 = vmatpush3.bf16.msra.mxu1 %v7008_v31 }
 0xad8   :  { %v6048_v12 = vpop.f32.mrb[68].mxu1 }
 0xad9   :  { %v6049_v33 = vpop.f32.mrb[69].mxu1 }
 0xada   :  { %v6050_v34 = vadd.f32 %v6049_v33, %v6048_v12  ;;  %v6051_v13 = vpop.f32.mrb[70].mxu1 }
 0xadb   :  { %v6052_v35 = vpop.f32.mrb[71].mxu1 }
 0xadc   :  { %v5150_v36 = vadd.f32 %v6050_v34, %v5855_v32  ;;  %v6053_v14 = vadd.f32 %v6052_v35, %v6051_v13 }
 0xade   :  { %v5153_v37 = vadd.f32 %v6053_v14, %v5855_v32  ;;  %v5164_v38 = vmax.f32 %v5150_v36, 0.0 }
 0xae0   :  { %v5165_v39 = vmax.f32 %v5153_v37, 0.0  ;;  %v6054_v40 = vpop.f32.mrb[72].mxu1 }
 0xae1   :  { %v6055_v41 = vpop.f32.mrb[73].mxu1 }
 0xae2   :  { %v6056_v43 = vadd.f32 %v6055_v41, %v6054_v40  ;;  %v6057_v23 = vpop.f32.mrb[74].mxu1  ;;  %v5168_v44 = vpack.c.bf16 %v5165_v39, %v5164_v38 }
 0xae3   :  { %v6058_v53 = vpop.f32.mrb[75].mxu1 }
 0xae4   :  { %v5158_v46 = vadd.f32 %v6056_v43, %v5855_v32  ;;  %v6059_v47 = vadd.f32 %v6058_v53, %v6057_v23  ;;  %6126 = vmatprep.mubr.bf16.mxu1 %v5168_v44 }
 0xae6   :  { %v5161_v24 = vadd.f32 %v6059_v47, %v5855_v32  ;;  %v5166_v48 = vmax.f32 %v5158_v46, 0.0 }
 0xae8   :  { %v5167_v25 = vmax.f32 %v5161_v24, 0.0 }
 0xaea   :  { %v5169_v49 = vpack.c.bf16 %v5167_v25, %v5166_v48 }
 0xaec   :  { %6127 = vmatmul.mubr.bf16.vlgmr.msra.gmra.mrb[76].mxu1 %v5169_v49 }
 0xbbf   :  { %v6128_v50 = vpop.f32.mrb[76].mxu1 }
 0xbc0   :  { %v5275_v54 = vpop.f32.mrb[77].mxu1  ;;  %v5284_v57 = vadd.f32 %v6128_v50, %v5872_v51 }
 0xbc1   :  { %v6129_v55 = vpop.f32.mrb[78].mxu1  ;;  %v5276_v0 = vadd.f32 %v5872_v51, %v5275_v54 }
 0xbc2   :  { %v5287_v60 = vadd.f32 %v6129_v55, %v5872_v51  ;;  %v5278_v61 = vpop.f32.mrb[79].mxu1 }
 0xbc3   :  { %v5279_v62 = vadd.f32 %v5872_v51, %v5278_v61 }
 0xbc4   :  { %v5897_v63 = vpack.c.bf16 %v5287_v60, %v5284_v57 }
 0xbc5   :  { %v5892_v1 = vpack.c.bf16 %v5279_v62, %v5276_v0 }
 0xbc6   :  { %5899 = vst [vmem:[#allocation23 + $0x8] sm:$0xff] %v5897_v63  }
 0xbc7   :  { %5893 = vst [vmem:[#allocation23] sm:$0xff] %v5892_v1  }
 0xbc8   :  { %7306 = shalt.err (!%p7303_p10)
}
 0xbc9   :  { %s7307_s20 = scalar_lea.hbm %s7745_s13, 256 }
 0xbca   :  { %p7308_p11 = scmp.ne.s32.totalorder %s7745_s13, %s7307_s20  ;;  %p7311_p12 = scmp.lt.u32.totalorder %s7307_s20, %s7745_s13 }
 0xbcc   :  { %p7313_p13 = pnand %p7311_p12, %p7308_p11 }
 0xbce   :  { %7316 = shalt.err (!%p7313_p13)
}
 0xbcf   :  { %5321 = dma.vmem_to_hbm [thread:$0]  %s5316_s26, 256, %s7745_s13, [#allocation4], %s7748_s6, %s7748_s6, %s7339_s28  }
 0xbd0   :  { %7331 = dma.done.wait [#allocation4], 256  }
 0xbd1   :  { %7332 = vsyncadd [#allocation4], 4294967040 }
 0xbd2   :  { %5325 = vsyncpa [#allocation3], 1 }
 0xbd3   :  { %5326 = vsyncpa [#allocation6], 1 }
 0xbd4   :  { %5327 = vsyncpa [#allocation9], 1 }
 0xbd5   :  { %5328 = vsyncpa [#allocation12], 1 }
 0xbd6   :  { %5329 = vsyncpa [#allocation15], 1 }
 0xbd7   :  { %5330 = vsyncpa [#allocation18], 1 }
 0xbd8   :  { %5331 = vsyncpa [#allocation21], 1 }
 0xbd9   :  { %5332 = vsyncpa [#allocation4], 1 }

</bundles_post_ra>
